<compile_context>
chip_gen: v7x
topology: tpu7x:2x2x1
jax: 0.10.0
libtpu: 0.0.40
codegen_flags: <defaults>
</compile_context>

<pallas_src>
import functools

import jax
import jax.numpy as jnp
from jax.experimental import pallas as pl
from jax.experimental.pallas import tpu as pltpu


# ---------------------------------------------------------------------------
# Fused forward kernel (one grid step = Bblk images)
# ---------------------------------------------------------------------------

def fused_forward_kernel(x_ref,
                         stem_w, stem_sb,
                         exp_w, exp_sb,
                         dw_w, dw_sb,
                         se_w1, se_b1, se_w2, se_b2,
                         pr_w, pr_sb,
                         hd_w, hd_sb,
                         cls_w, cls_b,
                         o_ref, *, Bblk, Ho, Wo):
    HW = Ho * Wo
    M = Bblk * HW
    C0 = stem_sb.shape[-1]
    CE = exp_sb.shape[-1]
    CH = hd_sb.shape[-1]
    inv_hw = 1.0 / HW

    # ---- stem: 3x3/s2 conv as ONE lane-dense matmul over wrapper-side im2col;
    #      folded BN + SiLU epilogue ------------------------------------------
    xcols = x_ref[...].reshape(M, x_ref.shape[-1])            # bf16, K=128
    y = jnp.dot(xcols, stem_w[...], preferred_element_type=jnp.float32)
    sb = stem_sb[...]
    y = y * sb[0:1, :] + sb[1:2, :]
    feat = y * jax.nn.sigmoid(y)                              # [M, C0] f32

    # ---- MBConv: expand 1x1 conv + BN + SiLU ---------------------------------
    y = jnp.dot(feat.astype(jnp.bfloat16), exp_w[...],
                preferred_element_type=jnp.float32)
    sb = exp_sb[...]
    y = y * sb[0:1, :] + sb[1:2, :]
    y = y * jax.nn.sigmoid(y)                                 # [M, CE]

    # ---- depthwise 3x3 (stride 1, pad 1) + BN + SiLU -------------------------
    # H padding via leading-dim concat; W shifts via sublane roll (XLU) + small
    # boundary masks; all 9 tap weights hoisted before the accumulate loop.
    y4 = y.reshape(Bblk, Ho, Wo, CE)
    zrow = jnp.zeros((Bblk, 1, Wo, CE), jnp.float32)
    yph = jnp.concatenate([zrow, y4, zrow], axis=1)           # [Bblk, Ho+2, Wo, CE]

    col = jax.lax.broadcasted_iota(jnp.int32, (1, 1, Wo, CE), 2)
    mask_l = (col >= 1).astype(jnp.float32)                   # valid for shift -1
    mask_r = (col < Wo - 1).astype(jnp.float32)               # valid for shift +1

    w_dw = dw_w[...]                                          # [9, CE] f32
    wt = [jnp.broadcast_to(w_dw[k:k + 1, :].reshape(1, 1, 1, CE),
                           (1, 1, Wo, CE)) for k in range(9)]

    acc = jnp.zeros((Bblk, Ho, Wo, CE), jnp.float32)
    for kw in range(3):
        shift_w = kw - 1                                      # -1 / 0 / +1
        if shift_w == 0:
            shifted = yph
        else:
            shifted = pltpu.roll(yph, shift=(-shift_w) % Wo, axis=2)
            shifted = shifted * (mask_r if shift_w > 0 else mask_l)
        for kh in range(3):
            acc = acc + shifted[:, kh:kh + Ho] * wt[kh * 3 + kw]
    y = acc.reshape(M, CE)
    sb = dw_sb[...]
    y = y * sb[0:1, :] + sb[1:2, :]
    y = y * jax.nn.sigmoid(y)                                 # [M, CE]

    # ---- squeeze-excite (per image) ------------------------------------------
    y3 = y.reshape(Bblk, HW, CE)
    pooled = jnp.sum(y3, axis=1) * inv_hw                     # [Bblk, CE]
    s = jnp.dot(pooled.astype(jnp.bfloat16), se_w1[...],
                preferred_element_type=jnp.float32) + se_b1[...]
    s = s * jax.nn.sigmoid(s)                                 # SiLU, [Bblk, CSE]
    g = jnp.dot(s.astype(jnp.bfloat16), se_w2[...],
                preferred_element_type=jnp.float32) + se_b2[...]
    y = (y3 * jax.nn.sigmoid(g)[:, None, :]).reshape(M, CE)   # excite

    # ---- project 1x1 conv + BN, residual add ---------------------------------
    y = jnp.dot(y.astype(jnp.bfloat16), pr_w[...],
                preferred_element_type=jnp.float32)
    sb = pr_sb[...]
    y = y * sb[0:1, :] + sb[1:2, :]
    feat = feat + y                                           # [M, C0]

    # ---- head 1x1 conv + BN + SiLU -------------------------------------------
    h = jnp.dot(feat.astype(jnp.bfloat16), hd_w[...],
                preferred_element_type=jnp.float32)
    sb = hd_sb[...]
    h = h * sb[0:1, :] + sb[1:2, :]
    h = h * jax.nn.sigmoid(h)                                 # [M, CH]

    # ---- global average pool + classifier (lane-padded to 128) ---------------
    pooled = jnp.sum(h.reshape(Bblk, HW, CH), axis=1) * inv_hw  # [Bblk, CH]
    logits = jnp.dot(pooled.astype(jnp.bfloat16), cls_w[...],
                     preferred_element_type=jnp.float32) + cls_b[...]
    o_ref[0] = logits                                         # [Bblk, 128]


# ---------------------------------------------------------------------------
# Wrapper: layout prep, parameter init, forward
# ---------------------------------------------------------------------------

def _im2col_stem(x, k_pad):
    """NHWC [B,H,W,C] -> [B, Ho*Wo, k_pad] im2col for a 3x3 stride-2 pad-1 conv.
    The 27-wide reduction dim is zero-padded to k_pad (128) for lane density."""
    B, H, W, C = x.shape
    assert H % 2 == 0 and W % 2 == 0
    Ho, Wo = H // 2, W // 2
    xp = jnp.pad(x, ((0, 0), (1, 1), (1, 1), (0, 0)))
    patches = []
    for kh in range(3):
        for kw in range(3):
            patches.append(xp[:, kh:kh + 2 * Ho:2, kw:kw + 2 * Wo:2, :])
    cols = jnp.concatenate(patches, axis=-1).reshape(B, Ho * Wo, 9 * C)
    pad = k_pad - 9 * C
    assert pad >= 0
    if pad:
        cols = jnp.pad(cols, ((0, 0), (0, 0), (0, pad)))
    return cols


def _pack_stem_weight(w3, k_pad):
    """HWIO [3,3,Cin,C0] -> [k_pad, C0] matching the wrapper im2col ordering."""
    kh, kw, cin, c0 = w3.shape
    assert kh == 3 and kw == 3
    w = w3.reshape(9 * cin, c0)
    pad = k_pad - 9 * cin
    if pad:
        w = jnp.pad(w, ((0, pad), (0, 0)))
    return w


def _bn_fold(key, c, eps=1e-3):
    """Folded BN as one packed [2, c] array: row 0 = scale, row 1 = bias."""
    k1, k2, k3, k4 = jax.random.split(key, 4)
    gamma = 1.0 + 0.1 * jax.random.normal(k1, (c,), jnp.float32)
    beta = 0.1 * jax.random.normal(k2, (c,), jnp.float32)
    mean = 0.1 * jax.random.normal(k3, (c,), jnp.float32)
    var = 1.0 + 0.1 * jnp.square(jax.random.normal(k4, (c,), jnp.float32))
    scale = gamma / jnp.sqrt(var + eps)
    bias = beta - mean * scale
    return jnp.stack([scale, bias], axis=0)


def init_params(key, *, c_in=3, c0=128, expand=2, c_se=128, c_head=256,
                num_classes=2, nc_pad=128, k_stem_pad=128):
    """Lane-dense (multiples of 128) channel widths; matmul weights in bf16."""
    ce = c0 * expand
    keys = jax.random.split(key, 16)
    p = {}
    w_stem = 0.1 * jax.random.normal(keys[0], (3, 3, c_in, c0), jnp.float32)
    p["stem_w"] = _pack_stem_weight(w_stem, k_stem_pad).astype(jnp.bfloat16)
    p["stem_sb"] = _bn_fold(keys[1], c0)
    p["exp_w"] = (0.1 * jax.random.normal(keys[2], (c0, ce), jnp.float32)
                  ).astype(jnp.bfloat16)
    p["exp_sb"] = _bn_fold(keys[3], ce)
    p["dw_w"] = 0.1 * jax.random.normal(keys[4], (9, ce), jnp.float32)
    p["dw_sb"] = _bn_fold(keys[5], ce)
    p["se_w1"] = (0.1 * jax.random.normal(keys[6], (ce, c_se), jnp.float32)
                  ).astype(jnp.bfloat16)
    p["se_b1"] = 0.01 * jax.random.normal(keys[7], (1, c_se), jnp.float32)
    p["se_w2"] = (0.1 * jax.random.normal(keys[8], (c_se, ce), jnp.float32)
                  ).astype(jnp.bfloat16)
    p["se_b2"] = 0.01 * jax.random.normal(keys[9], (1, ce), jnp.float32)
    p["proj_w"] = (0.1 * jax.random.normal(keys[10], (ce, c0), jnp.float32)
                   ).astype(jnp.bfloat16)
    p["proj_sb"] = _bn_fold(keys[11], c0)
    p["head_w"] = (0.1 * jax.random.normal(keys[12], (c0, c_head), jnp.float32)
                   ).astype(jnp.bfloat16)
    p["head_sb"] = _bn_fold(keys[13], c_head)
    cls_w = 0.1 * jax.random.normal(keys[14], (c_head, num_classes), jnp.float32)
    p["cls_w"] = jnp.pad(cls_w, ((0, 0), (0, nc_pad - num_classes))
                         ).astype(jnp.bfloat16)
    cls_b = 0.01 * jax.random.normal(keys[15], (1, num_classes), jnp.float32)
    p["cls_b"] = jnp.pad(cls_b, ((0, 0), (0, nc_pad - num_classes)))
    return p


_WEIGHT_ORDER = ("stem_w", "stem_sb",
                 "exp_w", "exp_sb",
                 "dw_w", "dw_sb",
                 "se_w1", "se_b1", "se_w2", "se_b2",
                 "proj_w", "proj_sb",
                 "head_w", "head_sb",
                 "cls_w", "cls_b")


def _const_spec(shape):
    nd = len(shape)
    return pl.BlockSpec(shape, lambda b, _nd=nd: (0,) * _nd)


def forward(params, x_nchw, *, block_b=None, num_classes=2):
    # NCHW (PyTorch convention) -> NHWC for the TPU kernel (channels on lanes).
    x = jnp.transpose(x_nchw, (0, 2, 3, 1)).astype(jnp.float32)
    B, H, W, _ = x.shape
    Ho, Wo = H // 2, W // 2
    HW = Ho * Wo
    k_pad = params["stem_w"].shape[0]
    nc_pad = params["cls_w"].shape[-1]

    if block_b is None:
        # Target M = block_b*HW >= 256 while keeping >= 2 grid steps (megacore).
        block_b = max(1, min(B // 2 if B >= 2 else B, max(1, 256 // HW)))
        while B % block_b:
            block_b -= 1
    assert B % block_b == 0
    n_steps = B // block_b

    # Lane-dense bf16 im2col input block: (block_b, HW, 128).
    cols = _im2col_stem(x, k_pad).astype(jnp.bfloat16)

    weights = [params[k] for k in _WEIGHT_ORDER]

    in_specs = [pl.BlockSpec((block_b, HW, k_pad), lambda b: (b, 0, 0))]
    in_specs += [_const_spec(w.shape) for w in weights]

    out = pl.pallas_call(
        functools.partial(fused_forward_kernel, Bblk=block_b, Ho=Ho, Wo=Wo),
        grid=(n_steps,),
        in_specs=in_specs,
        out_specs=pl.BlockSpec((1, block_b, nc_pad), lambda b: (b, 0, 0)),
        out_shape=jax.ShapeDtypeStruct((n_steps, block_b, nc_pad), jnp.float32),
        compiler_params=pltpu.CompilerParams(
            dimension_semantics=("parallel",),
            # Real footprint is ~3 MiB/step; leave generous headroom but stay
            # well under v7x's 64 MiB physical VMEM.
            vmem_limit_bytes=16 * 1024 * 1024),
    )(cols, *weights)
    return out.reshape(B, nc_pad)[:, :num_classes]


if __name__ == "__main__":
    key = jax.random.PRNGKey(0)
    pkey, xkey = jax.random.split(key)
    params = init_params(pkey)
    # Image batch, 3 channels (NCHW like the PyTorch module); B=8 so each grid
    # step processes 4 images (M=256) and 2 steps shard across TensorCores.
    x = jax.random.normal(xkey, (8, 3, 16, 16), jnp.float32)
    fwd = jax.jit(forward)
    out = jax.block_until_ready(fwd(params, x))
    assert out.shape == (8, 2), out.shape
    assert bool(jnp.all(jnp.isfinite(out)))
    print("KERNEL_OK")
</pallas_src>

<mosaic_0001>
module attributes {stable_mosaic.version = 11 : i64} {
  func.func @fused_forward_kernel(%arg0: i32, %arg1: memref<4x64x128xbf16, #tpu.memory_space<vmem>>, %arg2: memref<128x128xbf16, #tpu.memory_space<vmem>>, %arg3: memref<2x128xf32, #tpu.memory_space<vmem>>, %arg4: memref<128x256xbf16, #tpu.memory_space<vmem>>, %arg5: memref<2x256xf32, #tpu.memory_space<vmem>>, %arg6: memref<9x256xf32, #tpu.memory_space<vmem>>, %arg7: memref<2x256xf32, #tpu.memory_space<vmem>>, %arg8: memref<256x128xbf16, #tpu.memory_space<vmem>>, %arg9: memref<1x128xf32, #tpu.memory_space<vmem>>, %arg10: memref<128x256xbf16, #tpu.memory_space<vmem>>, %arg11: memref<1x256xf32, #tpu.memory_space<vmem>>, %arg12: memref<256x128xbf16, #tpu.memory_space<vmem>>, %arg13: memref<2x128xf32, #tpu.memory_space<vmem>>, %arg14: memref<128x256xbf16, #tpu.memory_space<vmem>>, %arg15: memref<2x256xf32, #tpu.memory_space<vmem>>, %arg16: memref<256x128xbf16, #tpu.memory_space<vmem>>, %arg17: memref<1x128xf32, #tpu.memory_space<vmem>>, %arg18: memref<1x4x128xf32, #tpu.memory_space<vmem>>) attributes {dimension_semantics = [#tpu.dimension_semantics<parallel>], iteration_bounds = array<i64: 2>, scalar_prefetch = 0 : i64, scratch_operands = 0 : i64, tpu.core_type = #tpu.core_type<tc>, window_params = [{transform_indices = @transform_0, window_bounds = array<i64: 4, 64, 128>}, {pipeline_mode = #tpu.pipeline_mode<synchronous>, transform_indices = @transform_1, window_bounds = array<i64: 128, 128>}, {pipeline_mode = #tpu.pipeline_mode<synchronous>, transform_indices = @transform_2, window_bounds = array<i64: 2, 128>}, {pipeline_mode = #tpu.pipeline_mode<synchronous>, transform_indices = @transform_3, window_bounds = array<i64: 128, 256>}, {pipeline_mode = #tpu.pipeline_mode<synchronous>, transform_indices = @transform_4, window_bounds = array<i64: 2, 256>}, {pipeline_mode = #tpu.pipeline_mode<synchronous>, transform_indices = @transform_5, window_bounds = array<i64: 9, 256>}, {pipeline_mode = #tpu.pipeline_mode<synchronous>, transform_indices = @transform_6, window_bounds = array<i64: 2, 256>}, {pipeline_mode = #tpu.pipeline_mode<synchronous>, transform_indices = @transform_7, window_bounds = array<i64: 256, 128>}, {pipeline_mode = #tpu.pipeline_mode<synchronous>, transform_indices = @transform_8, window_bounds = array<i64: 1, 128>}, {pipeline_mode = #tpu.pipeline_mode<synchronous>, transform_indices = @transform_9, window_bounds = array<i64: 128, 256>}, {pipeline_mode = #tpu.pipeline_mode<synchronous>, transform_indices = @transform_10, window_bounds = array<i64: 1, 256>}, {pipeline_mode = #tpu.pipeline_mode<synchronous>, transform_indices = @transform_11, window_bounds = array<i64: 256, 128>}, {pipeline_mode = #tpu.pipeline_mode<synchronous>, transform_indices = @transform_12, window_bounds = array<i64: 2, 128>}, {pipeline_mode = #tpu.pipeline_mode<synchronous>, transform_indices = @transform_13, window_bounds = array<i64: 128, 256>}, {pipeline_mode = #tpu.pipeline_mode<synchronous>, transform_indices = @transform_14, window_bounds = array<i64: 2, 256>}, {pipeline_mode = #tpu.pipeline_mode<synchronous>, transform_indices = @transform_15, window_bounds = array<i64: 256, 128>}, {pipeline_mode = #tpu.pipeline_mode<synchronous>, transform_indices = @transform_16, window_bounds = array<i64: 1, 128>}, {transform_indices = @transform_17, window_bounds = array<i64: 1, 4, 128>}]} {
    %c0 = arith.constant 0 : index
    %c0_0 = arith.constant 0 : index
    %c0_1 = arith.constant 0 : index
    %0 = vector.load %arg1[%c0, %c0_0, %c0_1] : memref<4x64x128xbf16, #tpu.memory_space<vmem>>, vector<4x64x128xbf16>
    %1 = vector.shape_cast %0 : vector<4x64x128xbf16> to vector<256x128xbf16>
    %c0_2 = arith.constant 0 : index
    %c0_3 = arith.constant 0 : index
    %2 = vector.load %arg2[%c0_2, %c0_3] : memref<128x128xbf16, #tpu.memory_space<vmem>>, vector<128x128xbf16>
    %cst = arith.constant dense<0.000000e+00> : vector<256x128xf32>
    %3 = tpu.matmul %1, %2, %cst {dimension_numbers = #tpu.dot_dimension_numbers<[1], [0], [0], [1], [0, 0, 1, 1], [], []>} : vector<256x128xbf16>, vector<128x128xbf16>, vector<256x128xf32> -> vector<256x128xf32>
    %c0_4 = arith.constant 0 : index
    %c0_5 = arith.constant 0 : index
    %4 = vector.load %arg3[%c0_4, %c0_5] : memref<2x128xf32, #tpu.memory_space<vmem>>, vector<2x128xf32>
    %5 = vector.extract_strided_slice %4 {offsets = [0, 0], sizes = [1, 128], strides = [1, 1]} : vector<2x128xf32> to vector<1x128xf32>
    %6 = vector.broadcast %5 : vector<1x128xf32> to vector<256x128xf32>
    %7 = arith.mulf %3, %6 : vector<256x128xf32>
    %8 = vector.extract_strided_slice %4 {offsets = [1, 0], sizes = [1, 128], strides = [1, 1]} : vector<2x128xf32> to vector<1x128xf32>
    %9 = vector.broadcast %8 : vector<1x128xf32> to vector<256x128xf32>
    %10 = arith.addf %7, %9 : vector<256x128xf32>
    %11 = arith.negf %10 : vector<256x128xf32>
    %12 = math.exp %11 : vector<256x128xf32>
    %cst_6 = arith.constant 1.000000e+00 : f32
    %13 = vector.broadcast %cst_6 : f32 to vector<256x128xf32>
    %14 = arith.addf %13, %12 : vector<256x128xf32>
    %15 = arith.divf %13, %14 : vector<256x128xf32>
    %16 = arith.mulf %10, %15 : vector<256x128xf32>
    %17 = arith.truncf %16 : vector<256x128xf32> to vector<256x128xbf16>
    %c0_7 = arith.constant 0 : index
    %c0_8 = arith.constant 0 : index
    %18 = vector.load %arg4[%c0_7, %c0_8] : memref<128x256xbf16, #tpu.memory_space<vmem>>, vector<128x256xbf16>
    %cst_9 = arith.constant dense<0.000000e+00> : vector<256x256xf32>
    %19 = tpu.matmul %17, %18, %cst_9 {dimension_numbers = #tpu.dot_dimension_numbers<[1], [0], [0], [1], [0, 0, 1, 1], [], []>} : vector<256x128xbf16>, vector<128x256xbf16>, vector<256x256xf32> -> vector<256x256xf32>
    %c0_10 = arith.constant 0 : index
    %c0_11 = arith.constant 0 : index
    %20 = vector.load %arg5[%c0_10, %c0_11] : memref<2x256xf32, #tpu.memory_space<vmem>>, vector<2x256xf32>
    %21 = vector.extract_strided_slice %20 {offsets = [0, 0], sizes = [1, 256], strides = [1, 1]} : vector<2x256xf32> to vector<1x256xf32>
    %22 = vector.broadcast %21 : vector<1x256xf32> to vector<256x256xf32>
    %23 = arith.mulf %19, %22 : vector<256x256xf32>
    %24 = vector.extract_strided_slice %20 {offsets = [1, 0], sizes = [1, 256], strides = [1, 1]} : vector<2x256xf32> to vector<1x256xf32>
    %25 = vector.broadcast %24 : vector<1x256xf32> to vector<256x256xf32>
    %26 = arith.addf %23, %25 : vector<256x256xf32>
    %27 = arith.negf %26 : vector<256x256xf32>
    %28 = math.exp %27 : vector<256x256xf32>
    %cst_12 = arith.constant 1.000000e+00 : f32
    %29 = vector.broadcast %cst_12 : f32 to vector<256x256xf32>
    %30 = arith.addf %29, %28 : vector<256x256xf32>
    %31 = arith.divf %29, %30 : vector<256x256xf32>
    %32 = arith.mulf %26, %31 : vector<256x256xf32>
    %33 = vector.shape_cast %32 : vector<256x256xf32> to vector<4x8x8x256xf32>
    %cst_13 = arith.constant 0.000000e+00 : f32
    %34 = vector.broadcast %cst_13 : f32 to vector<4x1x8x256xf32>
    %35 = tpu.concatenate %34, %33, %34 in 1 : vector<4x1x8x256xf32>, vector<4x8x8x256xf32>, vector<4x1x8x256xf32> -> vector<4x10x8x256xf32>
    %36 = tpu.iota {dimensions = array<i32: 2>} : vector<1x1x8x256xi32>
    %c1_i32 = arith.constant 1 : i32
    %37 = vector.broadcast %c1_i32 : i32 to vector<1x1x8x256xi32>
    %38 = arith.cmpi sge, %36, %37 : vector<1x1x8x256xi32>
    %39 = arith.extui %38 : vector<1x1x8x256xi1> to vector<1x1x8x256xi32>
    %40 = arith.sitofp %39 : vector<1x1x8x256xi32> to vector<1x1x8x256xf32>
    %c7_i32 = arith.constant 7 : i32
    %41 = vector.broadcast %c7_i32 : i32 to vector<1x1x8x256xi32>
    %42 = arith.cmpi slt, %36, %41 : vector<1x1x8x256xi32>
    %43 = arith.extui %42 : vector<1x1x8x256xi1> to vector<1x1x8x256xi32>
    %44 = arith.sitofp %43 : vector<1x1x8x256xi32> to vector<1x1x8x256xf32>
    %c0_14 = arith.constant 0 : index
    %c0_15 = arith.constant 0 : index
    %45 = vector.load %arg6[%c0_14, %c0_15] : memref<9x256xf32, #tpu.memory_space<vmem>>, vector<9x256xf32>
    %46 = vector.extract_strided_slice %45 {offsets = [0, 0], sizes = [1, 256], strides = [1, 1]} : vector<9x256xf32> to vector<1x256xf32>
    %47 = vector.shape_cast %46 : vector<1x256xf32> to vector<1x1x1x256xf32>
    %48 = vector.shape_cast %47 : vector<1x1x1x256xf32> to vector<1x1x1x256xf32>
    %49 = vector.broadcast %48 : vector<1x1x1x256xf32> to vector<1x1x8x256xf32>
    %50 = vector.extract_strided_slice %45 {offsets = [1, 0], sizes = [1, 256], strides = [1, 1]} : vector<9x256xf32> to vector<1x256xf32>
    %51 = vector.shape_cast %50 : vector<1x256xf32> to vector<1x1x1x256xf32>
    %52 = vector.shape_cast %51 : vector<1x1x1x256xf32> to vector<1x1x1x256xf32>
    %53 = vector.broadcast %52 : vector<1x1x1x256xf32> to vector<1x1x8x256xf32>
    %54 = vector.extract_strided_slice %45 {offsets = [2, 0], sizes = [1, 256], strides = [1, 1]} : vector<9x256xf32> to vector<1x256xf32>
    %55 = vector.shape_cast %54 : vector<1x256xf32> to vector<1x1x1x256xf32>
    %56 = vector.shape_cast %55 : vector<1x1x1x256xf32> to vector<1x1x1x256xf32>
    %57 = vector.broadcast %56 : vector<1x1x1x256xf32> to vector<1x1x8x256xf32>
    %58 = vector.extract_strided_slice %45 {offsets = [3, 0], sizes = [1, 256], strides = [1, 1]} : vector<9x256xf32> to vector<1x256xf32>
    %59 = vector.shape_cast %58 : vector<1x256xf32> to vector<1x1x1x256xf32>
    %60 = vector.shape_cast %59 : vector<1x1x1x256xf32> to vector<1x1x1x256xf32>
    %61 = vector.broadcast %60 : vector<1x1x1x256xf32> to vector<1x1x8x256xf32>
    %62 = vector.extract_strided_slice %45 {offsets = [4, 0], sizes = [1, 256], strides = [1, 1]} : vector<9x256xf32> to vector<1x256xf32>
    %63 = vector.shape_cast %62 : vector<1x256xf32> to vector<1x1x1x256xf32>
    %64 = vector.shape_cast %63 : vector<1x1x1x256xf32> to vector<1x1x1x256xf32>
    %65 = vector.broadcast %64 : vector<1x1x1x256xf32> to vector<1x1x8x256xf32>
    %66 = vector.extract_strided_slice %45 {offsets = [5, 0], sizes = [1, 256], strides = [1, 1]} : vector<9x256xf32> to vector<1x256xf32>
    %67 = vector.shape_cast %66 : vector<1x256xf32> to vector<1x1x1x256xf32>
    %68 = vector.shape_cast %67 : vector<1x1x1x256xf32> to vector<1x1x1x256xf32>
    %69 = vector.broadcast %68 : vector<1x1x1x256xf32> to vector<1x1x8x256xf32>
    %70 = vector.extract_strided_slice %45 {offsets = [6, 0], sizes = [1, 256], strides = [1, 1]} : vector<9x256xf32> to vector<1x256xf32>
    %71 = vector.shape_cast %70 : vector<1x256xf32> to vector<1x1x1x256xf32>
    %72 = vector.shape_cast %71 : vector<1x1x1x256xf32> to vector<1x1x1x256xf32>
    %73 = vector.broadcast %72 : vector<1x1x1x256xf32> to vector<1x1x8x256xf32>
    %74 = vector.extract_strided_slice %45 {offsets = [7, 0], sizes = [1, 256], strides = [1, 1]} : vector<9x256xf32> to vector<1x256xf32>
    %75 = vector.shape_cast %74 : vector<1x256xf32> to vector<1x1x1x256xf32>
    %76 = vector.shape_cast %75 : vector<1x1x1x256xf32> to vector<1x1x1x256xf32>
    %77 = vector.broadcast %76 : vector<1x1x1x256xf32> to vector<1x1x8x256xf32>
    %78 = vector.extract_strided_slice %45 {offsets = [8, 0], sizes = [1, 256], strides = [1, 1]} : vector<9x256xf32> to vector<1x256xf32>
    %79 = vector.shape_cast %78 : vector<1x256xf32> to vector<1x1x1x256xf32>
    %80 = vector.shape_cast %79 : vector<1x1x1x256xf32> to vector<1x1x1x256xf32>
    %81 = vector.broadcast %80 : vector<1x1x1x256xf32> to vector<1x1x8x256xf32>
    %cst_16 = arith.constant 0.000000e+00 : f32
    %82 = vector.broadcast %cst_16 : f32 to vector<4x8x8x256xf32>
    %c1_i32_17 = arith.constant 1 : i32
    %83 = tpu.dynamic_rotate %35 by %c1_i32_17 dim 2 : vector<4x10x8x256xf32>, i32 -> vector<4x10x8x256xf32>
    %84 = vector.broadcast %40 : vector<1x1x8x256xf32> to vector<4x10x8x256xf32>
    %85 = arith.mulf %83, %84 : vector<4x10x8x256xf32>
    %86 = vector.extract_strided_slice %85 {offsets = [0, 0, 0, 0], sizes = [4, 8, 8, 256], strides = [1, 1, 1, 1]} : vector<4x10x8x256xf32> to vector<4x8x8x256xf32>
    %87 = vector.broadcast %49 : vector<1x1x8x256xf32> to vector<4x8x8x256xf32>
    %88 = arith.mulf %86, %87 : vector<4x8x8x256xf32>
    %89 = arith.addf %82, %88 : vector<4x8x8x256xf32>
    %90 = vector.extract_strided_slice %85 {offsets = [0, 1, 0, 0], sizes = [4, 8, 8, 256], strides = [1, 1, 1, 1]} : vector<4x10x8x256xf32> to vector<4x8x8x256xf32>
    %91 = vector.broadcast %61 : vector<1x1x8x256xf32> to vector<4x8x8x256xf32>
    %92 = arith.mulf %90, %91 : vector<4x8x8x256xf32>
    %93 = arith.addf %89, %92 : vector<4x8x8x256xf32>
    %94 = vector.extract_strided_slice %85 {offsets = [0, 2, 0, 0], sizes = [4, 8, 8, 256], strides = [1, 1, 1, 1]} : vector<4x10x8x256xf32> to vector<4x8x8x256xf32>
    %95 = vector.broadcast %73 : vector<1x1x8x256xf32> to vector<4x8x8x256xf32>
    %96 = arith.mulf %94, %95 : vector<4x8x8x256xf32>
    %97 = arith.addf %93, %96 : vector<4x8x8x256xf32>
    %98 = vector.extract_strided_slice %35 {offsets = [0, 0, 0, 0], sizes = [4, 8, 8, 256], strides = [1, 1, 1, 1]} : vector<4x10x8x256xf32> to vector<4x8x8x256xf32>
    %99 = vector.broadcast %53 : vector<1x1x8x256xf32> to vector<4x8x8x256xf32>
    %100 = arith.mulf %98, %99 : vector<4x8x8x256xf32>
    %101 = arith.addf %97, %100 : vector<4x8x8x256xf32>
    %102 = vector.extract_strided_slice %35 {offsets = [0, 1, 0, 0], sizes = [4, 8, 8, 256], strides = [1, 1, 1, 1]} : vector<4x10x8x256xf32> to vector<4x8x8x256xf32>
    %103 = vector.broadcast %65 : vector<1x1x8x256xf32> to vector<4x8x8x256xf32>
    %104 = arith.mulf %102, %103 : vector<4x8x8x256xf32>
    %105 = arith.addf %101, %104 : vector<4x8x8x256xf32>
    %106 = vector.extract_strided_slice %35 {offsets = [0, 2, 0, 0], sizes = [4, 8, 8, 256], strides = [1, 1, 1, 1]} : vector<4x10x8x256xf32> to vector<4x8x8x256xf32>
    %107 = vector.broadcast %77 : vector<1x1x8x256xf32> to vector<4x8x8x256xf32>
    %108 = arith.mulf %106, %107 : vector<4x8x8x256xf32>
    %109 = arith.addf %105, %108 : vector<4x8x8x256xf32>
    %c7_i32_18 = arith.constant 7 : i32
    %110 = tpu.dynamic_rotate %35 by %c7_i32_18 dim 2 : vector<4x10x8x256xf32>, i32 -> vector<4x10x8x256xf32>
    %111 = vector.broadcast %44 : vector<1x1x8x256xf32> to vector<4x10x8x256xf32>
    %112 = arith.mulf %110, %111 : vector<4x10x8x256xf32>
    %113 = vector.extract_strided_slice %112 {offsets = [0, 0, 0, 0], sizes = [4, 8, 8, 256], strides = [1, 1, 1, 1]} : vector<4x10x8x256xf32> to vector<4x8x8x256xf32>
    %114 = vector.broadcast %57 : vector<1x1x8x256xf32> to vector<4x8x8x256xf32>
    %115 = arith.mulf %113, %114 : vector<4x8x8x256xf32>
    %116 = arith.addf %109, %115 : vector<4x8x8x256xf32>
    %117 = vector.extract_strided_slice %112 {offsets = [0, 1, 0, 0], sizes = [4, 8, 8, 256], strides = [1, 1, 1, 1]} : vector<4x10x8x256xf32> to vector<4x8x8x256xf32>
    %118 = vector.broadcast %69 : vector<1x1x8x256xf32> to vector<4x8x8x256xf32>
    %119 = arith.mulf %117, %118 : vector<4x8x8x256xf32>
    %120 = arith.addf %116, %119 : vector<4x8x8x256xf32>
    %121 = vector.extract_strided_slice %112 {offsets = [0, 2, 0, 0], sizes = [4, 8, 8, 256], strides = [1, 1, 1, 1]} : vector<4x10x8x256xf32> to vector<4x8x8x256xf32>
    %122 = vector.broadcast %81 : vector<1x1x8x256xf32> to vector<4x8x8x256xf32>
    %123 = arith.mulf %121, %122 : vector<4x8x8x256xf32>
    %124 = arith.addf %120, %123 : vector<4x8x8x256xf32>
    %125 = vector.shape_cast %124 : vector<4x8x8x256xf32> to vector<256x256xf32>
    %c0_19 = arith.constant 0 : index
    %c0_20 = arith.constant 0 : index
    %126 = vector.load %arg7[%c0_19, %c0_20] : memref<2x256xf32, #tpu.memory_space<vmem>>, vector<2x256xf32>
    %127 = vector.extract_strided_slice %126 {offsets = [0, 0], sizes = [1, 256], strides = [1, 1]} : vector<2x256xf32> to vector<1x256xf32>
    %128 = vector.broadcast %127 : vector<1x256xf32> to vector<256x256xf32>
    %129 = arith.mulf %125, %128 : vector<256x256xf32>
    %130 = vector.extract_strided_slice %126 {offsets = [1, 0], sizes = [1, 256], strides = [1, 1]} : vector<2x256xf32> to vector<1x256xf32>
    %131 = vector.broadcast %130 : vector<1x256xf32> to vector<256x256xf32>
    %132 = arith.addf %129, %131 : vector<256x256xf32>
    %133 = arith.negf %132 : vector<256x256xf32>
    %134 = math.exp %133 : vector<256x256xf32>
    %cst_21 = arith.constant 1.000000e+00 : f32
    %135 = vector.broadcast %cst_21 : f32 to vector<256x256xf32>
    %136 = arith.addf %135, %134 : vector<256x256xf32>
    %137 = arith.divf %135, %136 : vector<256x256xf32>
    %138 = arith.mulf %132, %137 : vector<256x256xf32>
    %139 = vector.shape_cast %138 : vector<256x256xf32> to vector<4x64x256xf32>
    %cst_22 = arith.constant dense<0.000000e+00> : vector<4x256xf32>
    %140 = vector.multi_reduction <add>, %139, %cst_22 [1] : vector<4x64x256xf32> to vector<4x256xf32>
    %cst_23 = arith.constant 1.562500e-02 : f32
    %141 = vector.broadcast %cst_23 : f32 to vector<4x256xf32>
    %142 = arith.mulf %140, %141 : vector<4x256xf32>
    %143 = arith.truncf %142 : vector<4x256xf32> to vector<4x256xbf16>
    %c0_24 = arith.constant 0 : index
    %c0_25 = arith.constant 0 : index
    %144 = vector.load %arg8[%c0_24, %c0_25] : memref<256x128xbf16, #tpu.memory_space<vmem>>, vector<256x128xbf16>
    %cst_26 = arith.constant dense<0.000000e+00> : vector<4x128xf32>
    %145 = tpu.matmul %143, %144, %cst_26 {dimension_numbers = #tpu.dot_dimension_numbers<[1], [0], [0], [1], [0, 0, 1, 1], [], []>} : vector<4x256xbf16>, vector<256x128xbf16>, vector<4x128xf32> -> vector<4x128xf32>
    %c0_27 = arith.constant 0 : index
    %c0_28 = arith.constant 0 : index
    %146 = vector.load %arg9[%c0_27, %c0_28] : memref<1x128xf32, #tpu.memory_space<vmem>>, vector<1x128xf32>
    %147 = vector.broadcast %146 : vector<1x128xf32> to vector<4x128xf32>
    %148 = arith.addf %145, %147 : vector<4x128xf32>
    %149 = arith.negf %148 : vector<4x128xf32>
    %150 = math.exp %149 : vector<4x128xf32>
    %cst_29 = arith.constant 1.000000e+00 : f32
    %151 = vector.broadcast %cst_29 : f32 to vector<4x128xf32>
    %152 = arith.addf %151, %150 : vector<4x128xf32>
    %153 = arith.divf %151, %152 : vector<4x128xf32>
    %154 = arith.mulf %148, %153 : vector<4x128xf32>
    %155 = arith.truncf %154 : vector<4x128xf32> to vector<4x128xbf16>
    %c0_30 = arith.constant 0 : index
    %c0_31 = arith.constant 0 : index
    %156 = vector.load %arg10[%c0_30, %c0_31] : memref<128x256xbf16, #tpu.memory_space<vmem>>, vector<128x256xbf16>
    %cst_32 = arith.constant dense<0.000000e+00> : vector<4x256xf32>
    %157 = tpu.matmul %155, %156, %cst_32 {dimension_numbers = #tpu.dot_dimension_numbers<[1], [0], [0], [1], [0, 0, 1, 1], [], []>} : vector<4x128xbf16>, vector<128x256xbf16>, vector<4x256xf32> -> vector<4x256xf32>
    %c0_33 = arith.constant 0 : index
    %c0_34 = arith.constant 0 : index
    %158 = vector.load %arg11[%c0_33, %c0_34] : memref<1x256xf32, #tpu.memory_space<vmem>>, vector<1x256xf32>
    %159 = vector.broadcast %158 : vector<1x256xf32> to vector<4x256xf32>
    %160 = arith.addf %157, %159 : vector<4x256xf32>
    %161 = arith.negf %160 : vector<4x256xf32>
    %162 = math.exp %161 : vector<4x256xf32>
    %cst_35 = arith.constant 1.000000e+00 : f32
    %163 = vector.broadcast %cst_35 : f32 to vector<4x256xf32>
    %164 = arith.addf %163, %162 : vector<4x256xf32>
    %165 = arith.divf %163, %164 : vector<4x256xf32>
    %166 = vector.shape_cast %165 : vector<4x256xf32> to vector<4x1x256xf32>
    %167 = vector.broadcast %166 : vector<4x1x256xf32> to vector<4x64x256xf32>
    %168 = arith.mulf %139, %167 : vector<4x64x256xf32>
    %169 = vector.shape_cast %168 : vector<4x64x256xf32> to vector<256x256xf32>
    %170 = arith.truncf %169 : vector<256x256xf32> to vector<256x256xbf16>
    %c0_36 = arith.constant 0 : index
    %c0_37 = arith.constant 0 : index
    %171 = vector.load %arg12[%c0_36, %c0_37] : memref<256x128xbf16, #tpu.memory_space<vmem>>, vector<256x128xbf16>
    %cst_38 = arith.constant dense<0.000000e+00> : vector<256x128xf32>
    %172 = tpu.matmul %170, %171, %cst_38 {dimension_numbers = #tpu.dot_dimension_numbers<[1], [0], [0], [1], [0, 0, 1, 1], [], []>} : vector<256x256xbf16>, vector<256x128xbf16>, vector<256x128xf32> -> vector<256x128xf32>
    %c0_39 = arith.constant 0 : index
    %c0_40 = arith.constant 0 : index
    %173 = vector.load %arg13[%c0_39, %c0_40] : memref<2x128xf32, #tpu.memory_space<vmem>>, vector<2x128xf32>
    %174 = vector.extract_strided_slice %173 {offsets = [0, 0], sizes = [1, 128], strides = [1, 1]} : vector<2x128xf32> to vector<1x128xf32>
    %175 = vector.broadcast %174 : vector<1x128xf32> to vector<256x128xf32>
    %176 = arith.mulf %172, %175 : vector<256x128xf32>
    %177 = vector.extract_strided_slice %173 {offsets = [1, 0], sizes = [1, 128], strides = [1, 1]} : vector<2x128xf32> to vector<1x128xf32>
    %178 = vector.broadcast %177 : vector<1x128xf32> to vector<256x128xf32>
    %179 = arith.addf %176, %178 : vector<256x128xf32>
    %180 = arith.addf %16, %179 : vector<256x128xf32>
    %181 = arith.truncf %180 : vector<256x128xf32> to vector<256x128xbf16>
    %c0_41 = arith.constant 0 : index
    %c0_42 = arith.constant 0 : index
    %182 = vector.load %arg14[%c0_41, %c0_42] : memref<128x256xbf16, #tpu.memory_space<vmem>>, vector<128x256xbf16>
    %cst_43 = arith.constant dense<0.000000e+00> : vector<256x256xf32>
    %183 = tpu.matmul %181, %182, %cst_43 {dimension_numbers = #tpu.dot_dimension_numbers<[1], [0], [0], [1], [0, 0, 1, 1], [], []>} : vector<256x128xbf16>, vector<128x256xbf16>, vector<256x256xf32> -> vector<256x256xf32>
    %c0_44 = arith.constant 0 : index
    %c0_45 = arith.constant 0 : index
    %184 = vector.load %arg15[%c0_44, %c0_45] : memref<2x256xf32, #tpu.memory_space<vmem>>, vector<2x256xf32>
    %185 = vector.extract_strided_slice %184 {offsets = [0, 0], sizes = [1, 256], strides = [1, 1]} : vector<2x256xf32> to vector<1x256xf32>
    %186 = vector.broadcast %185 : vector<1x256xf32> to vector<256x256xf32>
    %187 = arith.mulf %183, %186 : vector<256x256xf32>
    %188 = vector.extract_strided_slice %184 {offsets = [1, 0], sizes = [1, 256], strides = [1, 1]} : vector<2x256xf32> to vector<1x256xf32>
    %189 = vector.broadcast %188 : vector<1x256xf32> to vector<256x256xf32>
    %190 = arith.addf %187, %189 : vector<256x256xf32>
    %191 = arith.negf %190 : vector<256x256xf32>
    %192 = math.exp %191 : vector<256x256xf32>
    %cst_46 = arith.constant 1.000000e+00 : f32
    %193 = vector.broadcast %cst_46 : f32 to vector<256x256xf32>
    %194 = arith.addf %193, %192 : vector<256x256xf32>
    %195 = arith.divf %193, %194 : vector<256x256xf32>
    %196 = arith.mulf %190, %195 : vector<256x256xf32>
    %197 = vector.shape_cast %196 : vector<256x256xf32> to vector<4x64x256xf32>
    %cst_47 = arith.constant dense<0.000000e+00> : vector<4x256xf32>
    %198 = vector.multi_reduction <add>, %197, %cst_47 [1] : vector<4x64x256xf32> to vector<4x256xf32>
    %cst_48 = arith.constant 1.562500e-02 : f32
    %199 = vector.broadcast %cst_48 : f32 to vector<4x256xf32>
    %200 = arith.mulf %198, %199 : vector<4x256xf32>
    %201 = arith.truncf %200 : vector<4x256xf32> to vector<4x256xbf16>
    %c0_49 = arith.constant 0 : index
    %c0_50 = arith.constant 0 : index
    %202 = vector.load %arg16[%c0_49, %c0_50] : memref<256x128xbf16, #tpu.memory_space<vmem>>, vector<256x128xbf16>
    %cst_51 = arith.constant dense<0.000000e+00> : vector<4x128xf32>
    %203 = tpu.matmul %201, %202, %cst_51 {dimension_numbers = #tpu.dot_dimension_numbers<[1], [0], [0], [1], [0, 0, 1, 1], [], []>} : vector<4x256xbf16>, vector<256x128xbf16>, vector<4x128xf32> -> vector<4x128xf32>
    %c0_52 = arith.constant 0 : index
    %c0_53 = arith.constant 0 : index
    %204 = vector.load %arg17[%c0_52, %c0_53] : memref<1x128xf32, #tpu.memory_space<vmem>>, vector<1x128xf32>
    %205 = vector.broadcast %204 : vector<1x128xf32> to vector<4x128xf32>
    %206 = arith.addf %203, %205 : vector<4x128xf32>
    %c0_54 = arith.constant 0 : index
    %c0_55 = arith.constant 0 : index
    %c0_56 = arith.constant 0 : index
    %207 = vector.load %arg18[%c0_54, %c0_55, %c0_56] : memref<1x4x128xf32, #tpu.memory_space<vmem>>, vector<1x4x128xf32>
    %208 = vector.shape_cast %207 : vector<1x4x128xf32> to vector<4x128xf32>
    %209 = vector.shape_cast %206 : vector<4x128xf32> to vector<1x4x128xf32>
    tpu.vector_store %arg18[%c0_54, %c0_55, %c0_56], %209 {strides = array<i32>} : memref<1x4x128xf32, #tpu.memory_space<vmem>>, vector<1x4x128xf32>,
    return
  }
  func.func @transform_0(%arg0: i32) -> (i32, i32, i32) {
    %c0_i32 = arith.constant 0 : i32
    %c0_i32_0 = arith.constant 0 : i32
    %c0_i32_1 = arith.constant 0 : i32
    return %arg0, %c0_i32, %c0_i32_0 : i32, i32, i32
  }
  func.func @transform_1(%arg0: i32) -> (i32, i32) {
    %c0_i32 = arith.constant 0 : i32
    %c0_i32_0 = arith.constant 0 : i32
    %c0_i32_1 = arith.constant 0 : i32
    return %c0_i32, %c0_i32_0 : i32, i32
  }
  func.func @transform_2(%arg0: i32) -> (i32, i32) {
    %c0_i32 = arith.constant 0 : i32
    %c0_i32_0 = arith.constant 0 : i32
    %c0_i32_1 = arith.constant 0 : i32
    return %c0_i32, %c0_i32_0 : i32, i32
  }
  func.func @transform_3(%arg0: i32) -> (i32, i32) {
    %c0_i32 = arith.constant 0 : i32
    %c0_i32_0 = arith.constant 0 : i32
    %c0_i32_1 = arith.constant 0 : i32
    return %c0_i32, %c0_i32_0 : i32, i32
  }
  func.func @transform_4(%arg0: i32) -> (i32, i32) {
    %c0_i32 = arith.constant 0 : i32
    %c0_i32_0 = arith.constant 0 : i32
    %c0_i32_1 = arith.constant 0 : i32
    return %c0_i32, %c0_i32_0 : i32, i32
  }
  func.func @transform_5(%arg0: i32) -> (i32, i32) {
    %c0_i32 = arith.constant 0 : i32
    %c0_i32_0 = arith.constant 0 : i32
    %c0_i32_1 = arith.constant 0 : i32
    return %c0_i32, %c0_i32_0 : i32, i32
  }
  func.func @transform_6(%arg0: i32) -> (i32, i32) {
    %c0_i32 = arith.constant 0 : i32
    %c0_i32_0 = arith.constant 0 : i32
    %c0_i32_1 = arith.constant 0 : i32
    return %c0_i32, %c0_i32_0 : i32, i32
  }
  func.func @transform_7(%arg0: i32) -> (i32, i32) {
    %c0_i32 = arith.constant 0 : i32
    %c0_i32_0 = arith.constant 0 : i32
    %c0_i32_1 = arith.constant 0 : i32
    return %c0_i32, %c0_i32_0 : i32, i32
  }
  func.func @transform_8(%arg0: i32) -> (i32, i32) {
    %c0_i32 = arith.constant 0 : i32
    %c0_i32_0 = arith.constant 0 : i32
    %c0_i32_1 = arith.constant 0 : i32
    return %c0_i32, %c0_i32_0 : i32, i32
  }
  func.func @transform_9(%arg0: i32) -> (i32, i32) {
    %c0_i32 = arith.constant 0 : i32
    %c0_i32_0 = arith.constant 0 : i32
    %c0_i32_1 = arith.constant 0 : i32
    return %c0_i32, %c0_i32_0 : i32, i32
  }
  func.func @transform_10(%arg0: i32) -> (i32, i32) {
    %c0_i32 = arith.constant 0 : i32
    %c0_i32_0 = arith.constant 0 : i32
    %c0_i32_1 = arith.constant 0 : i32
    return %c0_i32, %c0_i32_0 : i32, i32
  }
  func.func @transform_11(%arg0: i32) -> (i32, i32) {
    %c0_i32 = arith.constant 0 : i32
    %c0_i32_0 = arith.constant 0 : i32
    %c0_i32_1 = arith.constant 0 : i32
    return %c0_i32, %c0_i32_0 : i32, i32
  }
  func.func @transform_12(%arg0: i32) -> (i32, i32) {
    %c0_i32 = arith.constant 0 : i32
    %c0_i32_0 = arith.constant 0 : i32
    %c0_i32_1 = arith.constant 0 : i32
    return %c0_i32, %c0_i32_0 : i32, i32
  }
  func.func @transform_13(%arg0: i32) -> (i32, i32) {
    %c0_i32 = arith.constant 0 : i32
    %c0_i32_0 = arith.constant 0 : i32
    %c0_i32_1 = arith.constant 0 : i32
    return %c0_i32, %c0_i32_0 : i32, i32
  }
  func.func @transform_14(%arg0: i32) -> (i32, i32) {
    %c0_i32 = arith.constant 0 : i32
    %c0_i32_0 = arith.constant 0 : i32
    %c0_i32_1 = arith.constant 0 : i32
    return %c0_i32, %c0_i32_0 : i32, i32
  }
  func.func @transform_15(%arg0: i32) -> (i32, i32) {
    %c0_i32 = arith.constant 0 : i32
    %c0_i32_0 = arith.constant 0 : i32
    %c0_i32_1 = arith.constant 0 : i32
    return %c0_i32, %c0_i32_0 : i32, i32
  }
  func.func @transform_16(%arg0: i32) -> (i32, i32) {
    %c0_i32 = arith.constant 0 : i32
    %c0_i32_0 = arith.constant 0 : i32
    %c0_i32_1 = arith.constant 0 : i32
    return %c0_i32, %c0_i32_0 : i32, i32
  }
  func.func @transform_17(%arg0: i32) -> (i32, i32, i32) {
    %c0_i32 = arith.constant 0 : i32
    %c0_i32_0 = arith.constant 0 : i32
    %c0_i32_1 = arith.constant 0 : i32
    return %arg0, %c0_i32, %c0_i32_0 : i32, i32, i32
  }
}

</mosaic_0001>

<bundles_post_ra>
// kernel: forward.1
= control target key start
LH: loop header
LB: loop body
LE: loop exit
PB: predicated region body
PF: predicated region fallthrough
CT: control target
= control target key end

     0   :  { %s8296_s24 = smov 0   ;;  %s13081_s0 = inlined_call_operand.vmem [shape: bf16[8,64,128], index: 0, kind: input, shape index: {}]   ;;  %s13082_s1 = inlined_call_operand.vmem [shape: bf16[128,128], index: 1, kind: input, shape index: {}]   ;;  %s13083_s2 = inlined_call_operand.vmem [shape: f32[2,128], index: 2, kind: input, shape index: {}]   ;;  %s13084_s3 = inlined_call_operand.vmem [shape: bf16[128,256], index: 3, kind: input, shape index: {}]   ;;  %s13085_s4 = inlined_call_operand.vmem [shape: f32[2,256], index: 4, kind: input, shape index: {}]   ;;  %s13086_s5 = inlined_call_operand.vmem [shape: f32[9,256], index: 5, kind: input, shape index: {}]   ;;  %s13087_s6 = inlined_call_operand.vmem [shape: f32[2,256], index: 6, kind: input, shape index: {}]   ;;  %s13088_s7 = inlined_call_operand.vmem [shape: bf16[256,128], index: 7, kind: input, shape index: {}]   ;;  %s13089_s8 = inlined_call_operand.vmem [shape: f32[1,128], index: 8, kind: input, shape index: {}]   ;;  %s13090_s9 = inlined_call_operand.vmem [shape: bf16[128,256], index: 9, kind: input, shape index: {}]   ;;  %s13091_s10 = inlined_call_operand.vmem [shape: f32[1,256], index: 10, kind: input, shape index: {}]   ;;  %s13092_s11 = inlined_call_operand.vmem [shape: bf16[256,128], index: 11, kind: input, shape index: {}]   ;;  %s13093_s12 = inlined_call_operand.vmem [shape: f32[2,128], index: 12, kind: input, shape index: {}]   ;;  %s13094_s13 = inlined_call_operand.vmem [shape: bf16[128,256], index: 13, kind: input, shape index: {}]   ;;  %s13095_s14 = inlined_call_operand.vmem [shape: f32[2,256], index: 14, kind: input, shape index: {}]   ;;  %s13096_s15 = inlined_call_operand.vmem [shape: bf16[256,128], index: 15, kind: input, shape index: {}]   ;;  %s13097_s16 = inlined_call_operand.vmem [shape: f32[1,128], index: 16, kind: input, shape index: {}]   ;;  %s13098_s17 = inlined_call_operand.vmem [shape: f32[2,4,128], index: 17, kind: output, shape index: {}]  }
   0x1   :  { %13423 = sst [smem:[#allocation142_spill]] %s13081_s0 }
   0x2   :  { %13424 = sst [smem:[#allocation143_spill]] %s13082_s1 }
   0x3 LB: > { %s8302_s25 = sadd.s32 4294967295, %s8201_s24   ;;  %p6536_p0 = scmp.ge.s32.totalorder %s8201_s24, 1  ;;  %s8201_s24 = sphi %s8296_s24, %s27_s24  }
   0x4   : > { %p489_p1 = scmp.lt.s32.totalorder %s8201_s24, 3 }
   0x6   : > { %p490_p2 = pnand %p6536_p0, %p489_p1 }
   0x8   : > { %493 = sbr.rel (%p490_p2) target bundleno = 2489 (0x9b9), region = 88 }
   0xf   : > { %s13425_s28 = sld [smem:[#allocation143_spill]]  ;;  %s6537_s29 = sshll.u32 %s8302_s25, 2  ;;  %v7160_v24 = vld [vmem:[%s13084_s3 + $0x4] ss:$8 sps:$4 sm:$0xff]   ;;  %v7162_v25 = vld [vmem:[%s13084_s3] ss:$8 sps:$4 sm:$0xff]   ;;  %v907_v41 = vlaneseq }
  0x10   : > { %p542_p3 = scmp.lt.s32.totalorder %s6537_s29, 7  ;;  %s13426_s22 = sld [smem:[#allocation142_spill]]  ;;  %1315 = vmatprep.subr.bf16.mxu1 %v7160_v24  ;;  %v7163_v26 = vld [vmem:[%s13084_s3 + $0x14] ss:$8 sps:$4 sm:$0xff]   ;;  %v7165_v27 = vld [vmem:[%s13084_s3 + $0x10] ss:$8 sps:$4 sm:$0xff]  }
  0x11   : > { %1316 = vmatpush1.bf16.msra.mxu1 %v7162_v25  ;;  %v7166_v28 = vld [vmem:[%s13084_s3 + $0x24] ss:$8 sps:$4 sm:$0xff]   ;;  %v7168_v29 = vld [vmem:[%s13084_s3 + $0x20] ss:$8 sps:$4 sm:$0xff]   ;;  %v7169_v30 = vld [vmem:[%s13084_s3 + $0x34] ss:$8 sps:$4 sm:$0xff]  }
  0x12   : > { %s14219_s29 = smov (!%p542_p3, %s6537_s29), 7  ;;  %1317 = vmatprep.subr.bf16.mxu1 %v7163_v26  ;;  %v7171_v31 = vld [vmem:[%s13084_s3 + $0x30] ss:$8 sps:$4 sm:$0xff]   ;;  %v7172_v32 = vld [vmem:[%s13084_s3 + $0x44] ss:$8 sps:$4 sm:$0xff]   ;;  %v13100_v40 = vmov 0  }
  0x13   : > { %s6896_s1 = sshll.u32 %s14219_s29, 5  ;;  %v7174_v33 = vld [vmem:[%s13084_s3 + $0x40] ss:$8 sps:$4 sm:$0xff]   ;;  %v7175_v34 = vld [vmem:[%s13084_s3 + $0x54] ss:$8 sps:$4 sm:$0xff]   ;;  %1347 = vmatprep.mubr.bf16.mxu1 %v13100_v40  ;;  %v8401_v42 = vshrl.u32 %v907_v41, 7 }
  0x14   : > { %v7177_v35 = vld [vmem:[%s13084_s3 + $0x50] ss:$8 sps:$4 sm:$0xff]   ;;  %v7178_v36 = vld [vmem:[%s13084_s3 + $0x64] ss:$8 sps:$4 sm:$0xff]   ;;  %v7180_v37 = vld [vmem:[%s13084_s3 + $0x60] ss:$8 sps:$4 sm:$0xff]  }
  0x15   : > { %v7136_v0 = vld [vmem:[%s13425_s28] sm:$0xff]   ;;  %v7137_v1 = vld [vmem:[%s13425_s28 + $0x8] sm:$0xff]   ;;  %v7138_v2 = vld [vmem:[%s13425_s28 + $0x10] sm:$0xff]   ;;  %1318 = vmatpush1.bf16.msra.mxu1 %v7165_v27  ;;  %13427 = vst [vmem:[#allocation2_spill] sm:$0xff] %v8401_v42  ;;  %v8404_v43 = vsub.s32 0, %v8401_v42  ;;  %v8410_v45 = vsub.s32 1, %v8401_v42 }
  0x16   : > { %7077 = vmatprep.subr.bf16.mxu0 %v7136_v0  ;;  %s8319_s23 = scalar_lea.vmem %s13426_s22, %s6896_s1  ;;  %v7139_v3 = vld [vmem:[%s13425_s28 + $0x18] sm:$0xff]   ;;  %v7140_v5 = vld [vmem:[%s13425_s28 + $0x20] sm:$0xff]   ;;  %v7141_v6 = vld [vmem:[%s13425_s28 + $0x28] sm:$0xff]   ;;  %1319 = vmatprep.subr.bf16.mxu1 %v7166_v28  ;;  %vm2124_vm0 = vcmp.ge.s32.totalorder %v8401_v42, 1  ;;  %vm2127_vm1 = vcmp.lt.s32.totalorder %v8401_v42, 7  ;;  %vm4363_vm2 = vcmask 1041409  }
  0x17   : > { %7078 = vmatpush3.bf16.msra.mxu0 %v7136_v0  ;;  %v7144_v4 = vld [vmem:[%s8319_s23] sm:$0xff]   ;;  %v7142_v7 = vld [vmem:[%s13425_s28 + $0x30] sm:$0xff]   ;;  %v7143_v8 = vld [vmem:[%s13425_s28 + $0x38] sm:$0xff]   ;;  %13428 = vst [vmem:[#allocation3_spill] sm:$0xff] %v8404_v43  ;;  %vm4365_vm3 = vcmask 1042434   ;;  %vm4367_vm4 = vcmask 1043459  }
  0x18   : > { %7079 = vmatprep.subr.bf16.mxu0 %v7137_v1  ;;  %7093 = vmatprep.mubr.bf16.mxu0 %v7144_v4  ;;  %v7145_v9 = vld [vmem:[%s8319_s23 + $0x8] sm:$0xff]   ;;  %v7146_v10 = vld [vmem:[%s8319_s23 + $0x10] sm:$0xff]   ;;  %v7147_v11 = vld [vmem:[%s8319_s23 + $0x18] sm:$0xff]   ;;  %13429 = vst [vmem:[#allocation4_spill] sm:$0xff] %v8410_v45  ;;  %p548_p4 = scmp.lt.s32.totalorder %s8302_s25, 1 }
  0x19   : > { %v7148_v12 = vld [vmem:[%s8319_s23 + $0x20] sm:$0xff]   ;;  %v7149_v13 = vld [vmem:[%s8319_s23 + $0x28] sm:$0xff]   ;;  %v7150_v14 = vld [vmem:[%s8319_s23 + $0x30] sm:$0xff]   ;;  %1320 = vmatpush1.bf16.msra.mxu1 %v7168_v29 }
  0x1a   : > { %v7151_v15 = vld [vmem:[%s8319_s23 + $0x38] sm:$0xff]   ;;  %v7152_v16 = vld [vmem:[%s8319_s23 + $0x40] sm:$0xff]   ;;  %v7153_v17 = vld [vmem:[%s8319_s23 + $0x48] sm:$0xff]   ;;  %1321 = vmatprep.subr.bf16.mxu1 %v7169_v30  ;;  %s14221_s25 = smov (!%p548_p4, %s8302_s25), 1 }
  0x1b   : > { %7080 = vmatpush3.bf16.msra.mxu0 %v7137_v1  ;;  %v7154_v18 = vld [vmem:[%s8319_s23 + $0x50] sm:$0xff]   ;;  %v7155_v19 = vld [vmem:[%s8319_s23 + $0x58] sm:$0xff]   ;;  %v7156_v20 = vld [vmem:[%s8319_s23 + $0x60] sm:$0xff]   ;;  %s6540_s22 = sshll.u32 %s14221_s25, 2 }
  0x1c   : > { %7081 = vmatprep.subr.bf16.mxu0 %v7138_v2  ;;  %v7157_v21 = vld [vmem:[%s8319_s23 + $0x68] sm:$0xff]   ;;  %v7158_v22 = vld [vmem:[%s8319_s23 + $0x70] sm:$0xff]   ;;  %v7159_v23 = vld [vmem:[%s8319_s23 + $0x78] sm:$0xff]   ;;  %s551_s30 = scalar_lea.vmem %s13098_s17, %s6540_s22 }
  0x1d   : > { %1322 = vmatpush1.bf16.msra.mxu1 %v7171_v31  ;;  %v7181_v38 = vld [vmem:[%s13084_s3 + $0x74] ss:$8 sps:$4 sm:$0xff]   ;;  %v7183_v39 = vld [vmem:[%s13084_s3 + $0x70] ss:$8 sps:$4 sm:$0xff]   ;;  %v906_v44 = vld [vmem:[%s13083_s2] sm:$0x3] }
  0x1e   : > { %1323 = vmatprep.subr.bf16.mxu1 %v7172_v32  ;;  %v8413_v46 = vrot.slane %v906_v44, %v8404_v43  ;;  %v8416_v48 = vrot.slane %v906_v44, %v8410_v45 }
  0x1f   : > { %7082 = vmatpush3.bf16.msra.mxu0 %v7138_v2 }
  0x20   : > { %7083 = vmatprep.subr.bf16.mxu0 %v7139_v3 }
  0x21   : > { %1324 = vmatpush1.bf16.msra.mxu1 %v7174_v33 }
  0x22   : > { %1325 = vmatprep.subr.bf16.mxu1 %v7175_v34 }
  0x23   : > { %7084 = vmatpush3.bf16.msra.mxu0 %v7139_v3 }
  0x24   : > { %7085 = vmatprep.subr.bf16.mxu0 %v7140_v5 }
  0x25   : > { %1326 = vmatpush1.bf16.msra.mxu1 %v7177_v35 }
  0x26   : > { %1327 = vmatprep.subr.bf16.mxu1 %v7178_v36 }
  0x27   : > { %7086 = vmatpush3.bf16.msra.mxu0 %v7140_v5 }
  0x28   : > { %7087 = vmatprep.subr.bf16.mxu0 %v7141_v6 }
  0x29   : > { %1328 = vmatpush1.bf16.msra.mxu1 %v7180_v37 }
  0x2a   : > { %1329 = vmatprep.subr.bf16.mxu1 %v7181_v38 }
  0x2b   : > { %7088 = vmatpush3.bf16.msra.mxu0 %v7141_v6 }
  0x2c   : > { %7089 = vmatprep.subr.bf16.mxu0 %v7142_v7 }
  0x2d   : > { %1330 = vmatpush1.bf16.msra.mxu1 %v7183_v39 }
  0x2f   : > { %7090 = vmatpush3.bf16.msra.mxu0 %v7142_v7 }
  0x30   : > { %7091 = vmatprep.subr.bf16.mxu0 %v7143_v8 }
  0x33   : > { %7092 = vmatpush3.bf16.msra.mxu0 %v7143_v8 }
  0x36   : > { %7094 = vmatmul.mubr.bf16.vlgmr.msra.gmra.mrb[0].mxu0 %v7145_v9 }
  0x37   : > { %7097 = vmatprep.mubr.bf16.mxu0 %v7146_v10 }
  0x3e   : > { %7098 = vmatmul.mubr.bf16.gmra.mrb[4].mxu0 %v7147_v11 }
  0x3f   : > { %7101 = vmatprep.mubr.bf16.mxu0 %v7148_v12 }
  0x46   : > { %7102 = vmatmul.mubr.bf16.gmra.mrb[8].mxu0 %v7149_v13 }
  0x47   : > { %7105 = vmatprep.mubr.bf16.mxu0 %v7150_v14 }
  0x4e   : > { %7106 = vmatmul.mubr.bf16.gmra.mrb[12].mxu0 %v7151_v15 }
  0x4f   : > { %7109 = vmatprep.mubr.bf16.mxu0 %v7152_v16 }
  0x56   : > { %7110 = vmatmul.mubr.bf16.gmra.mrb[16].mxu0 %v7153_v17 }
  0x57   : > { %7113 = vmatprep.mubr.bf16.mxu0 %v7154_v18 }
  0x5e   : > { %7114 = vmatmul.mubr.bf16.gmra.mrb[20].mxu0 %v7155_v19 }
  0x5f   : > { %7117 = vmatprep.mubr.bf16.mxu0 %v7156_v20 }
  0x66   : > { %7118 = vmatmul.mubr.bf16.gmra.mrb[24].mxu0 %v7157_v21 }
  0x67   : > { %7121 = vmatprep.mubr.bf16.mxu0 %v7158_v22 }
  0x6e   : > { %7122 = vmatmul.mubr.bf16.gmra.mrb[28].mxu0 %v7159_v23 }
 0x109   : > { %v7095_v47 = vpop.f32.mrb[0].mxu0 }
 0x10a   : > { %v913_v49 = vmul.f32 %v7095_v47, %v8413_v46  ;;  %v779_v50 = vpop.f32.mrb[1].mxu0 }
 0x10b   : > { %v911_v51 = vmul.f32 %v8413_v46, %v779_v50  ;;  %v7096_v52 = vpop.f32.mrb[2].mxu0 }
 0x10c   : > { %v914_v53 = vmul.f32 %v7096_v52, %v8413_v46  ;;  %v782_v54 = vpop.f32.mrb[3].mxu0  ;;  %v8422_v55 = vadd.f32 %v8416_v48, %v913_v49 }
 0x10d   : > { %v8425_v56 = vadd.f32 %v8416_v48, %v911_v51  ;;  %v912_v57 = vmul.f32 %v8413_v46, %v782_v54 }
 0x10e   : > { %v8429_v58 = vadd.f32 %v8416_v48, %v914_v53  ;;  %v6567_v62 = vmul.f32 -1.442695, %v8422_v55 }
 0x10f   : > { %v6565_v59 = vmul.f32 -1.442695, %v8425_v56  ;;  %v8433_v60 = vadd.f32 %v8416_v48, %v912_v57 }
 0x110   : > { %v6568_v61 = vmul.f32 -1.442695, %v8429_v58 }
 0x111   : > { %7280 = vpow2.f32 %v6565_v59  ;;  %v6566_v63 = vmul.f32 -1.442695, %v8433_v60  ;;  %v7099_v0 = vpop.f32.mrb[4].mxu0 }
 0x112   : > { %7282 = vpow2.f32 %v6568_v61  ;;  %v795_v1 = vpop.f32.mrb[5].mxu0  ;;  %v917_v9 = vmul.f32 %v7099_v0, %v8413_v46 }
 0x113   : > { %7284 = vpow2.f32 %v6566_v63  ;;  %v915_v2 = vmul.f32 %v8413_v46, %v795_v1  ;;  %v7100_v3 = vpop.f32.mrb[6].mxu0 }
 0x114   : > { %v798_v4 = vpop.f32.mrb[7].mxu0  ;;  %7286 = vpow2.f32 %v6567_v62  ;;  %v918_v7 = vmul.f32 %v7100_v3, %v8413_v46  ;;  %v8454_v21 = vadd.f32 %v8416_v48, %v917_v9 }
 0x115   : > { %v8440_v5 = vadd.f32 %v8416_v48, %v915_v2  ;;  %v916_v6 = vmul.f32 %v8413_v46, %v798_v4 }
 0x116   : > { %v8451_v15 = vadd.f32 %v8416_v48, %v918_v7  ;;  %v6571_v27 = vmul.f32 -1.442695, %v8454_v21 }
 0x117   : > { %v8445_v8 = vadd.f32 %v8416_v48, %v916_v6  ;;  %v6569_v10 = vmul.f32 -1.442695, %v8440_v5 }
 0x118   : > { %v6572_v24 = vmul.f32 -1.442695, %v8451_v15 }
 0x119   : > { %v6570_v11 = vmul.f32 -1.442695, %v8445_v8  ;;  %v7103_v12 = vpop.f32.mrb[8].mxu0 }
 0x11a   : > { %v811_v13 = vpop.f32.mrb[9].mxu0  ;;  %v921_v37 = vmul.f32 %v7103_v12, %v8413_v46 }
 0x11b   : > { %v7281_v14 = vpop.eup %7280  ;;  %7288 = vpow2.f32 %v6570_v11  ;;  %v7104_v16 = vpop.f32.mrb[10].mxu0  ;;  %v919_v28 = vmul.f32 %v8413_v46, %v811_v13 }
 0x11c   : > { %v7283_v17 = vpop.eup %7282  ;;  %v1075_v18 = vadd.f32 1.0, %v7281_v14  ;;  %v814_v19 = vpop.f32.mrb[11].mxu0  ;;  %7290 = vpow2.f32 %v6569_v10  ;;  %v922_v38 = vmul.f32 %v7104_v16, %v8413_v46  ;;  %v8475_v53 = vadd.f32 %v8416_v48, %v921_v37 }
 0x11d   : > { %v7285_v20 = vpop.eup %7284  ;;  %v920_v25 = vmul.f32 %v8413_v46, %v814_v19  ;;  %v1078_v26 = vadd.f32 1.0, %v7283_v17  ;;  %v8468_v36 = vadd.f32 %v8416_v48, %v919_v28 }
 0x11e   : > { %7292 = vrcp.f32 %v1075_v18  ;;  %v1076_v22 = vadd.f32 1.0, %v7285_v20  ;;  %v7287_v23 = vpop.eup %7286  ;;  %v8478_v54 = vadd.f32 %v8416_v48, %v922_v38  ;;  %v6575_v9 = vmul.f32 -1.442695, %v8475_v53 }
 0x11f   : > { %v1077_v30 = vadd.f32 1.0, %v7287_v23  ;;  %v8463_v32 = vadd.f32 %v8416_v48, %v920_v25  ;;  %v6573_v49 = vmul.f32 -1.442695, %v8468_v36 }
 0x120   : > { %7294 = vrcp.f32 %v1076_v22  ;;  %v6576_v12 = vmul.f32 -1.442695, %v8478_v54 }
 0x121   : > { %v8460_v29 = vpop.f32.mrb[12].mxu0  ;;  %7296 = vpow2.f32 %v6572_v24  ;;  %v6574_v41 = vmul.f32 -1.442695, %v8463_v32 }
 0x122   : > { %v827_v31 = vpop.f32.mrb[13].mxu0  ;;  %7298 = vrcp.f32 %v1078_v26 }
 0x123   : > { %v8465_v33 = vpop.f32.mrb[14].mxu0  ;;  %7300 = vpow2.f32 %v6571_v27  ;;  %v923_v19 = vmul.f32 %v8413_v46, %v827_v31 }
 0x124   : > { %v830_v34 = vpop.f32.mrb[15].mxu0  ;;  %7302 = vrcp.f32 %v1077_v30 }
 0x125   : > { %v7289_v35 = vpop.eup %7288  ;;  %7304 = vpow2.f32 %v6574_v41  ;;  %v924_v13 = vmul.f32 %v8413_v46, %v830_v34 }
 0x126   : > { %v7291_v39 = vpop.eup %7290  ;;  %v1080_v47 = vadd.f32 1.0, %v7289_v35  ;;  %v8525_v35 = vadd.f32 %v8416_v48, %v923_v19 }
 0x127   : > { %v1079_v52 = vadd.f32 1.0, %v7291_v39  ;;  %v8517_v26 = vadd.f32 %v8416_v48, %v924_v13 }
 0x128   : > { %v7293_v44 = vpop.eup %7292  ;;  %7306 = vrcp.f32 %v1080_v47  ;;  %v926_v47 = vmul.f32 %v8465_v33, %v8413_v46 }
 0x129   : > { %v7111_v50 = vpop.f32.mrb[16].mxu0  ;;  %v8482_v61 = vmul.f32 %v7293_v44, %v8425_v56  ;;  %7308 = vpow2.f32 %v6573_v49  ;;  %v6578_v49 = vmul.f32 -1.442695, %v8517_v26 }
 0x12a   : > { %v7295_v51 = vpop.eup %7294  ;;  %v929_v57 = vmul.f32 %v7111_v50, %v8413_v46  ;;  %v843_v59 = vpop.f32.mrb[17].mxu0  ;;  %7310 = vrcp.f32 %v1079_v52 }
 0x12b   : > { %13430 = vst [vmem:[#allocation5_spill] sm:$0xff] %v8482_v61  ;;  %v8485_v62 = vmul.f32 %v7295_v51, %v8433_v60  ;;  %v927_v63 = vmul.f32 %v8413_v46, %v843_v59  ;;  %v7112_v0 = vpop.f32.mrb[18].mxu0  ;;  %v7297_v4 = vpop.eup %7296  ;;  %7312 = vpow2.f32 %v6575_v9 }
 0x12c   : > { %v8489_v1 = vadd.f32 %v8416_v48, %v929_v57  ;;  %v930_v2 = vmul.f32 %v7112_v0, %v8413_v46  ;;  %v846_v3 = vpop.f32.mrb[19].mxu0  ;;  %v7299_v7 = vpop.eup %7298  ;;  %v1082_v17 = vadd.f32 1.0, %v7297_v4  ;;  %7314 = vpow2.f32 %v6576_v12 }
 0x12d   : > { %13431 = vst [vmem:[#allocation6_spill] sm:$0xff] %v8485_v62  ;;  %v8493_v6 = vadd.f32 %v8416_v48, %v927_v63  ;;  %v928_v56 = vmul.f32 %v8413_v46, %v846_v3  ;;  %v1203_v60 = vpack.c.bf16 %v8485_v62, %v8482_v61  ;;  %v7301_v11 = vpop.eup %7300  ;;  %v8509_v18 = vmul.f32 %v7299_v7, %v8429_v58 }
 0x12e   : > { %v8500_v10 = vadd.f32 %v8416_v48, %v930_v2  ;;  %v7303_v16 = vpop.eup %7302  ;;  %v1081_v22 = vadd.f32 1.0, %v7301_v11  ;;  %7316 = vrcp.f32 %v1082_v17  ;;  %v925_v57 = vmul.f32 %v8460_v29, %v8413_v46 }
 0x12f   : > { %v8505_v14 = vadd.f32 %v8416_v48, %v928_v56  ;;  %1348 = vmatmul.mubr.bf16.vlgmr.msra.gmra.mrb[0].mxu1 %v1203_v60  ;;  %13432 = vst [vmem:[#allocation7_spill] sm:$0xff] %v8509_v18  ;;  %v8514_v25 = vmul.f32 %v7303_v16, %v8422_v55  ;;  %v7305_v34 = vpop.eup %7304  ;;  %v6577_v63 = vmul.f32 -1.442695, %v8525_v35  ;;  %v8554_v56 = vadd.f32 %v8416_v48, %v926_v47 }
 0x130   : > { %1357 = vmatprep.mubr.bf16.mxu1 %v13100_v40  ;;  %7318 = vrcp.f32 %v1081_v22  ;;  %v1084_v52 = vadd.f32 1.0, %v7305_v34 }
 0x131   : > { %v7115_v20 = vpop.f32.mrb[20].mxu0  ;;  %13433 = vst [vmem:[#allocation8_spill] sm:$0xff] %v8514_v25  ;;  %v1204_v55 = vpack.c.bf16 %v8509_v18, %v8514_v25  ;;  %7320 = vpow2.f32 %v6578_v49  ;;  %v6580_v22 = vmul.f32 -1.442695, %v8554_v56 }
 0x132   : > { %v933_v23 = vmul.f32 %v7115_v20, %v8413_v46  ;;  %v859_v24 = vpop.f32.mrb[21].mxu0  ;;  %v7307_v39 = vpop.eup %7306  ;;  %7322 = vrcp.f32 %v1084_v52 }
 0x133   : > { %v931_v27 = vmul.f32 %v8413_v46, %v859_v24  ;;  %v7116_v28 = vpop.f32.mrb[22].mxu0  ;;  %v7309_v44 = vpop.eup %7308  ;;  %v8546_v59 = vmul.f32 %v7307_v39, %v8445_v8  ;;  %v8558_v8 = vadd.f32 %v8416_v48, %v925_v57  ;;  %7324 = vpow2.f32 %v6577_v63 }
 0x134   : > { %v8521_v58 = vadd.f32 %v8416_v48, %v933_v23  ;;  %v934_v30 = vmul.f32 %v7116_v28, %v8413_v46  ;;  %v862_v31 = vpop.f32.mrb[23].mxu0  ;;  %v7311_v51 = vpop.eup %7310  ;;  %v1083_v33 = vadd.f32 1.0, %v7309_v44 }
 0x135   : > { %v8530_v37 = vadd.f32 %v8416_v48, %v931_v27  ;;  %v932_v38 = vmul.f32 %v8413_v46, %v862_v31  ;;  %13434 = vst [vmem:[#allocation9_spill] sm:$0xff] %v8546_v59  ;;  %v8551_v4 = vmul.f32 %v7311_v51, %v8440_v5  ;;  %v7313_v7 = vpop.eup %7312 }
 0x136   : > { %v8534_v41 = vadd.f32 %v8416_v48, %v934_v30  ;;  %v7315_v5 = vpop.eup %7314  ;;  %7326 = vrcp.f32 %v1083_v33  ;;  %v6579_v30 = vmul.f32 -1.442695, %v8558_v8  ;;  %v1085_v34 = vadd.f32 1.0, %v7313_v7 }
 0x137   : > { %1358 = vmatmul.mubr.bf16.gmra.mrb[4].mxu1 %v1204_v55  ;;  %v8540_v50 = vadd.f32 %v8416_v48, %v932_v38  ;;  %13435 = vst [vmem:[#allocation10_spill] sm:$0xff] %v8551_v4  ;;  %v1205_v13 = vpack.c.bf16 %v8546_v59, %v8551_v4  ;;  %v1086_v27 = vadd.f32 1.0, %v7315_v5  ;;  %7328 = vpow2.f32 %v6580_v22 }
 0x138   : > { %1367 = vmatprep.mubr.bf16.mxu1 %v13100_v40  ;;  %v7317_v19 = vpop.eup %7316  ;;  %v6581_v33 = vmul.f32 -1.442695, %v8493_v6 }
 0x139   : > { %v7119_v0 = vpop.f32.mrb[24].mxu0  ;;  %v8579_v28 = vmul.f32 %v7317_v19, %v8451_v15  ;;  %7330 = vrcp.f32 %v1086_v27  ;;  %v6583_v19 = vmul.f32 -1.442695, %v8489_v1 }
 0x13a   : > { %v937_v2 = vmul.f32 %v7119_v0, %v8413_v46  ;;  %v875_v3 = vpop.f32.mrb[25].mxu0  ;;  %v7319_v24 = vpop.eup %7318  ;;  %7332 = vpow2.f32 %v6579_v30 }
 0x13b   : > { %v935_v29 = vmul.f32 %v8413_v46, %v875_v3  ;;  %v7120_v60 = vpop.f32.mrb[26].mxu0  ;;  %13436 = vst [vmem:[#allocation11_spill] sm:$0xff] %v8579_v28  ;;  %v8584_v39 = vmul.f32 %v7319_v24, %v8454_v21  ;;  %v7321_v52 = vpop.eup %7320  ;;  %7334 = vrcp.f32 %v1085_v34  ;;  %v6584_v24 = vmul.f32 -1.442695, %v8500_v10 }
 0x13c   : > { %v8561_v9 = vadd.f32 %v8416_v48, %v937_v2  ;;  %v938_v11 = vmul.f32 %v7120_v60, %v8413_v46  ;;  %v878_v12 = vpop.f32.mrb[27].mxu0  ;;  %v7323_v0 = vpop.eup %7322  ;;  %7336 = vpow2.f32 %v6581_v33  ;;  %v6587_v33 = vmul.f32 -1.442695, %v8521_v58 }
 0x13d   : > { %v8567_v16 = vadd.f32 %v8416_v48, %v935_v29  ;;  %v936_v17 = vmul.f32 %v8413_v46, %v878_v12  ;;  %13437 = vst [vmem:[#allocation12_spill] sm:$0xff] %v8584_v39  ;;  %v1206_v57 = vpack.c.bf16 %v8579_v28, %v8584_v39  ;;  %v7325_v3 = vpop.eup %7324  ;;  %v6582_v29 = vmul.f32 -1.442695, %v8505_v14 }
 0x13e   : > { %v8571_v20 = vadd.f32 %v8416_v48, %v938_v11  ;;  %v1088_v11 = vadd.f32 1.0, %v7321_v52  ;;  %v1087_v12 = vadd.f32 1.0, %v7325_v3 }
 0x13f   : > { %1368 = vmatmul.mubr.bf16.gmra.mrb[8].mxu1 %v1205_v13  ;;  %v8575_v23 = vadd.f32 %v8416_v48, %v936_v17  ;;  %7338 = vpow2.f32 %v6582_v29 }
 0x140   : > { %1377 = vmatprep.mubr.bf16.mxu1 %v13100_v40  ;;  %v7327_v7 = vpop.eup %7326  ;;  %7340 = vrcp.f32 %v1088_v11 }
 0x141   : > { %v7123_v31 = vpop.f32.mrb[28].mxu0  ;;  %v8610_v5 = vmul.f32 %v7327_v7, %v8468_v36  ;;  %v7329_v13 = vpop.eup %7328  ;;  %7342 = vrcp.f32 %v1087_v12  ;;  %v6588_v7 = vmul.f32 -1.442695, %v8534_v41 }
 0x142   : > { %v941_v55 = vmul.f32 %v7123_v31, %v8413_v46  ;;  %v891_v38 = vpop.f32.mrb[29].mxu0  ;;  %v1090_v27 = vadd.f32 1.0, %v7329_v13  ;;  %7344 = vpow2.f32 %v6583_v19 }
 0x143   : > { %v939_v44 = vmul.f32 %v8413_v46, %v891_v38  ;;  %v7124_v47 = vpop.f32.mrb[30].mxu0  ;;  %13439 = vst [vmem:[#allocation14_spill] sm:$0xff] %v8610_v5  ;;  %7346 = vpow2.f32 %v6584_v24  ;;  %v6585_v38 = vmul.f32 -1.442695, %v8530_v37 }
 0x144   : > { %v8588_v49 = vadd.f32 %v8416_v48, %v941_v55  ;;  %v942_v15 = vmul.f32 %v7124_v47, %v8413_v46  ;;  %v894_v51 = vpop.f32.mrb[31].mxu0  ;;  %7348 = vrcp.f32 %v1090_v27  ;;  %v6590_v27 = vmul.f32 -1.442695, %v8575_v23 }
 0x145   : > { %v8594_v63 = vadd.f32 %v8416_v48, %v939_v44  ;;  %v940_v21 = vmul.f32 %v8413_v46, %v894_v51  ;;  %v8607_v46 = vmul.f32 %v7323_v0, %v8463_v32 }
 0x146   : > { %v8599_v2 = vadd.f32 %v8416_v48, %v942_v15  ;;  %v6586_v15 = vmul.f32 -1.442695, %v8540_v50 }
 0x147   : > { %1378 = vmatmul.mubr.bf16.gmra.mrb[12].mxu1 %v1206_v57  ;;  %v8603_v60 = vadd.f32 %v8416_v48, %v940_v21  ;;  %13438 = vst [vmem:[#allocation13_spill] sm:$0xff] %v8607_v46  ;;  %v1207_v17 = vpack.c.bf16 %v8607_v46, %v8610_v5  ;;  %v7331_v48 = vpop.eup %7330  ;;  %v8880_v5 = vld [vmem:[%s13087_s6] sm:$0xf] }
 0x148   : > { %1387 = vmatprep.mubr.bf16.mxu1 %v13100_v40  ;;  %v7333_v22 = vpop.eup %7332  ;;  %v8618_v36 = vmul.f32 %v7331_v48, %v8478_v54  ;;  %13491 = vst [vmem:[#allocation66_spill] sm:$0xff] %v8880_v5 }
 0x149   : > { %v7335_v32 = vpop.eup %7334  ;;  %v1089_v30 = vadd.f32 1.0, %v7333_v22  ;;  %v6589_v22 = vmul.f32 -1.442695, %v8567_v16 }
 0x14a   : > { %13440 = vst [vmem:[#allocation15_spill] sm:$0xff] %v8618_v36  ;;  %v8621_v31 = vmul.f32 %v7335_v32, %v8475_v53  ;;  %v7337_v34 = vpop.eup %7336 }
 0x14b   : > { %v7339_v55 = vpop.eup %7338  ;;  %7350 = vrcp.f32 %v1089_v30  ;;  %v1091_v54 = vadd.f32 1.0, %v7337_v34 }
 0x14c   : > { %13441 = vst [vmem:[#allocation16_spill] sm:$0xff] %v8621_v31  ;;  %v1208_v44 = vpack.c.bf16 %v8618_v36, %v8621_v31  ;;  %v7341_v47 = vpop.eup %7340  ;;  %v1092_v52 = vadd.f32 1.0, %v7339_v55  ;;  %7352 = vpow2.f32 %v6585_v38 }
 0x14d   : > { %v7343_v51 = vpop.eup %7342  ;;  %v8629_v53 = vmul.f32 %v7341_v47, %v8517_v26  ;;  %7354 = vpow2.f32 %v6586_v15  ;;  %v6591_v47 = vmul.f32 -1.442695, %v8561_v9 }
 0x14e   : > { %v8632_v57 = vmul.f32 %v7343_v51, %v8525_v35  ;;  %7356 = vrcp.f32 %v1091_v54  ;;  %v7345_v21 = vpop.eup %7344  ;;  %v6592_v51 = vmul.f32 -1.442695, %v8571_v20 }
 0x14f   : > { %1388 = vmatmul.mubr.bf16.gmra.mrb[16].mxu1 %v1207_v17  ;;  %13442 = vst [vmem:[#allocation17_spill] sm:$0xff] %v8629_v53  ;;  %7358 = vrcp.f32 %v1092_v52  ;;  %v7347_v0 = vpop.eup %7346  ;;  %v1093_v11 = vadd.f32 1.0, %v7345_v21 }
 0x150   : > { %1397 = vmatprep.mubr.bf16.mxu1 %v13100_v40  ;;  %13443 = vst [vmem:[#allocation18_spill] sm:$0xff] %v8632_v57  ;;  %v1209_v3 = vpack.c.bf16 %v8629_v53, %v8632_v57  ;;  %v7349_v29 = vpop.eup %7348  ;;  %v1094_v12 = vadd.f32 1.0, %v7347_v0  ;;  %7360 = vpow2.f32 %v6587_v33 }
 0x151   : > { %v8640_v35 = vmul.f32 %v7349_v29, %v8554_v56  ;;  %7362 = vpow2.f32 %v6588_v7  ;;  %v6593_v29 = vmul.f32 -1.442695, %v8594_v63 }
 0x152   : > { %7364 = vrcp.f32 %v1093_v11 }
 0x153   : > { %13444 = vst [vmem:[#allocation19_spill] sm:$0xff] %v8640_v35  ;;  %7366 = vrcp.f32 %v1094_v12 }
 0x154   : > { %7368 = vpow2.f32 %v6589_v22 }
 0x155   : > { %v7351_v26 = vpop.eup %7350  ;;  %7370 = vpow2.f32 %v6590_v27 }
 0x156   : > { %v7353_v13 = vpop.eup %7352  ;;  %v8643_v17 = vmul.f32 %v7351_v26, %v8558_v8  ;;  %v6594_v26 = vmul.f32 -1.442695, %v8603_v60 }
 0x157   : > { %1398 = vmatmul.mubr.bf16.gmra.mrb[20].mxu1 %v1208_v44  ;;  %v7355_v48 = vpop.eup %7354  ;;  %v1095_v56 = vadd.f32 1.0, %v7353_v13 }
 0x158   : > { %1407 = vmatprep.mubr.bf16.mxu1 %v13100_v40  ;;  %13445 = vst [vmem:[#allocation20_spill] sm:$0xff] %v8643_v17  ;;  %v7357_v19 = vpop.eup %7356  ;;  %v1210_v24 = vpack.c.bf16 %v8640_v35, %v8643_v17  ;;  %v1096_v30 = vadd.f32 1.0, %v7355_v48 }
 0x159   : > { %v7359_v32 = vpop.eup %7358  ;;  %v8651_v8 = vmul.f32 %v7357_v19, %v8493_v6  ;;  %7372 = vrcp.f32 %v1095_v56  ;;  %v6596_v56 = vmul.f32 -1.442695, %v8599_v2 }
 0x15a   : > { %v8654_v34 = vmul.f32 %v7359_v32, %v8505_v14  ;;  %v7361_v55 = vpop.eup %7360  ;;  %7374 = vrcp.f32 %v1096_v30 }
 0x15b   : > { %13446 = vst [vmem:[#allocation21_spill] sm:$0xff] %v8651_v8  ;;  %v7363_v38 = vpop.eup %7362  ;;  %v1097_v6 = vadd.f32 1.0, %v7361_v55  ;;  %7376 = vpow2.f32 %v6591_v47 }
 0x15c   : > { %13447 = vst [vmem:[#allocation22_spill] sm:$0xff] %v8654_v34  ;;  %v7365_v44 = vpop.eup %7364  ;;  %v1211_v15 = vpack.c.bf16 %v8654_v34, %v8651_v8  ;;  %v1098_v52 = vadd.f32 1.0, %v7363_v38  ;;  %7378 = vpow2.f32 %v6592_v51 }
 0x15d   : > { %v7367_v54 = vpop.eup %7366  ;;  %v8662_v14 = vmul.f32 %v7365_v44, %v8489_v1  ;;  %7380 = vrcp.f32 %v1097_v6 }
 0x15e   : > { %v8665_v21 = vmul.f32 %v7367_v54, %v8500_v10  ;;  %v7369_v0 = vpop.eup %7368  ;;  %7382 = vrcp.f32 %v1098_v52 }
 0x15f   : > { %1408 = vmatmul.mubr.bf16.gmra.mrb[24].mxu1 %v1209_v3  ;;  %13448 = vst [vmem:[#allocation23_spill] sm:$0xff] %v8662_v14  ;;  %v7371_v33 = vpop.eup %7370  ;;  %v1099_v1 = vadd.f32 1.0, %v7369_v0  ;;  %7384 = vpow2.f32 %v6593_v29 }
 0x160   : > { %1417 = vmatprep.mubr.bf16.mxu1 %v13100_v40  ;;  %13449 = vst [vmem:[#allocation24_spill] sm:$0xff] %v8665_v21  ;;  %v1212_v7 = vpack.c.bf16 %v8665_v21, %v8662_v14  ;;  %v1100_v12 = vadd.f32 1.0, %v7371_v33  ;;  %7386 = vpow2.f32 %v6594_v26 }
 0x161   : > { %7388 = vrcp.f32 %v1099_v1 }
 0x162   : > { %7390 = vrcp.f32 %v1100_v12 }
 0x163   : > { %v7373_v3 = vpop.eup %7372 }
 0x164   : > { %v7375_v11 = vpop.eup %7374  ;;  %v8673_v10 = vmul.f32 %v7373_v3, %v8530_v37 }
 0x165   : > { %v8676_v13 = vmul.f32 %v7375_v11, %v8540_v50  ;;  %v7377_v48 = vpop.eup %7376 }
 0x166   : > { %13450 = vst [vmem:[#allocation25_spill] sm:$0xff] %v8673_v10  ;;  %v7379_v19 = vpop.eup %7378  ;;  %v1101_v37 = vadd.f32 1.0, %v7377_v48 }
 0x167   : > { %1418 = vmatmul.mubr.bf16.gmra.mrb[28].mxu1 %v1210_v24  ;;  %13451 = vst [vmem:[#allocation26_spill] sm:$0xff] %v8676_v13  ;;  %v7381_v22 = vpop.eup %7380  ;;  %v6595_v24 = vmul.f32 -1.442695, %v8588_v49  ;;  %v1213_v32 = vpack.c.bf16 %v8676_v13, %v8673_v10  ;;  %v1102_v30 = vadd.f32 1.0, %v7379_v19 }
 0x168   : > { %1427 = vmatprep.mubr.bf16.mxu1 %v13100_v40  ;;  %v7383_v27 = vpop.eup %7382  ;;  %v8684_v50 = vmul.f32 %v7381_v22, %v8521_v58 }
 0x169   : > { %v8687_v55 = vmul.f32 %v7383_v27, %v8534_v41  ;;  %7392 = vpow2.f32 %v6595_v24  ;;  %v7385_v38 = vpop.eup %7384  ;;  %v8732_v27 = vsub.s32 2, %v8401_v42 }
 0x16a   : > { %13452 = vst [vmem:[#allocation27_spill] sm:$0xff] %v8684_v50  ;;  %7394 = vpow2.f32 %v6596_v56  ;;  %v7387_v44 = vpop.eup %7386  ;;  %v1103_v51 = vadd.f32 1.0, %v7385_v38  ;;  %v8735_v56 = vsub.s32 3, %v8401_v42 }
 0x16b   : > { %13453 = vst [vmem:[#allocation28_spill] sm:$0xff] %v8687_v55  ;;  %7396 = vrcp.f32 %v1101_v37  ;;  %v7389_v47 = vpop.eup %7388  ;;  %v1104_v6 = vadd.f32 1.0, %v7387_v44  ;;  %13462 = vst [vmem:[#allocation37_spill] sm:$0xff] %v8732_v27  ;;  %v3583_v62 = vrot.slane %v8880_v5, %v8732_v27 }
 0x16c   : > { %7398 = vrcp.f32 %v1102_v30  ;;  %v7391_v54 = vpop.eup %7390  ;;  %v8693_v58 = vmul.f32 %v7389_v47, %v8567_v16  ;;  %13463 = vst [vmem:[#allocation38_spill] sm:$0xff] %v8735_v56 }
 0x16d   : > { %v8696_v41 = vmul.f32 %v7391_v54, %v8575_v23  ;;  %7400 = vrcp.f32 %v1103_v51 }
 0x16e   : > { %13454 = vst [vmem:[#allocation29_spill] sm:$0xff] %v8693_v58  ;;  %7402 = vrcp.f32 %v1104_v6 }
 0x16f   : > { %1428 = vmatmul.mubr.bf16.gmra.mrb[32].mxu1 %v1211_v15  ;;  %v1214_v15 = vpack.c.bf16 %v8687_v55, %v8684_v50  ;;  %13455 = vst [vmem:[#allocation30_spill] sm:$0xff] %v8696_v41  ;;  %v1215_v3 = vpack.c.bf16 %v8696_v41, %v8693_v58  ;;  %v2525_v50 = vsub.s32 6, %v8401_v42 }
 0x170   : > { %1437 = vmatprep.mubr.bf16.mxu1 %v13100_v40 }
 0x173   : > { %v7393_v52 = vpop.eup %7392 }
 0x174   : > { %v7395_v0 = vpop.eup %7394 }
 0x175   : > { %v7397_v33 = vpop.eup %7396  ;;  %v1106_v11 = vadd.f32 1.0, %v7395_v0 }
 0x176   : > { %v7399_v29 = vpop.eup %7398  ;;  %v8702_v16 = vmul.f32 %v7397_v33, %v8561_v9 }
 0x177   : > { %1438 = vmatmul.mubr.bf16.gmra.mrb[36].mxu1 %v1212_v7  ;;  %v1105_v7 = vadd.f32 1.0, %v7393_v52  ;;  %v8705_v23 = vmul.f32 %v7399_v29, %v8571_v20  ;;  %v7401_v26 = vpop.eup %7400 }
 0x178   : > { %1447 = vmatprep.mubr.bf16.mxu1 %v13100_v40  ;;  %13456 = vst [vmem:[#allocation31_spill] sm:$0xff] %v8702_v16  ;;  %v7403_v12 = vpop.eup %7402  ;;  %v8711_v48 = vmul.f32 %v7401_v26, %v8594_v63 }
 0x179   : > { %13457 = vst [vmem:[#allocation32_spill] sm:$0xff] %v8705_v23  ;;  %7404 = vrcp.f32 %v1105_v7  ;;  %v1216_v1 = vpack.c.bf16 %v8705_v23, %v8702_v16  ;;  %v8714_v19 = vmul.f32 %v7403_v12, %v8603_v60  ;;  %v1508_v60 = vld [vmem:[%s13085_s4] sm:$0xf] }
 0x17a   : > { %7406 = vrcp.f32 %v1106_v11  ;;  %13458 = vst [vmem:[#allocation33_spill] sm:$0xff] %v8711_v48  ;;  %v1595_v37 = vrot.slane %v1508_v60, %v8410_v45  ;;  %v1599_v30 = vrot.slane %v1508_v60, %v8735_v56 }
 0x17b   : > { %13459 = vst [vmem:[#allocation34_spill] sm:$0xff] %v8714_v19  ;;  %v1217_v20 = vpack.c.bf16 %v8714_v19, %v8711_v48 }
 0x17c   : > { %v8748_v47 = vrot.slane %v1595_v37, %v8410_v45  ;;  %v8751_v54 = vrot.slane %v1599_v30, %v8410_v45 }
 0x17e   : > { %13466 = vst [vmem:[#allocation41_spill] sm:$0xff] %v8748_v47  ;;  %13467 = vst [vmem:[#allocation42_spill] sm:$0xff] %v8751_v54 }
 0x17f   : > { %1448 = vmatmul.mubr.bf16.gmra.mrb[40].mxu1 %v1213_v32 }
 0x180   : > { %1457 = vmatprep.mubr.bf16.mxu1 %v13100_v40 }
 0x183   : > { %v7405_v9 = vpop.eup %7404 }
 0x184   : > { %v7407_v22 = vpop.eup %7406  ;;  %v8720_v24 = vmul.f32 %v7405_v9, %v8588_v49  ;;  %v1513_v49 = vrot.slane %v1508_v60, %v8404_v43 }
 0x185   : > { %v8723_v32 = vmul.f32 %v7407_v22, %v8599_v2  ;;  %v1517_v2 = vrot.slane %v1508_v60, %v8732_v27 }
 0x186   : > { %13460 = vst [vmem:[#allocation35_spill] sm:$0xff] %v8720_v24  ;;  %v8742_v38 = vrot.slane %v1513_v49, %v8404_v43 }
 0x187   : > { %1458 = vmatmul.mubr.bf16.gmra.mrb[44].mxu1 %v1214_v15  ;;  %13461 = vst [vmem:[#allocation36_spill] sm:$0xff] %v8723_v32  ;;  %v1218_v63 = vpack.c.bf16 %v8723_v32, %v8720_v24  ;;  %v8745_v44 = vrot.slane %v1517_v2, %v8404_v43 }
 0x188   : > { %1467 = vmatprep.mubr.bf16.mxu1 %v13100_v40  ;;  %13464 = vst [vmem:[#allocation39_spill] sm:$0xff] %v8742_v38 }
 0x189   : > { %13465 = vst [vmem:[#allocation40_spill] sm:$0xff] %v8745_v44 }
 0x18f   : > { %1468 = vmatmul.mubr.bf16.gmra.mrb[48].mxu1 %v1215_v3 }
 0x190   : > { %1477 = vmatprep.mubr.bf16.mxu1 %v13100_v40 }
 0x197   : > { %1478 = vmatmul.mubr.bf16.gmra.mrb[52].mxu1 %v1216_v1 }
 0x198   : > { %1487 = vmatprep.mubr.bf16.mxu1 %v13100_v40 }
 0x19f   : > { %1488 = vmatmul.mubr.bf16.gmra.mrb[56].mxu1 %v1217_v20 }
 0x1a0   : > { %1497 = vmatprep.mubr.bf16.mxu1 %v13100_v40 }
 0x1a7   : > { %1498 = vmatmul.mubr.bf16.gmra.mrb[60].mxu1 %v1218_v63 }
 0x1a8   : > { %5382 = vmatprep.mubr.bf16.mxu1 %v13100_v40 }
 0x202   : > { %v1349_v15 = vpop.f32.mrb[0].mxu1 }
 0x203   : > { %v1528_v51 = vmul.f32 %v8742_v38, %v1349_v15  ;;  %v1351_v6 = vpop.f32.mrb[1].mxu1 }
 0x204   : > { %v1529_v52 = vmul.f32 %v8745_v44, %v1351_v6  ;;  %v1353_v0 = vpop.f32.mrb[2].mxu1 }
 0x205   : > { %v8756_v33 = vadd.f32 %v8748_v47, %v1528_v51  ;;  %v1530_v3 = vmul.f32 %v8742_v38, %v1353_v0  ;;  %v1355_v29 = vpop.f32.mrb[3].mxu1 }
 0x206   : > { %v8760_v7 = vadd.f32 %v8751_v54, %v1529_v52  ;;  %v1531_v11 = vmul.f32 %v8745_v44, %v1355_v29 }
 0x207   : > { %v6613_v26 = vmul.f32 -1.442695, %v8756_v33  ;;  %v8765_v1 = vadd.f32 %v8748_v47, %v1530_v3 }
 0x208   : > { %v6614_v12 = vmul.f32 -1.442695, %v8760_v7  ;;  %v8769_v9 = vadd.f32 %v8751_v54, %v1531_v11 }
 0x209   : > { %7408 = vpow2.f32 %v6613_v26  ;;  %v6615_v20 = vmul.f32 -1.442695, %v8765_v1 }
 0x20a   : > { %7410 = vpow2.f32 %v6614_v12  ;;  %v6616_v22 = vmul.f32 -1.442695, %v8769_v9  ;;  %v1359_v63 = vpop.f32.mrb[4].mxu1 }
 0x20b   : > { %7412 = vpow2.f32 %v6615_v20  ;;  %v1532_v60 = vmul.f32 %v8742_v38, %v1359_v63  ;;  %v1361_v49 = vpop.f32.mrb[5].mxu1 }
 0x20c   : > { %7414 = vpow2.f32 %v6616_v22  ;;  %v1533_v2 = vmul.f32 %v8745_v44, %v1361_v49  ;;  %v1363_v37 = vpop.f32.mrb[6].mxu1  ;;  %v8204_v49 = vmov 0.0  }
 0x20d   : > { %v8776_v30 = vadd.f32 %v8748_v47, %v1532_v60  ;;  %v1534_v15 = vmul.f32 %v8742_v38, %v1363_v37  ;;  %v1365_v51 = vpop.f32.mrb[7].mxu1 }
 0x20e   : > { %v8780_v6 = vadd.f32 %v8751_v54, %v1533_v2  ;;  %v1535_v52 = vmul.f32 %v8745_v44, %v1365_v51  ;;  %v8793_v2 = vsel %vm2124_vm0, 1.0, %v8204_v49 }
 0x20f   : > { %v6617_v0 = vmul.f32 -1.442695, %v8776_v30  ;;  %v8785_v3 = vadd.f32 %v8748_v47, %v1534_v15  ;;  %v8802_v24 = vmul.f32 0.0, %v8793_v2 }
 0x210   : > { %v6618_v29 = vmul.f32 -1.442695, %v8780_v6  ;;  %v8791_v26 = vadd.f32 %v8751_v54, %v1535_v52  ;;  %v2130_v52 = vld [vmem:[%s13086_s5] sm:$0xff] }
 0x211   : > { %7416 = vpow2.f32 %v6617_v0  ;;  %v6619_v11 = vmul.f32 -1.442695, %v8785_v3  ;;  %13468 = vst [vmem:[#allocation43_spill] sm:$0xff] %v8802_v24  ;;  %v8805_v19 = vrot.slane %v2130_v52, %v8404_v43  ;;  %v8816_v48 = vrot.slane %v2130_v52, %v8410_v45 }
 0x212   : > { %7418 = vpow2.f32 %v6618_v29  ;;  %v1369_v12 = vpop.f32.mrb[8].mxu1  ;;  %v2785_v29 = vsub.s32 4, %v8401_v42  ;;  %v8851_v17 = vrot.slane %v2130_v52, %v8732_v27 }
 0x213   : > { %v7409_v20 = vpop.eup %7408  ;;  %v1371_v22 = vpop.f32.mrb[9].mxu1  ;;  %7420 = vpow2.f32 %v6619_v11  ;;  %13469 = vst [vmem:[#allocation44_spill] sm:$0xff] %v8805_v19  ;;  %13471 = vst [vmem:[#allocation46_spill] sm:$0xff] %v8816_v48  ;;  %v1536_v41 = vmul.f32 %v8742_v38, %v1369_v12  ;;  %v8897_v4 = vmul.f32 0.0, %v8816_v48 }
 0x214   : > { %v7411_v63 = vpop.eup %7410  ;;  %v1866_v60 = vadd.f32 1.0, %v7409_v20  ;;  %v1373_v37 = vpop.f32.mrb[10].mxu1  ;;  %v6620_v20 = vmul.f32 -1.442695, %v8791_v26  ;;  %v8818_v23 = vrot.slane %v2130_v52, %v2785_v29  ;;  %v1537_v10 = vmul.f32 %v8745_v44, %v1371_v22  ;;  %13481 = vst [vmem:[#allocation56_spill] sm:$0xff] %v8851_v17 }
 0x215   : > { %v7413_v15 = vpop.eup %7412  ;;  %v1867_v51 = vadd.f32 1.0, %v7411_v63  ;;  %v1375_v0 = vpop.f32.mrb[11].mxu1  ;;  %v2131_v63 = vld [vmem:[%s13086_s5 + $0x8] sm:$0xff]  ;;  %v1538_v12 = vmul.f32 %v8742_v38, %v1373_v37  ;;  %v8867_v37 = vadd.f32 %v8748_v47, %v1536_v41  ;;  %13495 = vst [vmem:[#allocation70_spill] sm:$0xff] %v8897_v4 }
 0x216   : > { %v7415_v40 = vpop.eup %7414  ;;  %7422 = vrcp.f32 %v1866_v60  ;;  %v1868_v32 = vadd.f32 1.0, %v7413_v15  ;;  %v8812_v60 = vsel %vm2127_vm1, 1.0, %v8204_v49  ;;  %v2921_v15 = vsub.s32 7, %v8401_v42 }
 0x217   : > { %7424 = vrcp.f32 %v1867_v51  ;;  %v1869_v11 = vadd.f32 1.0, %v7415_v40  ;;  %13470 = vst [vmem:[#allocation45_spill] sm:$0xff] %v8812_v60  ;;  %v3310_v51 = vsub.s32 5, %v8401_v42  ;;  %v8828_v49 = vrot.slane %v2130_v52, %v8735_v56  ;;  %13487 = vst [vmem:[#allocation62_spill] sm:$0xff] %v8867_v37 }
 0x218   : > { %7426 = vrcp.f32 %v1868_v32  ;;  %v8825_v32 = vmul.f32 %v8805_v19, %v8802_v24  ;;  %v8843_v14 = vrot.slane %v2131_v63, %v2785_v29  ;;  %v8845_v34 = vrot.slane %v2130_v52, %v2921_v15 }
 0x219   : > { %7428 = vrcp.f32 %v1869_v11  ;;  %13473 = vst [vmem:[#allocation48_spill] sm:$0xff] %v8828_v49  ;;  %v8831_v11 = vrot.slane %v2131_v63, %v8410_v45  ;;  %v8853_v53 = vrot.slane %v2130_v52, %v3310_v51  ;;  %v8858_v22 = vrot.slane %v2131_v63, %v2921_v15 }
 0x21a   : > { %7430 = vpow2.f32 %v6620_v20  ;;  %v8821_v40 = vpop.f32.mrb[12].mxu1  ;;  %13472 = vst [vmem:[#allocation47_spill] sm:$0xff] %v8825_v32  ;;  %v8837_v20 = vrot.slane %v2131_v63, %v8404_v43  ;;  %13478 = vst [vmem:[#allocation53_spill] sm:$0xff] %v8843_v14  ;;  %v8861_v29 = vrot.slane %v2131_v63, %v8732_v27  ;;  %v8873_v46 = vrot.slane %v2131_v63, %v3310_v51 }
 0x21b   : > { %v7417_v16 = vpop.eup %7416  ;;  %13474 = vst [vmem:[#allocation49_spill] sm:$0xff] %v8831_v11  ;;  %v8834_v58 = vpop.f32.mrb[13].mxu1  ;;  %13479 = vst [vmem:[#allocation54_spill] sm:$0xff] %v8845_v34  ;;  %v8875_v15 = vrot.slane %v2130_v52, %v2525_v50  ;;  %v8883_v28 = vadd.f32 %v8751_v54, %v1537_v10  ;;  %v8888_v39 = vrot.slane %v2131_v63, %v2525_v50  ;;  %v8900_v10 = vmul.f32 0.0, %v8831_v11 }
 0x21c   : > { %13475 = vst [vmem:[#allocation50_spill] sm:$0xff] %v8834_v58  ;;  %v7419_v55 = vpop.eup %7418  ;;  %13476 = vst [vmem:[#allocation51_spill] sm:$0xff] %v8837_v20  ;;  %v1870_v13 = vadd.f32 1.0, %v7417_v16  ;;  %v8841_v21 = vpop.f32.mrb[14].mxu1  ;;  %v8856_v16 = vrot.slane %v2131_v63, %v8735_v56  ;;  %v8871_v31 = vmul.f32 %v8837_v20, %v8802_v24  ;;  %v8891_v51 = vadd.f32 %v8748_v47, %v1538_v12 }
 0x21d   : > { %13477 = vst [vmem:[#allocation52_spill] sm:$0xff] %v8841_v21  ;;  %v1871_v8 = vadd.f32 1.0, %v7419_v55  ;;  %v8848_v35 = vpop.f32.mrb[15].mxu1  ;;  %13482 = vst [vmem:[#allocation57_spill] sm:$0xff] %v8853_v53  ;;  %v7421_v57 = vpop.eup %7420  ;;  %v8864_v55 = vmul.f32 0.0, %v8812_v60  ;;  %v1539_v18 = vmul.f32 %v8745_v44, %v1375_v0  ;;  %v3661_v0 = vrot.slane %v8880_v5, %v8410_v45 }
 0x21e   : > { %13480 = vst [vmem:[#allocation55_spill] sm:$0xff] %v8848_v35  ;;  %13483 = vst [vmem:[#allocation58_spill] sm:$0xff] %v8856_v16  ;;  %7432 = vrcp.f32 %v1870_v13  ;;  %v6621_v63 = vmul.f32 -1.442695, %v8867_v37  ;;  %v6622_v61 = vmul.f32 -1.442695, %v8883_v28 }
 0x21f   : > { %13484 = vst [vmem:[#allocation59_spill] sm:$0xff] %v8858_v22  ;;  %13485 = vst [vmem:[#allocation60_spill] sm:$0xff] %v8861_v29  ;;  %7434 = vrcp.f32 %v1871_v8  ;;  %v6623_v37 = vmul.f32 -1.442695, %v8891_v51 }
 0x220   : > { %13486 = vst [vmem:[#allocation61_spill] sm:$0xff] %v8864_v55  ;;  %v7423_v36 = vpop.eup %7422  ;;  %13488 = vst [vmem:[#allocation63_spill] sm:$0xff] %v8871_v31  ;;  %7436 = vpow2.f32 %v6621_v63 }
 0x221   : > { %13489 = vst [vmem:[#allocation64_spill] sm:$0xff] %v8873_v46  ;;  %13490 = vst [vmem:[#allocation65_spill] sm:$0xff] %v8875_v15  ;;  %v7425_v13 = vpop.eup %7424  ;;  %v8886_v41 = vmul.f32 %v7423_v36, %v8756_v33  ;;  %v8908_v33 = vmul.f32 %v8851_v17, %v8864_v55  ;;  %7438 = vpow2.f32 %v6622_v61 }
 0x222   : > { %13492 = vst [vmem:[#allocation67_spill] sm:$0xff] %v8883_v28  ;;  %13493 = vst [vmem:[#allocation68_spill] sm:$0xff] %v8888_v39  ;;  %v7427_v52 = vpop.eup %7426  ;;  %v8894_v59 = vmul.f32 %v7425_v13, %v8760_v7  ;;  %v8903_v36 = vpop.f32.mrb[16].mxu1  ;;  %v3579_v7 = vrot.slane %v8880_v5, %v8404_v43  ;;  %v1872_v28 = vadd.f32 1.0, %v7421_v57  ;;  %7440 = vpow2.f32 %v6623_v37 }
 0x223   : > { %13494 = vst [vmem:[#allocation69_spill] sm:$0xff] %v8891_v51  ;;  %13496 = vst [vmem:[#allocation71_spill] sm:$0xff] %v8900_v10  ;;  %v7429_v50 = vpop.eup %7428  ;;  %v2134_v8 = vrot.slane %v8886_v41, 7  ;;  %v8913_v12 = vpop.f32.mrb[17].mxu1  ;;  %v8925_v24 = vmul.f32 %v7427_v52, %v8765_v1 }
 0x224   : > { %13497 = vst [vmem:[#allocation72_spill] sm:$0xff] %v8903_v36  ;;  %13498 = vst [vmem:[#allocation73_spill] sm:$0xff] %v8908_v33  ;;  %v7431_v13 = vpop.eup %7430  ;;  %v2135_v25 = vrot.slane %v8894_v59, 7  ;;  %v8921_v42 = vpop.f32.mrb[18].mxu1  ;;  %v8936_v27 = vmul.f32 %v7429_v50, %v8769_v9  ;;  %v8943_v52 = vrot.slane %v3579_v7, %v8404_v43  ;;  %v3050_v7 = vrot.slane %v8894_v59, 1 }
 0x225   : > { %13499 = vst [vmem:[#allocation74_spill] sm:$0xff] %v8913_v12  ;;  %13500 = vst [vmem:[#allocation75_spill] sm:$0xff] %v8921_v42  ;;  %v2199_v36 = vmul.f32 %v8793_v2, %v2134_v8  ;;  %v8929_v12 = vmul.f32 %v8861_v29, %v8864_v55  ;;  %v8932_v35 = vpop.f32.mrb[19].mxu1  ;;  %v8939_v42 = vadd.f32 %v8751_v54, %v1539_v18  ;;  %v1873_v8 = vadd.f32 1.0, %v7431_v13 }
 0x226   : > { %13502 = vst [vmem:[#allocation77_spill] sm:$0xff] %v8932_v35  ;;  %v2200_v21 = vmul.f32 %v8793_v2, %v2135_v25  ;;  %13504 = vst [vmem:[#allocation79_spill] sm:$0xff] %v8943_v52  ;;  %v3049_v55 = vrot.slane %v8886_v41, 1  ;;  %v8947_v35 = vrot.slane %v3661_v0, %v8410_v45  ;;  %v8950_v25 = vrot.slane %v3583_v62, %v8404_v43 }
 0x227   : > { %13501 = vst [vmem:[#allocation76_spill] sm:$0xff] %v8929_v12  ;;  %13503 = vst [vmem:[#allocation78_spill] sm:$0xff] %v8939_v42  ;;  %v2395_v1 = vmul.f32 %v8828_v49, %v2199_v36  ;;  %v2136_v9 = vrot.slane %v8925_v24, 7  ;;  %v2137_v63 = vrot.slane %v8936_v27, 7  ;;  %7442 = vrcp.f32 %v1872_v28 }
 0x228   : > { %13505 = vst [vmem:[#allocation80_spill] sm:$0xff] %v8947_v35  ;;  %13506 = vst [vmem:[#allocation81_spill] sm:$0xff] %v8950_v25  ;;  %v7433_v57 = vpop.eup %7432  ;;  %v2396_v18 = vmul.f32 %v8856_v16, %v2200_v21  ;;  %v8959_v13 = vmul.f32 -1.442695, %v8939_v42  ;;  %7444 = vrcp.f32 %v1873_v8  ;;  %v8967_v50 = vmul.f32 %v8742_v38, %v8821_v40 }
 0x229   : > { %v7435_v61 = vpop.eup %7434  ;;  %v2459_v0 = vadd.f32 %v2395_v1, %v8825_v32  ;;  %v2201_v43 = vmul.f32 %v8793_v2, %v2136_v9  ;;  %v2663_v28 = vmul.f32 %v8816_v48, %v8886_v41  ;;  %v3114_v42 = vmul.f32 %v8812_v60, %v3049_v55 }
 0x22a   : > { %v8961_v62 = vpop.f32.mrb[20].mxu1  ;;  %v2202_v51 = vmul.f32 %v8793_v2, %v2137_v63  ;;  %v2273_v8 = vmul.f32 %v8805_v19, %v2199_v36  ;;  %v2460_v9 = vadd.f32 %v2396_v18, %v8871_v31  ;;  %v2274_v54 = vmul.f32 %v8837_v20, %v2200_v21  ;;  %v9002_v25 = vpop.eup %7436 }
 0x22b   : > { %13507 = vst [vmem:[#allocation82_spill] sm:$0xff] %v8961_v62  ;;  %v8969_v37 = vpop.f32.mrb[21].mxu1  ;;  %v8976_v62 = vmul.f32 %v7433_v57, %v8776_v30  ;;  %v2397_v40 = vmul.f32 %v8828_v49, %v2201_v43  ;;  %v2531_v32 = vmul.f32 %v8875_v15, %v2201_v43  ;;  %v8988_v55 = vmul.f32 %v8812_v60, %v3050_v7 }
 0x22c   : > { %13508 = vst [vmem:[#allocation83_spill] sm:$0xff] %v8969_v37  ;;  %v8978_v1 = vpop.f32.mrb[22].mxu1  ;;  %v2398_v30 = vmul.f32 %v8856_v16, %v2202_v51  ;;  %v8992_v57 = vmul.f32 %v7435_v61, %v8780_v6  ;;  %v2791_v36 = vmul.f32 %v8818_v23, %v8886_v41  ;;  %v2532_v31 = vmul.f32 %v8888_v39, %v2202_v51 }
 0x22d   : > { %13509 = vst [vmem:[#allocation84_spill] sm:$0xff] %v8978_v1  ;;  %v8984_v37 = vpop.f32.mrb[23].mxu1  ;;  %v2461_v18 = vadd.f32 %v2397_v40, %v2273_v8  ;;  %v2589_v63 = vadd.f32 %v2531_v32, %v2459_v0  ;;  %v2792_v21 = vmul.f32 %v8843_v14, %v8894_v59  ;;  %v2138_v1 = vrot.slane %v8976_v62, 7  ;;  %v9007_v0 = vpop.eup %7438 }
 0x22e   : > { %13510 = vst [vmem:[#allocation85_spill] sm:$0xff] %v8984_v37  ;;  %v2664_v37 = vmul.f32 %v8831_v11, %v8894_v59  ;;  %v2462_v7 = vadd.f32 %v2398_v30, %v2274_v54  ;;  %v3188_v6 = vmul.f32 %v8851_v17, %v3114_v42  ;;  %v3051_v41 = vrot.slane %v8925_v24, 1  ;;  %v9014_v30 = vpop.eup %7440 }
 0x22f   : > { %v2719_v61 = vadd.f32 %v8897_v4, %v2589_v63  ;;  %v2590_v32 = vadd.f32 %v2532_v31, %v2460_v9  ;;  %v3316_v8 = vmul.f32 %v8853_v53, %v3114_v42  ;;  %v3317_v40 = vmul.f32 %v8873_v46, %v8988_v55  ;;  %13511 = vst [vmem:[#allocation86_spill] sm:$0xff] %v9014_v30 }
 0x230   : > { %v2203_v59 = vmul.f32 %v8793_v2, %v2138_v1  ;;  %v2139_v54 = vrot.slane %v8992_v57, 7  ;;  %v2927_v63 = vmul.f32 %v8845_v34, %v8925_v24  ;;  %v3052_v31 = vrot.slane %v8936_v27, 1 }
 0x231   : > { %v2855_v38 = vadd.f32 %v2791_v36, %v2719_v61  ;;  %v2720_v4 = vadd.f32 %v8900_v10, %v2590_v32  ;;  %v7443_v9 = vpop.eup %7442  ;;  %v2275_v42 = vmul.f32 %v8805_v19, %v2201_v43  ;;  %v2928_v44 = vmul.f32 %v8858_v22, %v8936_v27  ;;  %v9036_v43 = vld [vmem:[%s13086_s5 + $0x10] ss:$0 sm:$0xff] }
 0x232   : > { %v2399_v1 = vmul.f32 %v8828_v49, %v2203_v59  ;;  %v2533_v58 = vmul.f32 %v8875_v15, %v2203_v59  ;;  %v7445_v56 = vpop.eup %7444  ;;  %v9026_v36 = vmul.f32 %v8812_v60, %v3051_v41  ;;  %v9029_v32 = vmul.f32 %v8793_v2, %v2139_v54  ;;  %v9031_v10 = vpop.f32.mrb[24].mxu1 }
 0x233   : > { %v2985_v30 = vadd.f32 %v2927_v63, %v2855_v38  ;;  %v2856_v61 = vadd.f32 %v2792_v21, %v2720_v4  ;;  %13512 = vst [vmem:[#allocation87_spill] sm:$0xff] %v9031_v10  ;;  %v2793_v5 = vmul.f32 %v8818_v23, %v8925_v24  ;;  %v2276_v45 = vmul.f32 %v8837_v20, %v2202_v51  ;;  %v9050_v10 = vld [vmem:[%s13086_s5 + $0x18] ss:$0 sm:$0xff] }
 0x234   : > { %v2463_v38 = vadd.f32 %v2399_v1, %v2275_v42  ;;  %v2591_v63 = vadd.f32 %v2533_v58, %v2461_v18  ;;  %v9043_v21 = vmul.f32 %v8812_v60, %v3052_v31  ;;  %v2400_v54 = vmul.f32 %v8856_v16, %v9029_v32 }
 0x235   : > { %v3244_v41 = vadd.f32 %v8908_v33, %v2985_v30  ;;  %v2986_v4 = vadd.f32 %v2928_v44, %v2856_v61  ;;  %v3053_v35 = vrot.slane %v8976_v62, 1  ;;  %v2534_v58 = vmul.f32 %v8888_v39, %v9029_v32 }
 0x236   : > { %v2721_v17 = vadd.f32 %v2663_v28, %v2591_v63  ;;  %v9056_v51 = vmul.f32 %v7443_v9, %v8785_v3  ;;  %v3452_v18 = vmul.f32 %v9036_v43, %v9026_v36  ;;  %v2464_v31 = vadd.f32 %v2400_v54, %v2276_v45  ;;  %v9067_v9 = vpop.f32.mrb[25].mxu1 }
 0x237   : > { %v3380_v44 = vadd.f32 %v3316_v8, %v3244_v41  ;;  %v3245_v30 = vadd.f32 %v8929_v12, %v2986_v4  ;;  %v2929_v1 = vmul.f32 %v8845_v34, %v8976_v62  ;;  %v2592_v28 = vadd.f32 %v2534_v58, %v2462_v7  ;;  %13513 = vst [vmem:[#allocation88_spill] sm:$0xff] %v9067_v9  ;;  %v13529_v12 = vld [vmem:[#allocation55_spill] sm:$0xff] }
 0x238   : > { %v2857_v42 = vadd.f32 %v2793_v5, %v2721_v17  ;;  %v2140_v61 = vrot.slane %v9056_v51, 7  ;;  %v3453_v3 = vmul.f32 %v9050_v10, %v9043_v21  ;;  %v3054_v8 = vrot.slane %v8992_v57, 1 }
 0x239   : > { %v3510_v63 = vadd.f32 %v3452_v18, %v3380_v44  ;;  %v3381_v33 = vadd.f32 %v3317_v40, %v3245_v30  ;;  %v2794_v41 = vmul.f32 %v8843_v14, %v8936_v27  ;;  %v9072_v5 = vmul.f32 %v8812_v60, %v3053_v35 }
 0x23a   : > { %v2987_v45 = vadd.f32 %v2929_v1, %v2857_v42  ;;  %v2722_v17 = vadd.f32 %v2664_v37, %v2592_v28  ;;  %v3318_v7 = vmul.f32 %v8853_v53, %v9026_v36  ;;  %v9079_v40 = vmul.f32 %v8793_v2, %v2140_v61  ;;  %v9108_v61 = vpop.f32.mrb[26].mxu1 }
 0x23b   : > { %v9076_v4 = vadd.f32 %v3453_v3, %v3381_v33  ;;  %v9083_v54 = vadd.f32 %v8748_v47, %v8967_v50  ;;  %v2930_v18 = vmul.f32 %v8858_v22, %v8992_v57  ;;  %v9088_v35 = vmul.f32 %v7445_v56, %v8791_v26  ;;  %13514 = vst [vmem:[#allocation89_spill] sm:$0xff] %v9108_v61 }
 0x23c   : > { %v3246_v58 = vadd.f32 %v3188_v6, %v2987_v45  ;;  %v2858_v44 = vadd.f32 %v2794_v41, %v2722_v17  ;;  %v3189_v37 = vmul.f32 %v8861_v29, %v8988_v55  ;;  %v2277_v33 = vmul.f32 %v8805_v19, %v2203_v59 }
 0x23d   : > { %v9094_v30 = vmul.f32 %v8812_v60, %v3054_v8  ;;  %v2401_v50 = vmul.f32 %v8828_v49, %v9079_v40  ;;  %v3454_v6 = vmul.f32 %v9036_v43, %v9072_v5  ;;  %v2535_v56 = vmul.f32 %v8875_v15, %v9079_v40 }
 0x23e   : > { %v3382_v42 = vadd.f32 %v3318_v7, %v3246_v58  ;;  %v2988_v1 = vadd.f32 %v2930_v18, %v2858_v44  ;;  %v2665_v26 = vmul.f32 %v8816_v48, %v8925_v24  ;;  %v2141_v59 = vrot.slane %v9088_v35, 7 }
 0x23f   : > { %v9104_v55 = vadd.f32 %v2401_v50, %v2277_v33  ;;  %v6625_v28 = vmul.f32 -1.442695, %v9083_v54  ;;  %v3319_v3 = vmul.f32 %v8873_v46, %v9043_v21  ;;  %v2593_v45 = vadd.f32 %v2535_v56, %v2463_v38 }
 0x240   : > { %v3512_v8 = vadd.f32 %v3454_v6, %v3382_v42  ;;  %v3247_v41 = vadd.f32 %v3189_v37, %v2988_v1  ;;  %v2795_v17 = vmul.f32 %v8818_v23, %v8976_v62  ;;  %v3455_v24 = vmul.f32 %v9050_v10, %v9094_v30 }
 0x241   : > { %v9117_v7 = vmul.f32 %v8793_v2, %v2141_v59  ;;  %7446 = vpow2.f32 %v8959_v13  ;;  %v3594_v58 = vmul.f32 %v8943_v52, %v3510_v63  ;;  %v2723_v18 = vadd.f32 %v2665_v26, %v2593_v45  ;;  %v13515_v59 = vld [vmem:[#allocation80_spill] sm:$0xff] }
 0x242   : > { %v3383_v44 = vadd.f32 %v3319_v3, %v3247_v41  ;;  %v3055_v33 = vrot.slane %v9056_v51, 1  ;;  %v2278_v38 = vmul.f32 %v8837_v20, %v9029_v32  ;;  %v1874_v42 = vadd.f32 1.0, %v9002_v25  ;;  %v13517_v45 = vld [vmem:[#allocation56_spill] sm:$0xff] }
 0x243   : > { %v2402_v37 = vmul.f32 %v8856_v16, %v9117_v7  ;;  %v2536_v50 = vmul.f32 %v8888_v39, %v9117_v7  ;;  %v2859_v1 = vadd.f32 %v2795_v17, %v2723_v18  ;;  %v2931_v13 = vmul.f32 %v8845_v34, %v9056_v51 }
 0x244   : > { %v3513_v6 = vadd.f32 %v3455_v24, %v3383_v44  ;;  %7448 = vpow2.f32 %v6625_v28  ;;  %v2666_v63 = vmul.f32 %v8831_v11, %v8936_v27  ;;  %v1875_v26 = vadd.f32 1.0, %v9007_v0  ;;  %v13519_v44 = vld [vmem:[#allocation66_spill] sm:$0xff] }
 0x245   : > { %v9133_v56 = vadd.f32 %v2402_v37, %v2278_v38  ;;  %v2594_v32 = vadd.f32 %v2536_v50, %v2464_v31  ;;  %v9137_v3 = vadd.f32 %v13515_v59, %v3594_v58  ;;  %v2989_v41 = vadd.f32 %v2931_v13, %v2859_v1  ;;  %v13518_v31 = vld [vmem:[#allocation4_spill] sm:$0xff]  ;;  %v13520_v0 = vld [vmem:[#allocation38_spill] sm:$0xff] }
 0x246   : > { %v9140_v25 = vmul.f32 %v8812_v60, %v3055_v33  ;;  %v3190_v17 = vmul.f32 %v13517_v45, %v9026_v36  ;;  %v2796_v28 = vmul.f32 %v8843_v14, %v8992_v57  ;;  %v3056_v27 = vrot.slane %v9088_v35, 1  ;;  %v13523_v50 = vld [vmem:[#allocation50_spill] sm:$0xff]  ;;  %v13524_v1 = vld [vmem:[#allocation40_spill] sm:$0xff] }
 0x247   : > { %13516 = vst [vmem:[#allocation90_spill] sm:$0xff] %v9137_v3  ;;  %v2724_v24 = vadd.f32 %v2666_v63, %v2594_v32  ;;  %7450 = vrcp.f32 %v1874_v42  ;;  %v13521_v18 = vrot.slane %v13519_v44, %v13520_v0  ;;  %v3320_v33 = vmul.f32 %v8853_v53, %v9072_v5  ;;  %v13525_v44 = vld [vmem:[#allocation52_spill] sm:$0xff] }
 0x248   : > { %v3248_v38 = vadd.f32 %v3190_v17, %v2989_v41  ;;  %v2932_v36 = vmul.f32 %v8858_v22, %v9088_v35  ;;  %7452 = vrcp.f32 %v1875_v26  ;;  %v1541_v13 = vmul.f32 %v13524_v1, %v13523_v50  ;;  %v13527_v41 = vld [vmem:[#allocation81_spill] sm:$0xff] }
 0x249   : > { %v9151_v58 = vrot.slane %v13521_v18, %v13518_v31  ;;  %v2860_v37 = vadd.f32 %v2796_v28, %v2724_v24  ;;  %v6681_v42 = vmul.f32 -1.442695, %v9137_v3  ;;  %v3456_v32 = vmul.f32 %v9036_v43, %v9140_v25  ;;  %v13526_v18 = vld [vmem:[#allocation39_spill] sm:$0xff] }
 0x24a   : > { %v3384_v63 = vadd.f32 %v3320_v33, %v3248_v38  ;;  %v1542_v0 = vmul.f32 %v13526_v18, %v13525_v44  ;;  %v3595_v17 = vmul.f32 %v13527_v41, %v9076_v4  ;;  %v9167_v24 = vmul.f32 %v8812_v60, %v3056_v27  ;;  %v13528_v33 = vld [vmem:[#allocation86_spill] sm:$0xff] }
 0x24b   : > { %13522 = vst [vmem:[#allocation66_spill] sm:$0xff] %v9151_v58  ;;  %v7447_v31 = vpop.eup %7446  ;;  %v2990_v28 = vadd.f32 %v2932_v36, %v2860_v37  ;;  %v3191_v26 = vmul.f32 %v8861_v29, %v9043_v21  ;;  %v1876_v38 = vadd.f32 1.0, %v13528_v33  ;;  %v1543_v61 = vmul.f32 %v13524_v1, %v13529_v12  ;;  %v13530_v36 = vld [vmem:[#allocation42_spill] sm:$0xff] }
 0x24c   : > { %v9171_v50 = vadd.f32 %v3456_v32, %v3384_v63  ;;  %v3596_v44 = vmul.f32 %v8943_v52, %v3512_v8  ;;  %v3321_v9 = vmul.f32 %v8873_v46, %v9094_v30  ;;  %7454 = vpow2.f32 %v6681_v42  ;;  %v9190_v8 = vpop.f32.mrb[27].mxu1 }
 0x24d   : > { %v3249_v4 = vadd.f32 %v3191_v26, %v2990_v28  ;;  %v1877_v27 = vadd.f32 1.0, %v7447_v31  ;;  %v9180_v3 = vadd.f32 %v13530_v36, %v1541_v13  ;;  %v9183_v21 = vadd.f32 %v9151_v58, %v3595_v17  ;;  %13534 = vst [vmem:[#allocation55_spill] sm:$0xff] %v9190_v8 }
 0x24e   : > { %v7449_v37 = vpop.eup %7448  ;;  %v3457_v32 = vmul.f32 %v9050_v10, %v9167_v24  ;;  %v9188_v12 = vadd.f32 %v8748_v47, %v1542_v0  ;;  %7456 = vrcp.f32 %v1876_v38  ;;  %v9193_v28 = vadd.f32 %v13530_v36, %v1543_v61  ;;  %v13538_v0 = vld [vmem:[#allocation43_spill] sm:$0xff] }
 0x24f   : > { %13531 = vst [vmem:[#allocation50_spill] sm:$0xff] %v9180_v3  ;;  %13532 = vst [vmem:[#allocation52_spill] sm:$0xff] %v9183_v21  ;;  %v3385_v63 = vadd.f32 %v3321_v9, %v3249_v4  ;;  %v9196_v13 = vadd.f32 %v13515_v59, %v3596_v44  ;;  %v3597_v42 = vmul.f32 %v13527_v41, %v3513_v6  ;;  %v13537_v9 = vld [vmem:[#allocation62_spill] sm:$0xff]  ;;  %7458 = vrcp.f32 %v1877_v27 }
 0x250   : > { %13533 = vst [vmem:[#allocation86_spill] sm:$0xff] %v9188_v12  ;;  %13535 = vst [vmem:[#allocation91_spill] sm:$0xff] %v9193_v28  ;;  %v9206_v33 = vmul.f32 %v8875_v15, %v13538_v0  ;;  %v6682_v61 = vmul.f32 -1.442695, %v9183_v21  ;;  %v9210_v4 = vmul.f32 -1.442695, %v9180_v3  ;;  %v9217_v6 = vmul.f32 %v8888_v39, %v13538_v0 }
 0x251   : > { %v7451_v31 = vpop.eup %7450  ;;  %13536 = vst [vmem:[#allocation92_spill] sm:$0xff] %v9196_v13  ;;  %v9199_v17 = vadd.f32 %v3457_v32, %v3385_v63  ;;  %v9213_v44 = vmul.f32 -1.442695, %v9188_v12  ;;  %v2667_v27 = vmul.f32 %v8816_v48, %v8976_v62  ;;  %v1878_v32 = vadd.f32 1.0, %v7449_v37 }
 0x252   : > { %v9202_v26 = vmul.f32 %v7451_v31, %v13537_v9  ;;  %13539 = vst [vmem:[#allocation62_spill] sm:$0xff] %v9206_v33  ;;  %v7453_v38 = vpop.eup %7452  ;;  %13540 = vst [vmem:[#allocation43_spill] sm:$0xff] %v9217_v6  ;;  %v9223_v31 = vmul.f32 -1.442695, %v9193_v28  ;;  %v6683_v9 = vmul.f32 -1.442695, %v9196_v13  ;;  %v2668_v21 = vmul.f32 %v8831_v11, %v8992_v57 }
 0x253   : > { %v9229_v8 = vadd.f32 %v9151_v58, %v3597_v42  ;;  %v9233_v0 = vmul.f32 %v8816_v48, %v9056_v51  ;;  %v2279_v62 = vmul.f32 %v8805_v19, %v9079_v40  ;;  %v2797_v37 = vmul.f32 %v8818_v23, %v9056_v51  ;;  %v13542_v33 = vld [vmem:[#allocation67_spill] sm:$0xff] }
 0x254   : > { %v2142_v63 = vrot.slane %v9202_v26, 7  ;;  %v9241_v13 = vmul.f32 %v7453_v38, %v13542_v33  ;;  %7460 = vpow2.f32 %v6682_v61  ;;  %v3322_v57 = vmul.f32 %v8853_v53, %v9140_v25  ;;  %v9263_v53 = vpop.f32.mrb[28].mxu1 }
 0x255   : > { %13541 = vst [vmem:[#allocation93_spill] sm:$0xff] %v9229_v8  ;;  %v2280_v42 = vmul.f32 %v8837_v20, %v9117_v7  ;;  %v9249_v28 = vmul.f32 %v8831_v11, %v9088_v35  ;;  %7462 = vrcp.f32 %v1878_v32  ;;  %v6684_v33 = vmul.f32 -1.442695, %v9229_v8  ;;  %13543 = vst [vmem:[#allocation67_spill] sm:$0xff] %v9263_v53 }
 0x256   : > { %v2207_v6 = vmul.f32 %v8793_v2, %v2142_v63  ;;  %v7455_v40 = vpop.eup %7454  ;;  %v2143_v63 = vrot.slane %v9241_v13, 7  ;;  %7464 = vpow2.f32 %v6683_v9  ;;  %v2798_v38 = vmul.f32 %v8843_v14, %v9088_v35 }
 0x257   : > { %v3192_v7 = vmul.f32 %v13517_v45, %v9072_v5  ;;  %v3193_v48 = vmul.f32 %v8861_v29, %v9094_v30  ;;  %v9265_v32 = vadd.f32 1.0, %v7455_v40  ;;  %v3323_v9 = vmul.f32 %v8873_v46, %v9167_v24 }
 0x258   : > { %v2403_v12 = vmul.f32 %v8828_v49, %v2207_v6  ;;  %v2537_v51 = vmul.f32 %v8875_v15, %v2207_v6  ;;  %v7457_v61 = vpop.eup %7456  ;;  %v2208_v58 = vmul.f32 %v8793_v2, %v2143_v63  ;;  %v9271_v35 = vmul.f32 %v13517_v45, %v9140_v25  ;;  %v13547_v63 = vld [vmem:[#allocation69_spill] sm:$0xff]  ;;  %v13548_v25 = vld [vmem:[#allocation72_spill] sm:$0xff] }
 0x259   : > { %13544 = vst [vmem:[#allocation94_spill] sm:$0xff] %v9265_v32  ;;  %v9275_v5 = vmul.f32 %v8861_v29, %v9167_v24  ;;  %7466 = vpow2.f32 %v6684_v33  ;;  %v9283_v8 = vmul.f32 %v7457_v61, %v13547_v63  ;;  %v1544_v53 = vmul.f32 %v13526_v18, %v13548_v25  ;;  %v13549_v32 = vld [vmem:[#allocation74_spill] sm:$0xff] }
 0x25a   : > { %v2467_v3 = vadd.f32 %v2403_v12, %v2279_v62  ;;  %v2595_v11 = vadd.f32 %v2537_v51, %v9104_v55  ;;  %v7459_v55 = vpop.eup %7458  ;;  %v3057_v62 = vrot.slane %v9202_v26, 1  ;;  %v2404_v30 = vmul.f32 %v8856_v16, %v2208_v58  ;;  %v9280_v51 = vpop.f32.mrb[29].mxu1  ;;  %v13550_v61 = vld [vmem:[#allocation78_spill] sm:$0xff] }
 0x25b   : > { %13545 = vst [vmem:[#allocation95_spill] sm:$0xff] %v9275_v5  ;;  %v2538_v40 = vmul.f32 %v8888_v39, %v2208_v58  ;;  %13546 = vst [vmem:[#allocation96_spill] sm:$0xff] %v9280_v51  ;;  %v1545_v24 = vmul.f32 %v13524_v1, %v13549_v32  ;;  %v3598_v51 = vmul.f32 %v8943_v52, %v9171_v50  ;;  %v2144_v33 = vrot.slane %v9283_v8, 7  ;;  %v13551_v5 = vld [vmem:[#allocation75_spill] sm:$0xff]  ;;  %v9300_v46 = vpop.f32.mrb[30].mxu1 }
 0x25c   : > { %v2725_v12 = vadd.f32 %v2667_v27, %v2595_v11  ;;  %v2933_v11 = vmul.f32 %v8845_v34, %v9202_v26  ;;  %v2468_v27 = vadd.f32 %v2404_v30, %v2280_v42  ;;  %v9296_v63 = vmul.f32 %v7459_v55, %v13550_v61  ;;  %13552 = vst [vmem:[#allocation69_spill] sm:$0xff] %v9300_v46 }
 0x25d   : > { %v2596_v45 = vadd.f32 %v2538_v40, %v9133_v56  ;;  %v1546_v25 = vmul.f32 %v13526_v18, %v13551_v5  ;;  %v9303_v32 = vmul.f32 %v8812_v60, %v3057_v62  ;;  %v3058_v56 = vrot.slane %v9241_v13, 1 }
 0x25e   : > { %v2861_v29 = vadd.f32 %v2797_v37, %v2725_v12  ;;  %v9306_v12 = vpop.eup %7460  ;;  %v9309_v50 = vmul.f32 %v8793_v2, %v2144_v33  ;;  %7468 = vpow2.f32 %v9210_v4  ;;  %v9313_v55 = vadd.f32 %v8748_v47, %v1544_v53 }
 0x25f   : > { %v2726_v42 = vadd.f32 %v2668_v21, %v2596_v45  ;;  %13553 = vst [vmem:[#allocation72_spill] sm:$0xff] %v9306_v12  ;;  %v9316_v5 = vadd.f32 %v13530_v36, %v1545_v24  ;;  %v2934_v45 = vmul.f32 %v8858_v22, %v9241_v13  ;;  %7470 = vpow2.f32 %v9213_v44 }
 0x260   : > { %v2991_v37 = vadd.f32 %v2933_v11, %v2861_v29  ;;  %13554 = vst [vmem:[#allocation74_spill] sm:$0xff] %v9313_v55  ;;  %v7463_v29 = vpop.eup %7462  ;;  %v2281_v40 = vmul.f32 %v8805_v19, %v2207_v6  ;;  %v2405_v4 = vmul.f32 %v8828_v49, %v9309_v50  ;;  %v2539_v53 = vmul.f32 %v8875_v15, %v9309_v50 }
 0x261   : > { %13555 = vst [vmem:[#allocation78_spill] sm:$0xff] %v9316_v5  ;;  %v2862_v62 = vadd.f32 %v2798_v38, %v2726_v42  ;;  %v9321_v21 = vpop.eup %7464  ;;  %v2145_v24 = vrot.slane %v9296_v63, 7  ;;  %v3458_v38 = vmul.f32 %v9036_v43, %v9303_v32  ;;  %v9332_v33 = vmul.f32 %v8812_v60, %v3058_v56 }
 0x262   : > { %v3250_v30 = vadd.f32 %v3192_v7, %v2991_v37  ;;  %v2469_v44 = vadd.f32 %v2405_v4, %v2281_v40  ;;  %v2597_v61 = vadd.f32 %v2539_v53, %v2467_v3  ;;  %v9335_v6 = vmul.f32 %v7463_v29, %v9083_v54 }
 0x263   : > { %v2992_v7 = vadd.f32 %v2934_v45, %v2862_v62  ;;  %v9338_v37 = vadd.f32 %v8748_v47, %v1546_v25  ;;  %v9341_v42 = vadd.f32 %v13515_v59, %v3598_v51  ;;  %v9346_v62 = vpop.eup %7466  ;;  %v2799_v56 = vmul.f32 %v8818_v23, %v9202_v26  ;;  %v13566_v47 = vld [vmem:[#allocation95_spill] sm:$0xff] }
 0x264   : > { %v3386_v11 = vadd.f32 %v3322_v57, %v3250_v30  ;;  %v9344_v30 = vmul.f32 %v8793_v2, %v2145_v24  ;;  %13558 = vst [vmem:[#allocation98_spill] sm:$0xff] %v9346_v62  ;;  %v2282_v3 = vmul.f32 %v8837_v20, %v2208_v58  ;;  %v2727_v54 = vadd.f32 %v9233_v0, %v2597_v61 }
 0x265   : > { %13556 = vst [vmem:[#allocation75_spill] sm:$0xff] %v9338_v37  ;;  %13557 = vst [vmem:[#allocation97_spill] sm:$0xff] %v9341_v42  ;;  %v3251_v57 = vadd.f32 %v3193_v48, %v2992_v7  ;;  %v3059_v25 = vrot.slane %v9283_v8, 1  ;;  %v3459_v51 = vmul.f32 %v9050_v10, %v9332_v33  ;;  %v2935_v4 = vmul.f32 %v8845_v34, %v9283_v8 }
 0x266   : > { %v3516_v46 = vadd.f32 %v3458_v38, %v3386_v11  ;;  %v2406_v48 = vmul.f32 %v8856_v16, %v9344_v30  ;;  %v2540_v45 = vmul.f32 %v8888_v39, %v9344_v30  ;;  %v2863_v40 = vadd.f32 %v2799_v56, %v2727_v54 }
 0x267   : > { %v3387_v29 = vadd.f32 %v3323_v9, %v3251_v57  ;;  %v2146_v58 = vrot.slane %v9335_v6, 7  ;;  %7472 = vpow2.f32 %v9223_v31  ;;  %v6685_v0 = vmul.f32 -1.442695, %v9341_v42  ;;  %v13563_v42 = vld [vmem:[#allocation66_spill] sm:$0xff] }
 0x268   : > { %v9364_v53 = vadd.f32 %v2406_v48, %v2282_v3  ;;  %v2598_v24 = vadd.f32 %v2540_v45, %v2468_v27  ;;  %v7469_v11 = vpop.eup %7468  ;;  %v3599_v38 = vmul.f32 %v13527_v41, %v9199_v17  ;;  %v2993_v7 = vadd.f32 %v2935_v4, %v2863_v40  ;;  %v13560_v48 = vld [vmem:[#allocation77_spill] sm:$0xff]  ;;  %v9386_v40 = vpop.f32.mrb[31].mxu1 }
 0x269   : > { %v3517_v9 = vadd.f32 %v3459_v51, %v3387_v29  ;;  %v9369_v61 = vmul.f32 %v8812_v60, %v3059_v25  ;;  %v9372_v57 = vmul.f32 %v8793_v2, %v2146_v58  ;;  %v7471_v56 = vpop.eup %7470  ;;  %v2800_v31 = vmul.f32 %v8843_v14, %v9241_v13  ;;  %v13559_v29 = vld [vmem:[#allocation57_spill] sm:$0xff] }
 0x26a   : > { %v2728_v54 = vadd.f32 %v9249_v28, %v2598_v24  ;;  %v3060_v3 = vrot.slane %v9296_v63, 1  ;;  %v6629_v27 = vmul.f32 -1.442695, %v9313_v55  ;;  %v3324_v17 = vmul.f32 %v13559_v29, %v9303_v32  ;;  %13561 = vst [vmem:[#allocation57_spill] sm:$0xff] %v9386_v40  ;;  %v13562_v28 = vld [vmem:[#allocation46_spill] sm:$0xff] }
 0x26b   : > { %v3252_v51 = vadd.f32 %v9271_v35, %v2993_v7  ;;  %v2541_v25 = vmul.f32 %v8875_v15, %v9372_v57  ;;  %v1547_v45 = vmul.f32 %v13524_v1, %v13560_v48  ;;  %7474 = vpow2.f32 %v6685_v0 }
 0x26c   : > { %v2671_v4 = vmul.f32 %v13562_v28, %v9202_v26  ;;  %v2864_v58 = vadd.f32 %v2800_v31, %v2728_v54  ;;  %v2936_v24 = vmul.f32 %v8858_v22, %v9296_v63  ;;  %v9393_v62 = vadd.f32 %v13563_v42, %v3599_v38 }
 0x26d   : > { %v3388_v35 = vadd.f32 %v3324_v17, %v3252_v51  ;;  %v3460_v7 = vmul.f32 %v9036_v43, %v9369_v61  ;;  %v2599_v55 = vadd.f32 %v2541_v25, %v2469_v44  ;;  %v2801_v48 = vmul.f32 %v8818_v23, %v9283_v8  ;;  %v13565_v17 = vld [vmem:[#allocation64_spill] sm:$0xff] }
 0x26e   : > { %13564 = vst [vmem:[#allocation77_spill] sm:$0xff] %v9393_v62  ;;  %v2994_v40 = vadd.f32 %v2936_v24, %v2864_v58  ;;  %v9400_v0 = vmul.f32 %v8812_v60, %v3060_v3  ;;  %v1879_v26 = vadd.f32 1.0, %v7469_v11  ;;  %v3061_v12 = vrot.slane %v9335_v6, 1  ;;  %v13567_v11 = vld [vmem:[#allocation56_spill] sm:$0xff] }
 0x26f   : > { %v3518_v31 = vadd.f32 %v3460_v7, %v3388_v35  ;;  %v2729_v54 = vadd.f32 %v2671_v4, %v2599_v55  ;;  %v1880_v1 = vadd.f32 1.0, %v7471_v56  ;;  %v3600_v38 = vmul.f32 %v8943_v52, %v3516_v46 }
 0x270   : > { %v3325_v51 = vmul.f32 %v13565_v17, %v9332_v33  ;;  %v3253_v44 = vadd.f32 %v13566_v47, %v2994_v40  ;;  %7476 = vpow2.f32 %v6629_v27  ;;  %v2937_v3 = vmul.f32 %v8845_v34, %v9335_v6 }
 0x271   : > { %v7473_v25 = vpop.eup %7472  ;;  %v2865_v16 = vadd.f32 %v2801_v48, %v2729_v54  ;;  %v3196_v58 = vmul.f32 %v13567_v11, %v9303_v32  ;;  %7478 = vrcp.f32 %v1879_v26  ;;  %v3601_v55 = vmul.f32 %v13527_v41, %v3517_v9 }
 0x272   : > { %v3389_v56 = vadd.f32 %v3325_v51, %v3253_v44  ;;  %v3461_v46 = vmul.f32 %v9050_v10, %v9400_v0  ;;  %7480 = vrcp.f32 %v1880_v1  ;;  %v3126_v47 = vmul.f32 %v8812_v60, %v3061_v12 }
 0x273   : > { %v2995_v4 = vadd.f32 %v2937_v3, %v2865_v16  ;;  %v2283_v27 = vmul.f32 %v8805_v19, %v9309_v50  ;;  %v2407_v40 = vmul.f32 %v8828_v49, %v9372_v57  ;;  %v9420_v24 = vadd.f32 %v13515_v59, %v3600_v38 }
 0x274   : > { %v3519_v32 = vadd.f32 %v3461_v46, %v3389_v56  ;;  %v1881_v35 = vadd.f32 1.0, %v7473_v25  ;;  %v9423_v9 = vadd.f32 %v13530_v36, %v1547_v45  ;;  %v3934_v7 = vadd.f32 1.0, %v9321_v21  ;;  %v13572_v45 = vld [vmem:[#allocation94_spill] sm:$0xff] }
 0x275   : > { %13568 = vst [vmem:[#allocation95_spill] sm:$0xff] %v9420_v24  ;;  %v3326_v16 = vmul.f32 %v13559_v29, %v9369_v61  ;;  %v3254_v1 = vadd.f32 %v3196_v58, %v2995_v4  ;;  %v9428_v12 = vadd.f32 %v2407_v40, %v2283_v27  ;;  %v7475_v50 = vpop.eup %7474  ;;  %v6686_v48 = vmul.f32 -1.442695, %v9393_v62  ;;  %v13574_v46 = vld [vmem:[#allocation82_spill] sm:$0xff] }
 0x276   : > { %13569 = vst [vmem:[#allocation99_spill] sm:$0xff] %v9423_v9  ;;  %v9432_v26 = vadd.f32 %v13563_v42, %v3601_v55  ;;  %v9435_v54 = vmul.f32 0.0, %v8845_v34  ;;  %7482 = vrcp.f32 %v1881_v35  ;;  %v3462_v21 = vmul.f32 %v9036_v43, %v3126_v47  ;;  %v13575_v35 = vld [vmem:[#allocation49_spill] sm:$0xff] }
 0x277   : > { %7484 = vrcp.f32 %v13572_v45  ;;  %v3390_v38 = vadd.f32 %v3326_v16, %v3254_v1  ;;  %v9440_v51 = vmul.f32 0.0, %v8858_v22  ;;  %v6687_v44 = vmul.f32 -1.442695, %v9420_v24 }
 0x278   : > { %13570 = vst [vmem:[#allocation100_spill] sm:$0xff] %v9432_v26  ;;  %13571 = vst [vmem:[#allocation101_spill] sm:$0xff] %v9435_v54  ;;  %v3602_v25 = vmul.f32 %v8943_v52, %v3518_v31  ;;  %v6630_v3 = vmul.f32 -1.442695, %v9316_v5  ;;  %v6631_v58 = vmul.f32 -1.442695, %v9338_v37  ;;  %7486 = vrcp.f32 %v3934_v7 }
 0x279   : > { %13573 = vst [vmem:[#allocation94_spill] sm:$0xff] %v9440_v51  ;;  %v3520_v55 = vadd.f32 %v3462_v21, %v3390_v38  ;;  %v9447_v56 = vmul.f32 -1.442695, %v9423_v9  ;;  %v9451_v4 = vmul.f32 %v13526_v18, %v13574_v46  ;;  %v9453_v40 = vadd.f32 1.0, %v7475_v50 }
 0x27a   : > { %v7477_v27 = vpop.eup %7476  ;;  %7488 = vpow2.f32 %v6686_v48  ;;  %v2672_v31 = vmul.f32 %v13575_v35, %v9241_v13  ;;  %v6688_v16 = vmul.f32 -1.442695, %v9432_v26  ;;  %v2673_v7 = vmul.f32 %v13562_v28, %v9283_v8  ;;  %v13577_v8 = vld [vmem:[#allocation50_spill] sm:$0xff] }
 0x27b   : > { %v7479_v1 = vpop.eup %7478  ;;  %v9462_v45 = vmul.f32 %v13575_v35, %v9296_v63  ;;  %v2802_v38 = vmul.f32 %v8843_v14, %v9296_v63  ;;  %v9468_v50 = vmul.f32 %v13562_v28, %v9335_v6  ;;  %7490 = vpow2.f32 %v6687_v44  ;;  %v13578_v63 = vld [vmem:[#allocation60_spill] sm:$0xff]  ;;  %v13579_v28 = vld [vmem:[#allocation86_spill] sm:$0xff] }
 0x27c   : > { %v7481_v48 = vpop.eup %7480  ;;  %v9471_v13 = vadd.f32 %v13515_v59, %v3602_v25  ;;  %v9475_v21 = vmul.f32 %v13565_v17, %v9400_v0  ;;  %v2071_v46 = vmul.f32 %v7479_v1, %v13577_v8  ;;  %v2803_v26 = vmul.f32 %v8818_v23, %v9335_v6 }
 0x27d   : > { %v9482_v62 = vmul.f32 %v13578_v63, %v9332_v33  ;;  %v2072_v9 = vmul.f32 %v7481_v48, %v13579_v28  ;;  %v1882_v24 = vadd.f32 1.0, %v7477_v27  ;;  %7492 = vpow2.f32 %v6688_v16  ;;  %v9505_v48 = vpop.f32.mrb[32].mxu1 }
 0x27e   : > { %13576 = vst [vmem:[#allocation82_spill] sm:$0xff] %v9471_v13  ;;  %v3603_v44 = vmul.f32 %v13527_v41, %v3519_v32  ;;  %v2147_v25 = vrot.slane %v2071_v46, 7  ;;  %v2285_v37 = vmul.f32 %v8805_v19, %v9372_v57  ;;  %v9490_v1 = vmul.f32 %v13567_v11, %v9369_v61  ;;  %13580 = vst [vmem:[#allocation50_spill] sm:$0xff] %v9505_v48  ;;  %v9521_v48 = vpop.f32.mrb[33].mxu1 }
 0x27f   : > { %v2148_v5 = vrot.slane %v2072_v9, 7  ;;  %v9493_v6 = vmul.f32 %v13567_v11, %v3126_v47  ;;  %v9496_v33 = vmul.f32 %v13559_v29, %v3126_v47  ;;  %v9499_v27 = vmul.f32 -1.442695, %v9471_v13  ;;  %v13582_v11 = vld [vmem:[#allocation91_spill] sm:$0xff]  ;;  %13584 = vst [vmem:[#allocation102_spill] sm:$0xff] %v9521_v48 }
 0x280   : > { %v7483_v28 = vpop.eup %7482  ;;  %v3604_v32 = vmul.f32 %v8943_v52, %v3520_v55  ;;  %v2212_v16 = vmul.f32 %v8793_v2, %v2147_v25  ;;  %v2284_v57 = vmul.f32 %v8837_v20, %v9344_v30  ;;  %v9515_v13 = vmul.f32 %v13578_v63, %v9400_v0 }
 0x281   : > { %v9507_v61 = vpop.eup %7484  ;;  %v2213_v8 = vmul.f32 %v8793_v2, %v2148_v5  ;;  %v9511_v47 = vmul.f32 %v7483_v28, %v13582_v11  ;;  %7494 = vrcp.f32 %v1882_v24  ;;  %v9518_v55 = vadd.f32 %v13563_v42, %v3603_v44 }
 0x282   : > { %13581 = vst [vmem:[#allocation86_spill] sm:$0xff] %v9507_v61  ;;  %v2542_v25 = vmul.f32 %v8888_v39, %v2212_v16  ;;  %v3062_v30 = vrot.slane %v2071_v46, 1  ;;  %7496 = vpow2.f32 %v6630_v3  ;;  %v9523_v19 = vpop.eup %7486  ;;  %v9531_v24 = vadd.f32 %v13515_v59, %v3604_v32  ;;  %v13588_v32 = vld [vmem:[#allocation58_spill] sm:$0xff] }
 0x283   : > { %13583 = vst [vmem:[#allocation91_spill] sm:$0xff] %v9518_v55  ;;  %13585 = vst [vmem:[#allocation103_spill] sm:$0xff] %v9523_v19  ;;  %v2409_v5 = vmul.f32 %v8828_v49, %v2213_v8  ;;  %v2543_v11 = vmul.f32 %v8875_v15, %v2213_v8  ;;  %v2149_v28 = vrot.slane %v9511_v47, 7  ;;  %7498 = vpow2.f32 %v6631_v58  ;;  %v13589_v19 = vld [vmem:[#allocation62_spill] sm:$0xff] }
 0x284   : > { %v9528_v0 = vpop.eup %7488  ;;  %13587 = vst [vmem:[#allocation105_spill] sm:$0xff] %v9531_v24  ;;  %v2600_v44 = vadd.f32 %v2542_v25, %v9364_v53  ;;  %v2676_v3 = vmul.f32 %v13575_v35, %v2071_v46  ;;  %v3063_v42 = vrot.slane %v2072_v9, 1  ;;  %v2938_v48 = vmul.f32 %v8858_v22, %v2071_v46 }
 0x285   : > { %13586 = vst [vmem:[#allocation104_spill] sm:$0xff] %v9528_v0  ;;  %v2473_v41 = vadd.f32 %v2409_v5, %v2285_v37  ;;  %v2601_v49 = vadd.f32 %v2543_v11, %v9428_v12  ;;  %v2214_v8 = vmul.f32 %v8793_v2, %v2149_v28  ;;  %v7491_v15 = vpop.eup %7490  ;;  %v3127_v58 = vmul.f32 %v8812_v60, %v3062_v30  ;;  %v9544_v37 = vpop.f32.mrb[34].mxu1 }
 0x286   : > { %v2730_v52 = vadd.f32 %v2672_v31, %v2600_v44  ;;  %v2805_v61 = vmul.f32 %v8818_v23, %v2072_v9  ;;  %v2408_v59 = vmul.f32 %v13588_v32, %v2212_v16  ;;  %v2286_v35 = vmul.f32 %v8837_v20, %v2212_v16  ;;  %13590 = vst [vmem:[#allocation106_spill] sm:$0xff] %v9544_v37 }
 0x287   : > { %v2603_v53 = vadd.f32 %v13589_v19, %v2473_v41  ;;  %v2731_v25 = vadd.f32 %v2673_v7, %v2601_v49  ;;  %v2410_v0 = vmul.f32 %v13588_v32, %v2214_v8  ;;  %v9546_v12 = vpop.eup %7492  ;;  %v3128_v31 = vmul.f32 %v8812_v60, %v3063_v42 }
 0x288   : > { %v2866_v5 = vadd.f32 %v2802_v38, %v2730_v52  ;;  %v2472_v11 = vadd.f32 %v2408_v59, %v2284_v57  ;;  %v2544_v30 = vmul.f32 %v8888_v39, %v2214_v8  ;;  %v2939_v41 = vmul.f32 %v8845_v34, %v2072_v9  ;;  %v13591_v38 = vld [vmem:[#allocation43_spill] sm:$0xff]  ;;  %v9564_v8 = vpop.f32.mrb[35].mxu1 }
 0x289   : > { %v2733_v28 = vadd.f32 %v9468_v50, %v2603_v53  ;;  %v2867_v44 = vadd.f32 %v2803_v26, %v2731_v25  ;;  %v2474_v49 = vadd.f32 %v2410_v0, %v2286_v35  ;;  %v2804_v7 = vmul.f32 %v8843_v14, %v2071_v46  ;;  %13592 = vst [vmem:[#allocation107_spill] sm:$0xff] %v9564_v8 }
 0x28a   : > { %v2996_v16 = vadd.f32 %v2938_v48, %v2866_v5  ;;  %v2602_v19 = vadd.f32 %v2544_v30, %v2472_v11  ;;  %7500 = vpow2.f32 %v9447_v56  ;;  %v3064_v59 = vrot.slane %v9511_v47, 1 }
 0x28b   : > { %v7495_v37 = vpop.eup %7494  ;;  %v2869_v20 = vadd.f32 %v2805_v61, %v2733_v28  ;;  %v2997_v52 = vadd.f32 %v2939_v41, %v2867_v44  ;;  %v2604_v42 = vadd.f32 %v13591_v38, %v2474_v49  ;;  %v3463_v26 = vmul.f32 %v9050_v10, %v3127_v58 }
 0x28c   : > { %v7497_v57 = vpop.eup %7496  ;;  %v3255_v50 = vadd.f32 %v9482_v62, %v2996_v16  ;;  %v3330_v9 = vmul.f32 %v13559_v29, %v3128_v31  ;;  %v2732_v35 = vadd.f32 %v9462_v45, %v2602_v19  ;;  %v2806_v0 = vmul.f32 %v8843_v14, %v9511_v47 }
 0x28d   : > { %v7499_v46 = vpop.eup %7498  ;;  %v2999_v48 = vadd.f32 %v9435_v54, %v2869_v20  ;;  %v3256_v56 = vadd.f32 %v9490_v1, %v2997_v52  ;;  %v2734_v61 = vadd.f32 %v2676_v3, %v2604_v42  ;;  %v3464_v62 = vmul.f32 %v9036_v43, %v3128_v31 }
 0x28e   : > { %v3391_v53 = vadd.f32 %v9475_v21, %v3255_v50  ;;  %v2868_v25 = vadd.f32 %v2804_v7, %v2732_v35  ;;  %v2940_v5 = vmul.f32 %v8858_v22, %v9511_v47  ;;  %v3129_v1 = vmul.f32 %v8812_v60, %v3064_v59  ;;  %v13594_v59 = vld [vmem:[#allocation41_spill] sm:$0xff]  ;;  %v13597_v35 = vld [vmem:[#allocation84_spill] sm:$0xff] }
 0x28f   : > { %v3258_v19 = vadd.f32 %v9493_v6, %v2999_v48  ;;  %v3392_v20 = vadd.f32 %v9496_v33, %v3256_v56  ;;  %v2870_v45 = vadd.f32 %v2806_v0, %v2734_v61  ;;  %v6690_v3 = vmul.f32 -1.442695, %v9518_v55  ;;  %v13598_v56 = vld [vmem:[#allocation72_spill] sm:$0xff]  ;;  %v13599_v0 = vld [vmem:[#allocation74_spill] sm:$0xff] }
 0x290   : > { %v6691_v11 = vmul.f32 -1.442695, %v9531_v24  ;;  %v9575_v30 = vadd.f32 %v3463_v26, %v3391_v53  ;;  %v2998_v21 = vadd.f32 %v2940_v5, %v2868_v25  ;;  %v3201_v47 = vmul.f32 %v13578_v63, %v3127_v58 }
 0x291   : > { %v3394_v28 = vadd.f32 %v3330_v9, %v3258_v19  ;;  %v3522_v31 = vadd.f32 %v3464_v62, %v3392_v20  ;;  %v3000_v44 = vadd.f32 %v9440_v51, %v2870_v45  ;;  %7502 = vrcp.f32 %v9453_v40  ;;  %v13600_v62 = vld [vmem:[#allocation98_spill] sm:$0xff]  ;;  %v13601_v19 = vld [vmem:[#allocation104_spill] sm:$0xff]  ;;  %v13602_v45 = vld [vmem:[#allocation61_spill] sm:$0xff] }
 0x292   : > { %13593 = vst [vmem:[#allocation108_spill] sm:$0xff] %v9575_v30  ;;  %v3938_v6 = vadd.f32 1.0, %v7491_v15  ;;  %v3257_v33 = vadd.f32 %v9515_v13, %v2998_v21  ;;  %v3329_v41 = vmul.f32 %v13565_v17, %v3127_v58  ;;  %7504 = vpow2.f32 %v9499_v27  ;;  %v13595_v13 = vld [vmem:[#allocation83_spill] sm:$0xff]  ;;  %v13596_v58 = vld [vmem:[#allocation40_spill] sm:$0xff] }
 0x293   : > { %v3259_v49 = vadd.f32 %v3201_v47, %v3000_v44  ;;  %v3331_v7 = vmul.f32 %v13565_v17, %v3129_v1  ;;  %7506 = vpow2.f32 %v6690_v3  ;;  %v3465_v42 = vmul.f32 %v9050_v10, %v3129_v1  ;;  %v9618_v47 = vpop.f32.mrb[36].mxu1 }
 0x294   : > { %v7501_v16 = vpop.eup %7500  ;;  %v3393_v52 = vadd.f32 %v3329_v41, %v3257_v33  ;;  %v9587_v50 = vadd.f32 %v13594_v59, %v9451_v4  ;;  %7508 = vpow2.f32 %v6691_v11  ;;  %v1883_v40 = vadd.f32 1.0, %v7497_v57  ;;  %13605 = vst [vmem:[#allocation84_spill] sm:$0xff] %v9618_v47  ;;  %v13606_v33 = vld [vmem:[#allocation92_spill] sm:$0xff]  ;;  %v13607_v41 = vld [vmem:[#allocation103_spill] sm:$0xff] }
 0x295   : > { %v9589_v15 = vadd.f32 %v3331_v7, %v3259_v49  ;;  %v1549_v26 = vmul.f32 %v13596_v58, %v13595_v13  ;;  %7510 = vrcp.f32 %v3938_v6  ;;  %v1884_v9 = vadd.f32 1.0, %v7499_v46  ;;  %v9625_v7 = vpop.f32.mrb[37].mxu1 }
 0x296   : > { %v9593_v27 = vadd.f32 %v3465_v42, %v3393_v52  ;;  %v1550_v48 = vmul.f32 %v13526_v18, %v13597_v35  ;;  %v3933_v61 = vadd.f32 1.0, %v13598_v56  ;;  %7512 = vrcp.f32 %v1883_v40  ;;  %13609 = vst [vmem:[#allocation74_spill] sm:$0xff] %v9625_v7  ;;  %v13610_v52 = vld [vmem:[#allocation90_spill] sm:$0xff] }
 0x297   : > { %v9599_v4 = vmul.f32 %v7495_v37, %v13599_v0  ;;  %7514 = vrcp.f32 %v1884_v9  ;;  %v6633_v53 = vmul.f32 -1.442695, %v9587_v50  ;;  %v9603_v57 = vadd.f32 %v13530_v36, %v1549_v26  ;;  %v13604_v37 = vld [vmem:[#allocation85_spill] sm:$0xff]  ;;  %v13611_v42 = vld [vmem:[#allocation86_spill] sm:$0xff]  ;;  %v13613_v9 = vld [vmem:[#allocation79_spill] sm:$0xff] }
 0x298   : > { %v3935_v25 = vadd.f32 1.0, %v13600_v62  ;;  %v1885_v5 = vadd.f32 1.0, %v7501_v16  ;;  %v9607_v46 = vadd.f32 %v13594_v59, %v1550_v48  ;;  %7516 = vrcp.f32 %v3933_v61 }
 0x299   : > { %v3937_v20 = vadd.f32 1.0, %v13601_v19  ;;  %v9612_v1 = vmul.f32 %v9036_v43, %v13602_v45  ;;  %v1551_v3 = vmul.f32 %v13596_v58, %v13604_v37  ;;  %v3939_v21 = vadd.f32 1.0, %v9546_v12 }
 0x29a   : > { %v2150_v44 = vrot.slane %v9599_v4, 7  ;;  %7518 = vrcp.f32 %v1885_v5  ;;  %v9622_v49 = vmul.f32 %v13607_v41, %v13606_v33  ;;  %v6634_v43 = vmul.f32 -1.442695, %v9603_v57  ;;  %v13615_v5 = vld [vmem:[#allocation97_spill] sm:$0xff]  ;;  %v13621_v41 = vld [vmem:[#allocation95_spill] sm:$0xff] }
 0x29b   : > { %13603 = vst [vmem:[#allocation83_spill] sm:$0xff] %v9612_v1  ;;  %v7503_v11 = vpop.eup %7502  ;;  %7520 = vpow2.f32 %v6633_v53  ;;  %v9629_v40 = vmul.f32 %v13611_v42, %v13610_v52  ;;  %v6635_v12 = vmul.f32 -1.442695, %v9607_v46  ;;  %v3524_v26 = vadd.f32 %v9612_v1, %v3394_v28  ;;  %v13638_v1 = vld [vmem:[#allocation66_spill] sm:$0xff] }
 0x29c   : > { %v7505_v6 = vpop.eup %7504  ;;  %13608 = vst [vmem:[#allocation72_spill] sm:$0xff] %v9622_v49  ;;  %7522 = vrcp.f32 %v3935_v25  ;;  %v3606_v35 = vmul.f32 %v13613_v9, %v3522_v31  ;;  %v9635_v48 = vadd.f32 %v13530_v36, %v1551_v3  ;;  %v9639_v0 = vmul.f32 %v9050_v10, %v13602_v45  ;;  %v13617_v3 = vld [vmem:[#allocation78_spill] sm:$0xff]  ;;  %v13618_v45 = vld [vmem:[#allocation80_spill] sm:$0xff] }
 0x29d   : > { %v7507_v16 = vpop.eup %7506  ;;  %13612 = vst [vmem:[#allocation98_spill] sm:$0xff] %v9629_v40  ;;  %7524 = vrcp.f32 %v3937_v20  ;;  %v3940_v61 = vadd.f32 1.0, %v7505_v6  ;;  %v2215_v53 = vmul.f32 %v8793_v2, %v2150_v44  ;;  %v4188_v25 = vadd.f32 %v9622_v49, %v9629_v40  ;;  %v13620_v6 = vld [vmem:[#allocation75_spill] sm:$0xff] }
 0x29e   : > { %v7509_v13 = vpop.eup %7508  ;;  %7526 = vrcp.f32 %v3939_v21  ;;  %13614 = vst [vmem:[#allocation104_spill] sm:$0xff] %v9639_v0  ;;  %v9645_v28 = vmul.f32 %v7503_v11, %v13615_v5  ;;  %v3941_v31 = vadd.f32 1.0, %v7507_v16  ;;  %v3065_v37 = vrot.slane %v9599_v4, 1  ;;  %v13623_v16 = vld [vmem:[#allocation48_spill] sm:$0xff] }
 0x29f   : > { %v7511_v56 = vpop.eup %7510  ;;  %7528 = vpow2.f32 %v6634_v43  ;;  %v3942_v20 = vadd.f32 1.0, %v7509_v13  ;;  %v3608_v10 = vmul.f32 %v13613_v9, %v3524_v26  ;;  %v9653_v44 = vadd.f32 %v13618_v45, %v3606_v35  ;;  %v13625_v35 = vld [vmem:[#allocation87_spill] sm:$0xff] }
 0x2a0   : > { %v7513_v62 = vpop.eup %7512  ;;  %13616 = vst [vmem:[#allocation61_spill] sm:$0xff] %v9645_v28  ;;  %7530 = vpow2.f32 %v6635_v12  ;;  %v6636_v11 = vmul.f32 -1.442695, %v9635_v48  ;;  %v9660_v43 = vmul.f32 %v7511_v56, %v13621_v41  ;;  %v2411_v52 = vmul.f32 %v13623_v16, %v2215_v53 }
 0x2a1   : > { %v7515_v19 = vpop.eup %7514  ;;  %v9649_v21 = vmul.f32 %v7513_v62, %v13617_v3  ;;  %13619 = vst [vmem:[#allocation85_spill] sm:$0xff] %v9653_v44  ;;  %7532 = vrcp.f32 %v3940_v61  ;;  %v3525_v12 = vadd.f32 %v9639_v0, %v9589_v15  ;;  %v1552_v62 = vmul.f32 %v13526_v18, %v13625_v35  ;;  %v9676_v3 = vpop.f32.mrb[38].mxu1  ;;  %v13628_v35 = vld [vmem:[#allocation99_spill] sm:$0xff] }
 0x2a2   : > { %v9656_v33 = vmul.f32 %v7515_v19, %v13620_v6  ;;  %13622 = vst [vmem:[#allocation92_spill] sm:$0xff] %v9660_v43  ;;  %v9664_v13 = vpop.eup %7516  ;;  %7534 = vrcp.f32 %v3941_v31  ;;  %v4189_v56 = vadd.f32 %v4188_v25, %v9645_v28  ;;  %v9673_v61 = vmul.f32 %v8812_v60, %v3065_v37  ;;  %13626 = vst [vmem:[#allocation90_spill] sm:$0xff] %v9676_v3  ;;  %v13631_v37 = vld [vmem:[#allocation81_spill] sm:$0xff]  ;;  %v13632_v28 = vld [vmem:[#allocation47_spill] sm:$0xff] }
 0x2a3   : > { %v2151_v42 = vrot.slane %v9649_v21, 7  ;;  %13624 = vst [vmem:[#allocation103_spill] sm:$0xff] %v9664_v13  ;;  %7536 = vrcp.f32 %v3942_v20  ;;  %v9679_v6 = vadd.f32 %v13618_v45, %v3608_v10  ;;  %v6693_v15 = vmul.f32 -1.442695, %v9653_v44 }
 0x2a4   : > { %v2152_v26 = vrot.slane %v9656_v33, 7  ;;  %v7519_v5 = vpop.eup %7518  ;;  %v9691_v20 = vadd.f32 %v4189_v56, %v9660_v43  ;;  %v2475_v40 = vadd.f32 %v2411_v52, %v13632_v28  ;;  %7538 = vpow2.f32 %v6636_v11  ;;  %v13635_v43 = vld [vmem:[#allocation44_spill] sm:$0xff]  ;;  %v13636_v11 = vld [vmem:[#allocation65_spill] sm:$0xff] }
 0x2a5   : > { %v2216_v19 = vmul.f32 %v8793_v2, %v2151_v42  ;;  %v7521_v31 = vpop.eup %7520  ;;  %13627 = vst [vmem:[#allocation86_spill] sm:$0xff] %v9679_v6  ;;  %v9686_v49 = vmul.f32 %v7519_v5, %v13628_v35  ;;  %v3607_v42 = vmul.f32 %v13631_v37, %v9593_v27  ;;  %v3609_v55 = vmul.f32 %v13631_v37, %v3525_v12 }
 0x2a6   : > { %v9683_v41 = vmul.f32 %v8793_v2, %v2152_v26  ;;  %v9688_v25 = vpop.eup %7522  ;;  %13630 = vst [vmem:[#allocation78_spill] sm:$0xff] %v9691_v20  ;;  %v2807_v26 = vmul.f32 %v8818_v23, %v9599_v4  ;;  %v9703_v35 = vadd.f32 %v13594_v59, %v1552_v62  ;;  %v2287_v0 = vmul.f32 %v13635_v43, %v2215_v53 }
 0x2a7   : > { %13629 = vst [vmem:[#allocation97_spill] sm:$0xff] %v9688_v25  ;;  %v9696_v10 = vpop.eup %7524  ;;  %v2412_v5 = vmul.f32 %v13588_v32, %v2216_v19  ;;  %v1886_v28 = vadd.f32 1.0, %v7521_v31  ;;  %7540 = vpow2.f32 %v6693_v15  ;;  %v9713_v51 = vmul.f32 -1.442695, %v9679_v6  ;;  %v13640_v31 = vld [vmem:[#allocation88_spill] sm:$0xff] }
 0x2a8   : > { %13633 = vst [vmem:[#allocation75_spill] sm:$0xff] %v9696_v10  ;;  %v9705_v56 = vpop.eup %7526  ;;  %v2413_v27 = vmul.f32 %v13623_v16, %v9683_v41  ;;  %v2547_v52 = vmul.f32 %v13636_v11, %v9683_v41  ;;  %v3332_v62 = vmul.f32 %v13559_v29, %v9673_v61  ;;  %v2153_v38 = vrot.slane %v9686_v49, 7  ;;  %v13642_v10 = vld [vmem:[#allocation63_spill] sm:$0xff] }
 0x2a9   : > { %13634 = vst [vmem:[#allocation95_spill] sm:$0xff] %v9705_v56  ;;  %v7529_v12 = vpop.eup %7528  ;;  %v9718_v56 = vpop.f32.mrb[39].mxu1  ;;  %v9721_v3 = vadd.f32 %v13638_v1, %v3607_v42  ;;  %v1553_v15 = vmul.f32 %v13596_v58, %v13640_v31  ;;  %v9728_v6 = vadd.f32 %v13638_v1, %v3609_v55  ;;  %v2476_v20 = vadd.f32 %v2412_v5, %v13642_v10  ;;  %v13644_v42 = vld [vmem:[#allocation70_spill] sm:$0xff] }
 0x2aa   : > { %13637 = vst [vmem:[#allocation87_spill] sm:$0xff] %v9718_v56  ;;  %v7531_v53 = vpop.eup %7530  ;;  %v9723_v44 = vadd.f32 %v2413_v27, %v2287_v0  ;;  %v2605_v30 = vadd.f32 %v2547_v52, %v2475_v40  ;;  %v9732_v25 = vmul.f32 %v8793_v2, %v2153_v38  ;;  %v6637_v56 = vmul.f32 -1.442695, %v9703_v35  ;;  %v13646_v52 = vld [vmem:[#allocation51_spill] sm:$0xff] }
 0x2ab   : > { %13639 = vst [vmem:[#allocation99_spill] sm:$0xff] %v9721_v3  ;;  %13641 = vst [vmem:[#allocation81_spill] sm:$0xff] %v9728_v6  ;;  %v9735_v24 = vpop.eup %7532  ;;  %v3067_v0 = vrot.slane %v9656_v33, 1  ;;  %7542 = vrcp.f32 %v1886_v28  ;;  %v1887_v40 = vadd.f32 1.0, %v7529_v12  ;;  %v2288_v55 = vmul.f32 %v13646_v52, %v2216_v19 }
 0x2ac   : > { %13643 = vst [vmem:[#allocation88_spill] sm:$0xff] %v9735_v24  ;;  %v2735_v13 = vadd.f32 %v13644_v42, %v2605_v30  ;;  %v9739_v27 = vpop.eup %7534  ;;  %v2414_v5 = vmul.f32 %v13588_v32, %v9732_v25  ;;  %v2548_v38 = vmul.f32 %v8888_v39, %v9732_v25  ;;  %v1888_v31 = vadd.f32 1.0, %v7531_v53 }
 0x2ad   : > { %13645 = vst [vmem:[#allocation109_spill] sm:$0xff] %v9739_v27  ;;  %v9746_v10 = vpop.eup %7536  ;;  %v2943_v30 = vmul.f32 %v8845_v34, %v9656_v33  ;;  %7544 = vrcp.f32 %v1887_v40  ;;  %v9751_v28 = vadd.f32 %v13530_v36, %v1553_v15  ;;  %v3066_v12 = vrot.slane %v9649_v21, 1  ;;  %v13650_v15 = vld [vmem:[#allocation71_spill] sm:$0xff] }
 0x2ae   : > { %13647 = vst [vmem:[#allocation51_spill] sm:$0xff] %v9746_v10  ;;  %v2871_v7 = vadd.f32 %v2807_v26, %v2735_v13  ;;  %v9754_v19 = vadd.f32 %v2414_v5, %v2288_v55  ;;  %v2606_v27 = vadd.f32 %v2548_v38, %v2476_v20  ;;  %7546 = vpow2.f32 %v6637_v56  ;;  %v7539_v42 = vpop.eup %7538  ;;  %v13649_v13 = vld [vmem:[#allocation89_spill] sm:$0xff]  ;;  %v13651_v55 = vld [vmem:[#allocation55_spill] sm:$0xff] }
 0x2af   : > { %13648 = vst [vmem:[#allocation110_spill] sm:$0xff] %v9751_v28  ;;  %v9757_v53 = vmul.f32 %v8812_v60, %v3067_v0  ;;  %7548 = vrcp.f32 %v1888_v31  ;;  %v1554_v26 = vmul.f32 %v13526_v18, %v13649_v13  ;;  %v2808_v40 = vmul.f32 %v8843_v14, %v9649_v21  ;;  %v13653_v38 = vld [vmem:[#allocation67_spill] sm:$0xff] }
 0x2b0   : > { %v3001_v24 = vadd.f32 %v2943_v30, %v2871_v7  ;;  %v2736_v10 = vadd.f32 %v13650_v15, %v2606_v27  ;;  %v3068_v47 = vrot.slane %v9686_v49, 1  ;;  %v1555_v20 = vmul.f32 %v13596_v58, %v13651_v55  ;;  %v13652_v7 = vld [vmem:[#allocation73_spill] sm:$0xff] }
 0x2b1   : > { %v6694_v56 = vmul.f32 -1.442695, %v9721_v3  ;;  %v6638_v0 = vmul.f32 -1.442695, %v9751_v28  ;;  %v1556_v31 = vmul.f32 %v13526_v18, %v13653_v38  ;;  %v9772_v30 = vpop.eup %7540  ;;  %v3131_v13 = vmul.f32 %v8812_v60, %v3066_v12 }
 0x2b2   : > { %v3260_v5 = vadd.f32 %v13652_v7, %v3001_v24  ;;  %13654 = vst [vmem:[#allocation89_spill] sm:$0xff] %v9772_v30  ;;  %v2872_v54 = vadd.f32 %v2808_v40, %v2736_v10  ;;  %v2944_v27 = vmul.f32 %v8858_v22, %v9686_v49  ;;  %v1889_v15 = vadd.f32 1.0, %v7539_v42  ;;  %v9781_v24 = vld [vmem:[%s13086_s5 + $0x10] ss:$0 sm:$0xff]  ;;  %v13659_v30 = vld [vmem:[#allocation69_spill] sm:$0xff] }
 0x2b3   : > { %v6696_v55 = vmul.f32 -1.442695, %v9728_v6  ;;  %v3468_v38 = vmul.f32 %v9781_v24, %v9757_v53  ;;  %v13655_v7 = vld [vmem:[#allocation96_spill] sm:$0xff]  ;;  %v9788_v10 = vmul.f32 %v8812_v60, %v3068_v47  ;;  %v9791_v42 = vadd.f32 %v13594_v59, %v1554_v26 }
 0x2b4   : > { %v3396_v8 = vadd.f32 %v3332_v62, %v3260_v5  ;;  %v1557_v3 = vmul.f32 %v13596_v58, %v13655_v7  ;;  %v3002_v12 = vadd.f32 %v2944_v27, %v2872_v54  ;;  %v9794_v62 = vadd.f32 %v13530_v36, %v1555_v20  ;;  %v9803_v54 = vpop.f32.mrb[40].mxu1  ;;  %v13661_v27 = vld [vmem:[#allocation76_spill] sm:$0xff] }
 0x2b5   : > { %13656 = vst [vmem:[#allocation55_spill] sm:$0xff] %v9791_v42  ;;  %v7543_v40 = vpop.eup %7542  ;;  %7550 = vpow2.f32 %v6638_v0  ;;  %v9799_v6 = vadd.f32 %v13594_v59, %v1556_v31  ;;  %v1558_v7 = vmul.f32 %v13526_v18, %v13659_v30  ;;  %13660 = vst [vmem:[#allocation69_spill] sm:$0xff] %v9803_v54  ;;  %v3333_v47 = vmul.f32 %v13565_v17, %v3131_v13  ;;  %v13663_v31 = vld [vmem:[#allocation56_spill] sm:$0xff] }
 0x2b6   : > { %13657 = vst [vmem:[#allocation67_spill] sm:$0xff] %v9794_v62  ;;  %v9796_v5 = vadd.f32 %v3468_v38, %v3396_v8  ;;  %v3261_v26 = vadd.f32 %v13661_v27, %v3002_v12  ;;  %v9808_v58 = vmul.f32 %v7543_v40, %v9587_v50  ;;  %7552 = vrcp.f32 %v1889_v15  ;;  %v13662_v8 = vld [vmem:[#allocation46_spill] sm:$0xff]  ;;  %v9823_v50 = vld [vmem:[%s13086_s5 + $0x18] ss:$0 sm:$0xff] }
 0x2b7   : > { %13658 = vst [vmem:[#allocation96_spill] sm:$0xff] %v9799_v6  ;;  %v7545_v20 = vpop.eup %7544  ;;  %7554 = vpow2.f32 %v9713_v51  ;;  %v2677_v0 = vmul.f32 %v13662_v8, %v9599_v4  ;;  %v9815_v38 = vmul.f32 %v13663_v31, %v9673_v61  ;;  %v9818_v30 = vadd.f32 %v13530_v36, %v1557_v3 }
 0x2b8   : > { %v7547_v54 = vpop.eup %7546  ;;  %7556 = vpow2.f32 %v6694_v56  ;;  %v3397_v12 = vadd.f32 %v3333_v47, %v3261_v26  ;;  %v3469_v51 = vmul.f32 %v9823_v50, %v9788_v10  ;;  %v2154_v4 = vrot.slane %v9808_v58, 7 }
 0x2b9   : > { %13664 = vst [vmem:[#allocation111_spill] sm:$0xff] %v9818_v30  ;;  %v7549_v15 = vpop.eup %7548  ;;  %7558 = vpow2.f32 %v6696_v55  ;;  %v9829_v61 = vmul.f32 %v7545_v20, %v9603_v57  ;;  %v6639_v3 = vmul.f32 -1.442695, %v9791_v42  ;;  %v9833_v56 = vmul.f32 -1.442695, %v9794_v62  ;;  %v13667_v55 = vld [vmem:[#allocation49_spill] sm:$0xff] }
 0x2ba   : > { %v9835_v40 = vadd.f32 %v3469_v51, %v3397_v12  ;;  %v2219_v47 = vmul.f32 %v8793_v2, %v2154_v4  ;;  %v9839_v26 = vmul.f32 -1.442695, %v9799_v6  ;;  %v9842_v27 = vadd.f32 %v13594_v59, %v1558_v7 }
 0x2bb   : > { %v2678_v18 = vmul.f32 %v13667_v55, %v9649_v21  ;;  %v2155_v57 = vrot.slane %v9829_v61, 7  ;;  %v1890_v20 = vadd.f32 1.0, %v7547_v54  ;;  %v9848_v42 = vmul.f32 -1.442695, %v9818_v30 }
 0x2bc   : > { %13665 = vst [vmem:[#allocation112_spill] sm:$0xff] %v9839_v26  ;;  %13666 = vst [vmem:[#allocation113_spill] sm:$0xff] %v9842_v27  ;;  %v2289_v12 = vmul.f32 %v13635_v43, %v9683_v41  ;;  %v2415_v51 = vmul.f32 %v13623_v16, %v2219_v47  ;;  %v2549_v4 = vmul.f32 %v13636_v11, %v2219_v47  ;;  %v3069_v28 = vrot.slane %v9808_v58, 1 }
 0x2bd   : > { %13668 = vst [vmem:[#allocation114_spill] sm:$0xff] %v9848_v42  ;;  %v9855_v6 = vmul.f32 %v7549_v15, %v9607_v46  ;;  %v3203_v7 = vmul.f32 %v13578_v63, %v3131_v13  ;;  %v2679_v21 = vmul.f32 %v13662_v8, %v9656_v33  ;;  %v2809_v54 = vmul.f32 %v8818_v23, %v9656_v33 }
 0x2be   : > { %v2220_v30 = vmul.f32 %v8793_v2, %v2155_v57  ;;  %v9865_v41 = vmul.f32 %v13667_v55, %v9686_v49  ;;  %v2810_v59 = vmul.f32 %v8843_v14, %v9686_v49  ;;  %v2479_v62 = vadd.f32 %v2415_v51, %v2289_v12 }
 0x2bf   : > { %v2607_v46 = vadd.f32 %v2549_v4, %v9723_v44  ;;  %v7551_v15 = vpop.eup %7550  ;;  %v2290_v13 = vmul.f32 %v13646_v52, %v9732_v25  ;;  %7560 = vrcp.f32 %v1890_v20  ;;  %v3334_v55 = vmul.f32 %v13559_v29, %v9757_v53 }
 0x2c0   : > { %13669 = vst [vmem:[#allocation115_spill] sm:$0xff] %v9865_v41  ;;  %v2416_v36 = vmul.f32 %v13588_v32, %v2220_v30  ;;  %v2550_v33 = vmul.f32 %v8888_v39, %v2220_v30  ;;  %v7553_v57 = vpop.eup %7552  ;;  %v2156_v49 = vrot.slane %v9855_v6, 7  ;;  %v3335_v44 = vmul.f32 %v13565_v17, %v9788_v10 }
 0x2c1   : > { %v2737_v42 = vadd.f32 %v2677_v0, %v2607_v46  ;;  %v9878_v12 = vpop.eup %7554  ;;  %v3204_v20 = vmul.f32 %v13663_v31, %v9757_v53  ;;  %v2945_v0 = vmul.f32 %v8845_v34, %v9808_v58  ;;  %v1891_v26 = vadd.f32 1.0, %v7551_v15 }
 0x2c2   : > { %13670 = vst [vmem:[#allocation116_spill] sm:$0xff] %v9878_v12  ;;  %v2480_v25 = vadd.f32 %v2416_v36, %v2290_v13  ;;  %v2608_v51 = vadd.f32 %v2550_v33, %v9754_v19  ;;  %v9885_v4 = vpop.eup %7556  ;;  %v9890_v46 = vmul.f32 %v8793_v2, %v2156_v49  ;;  %v9892_v12 = vpop.f32.mrb[41].mxu1  ;;  %v3070_v19 = vrot.slane %v9829_v61, 1 }
 0x2c3   : > { %v2873_v8 = vadd.f32 %v2809_v54, %v2737_v42  ;;  %13671 = vst [vmem:[#allocation117_spill] sm:$0xff] %v9892_v12  ;;  %v9894_v41 = vpop.eup %7558  ;;  %v9898_v13 = vmul.f32 %v7553_v57, %v9635_v48  ;;  %v9902_v53 = vmul.f32 %v13578_v63, %v9788_v10  ;;  %v2291_v42 = vmul.f32 %v13635_v43, %v2219_v47 }
 0x2c4   : > { %v2738_v36 = vadd.f32 %v2678_v18, %v2608_v51  ;;  %v9906_v33 = vmul.f32 %v8812_v60, %v3069_v28  ;;  %7562 = vpow2.f32 %v6639_v3  ;;  %v2946_v18 = vmul.f32 %v8858_v22, %v9829_v61  ;;  %v9918_v28 = vpop.f32.mrb[42].mxu1 }
 0x2c5   : > { %v3003_v54 = vadd.f32 %v2945_v0, %v2873_v8  ;;  %v2417_v49 = vmul.f32 %v13623_v16, %v9890_v46  ;;  %v2551_v48 = vmul.f32 %v13636_v11, %v9890_v46  ;;  %v3610_v10 = vmul.f32 %v13613_v9, %v9796_v5  ;;  %13672 = vst [vmem:[#allocation118_spill] sm:$0xff] %v9918_v28 }
 0x2c6   : > { %v2874_v15 = vadd.f32 %v2810_v59, %v2738_v36  ;;  %v2157_v8 = vrot.slane %v9898_v13, 7  ;;  %7564 = vrcp.f32 %v1891_v26  ;;  %v9921_v3 = vmul.f32 %v8812_v60, %v3070_v19 }
 0x2c7   : > { %v3262_v47 = vadd.f32 %v9815_v38, %v3003_v54  ;;  %v2481_v57 = vadd.f32 %v2417_v49, %v2291_v42  ;;  %v2609_v51 = vadd.f32 %v2551_v48, %v2479_v62  ;;  %v3470_v36 = vmul.f32 %v9781_v24, %v9906_v33 }
 0x2c8   : > { %v3004_v59 = vadd.f32 %v2946_v18, %v2874_v15  ;;  %v3071_v12 = vrot.slane %v9855_v6, 1  ;;  %v9927_v5 = vmul.f32 %v8793_v2, %v2157_v8  ;;  %v3611_v26 = vmul.f32 %v13631_v37, %v9835_v40 }
 0x2c9   : > { %v3398_v0 = vadd.f32 %v3334_v55, %v3262_v47  ;;  %v7561_v38 = vpop.eup %7560  ;;  %v2811_v54 = vmul.f32 %v8818_v23, %v9808_v58  ;;  %v2739_v15 = vadd.f32 %v2679_v21, %v2609_v51  ;;  %v2292_v62 = vmul.f32 %v13646_v52, %v2220_v30 }
 0x2ca   : > { %v3263_v19 = vadd.f32 %v3203_v7, %v3004_v59  ;;  %v2947_v55 = vmul.f32 %v8845_v34, %v9855_v6  ;;  %v2418_v18 = vmul.f32 %v13588_v32, %v9927_v5  ;;  %v3471_v48 = vmul.f32 %v9823_v50, %v9921_v3 }
 0x2cb   : > { %v3528_v42 = vadd.f32 %v3470_v36, %v3398_v0  ;;  %v2875_v47 = vadd.f32 %v2811_v54, %v2739_v15  ;;  %v2552_v40 = vmul.f32 %v8888_v39, %v9927_v5  ;;  %v9943_v7 = vadd.f32 %v13618_v45, %v3610_v10 }
 0x2cc   : > { %v3399_v49 = vadd.f32 %v3335_v44, %v3263_v19  ;;  %v9946_v21 = vmul.f32 %v8812_v60, %v3071_v12  ;;  %v9948_v30 = vadd.f32 %v2418_v18, %v2292_v62  ;;  %v9951_v8 = vmul.f32 %v7561_v38, %v9703_v35  ;;  %v9963_v19 = vpop.f32.mrb[43].mxu1 }
 0x2cd   : > { %13673 = vst [vmem:[#allocation119_spill] sm:$0xff] %v9943_v7  ;;  %v3005_v44 = vadd.f32 %v2947_v55, %v2875_v47  ;;  %v2610_v51 = vadd.f32 %v2552_v40, %v2480_v25  ;;  %v6643_v0 = vmul.f32 -1.442695, %v9842_v27  ;;  %v9957_v54 = vadd.f32 %v13638_v1, %v3611_v26  ;;  %13675 = vst [vmem:[#allocation121_spill] sm:$0xff] %v9963_v19  ;;  %v13676_v25 = vld [vmem:[#allocation115_spill] sm:$0xff] }
 0x2ce   : > { %v9953_v59 = vadd.f32 %v3471_v48, %v3399_v49  ;;  %v7563_v36 = vpop.eup %7562  ;;  %v3336_v10 = vmul.f32 %v13559_v29, %v9906_v33  ;;  %v2158_v12 = vrot.slane %v9951_v8, 7  ;;  %7566 = vpow2.f32 %v9833_v56  ;;  %v13677_v56 = vld [vmem:[#allocation112_spill] sm:$0xff] }
 0x2cf   : > { %13674 = vst [vmem:[#allocation120_spill] sm:$0xff] %v9957_v54  ;;  %v2812_v35 = vmul.f32 %v8843_v14, %v9829_v61  ;;  %v3264_v38 = vadd.f32 %v3204_v20, %v3005_v44  ;;  %v2740_v15 = vadd.f32 %v13676_v25, %v2610_v51  ;;  %v3072_v62 = vrot.slane %v9898_v13, 1  ;;  %v13678_v44 = vld [vmem:[#allocation46_spill] sm:$0xff] }
 0x2d0   : > { %v7565_v55 = vpop.eup %7564  ;;  %v6697_v26 = vmul.f32 -1.442695, %v9943_v7  ;;  %v3472_v18 = vmul.f32 %v9781_v24, %v9946_v21  ;;  %v9973_v49 = vmul.f32 %v8793_v2, %v2158_v12  ;;  %7568 = vpow2.f32 %v13677_v56 }
 0x2d1   : > { %v3612_v48 = vmul.f32 %v13613_v9, %v3528_v42  ;;  %v3400_v47 = vadd.f32 %v3336_v10, %v3264_v38  ;;  %v2876_v40 = vadd.f32 %v2812_v35, %v2740_v15  ;;  %v2948_v20 = vmul.f32 %v8858_v22, %v9898_v13  ;;  %v13679_v15 = vld [vmem:[#allocation110_spill] sm:$0xff] }
 0x2d2   : > { %v2681_v51 = vmul.f32 %v13678_v44, %v9808_v58  ;;  %v2293_v25 = vmul.f32 %v13635_v43, %v9890_v46  ;;  %v2419_v19 = vmul.f32 %v13623_v16, %v9973_v49  ;;  %v2553_v12 = vmul.f32 %v13636_v11, %v9973_v49 }
 0x2d3   : > { %v6698_v56 = vmul.f32 -1.442695, %v9957_v54  ;;  %v3530_v42 = vadd.f32 %v3472_v18, %v3400_v47  ;;  %v3006_v10 = vadd.f32 %v2948_v20, %v2876_v40  ;;  %v9989_v35 = vmul.f32 %v8812_v60, %v3072_v62  ;;  %v13681_v18 = vld [vmem:[#allocation114_spill] sm:$0xff]  ;;  %v13682_v47 = vld [vmem:[#allocation57_spill] sm:$0xff]  ;;  %v13683_v40 = vld [vmem:[#allocation40_spill] sm:$0xff] }
 0x2d4   : > { %7570 = vpow2.f32 %v6697_v26  ;;  %v9991_v38 = vadd.f32 %v2419_v19, %v2293_v25  ;;  %v2611_v58 = vadd.f32 %v2553_v12, %v2481_v57  ;;  %v9994_v28 = vmul.f32 %v7565_v55, %v13679_v15 }
 0x2d5   : > { %v9997_v46 = vadd.f32 %v13618_v45, %v3612_v48  ;;  %v3337_v7 = vmul.f32 %v13565_v17, %v9921_v3  ;;  %v3265_v54 = vadd.f32 %v9902_v53, %v3006_v10  ;;  %7572 = vpow2.f32 %v13681_v18 }
 0x2d6   : > { %v2813_v62 = vmul.f32 %v8818_v23, %v9855_v6  ;;  %v2741_v26 = vadd.f32 %v2681_v51, %v2611_v58  ;;  %v3073_v19 = vrot.slane %v9951_v8, 1  ;;  %v2159_v57 = vrot.slane %v9994_v28, 7 }
 0x2d7   : > { %13680 = vst [vmem:[#allocation115_spill] sm:$0xff] %v9997_v46  ;;  %7574 = vpow2.f32 %v6698_v56  ;;  %v3401_v55 = vadd.f32 %v3337_v7, %v3265_v54  ;;  %v3473_v48 = vmul.f32 %v9823_v50, %v9989_v35  ;;  %v1559_v20 = vmul.f32 %v13683_v40, %v13682_v47  ;;  %v13685_v47 = vld [vmem:[#allocation116_spill] sm:$0xff] }
 0x2d8   : > { %v7567_v25 = vpop.eup %7566  ;;  %v2877_v53 = vadd.f32 %v2813_v62, %v2741_v26  ;;  %v2949_v12 = vmul.f32 %v8845_v34, %v9951_v8  ;;  %v10014_v10 = vmul.f32 %v8793_v2, %v2159_v57  ;;  %7576 = vpow2.f32 %v6643_v0  ;;  %v13684_v57 = vld [vmem:[#allocation89_spill] sm:$0xff] }
 0x2d9   : > { %v6699_v51 = vmul.f32 -1.442695, %v9997_v46  ;;  %v2294_v7 = vmul.f32 %v13646_v52, %v9927_v5  ;;  %v3531_v54 = vadd.f32 %v3473_v48, %v3401_v55  ;;  %v1892_v56 = vadd.f32 1.0, %v7563_v36  ;;  %v13686_v55 = vld [vmem:[#allocation42_spill] sm:$0xff] }
 0x2da   : > { %v7569_v58 = vpop.eup %7568  ;;  %v3007_v15 = vadd.f32 %v2949_v12, %v2877_v53  ;;  %v10020_v18 = vmul.f32 %v8812_v60, %v3073_v19  ;;  %v3206_v62 = vmul.f32 %v13663_v31, %v9906_v33  ;;  %v2420_v26 = vmul.f32 %v13588_v32, %v10014_v10  ;;  %v13688_v12 = vld [vmem:[#allocation49_spill] sm:$0xff] }
 0x2db   : > { %v3944_v0 = vadd.f32 1.0, %v13684_v57  ;;  %v3946_v46 = vadd.f32 1.0, %v13685_v47  ;;  %v2554_v5 = vmul.f32 %v8888_v39, %v10014_v10  ;;  %v10031_v36 = vadd.f32 %v13686_v55, %v1559_v20 }
 0x2dc   : > { %v3338_v19 = vmul.f32 %v13559_v29, %v9946_v21  ;;  %v3266_v48 = vadd.f32 %v3206_v62, %v3007_v15  ;;  %v10035_v53 = vadd.f32 %v2420_v26, %v2294_v7  ;;  %7578 = vrcp.f32 %v1892_v56 }
 0x2dd   : > { %13687 = vst [vmem:[#allocation112_spill] sm:$0xff] %v10031_v36  ;;  %v3945_v33 = vadd.f32 1.0, %v9885_v4  ;;  %7580 = vpow2.f32 %v6699_v51  ;;  %v2682_v57 = vmul.f32 %v13688_v12, %v9829_v61  ;;  %v2612_v47 = vadd.f32 %v2554_v5, %v9948_v30  ;;  %v10048_v61 = vpop.f32.mrb[44].mxu1 }
 0x2de   : > { %v7571_v27 = vpop.eup %7570  ;;  %v3613_v20 = vmul.f32 %v13631_v37, %v9953_v59  ;;  %v3402_v34 = vadd.f32 %v3338_v19, %v3266_v48  ;;  %v3474_v55 = vmul.f32 %v9781_v24, %v10020_v18  ;;  %v1893_v15 = vadd.f32 1.0, %v7567_v25  ;;  %13689 = vst [vmem:[#allocation110_spill] sm:$0xff] %v10048_v61  ;;  %v10051_v26 = vpop.f32.mrb[45].mxu1 }
 0x2df   : > { %v7573_v7 = vpop.eup %7572  ;;  %7582 = vrcp.f32 %v3944_v0  ;;  %v2814_v4 = vmul.f32 %v8843_v14, %v9898_v13  ;;  %v2742_v51 = vadd.f32 %v2682_v57, %v2612_v47  ;;  %v3074_v56 = vrot.slane %v9994_v28, 1  ;;  %13690 = vst [vmem:[#allocation114_spill] sm:$0xff] %v10051_v26  ;;  %v13704_v26 = vld [vmem:[#allocation102_spill] sm:$0xff] }
 0x2e0   : > { %v3614_v30 = vmul.f32 %v13613_v9, %v3530_v42  ;;  %v3532_v62 = vadd.f32 %v3474_v55, %v3402_v34  ;;  %7584 = vrcp.f32 %v1893_v15  ;;  %v1894_v59 = vadd.f32 1.0, %v7569_v58 }
 0x2e1   : > { %v7575_v5 = vpop.eup %7574  ;;  %7586 = vrcp.f32 %v3946_v46  ;;  %v3948_v25 = vadd.f32 1.0, %v7571_v27  ;;  %v2878_v19 = vadd.f32 %v2814_v4, %v2742_v51  ;;  %v2950_v0 = vmul.f32 %v8858_v22, %v9994_v28  ;;  %v10067_v46 = vpop.f32.mrb[46].mxu1 }
 0x2e2   : > { %v7577_v48 = vpop.eup %7576  ;;  %v10056_v57 = vadd.f32 1.0, %v9894_v41  ;;  %7588 = vrcp.f32 %v3945_v33  ;;  %v10059_v47 = vadd.f32 %v13638_v1, %v3613_v20  ;;  %v1895_v34 = vadd.f32 1.0, %v7573_v7  ;;  %13693 = vst [vmem:[#allocation116_spill] sm:$0xff] %v10067_v46 }
 0x2e3   : > { %v3615_v42 = vmul.f32 %v13631_v37, %v3531_v54  ;;  %v3008_v58 = vadd.f32 %v2950_v0, %v2878_v19  ;;  %v10063_v55 = vmul.f32 %v8812_v60, %v3074_v56  ;;  %v3207_v27 = vmul.f32 %v13578_v63, %v9921_v3  ;;  %v13696_v19 = vld [vmem:[#allocation55_spill] sm:$0xff] }
 0x2e4   : > { %13691 = vst [vmem:[#allocation57_spill] sm:$0xff] %v10056_v57  ;;  %13692 = vst [vmem:[#allocation89_spill] sm:$0xff] %v10059_v47  ;;  %v3949_v15 = vadd.f32 1.0, %v7575_v5  ;;  %v10070_v41 = vadd.f32 %v13618_v45, %v3614_v30  ;;  %7590 = vrcp.f32 %v1894_v59  ;;  %v10073_v33 = vmul.f32 -1.442695, %v10031_v36 }
 0x2e5   : > { %7592 = vrcp.f32 %v3948_v25  ;;  %v3339_v54 = vmul.f32 %v13565_v17, %v9989_v35  ;;  %v3267_v20 = vadd.f32 %v3207_v27, %v3008_v58  ;;  %v1896_v7 = vadd.f32 1.0, %v7577_v48 }
 0x2e6   : > { %13694 = vst [vmem:[#allocation122_spill] sm:$0xff] %v10070_v41  ;;  %v7579_v4 = vpop.eup %7578  ;;  %v6700_v51 = vmul.f32 -1.442695, %v10059_v47  ;;  %v2683_v3 = vmul.f32 %v13678_v44, %v9855_v6  ;;  %v10082_v56 = vmul.f32 %v13688_v12, %v9898_v13  ;;  %7594 = vrcp.f32 %v1895_v34 }
 0x2e7   : > { %v7581_v30 = vpop.eup %7580  ;;  %v10085_v59 = vadd.f32 %v13638_v1, %v3615_v42  ;;  %v3403_v5 = vadd.f32 %v3339_v54, %v3267_v20  ;;  %v3475_v25 = vmul.f32 %v9823_v50, %v10063_v55  ;;  %v10090_v0 = vmul.f32 %v7579_v4, %v13696_v19  ;;  %v10114_v4 = vpop.f32.mrb[47].mxu1 }
 0x2e8   : > { %7596 = vrcp.f32 %v3949_v15  ;;  %v6701_v48 = vmul.f32 -1.442695, %v10070_v41  ;;  %v10095_v6 = vmul.f32 %v13678_v44, %v9951_v8  ;;  %v2815_v13 = vmul.f32 %v8818_v23, %v9951_v8  ;;  %13698 = vst [vmem:[#allocation124_spill] sm:$0xff] %v10114_v4 }
 0x2e9   : > { %13695 = vst [vmem:[#allocation123_spill] sm:$0xff] %v10085_v59  ;;  %v10099_v34 = vpop.eup %7582  ;;  %v2295_v42 = vmul.f32 %v13635_v43, %v9973_v49  ;;  %v10103_v58 = vadd.f32 %v3475_v25, %v3403_v5  ;;  %v2160_v27 = vrot.slane %v10090_v0, 7  ;;  %7598 = vrcp.f32 %v1896_v7 }
 0x2ea   : > { %13697 = vst [vmem:[#allocation55_spill] sm:$0xff] %v10099_v34  ;;  %v7585_v15 = vpop.eup %7584  ;;  %v3950_v54 = vadd.f32 1.0, %v7581_v30  ;;  %7600 = vpow2.f32 %v6700_v51  ;;  %v10108_v20 = vmul.f32 %v13688_v12, %v9994_v28  ;;  %v10112_v8 = vmul.f32 %v8843_v14, %v9994_v28  ;;  %v13700_v30 = vld [vmem:[#allocation67_spill] sm:$0xff]  ;;  %v13715_v34 = vld [vmem:[#allocation54_spill] sm:$0xff] }
 0x2eb   : > { %v10116_v19 = vpop.eup %7586  ;;  %v6702_v49 = vmul.f32 -1.442695, %v10085_v59  ;;  %v10121_v7 = vmul.f32 %v13559_v29, %v10020_v18  ;;  %v10124_v51 = vmul.f32 %v8793_v2, %v2160_v27  ;;  %v10127_v5 = vmul.f32 %v7585_v15, %v13700_v30  ;;  %v13702_v30 = vld [vmem:[#allocation50_spill] sm:$0xff] }
 0x2ec   : > { %13699 = vst [vmem:[#allocation125_spill] sm:$0xff] %v10116_v19  ;;  %v10129_v25 = vpop.eup %7588  ;;  %7602 = vpow2.f32 %v6701_v48  ;;  %v3616_v28 = vmul.f32 %v13613_v9, %v3532_v62  ;;  %v2296_v4 = vmul.f32 %v13646_v52, %v10014_v10  ;;  %v3208_v59 = vmul.f32 %v13663_v31, %v9946_v21  ;;  %v13703_v21 = vld [vmem:[#allocation39_spill] sm:$0xff] }
 0x2ed   : > { %13701 = vst [vmem:[#allocation67_spill] sm:$0xff] %v10129_v25  ;;  %v10138_v47 = vmul.f32 %v13565_v17, %v10063_v55  ;;  %v2421_v27 = vmul.f32 %v13623_v16, %v10124_v51  ;;  %v2555_v15 = vmul.f32 %v13636_v11, %v10124_v51  ;;  %v10146_v48 = vmul.f32 %v13578_v63, %v9989_v35 }
 0x2ee   : > { %v7591_v62 = vpop.eup %7590  ;;  %7604 = vrcp.f32 %v3950_v54  ;;  %v2161_v10 = vrot.slane %v10127_v5, 7  ;;  %v1560_v46 = vmul.f32 %v13703_v21, %v13702_v30  ;;  %v1561_v61 = vmul.f32 %v13683_v40, %v13704_v26  ;;  %v13707_v30 = vld [vmem:[#allocation106_spill] sm:$0xff] }
 0x2ef   : > { %v10153_v41 = vpop.eup %7592  ;;  %7606 = vpow2.f32 %v6702_v49  ;;  %v2485_v12 = vadd.f32 %v2421_v27, %v2295_v42  ;;  %v2613_v25 = vadd.f32 %v2555_v15, %v9991_v38  ;;  %v10158_v35 = vmul.f32 %v13663_v31, %v10020_v18  ;;  %v13708_v27 = vld [vmem:[#allocation96_spill] sm:$0xff]  ;;  %v13709_v15 = vld [vmem:[#allocation107_spill] sm:$0xff] }
 0x2f0   : > { %13705 = vst [vmem:[#allocation50_spill] sm:$0xff] %v10153_v41  ;;  %v7595_v36 = vpop.eup %7594  ;;  %v10161_v54 = vadd.f32 %v13618_v45, %v3616_v28  ;;  %v10164_v19 = vmul.f32 %v8793_v2, %v2161_v10  ;;  %v10168_v26 = vmul.f32 %v13578_v63, %v10063_v55  ;;  %v1562_v42 = vmul.f32 %v13703_v21, %v13707_v30  ;;  %v13712_v63 = vld [vmem:[#allocation41_spill] sm:$0xff] }
 0x2f1   : > { %v2743_v49 = vadd.f32 %v2683_v3, %v2613_v25  ;;  %v3075_v38 = vrot.slane %v10090_v0, 1  ;;  %v10174_v18 = vmul.f32 %v7591_v62, %v13708_v27  ;;  %v10178_v28 = vmul.f32 %v13683_v40, %v13709_v15  ;;  %v13713_v3 = vld [vmem:[#allocation42_spill] sm:$0xff] }
 0x2f2   : > { %13706 = vst [vmem:[#allocation102_spill] sm:$0xff] %v10161_v54  ;;  %v10180_v41 = vpop.eup %7596  ;;  %v2422_v10 = vmul.f32 %v13588_v32, %v10164_v19  ;;  %v2556_v55 = vmul.f32 %v8888_v39, %v10164_v19  ;;  %v10187_v30 = vadd.f32 %v13712_v63, %v1560_v46  ;;  %v10190_v25 = vadd.f32 %v13713_v3, %v1561_v61 }
 0x2f3   : > { %13710 = vst [vmem:[#allocation106_spill] sm:$0xff] %v10178_v28  ;;  %13711 = vst [vmem:[#allocation96_spill] sm:$0xff] %v10180_v41  ;;  %v7599_v62 = vpop.eup %7598  ;;  %v2879_v27 = vadd.f32 %v2815_v13, %v2743_v49  ;;  %v2951_v15 = vmul.f32 %v13715_v34, %v10090_v0  ;;  %v2162_v57 = vrot.slane %v10174_v18, 7  ;;  %v13716_v41 = vld [vmem:[#allocation111_spill] sm:$0xff]  ;;  %v6703_v45 = vmul.f32 -1.442695, %v10161_v54 }
 0x2f4   : > { %13714 = vst [vmem:[#allocation107_spill] sm:$0xff] %v10190_v25  ;;  %v10196_v40 = vmul.f32 %v7595_v36, %v13716_v41  ;;  %v10198_v28 = vpop.eup %7600  ;;  %v2486_v21 = vadd.f32 %v2422_v10, %v2296_v4  ;;  %v2614_v46 = vadd.f32 %v2556_v55, %v10035_v53  ;;  %v10203_v61 = vadd.f32 %v13712_v63, %v1562_v42 }
 0x2f5   : > { %13717 = vst [vmem:[#allocation111_spill] sm:$0xff] %v10198_v28  ;;  %v3009_v3 = vadd.f32 %v2951_v15, %v2879_v27  ;;  %v10206_v13 = vmul.f32 %v8812_v60, %v3075_v38  ;;  %v3076_v49 = vrot.slane %v10127_v5, 1  ;;  %v2227_v32 = vmul.f32 %v8793_v2, %v2162_v57  ;;  %v13719_v28 = vld [vmem:[#allocation113_spill] sm:$0xff] }
 0x2f6   : > { %13718 = vst [vmem:[#allocation126_spill] sm:$0xff] %v10203_v61  ;;  %v10210_v36 = vpop.eup %7602  ;;  %v2744_v41 = vadd.f32 %v10082_v56, %v2614_v46  ;;  %v10214_v54 = vmul.f32 %v7599_v62, %v13719_v28  ;;  %7608 = vpow2.f32 %v10073_v33  ;;  %v6645_v53 = vmul.f32 -1.442695, %v10187_v30 }
 0x2f7   : > { %v3268_v4 = vadd.f32 %v3208_v59, %v3009_v3  ;;  %v2557_v42 = vmul.f32 %v13636_v11, %v2227_v32  ;;  %v2163_v38 = vrot.slane %v10196_v40, 7  ;;  %v6646_v10 = vmul.f32 -1.442695, %v10190_v25 }
 0x2f8   : > { %v10221_v55 = vpop.eup %7604  ;;  %7610 = vpow2.f32 %v6703_v45  ;;  %v2880_v57 = vadd.f32 %v10112_v8, %v2744_v41  ;;  %v2952_v56 = vmul.f32 %v8858_v22, %v10127_v5  ;;  %v10227_v28 = vmul.f32 -1.442695, %v10203_v61 }
 0x2f9   : > { %v10229_v33 = vpop.eup %7606  ;;  %v3404_v59 = vadd.f32 %v10121_v7, %v3268_v4  ;;  %v3476_v3 = vmul.f32 %v9781_v24, %v10206_v13  ;;  %v10235_v62 = vmul.f32 %v8812_v60, %v3076_v49  ;;  %v2615_v27 = vadd.f32 %v2557_v42, %v2485_v12 }
 0x2fa   : > { %v3010_v45 = vadd.f32 %v2952_v56, %v2880_v57  ;;  %v3077_v8 = vrot.slane %v10174_v18, 1  ;;  %v10239_v15 = vmul.f32 %v8793_v2, %v2163_v38  ;;  %v2164_v46 = vrot.slane %v10214_v54, 7 }
 0x2fb   : > { %v3617_v41 = vmul.f32 %v13631_v37, %v10103_v58  ;;  %v2817_v7 = vmul.f32 %v8818_v23, %v10090_v0  ;;  %v3534_v4 = vadd.f32 %v3476_v3, %v3404_v59  ;;  %v2745_v61 = vadd.f32 %v10095_v6, %v2615_v27 }
 0x2fc   : > { %v2818_v12 = vmul.f32 %v8843_v14, %v10127_v5  ;;  %v3269_v49 = vadd.f32 %v10146_v48, %v3010_v45  ;;  %v2558_v42 = vmul.f32 %v8888_v39, %v10239_v15  ;;  %7612 = vpow2.f32 %v6645_v53 }
 0x2fd   : > { %v3477_v38 = vmul.f32 %v9823_v50, %v10235_v62  ;;  %v2881_v57 = vadd.f32 %v2817_v7, %v2745_v61  ;;  %v2953_v58 = vmul.f32 %v13715_v34, %v10174_v18  ;;  %v2229_v56 = vmul.f32 %v8793_v2, %v2164_v46 }
 0x2fe   : > { %v3405_v6 = vadd.f32 %v10138_v47, %v3269_v49  ;;  %v3142_v59 = vmul.f32 %v8812_v60, %v3077_v8  ;;  %v2616_v3 = vadd.f32 %v2558_v42, %v2486_v21  ;;  %v3078_v48 = vrot.slane %v10196_v40, 1 }
 0x2ff   : > { %v3011_v27 = vadd.f32 %v2953_v58, %v2881_v57  ;;  %v2297_v53 = vmul.f32 %v13635_v43, %v10124_v51  ;;  %v2423_v45 = vmul.f32 %v13623_v16, %v2227_v32  ;;  %v2425_v61 = vmul.f32 %v13623_v16, %v2229_v56 }
 0x300   : > { %v7609_v7 = vpop.eup %7608  ;;  %v10264_v25 = vadd.f32 %v3477_v38, %v3405_v6  ;;  %v2746_v46 = vadd.f32 %v10108_v20, %v2616_v3  ;;  %v2299_v47 = vmul.f32 %v13635_v43, %v2227_v32  ;;  %v2559_v8 = vmul.f32 %v13636_v11, %v2229_v56  ;;  %v10281_v56 = vpop.f32.mrb[48].mxu1 }
 0x301   : > { %v2687_v21 = vmul.f32 %v13678_v44, %v10090_v0  ;;  %v3342_v49 = vmul.f32 %v13559_v29, %v10206_v13  ;;  %v3270_v51 = vadd.f32 %v10158_v35, %v3011_v27  ;;  %v2487_v42 = vadd.f32 %v2423_v45, %v2297_v53  ;;  %13721 = vst [vmem:[#allocation127_spill] sm:$0xff] %v10281_v56 }
 0x302   : > { %v10274_v57 = vpop.eup %7610  ;;  %v10277_v38 = vadd.f32 %v13638_v1, %v3617_v41  ;;  %v2882_v58 = vadd.f32 %v2818_v12, %v2746_v46  ;;  %v2954_v32 = vmul.f32 %v8858_v22, %v10196_v40  ;;  %v2489_v20 = vadd.f32 %v2425_v61, %v2299_v47  ;;  %v13722_v41 = vld [vmem:[#allocation62_spill] sm:$0xff]  ;;  %v10291_v46 = vpop.f32.mrb[49].mxu1 }
 0x303   : > { %v2689_v0 = vmul.f32 %v13678_v44, %v10174_v18  ;;  %v3406_v6 = vadd.f32 %v3342_v49, %v3270_v51  ;;  %v3478_v3 = vmul.f32 %v9781_v24, %v3142_v59  ;;  %v2617_v35 = vadd.f32 %v2559_v8, %v2487_v42  ;;  %13723 = vst [vmem:[#allocation128_spill] sm:$0xff] %v10291_v46 }
 0x304   : > { %13720 = vst [vmem:[#allocation113_spill] sm:$0xff] %v10277_v38  ;;  %v3012_v27 = vadd.f32 %v2954_v32, %v2882_v58  ;;  %v10287_v53 = vmul.f32 %v8812_v60, %v3078_v48  ;;  %v2619_v45 = vadd.f32 %v13722_v41, %v2489_v20  ;;  %v3079_v12 = vrot.slane %v10214_v54, 1 }
 0x305   : > { %v2819_v61 = vmul.f32 %v8818_v23, %v10174_v18  ;;  %v3536_v47 = vadd.f32 %v3478_v3, %v3406_v6  ;;  %v2747_v56 = vadd.f32 %v2687_v21, %v2617_v35  ;;  %7614 = vpow2.f32 %v6646_v10 }
 0x306   : > { %v7613_v49 = vpop.eup %7612  ;;  %v3343_v8 = vmul.f32 %v13565_v17, %v10235_v62  ;;  %v3271_v51 = vadd.f32 %v10168_v26, %v3012_v27  ;;  %v2749_v48 = vadd.f32 %v2689_v0, %v2619_v45  ;;  %v2821_v42 = vmul.f32 %v8818_v23, %v10214_v54  ;;  %v10307_v26 = vpop.f32.mrb[50].mxu1  ;;  %v13726_v45 = vld [vmem:[#allocation101_spill] sm:$0xff] }
 0x307   : > { %v6704_v58 = vmul.f32 -1.442695, %v10277_v38  ;;  %v3618_v32 = vmul.f32 %v13613_v9, %v3534_v4  ;;  %v2883_v20 = vadd.f32 %v2819_v61, %v2747_v56  ;;  %v2955_v18 = vmul.f32 %v13715_v34, %v10214_v54  ;;  %13724 = vst [vmem:[#allocation129_spill] sm:$0xff] %v10307_v26 }
 0x308   : > { %v3407_v21 = vadd.f32 %v3343_v8, %v3271_v51  ;;  %v3479_v10 = vmul.f32 %v9823_v50, %v10287_v53  ;;  %v2885_v6 = vadd.f32 %v2821_v42, %v2749_v48  ;;  %v3144_v3 = vmul.f32 %v8812_v60, %v3079_v12  ;;  %v13727_v50 = vld [vmem:[#allocation58_spill] sm:$0xff]  ;;  %v13728_v48 = vld [vmem:[#allocation84_spill] sm:$0xff]  ;;  %v13729_v42 = vld [vmem:[#allocation39_spill] sm:$0xff] }
 0x309   : > { %v3013_v0 = vadd.f32 %v2955_v18, %v2883_v20  ;;  %v3212_v35 = vmul.f32 %v13663_v31, %v10206_v13  ;;  %v3214_v27 = vmul.f32 %v13663_v31, %v3142_v59  ;;  %v1897_v4 = vadd.f32 1.0, %v7609_v7 }
 0x30a   : > { %v10312_v56 = vadd.f32 %v3479_v10, %v3407_v21  ;;  %v3015_v54 = vadd.f32 %v13726_v45, %v2885_v6  ;;  %v2298_v61 = vmul.f32 %v13646_v52, %v10164_v19  ;;  %v2424_v8 = vmul.f32 %v13727_v50, %v10239_v15  ;;  %v13730_v21 = vld [vmem:[#allocation80_spill] sm:$0xff]  ;;  %v13766_v45 = vld [vmem:[#allocation67_spill] sm:$0xff] }
 0x30b   : > { %v3272_v12 = vadd.f32 %v3212_v35, %v3013_v0  ;;  %v3344_v51 = vmul.f32 %v13559_v29, %v3142_v59  ;;  %7616 = vrcp.f32 %v1897_v4  ;;  %v1564_v13 = vmul.f32 %v13729_v42, %v13728_v48  ;;  %v13732_v0 = vld [vmem:[#allocation111_spill] sm:$0xff]  ;;  %v13733_v4 = vld [vmem:[#allocation106_spill] sm:$0xff] }
 0x30c   : > { %13725 = vst [vmem:[#allocation130_spill] sm:$0xff] %v10312_v56  ;;  %7618 = vpow2.f32 %v6704_v58  ;;  %v3274_v20 = vadd.f32 %v3214_v27, %v3015_v54  ;;  %v3346_v7 = vmul.f32 %v13559_v29, %v3144_v3  ;;  %v10323_v18 = vadd.f32 %v2424_v8, %v2298_v61  ;;  %v13734_v58 = vld [vmem:[#allocation42_spill] sm:$0xff]  ;;  %v13736_v8 = vld [vmem:[#allocation88_spill] sm:$0xff] }
 0x30d   : > { %v10326_v10 = vadd.f32 %v13730_v21, %v3618_v32  ;;  %v3408_v19 = vadd.f32 %v3344_v51, %v3272_v12  ;;  %v3480_v6 = vmul.f32 %v9781_v24, %v3144_v3  ;;  %v1898_v38 = vadd.f32 1.0, %v7613_v49  ;;  %v13735_v61 = vld [vmem:[#allocation82_spill] sm:$0xff]  ;;  %v13739_v51 = vld [vmem:[#allocation40_spill] sm:$0xff] }
 0x30e   : > { %v3951_v35 = vadd.f32 1.0, %v13732_v0  ;;  %v10330_v59 = vadd.f32 %v3346_v7, %v3274_v20  ;;  %7620 = vpow2.f32 %v10227_v28  ;;  %v10335_v27 = vadd.f32 %v13734_v58, %v13733_v4  ;;  %v13738_v3 = vld [vmem:[#allocation74_spill] sm:$0xff]  ;;  %v13740_v7 = vld [vmem:[#allocation52_spill] sm:$0xff]  ;;  %v13741_v0 = vld [vmem:[#allocation103_spill] sm:$0xff] }
 0x30f   : > { %13731 = vst [vmem:[#allocation84_spill] sm:$0xff] %v10326_v10  ;;  %v7615_v54 = vpop.eup %7614  ;;  %v10339_v48 = vmul.f32 %v13736_v8, %v13735_v61  ;;  %v3952_v32 = vadd.f32 1.0, %v10210_v36  ;;  %v10342_v12 = vadd.f32 %v3480_v6, %v3408_v19  ;;  %7622 = vrcp.f32 %v1898_v38  ;;  %v13743_v61 = vld [vmem:[#allocation105_spill] sm:$0xff]  ;;  %v13744_v36 = vld [vmem:[#allocation51_spill] sm:$0xff] }
 0x310   : > { %v3953_v24 = vadd.f32 1.0, %v10229_v33  ;;  %v3619_v49 = vmul.f32 %v13631_v37, %v10264_v25  ;;  %v10348_v28 = vadd.f32 %v13712_v63, %v1564_v13  ;;  %v1565_v20 = vmul.f32 %v13739_v51, %v13738_v3  ;;  %v13746_v38 = vld [vmem:[#allocation57_spill] sm:$0xff] }
 0x311   : > { %13737 = vst [vmem:[#allocation111_spill] sm:$0xff] %v10339_v48  ;;  %v10354_v4 = vmul.f32 %v13741_v0, %v13740_v7  ;;  %v10358_v19 = vmul.f32 %v13744_v36, %v13743_v61  ;;  %7624 = vrcp.f32 %v13746_v38  ;;  %v6705_v33 = vmul.f32 -1.442695, %v10326_v10  ;;  %v13747_v6 = vld [vmem:[#allocation93_spill] sm:$0xff]  ;;  %v13750_v7 = vld [vmem:[#allocation78_spill] sm:$0xff] }
 0x312   : > { %v13748_v25 = vld [vmem:[#allocation97_spill] sm:$0xff]  ;;  %7626 = vrcp.f32 %v3951_v35  ;;  %v6648_v13 = vmul.f32 -1.442695, %v10335_v27  ;;  %v10368_v3 = vadd.f32 %v13734_v58, %v1565_v20  ;;  %v4191_v0 = vadd.f32 %v13750_v7, %v10339_v48  ;;  %v13755_v20 = vld [vmem:[#allocation108_spill] sm:$0xff] }
 0x313   : > { %13742 = vst [vmem:[#allocation106_spill] sm:$0xff] %v10354_v4  ;;  %13745 = vst [vmem:[#allocation82_spill] sm:$0xff] %v10358_v19  ;;  %v10364_v8 = vmul.f32 %v13748_v25, %v13747_v6  ;;  %7628 = vrcp.f32 %v3952_v32  ;;  %v3620_v61 = vmul.f32 %v13613_v9, %v3536_v47  ;;  %v1899_v36 = vadd.f32 1.0, %v7615_v54  ;;  %v13751_v38 = vld [vmem:[#allocation77_spill] sm:$0xff]  ;;  %v13752_v4 = vld [vmem:[#allocation75_spill] sm:$0xff] }
 0x314   : > { %v10375_v56 = vmul.f32 %v13752_v4, %v13751_v38  ;;  %7630 = vrcp.f32 %v3953_v24  ;;  %v10378_v6 = vadd.f32 %v13638_v1, %v3619_v49  ;;  %v6649_v35 = vmul.f32 -1.442695, %v10348_v28  ;;  %v13757_v7 = vld [vmem:[#allocation85_spill] sm:$0xff]  ;;  %v13758_v32 = vld [vmem:[#allocation55_spill] sm:$0xff]  ;;  %v13761_v24 = vld [vmem:[#allocation86_spill] sm:$0xff] }
 0x315   : > { %13749 = vst [vmem:[#allocation88_spill] sm:$0xff] %v10364_v8  ;;  %v7617_v25 = vpop.eup %7616  ;;  %v10383_v8 = vmul.f32 %v13631_v37, %v13755_v20  ;;  %v10387_v48 = vmul.f32 %v13758_v32, %v13757_v7  ;;  %v10390_v47 = vadd.f32 %v4191_v0, %v10358_v19  ;;  %7632 = vpow2.f32 %v6705_v33  ;;  %v13762_v4 = vld [vmem:[#allocation125_spill] sm:$0xff]  ;;  %v13764_v38 = vld [vmem:[#allocation112_spill] sm:$0xff]  ;;  %v13768_v7 = vld [vmem:[#allocation119_spill] sm:$0xff] }
 0x316   : > { %13753 = vst [vmem:[#allocation74_spill] sm:$0xff] %v10375_v56  ;;  %13754 = vst [vmem:[#allocation52_spill] sm:$0xff] %v10378_v6  ;;  %v7619_v54 = vpop.eup %7618  ;;  %v10394_v49 = vmul.f32 %v13762_v4, %v13761_v24  ;;  %v10397_v56 = vmul.f32 %v7617_v25, %v13764_v38  ;;  %7634 = vpow2.f32 %v6648_v13  ;;  %v6650_v20 = vmul.f32 -1.442695, %v10368_v3  ;;  %v13769_v32 = vld [vmem:[#allocation50_spill] sm:$0xff]  ;;  %v13772_v4 = vld [vmem:[#allocation120_spill] sm:$0xff] }
 0x317   : > { %13756 = vst [vmem:[#allocation103_spill] sm:$0xff] %v10383_v8  ;;  %13759 = vst [vmem:[#allocation105_spill] sm:$0xff] %v10387_v48  ;;  %v13765_v8 = vld [vmem:[#allocation99_spill] sm:$0xff]  ;;  %v10406_v0 = vmul.f32 %v13769_v32, %v13768_v7  ;;  %v10409_v33 = vadd.f32 %v13730_v21, %v3620_v61  ;;  %7636 = vrcp.f32 %v1899_v36  ;;  %v13773_v19 = vld [vmem:[#allocation96_spill] sm:$0xff]  ;;  %v6706_v13 = vmul.f32 -1.442695, %v10378_v6 }
 0x318   : > { %13760 = vst [vmem:[#allocation51_spill] sm:$0xff] %v10390_v47  ;;  %13763 = vst [vmem:[#allocation57_spill] sm:$0xff] %v10394_v49  ;;  %v10402_v41 = vmul.f32 %v13766_v45, %v13765_v8  ;;  %v7621_v24 = vpop.eup %7620  ;;  %v10413_v25 = vmul.f32 %v13773_v19, %v13772_v4  ;;  %v2165_v38 = vrot.slane %v10397_v56, 7  ;;  %7638 = vpow2.f32 %v6649_v35  ;;  %v10417_v45 = vpop.f32.mrb[51].mxu1  ;;  %v13776_v49 = vld [vmem:[#allocation90_spill] sm:$0xff]  ;;  %v13777_v36 = vld [vmem:[#allocation87_spill] sm:$0xff] }
 0x319   : > { %13770 = vst [vmem:[#allocation97_spill] sm:$0xff] %v10406_v0  ;;  %13771 = vst [vmem:[#allocation78_spill] sm:$0xff] %v10409_v33  ;;  %v7623_v8 = vpop.eup %7622  ;;  %v3954_v7 = vadd.f32 1.0, %v10274_v57  ;;  %v1900_v32 = vadd.f32 1.0, %v7621_v24  ;;  %v1566_v61 = vmul.f32 %v13729_v42, %v13776_v49  ;;  %v13778_v47 = vld [vmem:[#allocation115_spill] sm:$0xff]  ;;  %v3955_v4 = vadd.f32 1.0, %v7619_v54 }
 0x31a   : > { %13767 = vst [vmem:[#allocation93_spill] sm:$0xff] %v10402_v41  ;;  %13774 = vst [vmem:[#allocation77_spill] sm:$0xff] %v10413_v25  ;;  %v1567_v41 = vmul.f32 %v13739_v51, %v13777_v36  ;;  %v10426_v19 = vmul.f32 %v10221_v55, %v13778_v47  ;;  %v2230_v48 = vmul.f32 %v8793_v2, %v2165_v38  ;;  %7640 = vpow2.f32 %v6650_v20  ;;  %v13781_v6 = vld [vmem:[#allocation49_spill] sm:$0xff] }
 0x31b   : > { %13775 = vst [vmem:[#allocation75_spill] sm:$0xff] %v10417_v45  ;;  %v10429_v35 = vpop.eup %7624  ;;  %v2688_v57 = vmul.f32 %v13781_v6, %v10127_v5  ;;  %v6707_v24 = vmul.f32 -1.442695, %v10409_v33  ;;  %v10435_v49 = vmul.f32 %v7623_v8, %v10187_v30  ;;  %7642 = vrcp.f32 %v1900_v32  ;;  %v13783_v5 = vld [vmem:[#allocation83_spill] sm:$0xff] }
 0x31c   : > { %13779 = vst [vmem:[#allocation108_spill] sm:$0xff] %v10426_v19  ;;  %13780 = vst [vmem:[#allocation85_spill] sm:$0xff] %v10429_v35  ;;  %v10437_v36 = vpop.eup %7626  ;;  %7644 = vpow2.f32 %v6706_v13  ;;  %v2300_v55 = vmul.f32 %v13646_v52, %v10239_v15  ;;  %v2426_v47 = vmul.f32 %v13727_v50, %v2230_v48  ;;  %v2560_v54 = vmul.f32 %v8888_v39, %v2230_v48 }
 0x31d   : > { %13782 = vst [vmem:[#allocation55_spill] sm:$0xff] %v10437_v36  ;;  %v10443_v20 = vpop.eup %7628  ;;  %7646 = vrcp.f32 %v3954_v7  ;;  %v3540_v38 = vadd.f32 %v13783_v5, %v10330_v59  ;;  %v10448_v30 = vadd.f32 %v13712_v63, %v1566_v61  ;;  %v10451_v8 = vadd.f32 %v13734_v58, %v1567_v41  ;;  %v13787_v7 = vld [vmem:[#allocation60_spill] sm:$0xff]  ;;  %v13788_v5 = vld [vmem:[#allocation43_spill] sm:$0xff] }
 0x31e   : > { %v10453_v13 = vpop.eup %7630  ;;  %7648 = vrcp.f32 %v3955_v4  ;;  %v2690_v15 = vmul.f32 %v13781_v6, %v10196_v40  ;;  %v2490_v32 = vadd.f32 %v2426_v47, %v2300_v55  ;;  %v2618_v48 = vadd.f32 %v2560_v54, %v10323_v18  ;;  %v10467_v18 = vpop.f32.mrb[52].mxu1 }
 0x31f   : > { %13784 = vst [vmem:[#allocation86_spill] sm:$0xff] %v10448_v30  ;;  %13785 = vst [vmem:[#allocation125_spill] sm:$0xff] %v10451_v8  ;;  %v7633_v35 = vpop.eup %7632  ;;  %7650 = vpow2.f32 %v6707_v24  ;;  %v2820_v59 = vmul.f32 %v8843_v14, %v10196_v40  ;;  %v3213_v61 = vmul.f32 %v13787_v7, %v10235_v62  ;;  %v2166_v41 = vrot.slane %v10435_v49, 7 }
 0x320   : > { %13786 = vst [vmem:[#allocation112_spill] sm:$0xff] %v10453_v13  ;;  %v7635_v25 = vpop.eup %7634  ;;  %v3622_v4 = vmul.f32 %v13613_v9, %v10342_v12  ;;  %v2620_v13 = vadd.f32 %v13788_v5, %v2490_v32  ;;  %v2748_v45 = vadd.f32 %v2688_v57, %v2618_v48  ;;  %v3080_v55 = vrot.slane %v10397_v56, 1  ;;  %13789 = vst [vmem:[#allocation99_spill] sm:$0xff] %v10467_v18  ;;  %v10478_v48 = vpop.f32.mrb[53].mxu1 }
 0x321   : > { %v7637_v24 = vpop.eup %7636  ;;  %v3624_v47 = vmul.f32 %v13613_v9, %v3540_v38  ;;  %v3215_v40 = vmul.f32 %v13787_v7, %v10287_v53  ;;  %v6651_v62 = vmul.f32 -1.442695, %v10448_v30  ;;  %v6652_v54 = vmul.f32 -1.442695, %v10451_v8  ;;  %13790 = vst [vmem:[#allocation67_spill] sm:$0xff] %v10478_v48  ;;  %v13793_v48 = vld [vmem:[#allocation107_spill] sm:$0xff] }
 0x322   : > { %v7639_v26 = vpop.eup %7638  ;;  %v2750_v46 = vadd.f32 %v2690_v15, %v2620_v13  ;;  %v2822_v12 = vmul.f32 %v8843_v14, %v10397_v56  ;;  %v2884_v57 = vadd.f32 %v2820_v59, %v2748_v45  ;;  %v2956_v32 = vmul.f32 %v8858_v22, %v10397_v56  ;;  %v13795_v30 = vld [vmem:[#allocation126_spill] sm:$0xff] }
 0x323   : > { %v3956_v5 = vadd.f32 1.0, %v7633_v35  ;;  %v3345_v38 = vmul.f32 %v13565_v17, %v10287_v53  ;;  %v2231_v18 = vmul.f32 %v8793_v2, %v2166_v41  ;;  %v1901_v33 = vadd.f32 1.0, %v7635_v25  ;;  %v13794_v41 = vld [vmem:[#allocation94_spill] sm:$0xff] }
 0x324   : > { %v7641_v10 = vpop.eup %7640  ;;  %v10484_v36 = vadd.f32 %v13730_v21, %v3622_v4  ;;  %v2886_v13 = vadd.f32 %v2822_v12, %v2750_v46  ;;  %v3014_v15 = vadd.f32 %v2956_v32, %v2884_v57  ;;  %v3145_v45 = vmul.f32 %v8812_v60, %v3080_v55  ;;  %v13797_v12 = vld [vmem:[#allocation69_spill] sm:$0xff] }
 0x325   : > { %v7643_v59 = vpop.eup %7642  ;;  %v10488_v56 = vadd.f32 %v13730_v21, %v3624_v47  ;;  %v10491_v35 = vmul.f32 %v7637_v24, %v13793_v48  ;;  %v1902_v9 = vadd.f32 1.0, %v7639_v26  ;;  %7652 = vpow2.f32 %v6651_v62 }
 0x326   : > { %13791 = vst [vmem:[#allocation119_spill] sm:$0xff] %v10484_v36  ;;  %v7645_v53 = vpop.eup %7644  ;;  %v3016_v25 = vadd.f32 %v13794_v41, %v2886_v13  ;;  %v3273_v8 = vadd.f32 %v3213_v61, %v3014_v15  ;;  %v10495_v4 = vmul.f32 %v7643_v59, %v13795_v30  ;;  %7654 = vpow2.f32 %v6652_v54  ;;  %v10508_v30 = vld [vmem:[%s13086_s5 + $0x18] ss:$0 sm:$0xff]  ;;  %v10511_v54 = vpop.f32.mrb[54].mxu1 }
 0x327   : > { %13792 = vst [vmem:[#allocation50_spill] sm:$0xff] %v10488_v56  ;;  %v10497_v46 = vpop.eup %7646  ;;  %v2427_v55 = vmul.f32 %v13623_v16, %v2231_v18  ;;  %7656 = vrcp.f32 %v1901_v33  ;;  %v1903_v47 = vadd.f32 1.0, %v7641_v10  ;;  %v1568_v24 = vmul.f32 %v13729_v42, %v13797_v12  ;;  %13799 = vst [vmem:[#allocation90_spill] sm:$0xff] %v10511_v54  ;;  %v13800_v15 = vld [vmem:[#allocation117_spill] sm:$0xff] }
 0x328   : > { %13796 = vst [vmem:[#allocation120_spill] sm:$0xff] %v10497_v46  ;;  %v10502_v57 = vpop.eup %7648  ;;  %v3275_v26 = vadd.f32 %v3215_v40, %v3016_v25  ;;  %v3347_v62 = vmul.f32 %v13565_v17, %v3145_v45  ;;  %v3409_v32 = vadd.f32 %v3345_v38, %v3273_v8  ;;  %v3481_v61 = vmul.f32 %v10508_v30, %v3145_v45  ;;  %v13801_v25 = vld [vmem:[#allocation47_spill] sm:$0xff] }
 0x329   : > { %13798 = vst [vmem:[#allocation96_spill] sm:$0xff] %v10502_v57  ;;  %v7651_v33 = vpop.eup %7650  ;;  %v3957_v10 = vadd.f32 1.0, %v7645_v53  ;;  %v6709_v48 = vmul.f32 -1.442695, %v10484_v36  ;;  %v2168_v13 = vrot.slane %v10495_v4, 7  ;;  %v1569_v40 = vmul.f32 %v13739_v51, %v13800_v15 }
 0x32a   : > { %v10517_v59 = vadd.f32 %v3347_v62, %v3275_v26  ;;  %v10519_v8 = vadd.f32 %v3481_v61, %v3409_v32  ;;  %v2167_v38 = vrot.slane %v10491_v35, 7  ;;  %7658 = vrcp.f32 %v1902_v9  ;;  %v13804_v61 = vld [vmem:[#allocation122_spill] sm:$0xff] }
 0x32b   : > { %v6711_v45 = vmul.f32 -1.442695, %v10488_v56  ;;  %v2491_v12 = vadd.f32 %v2427_v55, %v13801_v25  ;;  %v10525_v53 = vmul.f32 %v8793_v2, %v2168_v13  ;;  %7660 = vrcp.f32 %v1903_v47 }
 0x32c   : > { %v10529_v57 = vadd.f32 %v10426_v19, %v10406_v0  ;;  %7662 = vrcp.f32 %v3956_v5  ;;  %v3958_v26 = vadd.f32 1.0, %v7651_v33  ;;  %v10532_v62 = vadd.f32 %v13712_v63, %v1568_v24 }
 0x32d   : > { %7664 = vrcp.f32 %v3957_v10  ;;  %v2301_v9 = vmul.f32 %v13635_v43, %v2231_v18  ;;  %v2429_v32 = vmul.f32 %v13623_v16, %v10525_v53  ;;  %v2561_v55 = vmul.f32 %v13636_v11, %v10525_v53 }
 0x32e   : > { %13802 = vst [vmem:[#allocation87_spill] sm:$0xff] %v10529_v57  ;;  %13803 = vst [vmem:[#allocation115_spill] sm:$0xff] %v10532_v62  ;;  %v10541_v47 = vmul.f32 %v10443_v20, %v13804_v61  ;;  %7666 = vpow2.f32 %v6709_v48  ;;  %v3081_v5 = vrot.slane %v10435_v49, 1  ;;  %v2232_v33 = vmul.f32 %v8793_v2, %v2167_v38  ;;  %v13807_v20 = vld [vmem:[#allocation118_spill] sm:$0xff]  ;;  %v13808_v61 = vld [vmem:[#allocation121_spill] sm:$0xff] }
 0x32f   : > { %v7653_v24 = vpop.eup %7652  ;;  %7668 = vpow2.f32 %v6711_v45  ;;  %v10545_v10 = vadd.f32 %v2429_v32, %v2301_v9  ;;  %v2621_v18 = vadd.f32 %v2561_v55, %v2491_v12  ;;  %v10548_v13 = vadd.f32 %v13734_v58, %v1569_v40  ;;  %v13810_v9 = vld [vmem:[#allocation70_spill] sm:$0xff] }
 0x330   : > { %13805 = vst [vmem:[#allocation107_spill] sm:$0xff] %v10541_v47  ;;  %v7655_v15 = vpop.eup %7654  ;;  %7670 = vrcp.f32 %v3958_v26  ;;  %v10551_v19 = vmul.f32 -1.442695, %v10532_v62  ;;  %v10555_v48 = vmul.f32 %v13729_v42, %v13807_v20  ;;  %v10559_v38 = vmul.f32 %v13739_v51, %v13808_v61 }
 0x331   : > { %13806 = vst [vmem:[#allocation126_spill] sm:$0xff] %v10548_v13  ;;  %v7657_v45 = vpop.eup %7656  ;;  %v2823_v12 = vmul.f32 %v8818_v23, %v10435_v49  ;;  %v3082_v40 = vrot.slane %v10491_v35, 1  ;;  %v2751_v32 = vadd.f32 %v13810_v9, %v2621_v18  ;;  %v3083_v26 = vrot.slane %v10495_v4, 1 }
 0x332   : > { %13809 = vst [vmem:[#allocation69_spill] sm:$0xff] %v10559_v38  ;;  %v3146_v55 = vmul.f32 %v8812_v60, %v3081_v5  ;;  %v2428_v0 = vmul.f32 %v13727_v50, %v2232_v33  ;;  %v10569_v20 = vmul.f32 %v7657_v45, %v10335_v27  ;;  %v1904_v25 = vadd.f32 1.0, %v7653_v24  ;;  %v10585_v45 = vpop.f32.mrb[55].mxu1  ;;  %v13826_v38 = vld [vmem:[#allocation125_spill] sm:$0xff] }
 0x333   : > { %v2887_v61 = vadd.f32 %v2823_v12, %v2751_v32  ;;  %v2957_v41 = vmul.f32 %v13715_v34, %v10495_v4  ;;  %v1905_v56 = vadd.f32 1.0, %v7655_v15  ;;  %v10574_v54 = vmul.f32 -1.442695, %v10548_v13  ;;  %13811 = vst [vmem:[#allocation117_spill] sm:$0xff] %v10585_v45 }
 0x334   : > { %v7659_v36 = vpop.eup %7658  ;;  %v2691_v18 = vmul.f32 %v13678_v44, %v10435_v49  ;;  %v10580_v5 = vmul.f32 %v13781_v6, %v10491_v35  ;;  %v2824_v27 = vmul.f32 %v8843_v14, %v10491_v35  ;;  %v2169_v24 = vrot.slane %v10569_v20, 7  ;;  %v13813_v35 = vld [vmem:[#allocation63_spill] sm:$0xff] }
 0x335   : > { %v7661_v12 = vpop.eup %7660  ;;  %v3147_v15 = vmul.f32 %v8812_v60, %v3082_v40  ;;  %v3017_v32 = vadd.f32 %v2957_v41, %v2887_v61  ;;  %v10589_v9 = vmul.f32 %v8812_v60, %v3083_v26  ;;  %v10592_v49 = vmul.f32 %v7659_v36, %v10348_v28  ;;  %v13815_v40 = vld [vmem:[#allocation73_spill] sm:$0xff] }
 0x336   : > { %v10594_v13 = vpop.eup %7662  ;;  %v10597_v62 = vmul.f32 %v13663_v31, %v3146_v55  ;;  %v2492_v57 = vadd.f32 %v2428_v0, %v13813_v35  ;;  %v2234_v47 = vmul.f32 %v8793_v2, %v2169_v24  ;;  %7672 = vrcp.f32 %v1904_v25 }
 0x337   : > { %13812 = vst [vmem:[#allocation122_spill] sm:$0xff] %v10594_v13  ;;  %v10601_v45 = vpop.eup %7664  ;;  %v3348_v41 = vmul.f32 %v13559_v29, %v3146_v55  ;;  %v3276_v26 = vadd.f32 %v13815_v40, %v3017_v32  ;;  %v2170_v61 = vrot.slane %v10592_v49, 7  ;;  %7674 = vrcp.f32 %v1905_v56  ;;  %v10622_v56 = vld [vmem:[%s13086_s5 + $0x10] ss:$0 sm:$0xff] }
 0x338   : > { %13814 = vst [vmem:[#allocation118_spill] sm:$0xff] %v10601_v45  ;;  %v10606_v28 = vpop.eup %7666  ;;  %v2302_v36 = vmul.f32 %v13646_v52, %v2232_v33  ;;  %v2430_v13 = vmul.f32 %v13727_v50, %v2234_v47  ;;  %v2562_v0 = vmul.f32 %v8888_v39, %v2234_v47  ;;  %v10612_v24 = vmul.f32 %v7661_v12, %v10368_v3  ;;  %v13820_v3 = vld [vmem:[#allocation104_spill] sm:$0xff] }
 0x339   : > { %13816 = vst [vmem:[#allocation121_spill] sm:$0xff] %v10606_v28  ;;  %v10614_v25 = vpop.eup %7668  ;;  %v10617_v55 = vmul.f32 %v13787_v7, %v3147_v15  ;;  %v3412_v32 = vadd.f32 %v3348_v41, %v3276_v26  ;;  %13818 = vst [vmem:[#allocation132_spill] sm:$0xff] %v10622_v56  ;;  %v3482_v33 = vmul.f32 %v10622_v56, %v10589_v9  ;;  %v3084_v46 = vrot.slane %v10569_v20, 1  ;;  %v10640_v7 = vpop.f32.mrb[56].mxu1 }
 0x33a   : > { %13817 = vst [vmem:[#allocation131_spill] sm:$0xff] %v10614_v25  ;;  %v10627_v45 = vmul.f32 %v8793_v2, %v2170_v61  ;;  %v10629_v40 = vpop.eup %7670  ;;  %v3541_v12 = vadd.f32 %v13820_v3, %v10517_v59  ;;  %v2303_v35 = vmul.f32 %v13635_v43, %v10525_v53  ;;  %v2494_v41 = vadd.f32 %v2430_v13, %v2302_v36  ;;  %v13822_v53 = vld [vmem:[#allocation71_spill] sm:$0xff] }
 0x33b   : > { %13819 = vst [vmem:[#allocation133_spill] sm:$0xff] %v10629_v40  ;;  %v2622_v26 = vadd.f32 %v2562_v0, %v2492_v57  ;;  %v3542_v25 = vadd.f32 %v3482_v33, %v3412_v32  ;;  %13821 = vst [vmem:[#allocation134_spill] sm:$0xff] %v10640_v7  ;;  %v3349_v40 = vmul.f32 %v13565_v17, %v3147_v15  ;;  %v2171_v57 = vrot.slane %v10612_v24, 7 }
 0x33c   : > { %v2431_v51 = vmul.f32 %v13623_v16, %v10627_v45  ;;  %v2563_v61 = vmul.f32 %v13636_v11, %v10627_v45  ;;  %v10645_v59 = vmul.f32 %v13678_v44, %v10495_v4  ;;  %v3623_v36 = vmul.f32 %v13631_v37, %v10519_v8 }
 0x33d   : > { %v2752_v13 = vadd.f32 %v13822_v53, %v2622_v26  ;;  %v2825_v0 = vmul.f32 %v8818_v23, %v10495_v4  ;;  %v2958_v15 = vmul.f32 %v8858_v22, %v10569_v20  ;;  %v2236_v7 = vmul.f32 %v8793_v2, %v2171_v57 }
 0x33e   : > { %v2495_v32 = vadd.f32 %v2431_v51, %v2303_v35  ;;  %v2623_v33 = vadd.f32 %v2563_v61, %v10545_v10  ;;  %7676 = vpow2.f32 %v10551_v19  ;;  %v3625_v26 = vmul.f32 %v13631_v37, %v3541_v12 }
 0x33f   : > { %v2888_v3 = vadd.f32 %v2824_v27, %v2752_v13  ;;  %v10660_v53 = vmul.f32 %v8812_v60, %v3084_v46  ;;  %v3085_v44 = vrot.slane %v10592_v49, 1  ;;  %v2304_v51 = vmul.f32 %v13646_v52, %v2234_v47 }
 0x340   : > { %v2753_v8 = vadd.f32 %v2691_v18, %v2623_v33  ;;  %v7673_v4 = vpop.eup %7672  ;;  %v2432_v27 = vmul.f32 %v13727_v50, %v2236_v7  ;;  %v2564_v35 = vmul.f32 %v8888_v39, %v2236_v7  ;;  %v10667_v13 = vadd.f32 %v13638_v1, %v3623_v36 }
 0x341   : > { %v3018_v10 = vadd.f32 %v2958_v15, %v2888_v3  ;;  %v7675_v61 = vpop.eup %7674  ;;  %v2959_v46 = vmul.f32 %v13715_v34, %v10592_v49  ;;  %v10673_v18 = vadd.f32 %v13712_v63, %v10555_v48  ;;  %v2826_v47 = vmul.f32 %v8843_v14, %v10569_v20  ;;  %v13824_v3 = vld [vmem:[#allocation76_spill] sm:$0xff] }
 0x342   : > { %13823 = vst [vmem:[#allocation135_spill] sm:$0xff] %v10667_v13  ;;  %v2889_v19 = vadd.f32 %v2825_v0, %v2753_v8  ;;  %v2496_v57 = vadd.f32 %v2432_v27, %v2304_v51  ;;  %v2624_v33 = vadd.f32 %v2564_v35, %v2494_v41  ;;  %v3483_v15 = vmul.f32 %v10508_v30, %v10660_v53  ;;  %v13825_v8 = vld [vmem:[#allocation86_spill] sm:$0xff]  ;;  %v13827_v27 = vld [vmem:[#allocation79_spill] sm:$0xff] }
 0x343   : > { %v3277_v12 = vadd.f32 %v13824_v3, %v3018_v10  ;;  %v10681_v0 = vmul.f32 %v8812_v60, %v3085_v44  ;;  %v10684_v28 = vmul.f32 %v7673_v4, %v13825_v8  ;;  %v3086_v63 = vrot.slane %v10612_v24, 1  ;;  %v13837_v3 = vld [vmem:[#allocation42_spill] sm:$0xff] }
 0x344   : > { %v3019_v36 = vadd.f32 %v2959_v46, %v2889_v19  ;;  %v2754_v48 = vadd.f32 %v10580_v5, %v2624_v33  ;;  %v10689_v42 = vmul.f32 %v7675_v61, %v13826_v38  ;;  %v3350_v41 = vmul.f32 %v13559_v29, %v10589_v9 }
 0x345   : > { %v3413_v58 = vadd.f32 %v3349_v40, %v3277_v12  ;;  %v2172_v10 = vrot.slane %v10684_v28, 7  ;;  %7678 = vpow2.f32 %v10574_v54  ;;  %v2960_v40 = vmul.f32 %v8858_v22, %v10612_v24  ;;  %v10712_v12 = vpop.f32.mrb[57].mxu1 }
 0x346   : > { %v3278_v51 = vadd.f32 %v10597_v62, %v3019_v36  ;;  %v2890_v4 = vadd.f32 %v2826_v47, %v2754_v48  ;;  %v6655_v5 = vmul.f32 -1.442695, %v10673_v18  ;;  %v3626_v35 = vmul.f32 %v13827_v27, %v3542_v25  ;;  %13829 = vst [vmem:[#allocation125_spill] sm:$0xff] %v10712_v12 }
 0x347   : > { %v3543_v44 = vadd.f32 %v3483_v15, %v3413_v58  ;;  %v3484_v61 = vmul.f32 %v10622_v56, %v10681_v0  ;;  %v10703_v19 = vmul.f32 %v8793_v2, %v2172_v10  ;;  %v10706_v46 = vadd.f32 %v13638_v1, %v3625_v26 }
 0x348   : > { %v3414_v38 = vadd.f32 %v3350_v41, %v3278_v51  ;;  %v7677_v62 = vpop.eup %7676  ;;  %v3020_v58 = vadd.f32 %v2960_v40, %v2890_v4  ;;  %v10709_v54 = vmul.f32 %v8812_v60, %v3086_v63  ;;  %v2173_v47 = vrot.slane %v10689_v42, 7 }
 0x349   : > { %13828 = vst [vmem:[#allocation86_spill] sm:$0xff] %v10706_v46  ;;  %v2305_v25 = vmul.f32 %v13635_v43, %v10627_v45  ;;  %v2433_v15 = vmul.f32 %v13623_v16, %v10703_v19  ;;  %v2565_v26 = vmul.f32 %v13636_v11, %v10703_v19  ;;  %v6710_v36 = vmul.f32 -1.442695, %v10667_v13 }
 0x34a   : > { %v10716_v33 = vadd.f32 %v3484_v61, %v3414_v38  ;;  %v3351_v63 = vmul.f32 %v13565_v17, %v10660_v53  ;;  %v3279_v8 = vadd.f32 %v10617_v55, %v3020_v58  ;;  %7680 = vpow2.f32 %v6655_v5 }
 0x34b   : > { %v10727_v48 = vadd.f32 %v13730_v21, %v3626_v35  ;;  %v10729_v45 = vadd.f32 %v2433_v15, %v2305_v25  ;;  %v2625_v41 = vadd.f32 %v2565_v26, %v2495_v32  ;;  %v10732_v51 = vmul.f32 %v8793_v2, %v2173_v47  ;;  %v10747_v25 = vpop.f32.mrb[58].mxu1 }
 0x34c   : > { %v6712_v10 = vmul.f32 -1.442695, %v10706_v46  ;;  %v2827_v4 = vmul.f32 %v8818_v23, %v10592_v49  ;;  %v3415_v40 = vadd.f32 %v3351_v63, %v3279_v8  ;;  %v3485_v38 = vmul.f32 %v10508_v30, %v10709_v54  ;;  %13831 = vst [vmem:[#allocation137_spill] sm:$0xff] %v10747_v25 }
 0x34d   : > { %13830 = vst [vmem:[#allocation136_spill] sm:$0xff] %v10727_v48  ;;  %v2306_v55 = vmul.f32 %v13646_v52, %v2236_v7  ;;  %v2755_v5 = vadd.f32 %v10645_v59, %v2625_v41  ;;  %v3087_v35 = vrot.slane %v10684_v28, 1  ;;  %v2434_v32 = vmul.f32 %v13727_v50, %v10732_v51 }
 0x34e   : > { %7682 = vpow2.f32 %v6710_v36  ;;  %v3627_v61 = vmul.f32 %v13631_v37, %v3543_v44  ;;  %v3545_v58 = vadd.f32 %v3485_v38, %v3415_v40  ;;  %v2566_v47 = vmul.f32 %v8888_v39, %v10732_v51 }
 0x34f   : > { %v7679_v15 = vpop.eup %7678  ;;  %v6713_v26 = vmul.f32 -1.442695, %v10727_v48  ;;  %v2891_v7 = vadd.f32 %v2827_v4, %v2755_v5  ;;  %v2961_v59 = vmul.f32 %v13715_v34, %v10684_v28  ;;  %v10752_v63 = vadd.f32 %v2434_v32, %v2306_v55  ;;  %v13832_v4 = vld [vmem:[#allocation110_spill] sm:$0xff]  ;;  %v13833_v5 = vld [vmem:[#allocation39_spill] sm:$0xff] }
 0x350   : > { %7684 = vpow2.f32 %v6712_v10  ;;  %v2694_v36 = vmul.f32 %v13781_v6, %v10569_v20  ;;  %v3218_v44 = vmul.f32 %v13663_v31, %v10589_v9  ;;  %v2626_v8 = vadd.f32 %v2566_v47, %v2496_v57 }
 0x351   : > { %v2828_v41 = vmul.f32 %v8843_v14, %v10612_v24  ;;  %v3021_v40 = vadd.f32 %v2961_v59, %v2891_v7  ;;  %v10761_v38 = vmul.f32 %v8812_v60, %v3087_v35  ;;  %v1572_v46 = vmul.f32 %v13833_v5, %v13832_v4  ;;  %v10771_v7 = vpop.f32.mrb[59].mxu1 }
 0x352   : > { %v10766_v55 = vadd.f32 %v13638_v1, %v3627_v61  ;;  %v2756_v10 = vadd.f32 %v2694_v36, %v2626_v8  ;;  %v3088_v20 = vrot.slane %v10689_v42, 1  ;;  %v1906_v32 = vadd.f32 1.0, %v7677_v62  ;;  %13835 = vst [vmem:[#allocation138_spill] sm:$0xff] %v10771_v7  ;;  %v13836_v61 = vld [vmem:[#allocation69_spill] sm:$0xff] }
 0x353   : > { %7686 = vpow2.f32 %v6713_v26  ;;  %v3352_v9 = vmul.f32 %v13559_v29, %v10681_v0  ;;  %v3280_v57 = vadd.f32 %v3218_v44, %v3021_v40  ;;  %v1907_v47 = vadd.f32 1.0, %v7679_v15  ;;  %v13839_v8 = vld [vmem:[#allocation121_spill] sm:$0xff]  ;;  %v13840_v40 = vld [vmem:[#allocation60_spill] sm:$0xff] }
 0x354   : > { %13834 = vst [vmem:[#allocation110_spill] sm:$0xff] %v10766_v55  ;;  %v7681_v35 = vpop.eup %7680  ;;  %v2892_v59 = vadd.f32 %v2828_v41, %v2756_v10  ;;  %v2962_v4 = vmul.f32 %v8858_v22, %v10689_v42  ;;  %7688 = vrcp.f32 %v1906_v32  ;;  %v10777_v36 = vadd.f32 %v13837_v3, %v13836_v61  ;;  %v13841_v61 = vld [vmem:[#allocation41_spill] sm:$0xff] }
 0x355   : > { %v3960_v62 = vadd.f32 1.0, %v13839_v8  ;;  %v3416_v26 = vadd.f32 %v3352_v9, %v3280_v57  ;;  %v3486_v25 = vmul.f32 %v10622_v56, %v10761_v38  ;;  %7690 = vrcp.f32 %v1907_v47  ;;  %v13843_v8 = vld [vmem:[#allocation114_spill] sm:$0xff]  ;;  %v13844_v9 = vld [vmem:[#allocation40_spill] sm:$0xff] }
 0x356   : > { %13838 = vst [vmem:[#allocation69_spill] sm:$0xff] %v10777_v36  ;;  %v6714_v15 = vmul.f32 -1.442695, %v10766_v55  ;;  %v3022_v44 = vadd.f32 %v2962_v4, %v2892_v59  ;;  %v10784_v41 = vmul.f32 %v8812_v60, %v3088_v20  ;;  %v3219_v10 = vmul.f32 %v13840_v40, %v10660_v53  ;;  %v13845_v55 = vld [vmem:[#allocation102_spill] sm:$0xff]  ;;  %v13846_v53 = vld [vmem:[#allocation120_spill] sm:$0xff] }
 0x357   : > { %v3546_v32 = vadd.f32 %v3486_v25, %v3416_v26  ;;  %v1908_v7 = vadd.f32 1.0, %v7681_v35  ;;  %v10789_v12 = vadd.f32 %v13841_v61, %v1572_v46  ;;  %v1573_v57 = vmul.f32 %v13844_v9, %v13843_v8  ;;  %v13848_v35 = vld [vmem:[#allocation131_spill] sm:$0xff]  ;;  %v13849_v56 = vld [vmem:[#allocation116_spill] sm:$0xff] }
 0x358   : > { %v7683_v13 = vpop.eup %7682  ;;  %v3628_v47 = vmul.f32 %v13827_v27, %v10716_v33  ;;  %v3353_v59 = vmul.f32 %v13565_v17, %v10709_v54  ;;  %v3281_v20 = vadd.f32 %v3219_v10, %v3022_v44  ;;  %v6656_v4 = vmul.f32 -1.442695, %v10777_v36  ;;  %v13850_v10 = vld [vmem:[#allocation107_spill] sm:$0xff] }
 0x359   : > { %13842 = vst [vmem:[#allocation121_spill] sm:$0xff] %v10789_v12  ;;  %v10800_v25 = vmul.f32 %v13846_v53, %v13845_v55  ;;  %v3962_v46 = vadd.f32 1.0, %v13848_v35  ;;  %7692 = vrcp.f32 %v3960_v62  ;;  %v6657_v26 = vmul.f32 -1.442695, %v10789_v12  ;;  %v13851_v36 = vld [vmem:[#allocation87_spill] sm:$0xff]  ;;  %v13854_v53 = vld [vmem:[#allocation89_spill] sm:$0xff] }
 0x35a   : > { %v7685_v8 = vpop.eup %7684  ;;  %7694 = vpow2.f32 %v6714_v15  ;;  %v3417_v48 = vadd.f32 %v3353_v59, %v3281_v20  ;;  %v3487_v33 = vmul.f32 %v10508_v30, %v10784_v41  ;;  %v1574_v44 = vmul.f32 %v13833_v5, %v13849_v56  ;;  %v13855_v35 = vld [vmem:[#allocation55_spill] sm:$0xff] }
 0x35b   : > { %13847 = vst [vmem:[#allocation114_spill] sm:$0xff] %v10800_v25  ;;  %v4215_v22 = vadd.f32 %v13851_v36, %v13850_v10  ;;  %v3961_v60 = vadd.f32 1.0, %v7683_v13  ;;  %7696 = vrcp.f32 %v1908_v7  ;;  %v10811_v55 = vadd.f32 %v13837_v3, %v1573_v57  ;;  %v10826_v7 = vpop.f32.mrb[60].mxu1  ;;  %v13860_v10 = vld [vmem:[#allocation122_spill] sm:$0xff] }
 0x35c   : > { %v10814_v62 = vadd.f32 %v13730_v21, %v3628_v47  ;;  %v3629_v15 = vmul.f32 %v13631_v37, %v3545_v58  ;;  %v10817_v59 = vadd.f32 %v3487_v33, %v3417_v48  ;;  %7698 = vpow2.f32 %v6656_v4  ;;  %13858 = vst [vmem:[#allocation87_spill] sm:$0xff] %v10826_v7  ;;  %v13859_v47 = vld [vmem:[#allocation84_spill] sm:$0xff]  ;;  %v13862_v48 = vld [vmem:[#allocation78_spill] sm:$0xff]  ;;  %v13863_v58 = vld [vmem:[#allocation133_spill] sm:$0xff] }
 0x35d   : > { %13852 = vst [vmem:[#allocation102_spill] sm:$0xff] %v10811_v55  ;;  %v7687_v20 = vpop.eup %7686  ;;  %v10821_v56 = vmul.f32 %v13855_v35, %v13854_v53  ;;  %v10824_v36 = vadd.f32 %v4215_v22, %v10800_v25  ;;  %v3963_v13 = vadd.f32 1.0, %v7685_v8  ;;  %7700 = vpow2.f32 %v6657_v26  ;;  %v13866_v22 = vld [vmem:[#allocation46_spill] sm:$0xff]  ;;  %v13867_v35 = vld [vmem:[#allocation115_spill] sm:$0xff] }
 0x35e   : > { %13853 = vst [vmem:[#allocation120_spill] sm:$0xff] %v10814_v62  ;;  %v7689_v57 = vpop.eup %7688  ;;  %v10830_v12 = vmul.f32 %v13860_v10, %v13859_v47  ;;  %7702 = vrcp.f32 %v3962_v46  ;;  %v10834_v4 = vmul.f32 %v13863_v58, %v13862_v48  ;;  %v10837_v33 = vadd.f32 %v13841_v61, %v1574_v44  ;;  %v13869_v44 = vld [vmem:[#allocation126_spill] sm:$0xff] }
 0x35f   : > { %13856 = vst [vmem:[#allocation131_spill] sm:$0xff] %v10821_v56  ;;  %13857 = vst [vmem:[#allocation116_spill] sm:$0xff] %v10824_v36  ;;  %v7691_v53 = vpop.eup %7690  ;;  %v2695_v8 = vmul.f32 %v13866_v22, %v10592_v49  ;;  %v2696_v26 = vmul.f32 %v13781_v6, %v10612_v24  ;;  %v10844_v25 = vmul.f32 %v7689_v57, %v13867_v35  ;;  %v6658_v10 = vmul.f32 -1.442695, %v10811_v55 }
 0x360   : > { %13861 = vst [vmem:[#allocation89_spill] sm:$0xff] %v10830_v12  ;;  %13864 = vst [vmem:[#allocation55_spill] sm:$0xff] %v10834_v4  ;;  %7704 = vrcp.f32 %v3961_v60  ;;  %v6715_v46 = vmul.f32 -1.442695, %v10814_v62  ;;  %v10849_v47 = vadd.f32 %v13638_v1, %v3629_v15  ;;  %v10852_v48 = vmul.f32 %v7691_v53, %v13869_v44 }
 0x361   : > { %13865 = vst [vmem:[#allocation84_spill] sm:$0xff] %v10837_v33  ;;  %7706 = vrcp.f32 %v3963_v13  ;;  %v10856_v49 = vmul.f32 %v13866_v22, %v10684_v28  ;;  %v2829_v24 = vmul.f32 %v8818_v23, %v10684_v28  ;;  %v2174_v57 = vrot.slane %v10844_v25, 7 }
 0x362   : > { %13868 = vst [vmem:[#allocation122_spill] sm:$0xff] %v10849_v47  ;;  %v2307_v60 = vmul.f32 %v13635_v43, %v10703_v19  ;;  %v10865_v15 = vmul.f32 %v13559_v29, %v10761_v38  ;;  %v2175_v58 = vrot.slane %v10852_v48, 7  ;;  %v6659_v13 = vmul.f32 -1.442695, %v10837_v33 }
 0x363   : > { %v10869_v53 = vpop.eup %7692  ;;  %v10871_v35 = vadd.f32 1.0, %v7687_v20  ;;  %v2308_v28 = vmul.f32 %v13646_v52, %v10732_v51  ;;  %v2239_v44 = vmul.f32 %v8793_v2, %v2174_v57  ;;  %7708 = vpow2.f32 %v6658_v10 }
 0x364   : > { %13870 = vst [vmem:[#allocation78_spill] sm:$0xff] %v10869_v53  ;;  %v7695_v56 = vpop.eup %7694  ;;  %7710 = vpow2.f32 %v6715_v46  ;;  %v6716_v19 = vmul.f32 -1.442695, %v10849_v47  ;;  %v3630_v7 = vmul.f32 %v13827_v27, %v3546_v32  ;;  %v10879_v62 = vmul.f32 %v8793_v2, %v2175_v58  ;;  %v13871_v58 = vld [vmem:[#allocation124_spill] sm:$0xff] }
 0x365   : > { %v7697_v4 = vpop.eup %7696  ;;  %v2830_v20 = vmul.f32 %v8843_v14, %v10689_v42  ;;  %v2435_v53 = vmul.f32 %v13623_v16, %v2239_v44  ;;  %v2567_v51 = vmul.f32 %v13636_v11, %v2239_v44  ;;  %v3220_v10 = vmul.f32 %v13663_v31, %v10681_v0 }
 0x366   : > { %v7699_v57 = vpop.eup %7698  ;;  %v10889_v46 = vmul.f32 %v13565_v17, %v10784_v41  ;;  %v3221_v32 = vmul.f32 %v13840_v40, %v10709_v54  ;;  %7712 = vpow2.f32 %v6659_v13  ;;  %v1575_v47 = vmul.f32 %v13844_v9, %v13871_v58 }
 0x367   : > { %v7701_v36 = vpop.eup %7700  ;;  %v2499_v12 = vadd.f32 %v2435_v53, %v2307_v60  ;;  %v2627_v33 = vadd.f32 %v2567_v51, %v10729_v45  ;;  %v2436_v27 = vmul.f32 %v13727_v50, %v10879_v62  ;;  %v2568_v0 = vmul.f32 %v8888_v39, %v10879_v62 }
 0x368   : > { %v10900_v55 = vpop.eup %7702  ;;  %7714 = vpow2.f32 %v6716_v19  ;;  %v10903_v17 = vadd.f32 %v13730_v21, %v3630_v7  ;;  %v3089_v54 = vrot.slane %v10844_v25, 1  ;;  %v10907_v13 = vmul.f32 %v7697_v4, %v10673_v18 }
 0x369   : > { %13872 = vst [vmem:[#allocation133_spill] sm:$0xff] %v10900_v55  ;;  %v2757_v60 = vadd.f32 %v2695_v8, %v2627_v33  ;;  %v10909_v53 = vadd.f32 %v2436_v27, %v2308_v28  ;;  %v2628_v45 = vadd.f32 %v2568_v0, %v10752_v63  ;;  %v1909_v51 = vadd.f32 1.0, %v7699_v57  ;;  %v10923_v63 = vpop.f32.mrb[61].mxu1 }
 0x36a   : > { %13873 = vst [vmem:[#allocation115_spill] sm:$0xff] %v10903_v17  ;;  %v10912_v58 = vpop.eup %7704  ;;  %v3965_v39 = vadd.f32 1.0, %v7695_v56  ;;  %v2176_v55 = vrot.slane %v10907_v13, 7  ;;  %v1910_v19 = vadd.f32 1.0, %v7701_v36  ;;  %v10916_v7 = vadd.f32 %v13837_v3, %v1575_v47  ;;  %13877 = vst [vmem:[#allocation140_spill] sm:$0xff] %v10923_v63  ;;  %v13878_v56 = vld [vmem:[#allocation45_spill] sm:$0xff] }
 0x36b   : > { %13874 = vst [vmem:[#allocation126_spill] sm:$0xff] %v10912_v58  ;;  %v10918_v21 = vpop.eup %7706  ;;  %v2893_v50 = vadd.f32 %v2829_v24, %v2757_v60  ;;  %v2963_v18 = vmul.f32 %v13715_v34, %v10844_v25  ;;  %v2758_v27 = vadd.f32 %v2696_v26, %v2628_v45  ;;  %v3090_v4 = vrot.slane %v10852_v48, 1  ;;  %v13879_v47 = vld [vmem:[#allocation127_spill] sm:$0xff]  ;;  %v10941_v63 = vpop.f32.mrb[62].mxu1 }
 0x36c   : > { %13875 = vst [vmem:[#allocation124_spill] sm:$0xff] %v10916_v7  ;;  %13876 = vst [vmem:[#allocation139_spill] sm:$0xff] %v10918_v21  ;;  %v6717_v33 = vmul.f32 -1.442695, %v10903_v17  ;;  %v10927_v8 = vmul.f32 %v13878_v56, %v3089_v54  ;;  %v10930_v36 = vmul.f32 %v8793_v2, %v2176_v55  ;;  %v1576_v28 = vmul.f32 %v13833_v5, %v13879_v47  ;;  %v13880_v26 = vld [vmem:[#allocation59_spill] sm:$0xff] }
 0x36d   : > { %v7709_v24 = vpop.eup %7708  ;;  %v3023_v57 = vadd.f32 %v2963_v18, %v2893_v50  ;;  %v2894_v0 = vadd.f32 %v2830_v20, %v2758_v27  ;;  %v2964_v60 = vmul.f32 %v13880_v26, %v10852_v48  ;;  %7716 = vrcp.f32 %v1909_v51  ;;  %13881 = vst [vmem:[#allocation45_spill] sm:$0xff] %v10941_v63 }
 0x36e   : > { %v7711_v45 = vpop.eup %7710  ;;  %v2309_v21 = vmul.f32 %v13635_v43, %v2239_v44  ;;  %v2437_v54 = vmul.f32 %v13623_v16, %v10930_v36  ;;  %v2569_v55 = vmul.f32 %v13636_v11, %v10930_v36  ;;  %7718 = vrcp.f32 %v1910_v19  ;;  %v13882_v19 = vld [vmem:[#allocation132_spill] sm:$0xff] }
 0x36f   : > { %v3631_v50 = vmul.f32 %v13631_v37, %v10817_v59  ;;  %v3282_v20 = vadd.f32 %v3220_v10, %v3023_v57  ;;  %v3024_v18 = vadd.f32 %v2964_v60, %v2894_v0  ;;  %v10946_v27 = vmul.f32 %v13878_v56, %v3090_v4 }
 0x370   : > { %v7713_v51 = vpop.eup %7712  ;;  %7720 = vpow2.f32 %v6717_v33  ;;  %v10948_v44 = vadd.f32 %v2437_v54, %v2309_v21  ;;  %v2629_v47 = vadd.f32 %v2569_v55, %v2499_v12  ;;  %v1911_v58 = vadd.f32 1.0, %v7709_v24  ;;  %v10957_v21 = vpop.f32.mrb[63].mxu1 }
 0x371   : > { %v3966_v17 = vadd.f32 1.0, %v7711_v45  ;;  %v3418_v16 = vadd.f32 %v10865_v15, %v3282_v20  ;;  %v3488_v63 = vmul.f32 %v13882_v19, %v10927_v8  ;;  %v3283_v26 = vadd.f32 %v3221_v32, %v3024_v18  ;;  %13883 = vst [vmem:[#allocation127_spill] sm:$0xff] %v10957_v21  ;;  %v13887_v20 = vld [vmem:[#allocation69_spill] sm:$0xff]  ;;  %v13899_v21 = vld [vmem:[#allocation102_spill] sm:$0xff] }
 0x372   : > { %v7715_v43 = vpop.eup %7714  ;;  %v2831_v59 = vmul.f32 %v8818_v23, %v10844_v25  ;;  %v2759_v10 = vadd.f32 %v10856_v49, %v2629_v47  ;;  %v3091_v4 = vrot.slane %v10907_v13, 1  ;;  %7722 = vrcp.f32 %v1911_v58  ;;  %v13890_v47 = vld [vmem:[#allocation129_spill] sm:$0xff] }
 0x373   : > { %v10959_v12 = vadd.f32 %v3488_v63, %v3418_v16  ;;  %v3419_v33 = vadd.f32 %v10889_v46, %v3283_v26  ;;  %v3489_v15 = vmul.f32 %v10508_v30, %v10946_v27  ;;  %v1912_v24 = vadd.f32 1.0, %v7713_v51 }
 0x374   : > { %7724 = vrcp.f32 %v10871_v35  ;;  %v10966_v32 = vadd.f32 %v13638_v1, %v3631_v50  ;;  %v2895_v57 = vadd.f32 %v2831_v59, %v2759_v10  ;;  %v2965_v49 = vmul.f32 %v13715_v34, %v10907_v13  ;;  %v13886_v35 = vld [vmem:[#allocation128_spill] sm:$0xff]  ;;  %v13891_v59 = vld [vmem:[#allocation75_spill] sm:$0xff] }
 0x375   : > { %7726 = vrcp.f32 %v3965_v39  ;;  %v10970_v58 = vadd.f32 %v3489_v15, %v3419_v33  ;;  %v3222_v16 = vmul.f32 %v13663_v31, %v10761_v38  ;;  %v10975_v46 = vadd.f32 %v13841_v61, %v1576_v28 }
 0x376   : > { %13884 = vst [vmem:[#allocation132_spill] sm:$0xff] %v10966_v32  ;;  %v3025_v63 = vadd.f32 %v2965_v49, %v2895_v57  ;;  %v10978_v0 = vmul.f32 %v13878_v56, %v3091_v4  ;;  %7728 = vrcp.f32 %v1912_v24  ;;  %v1577_v26 = vmul.f32 %v13844_v9, %v13886_v35 }
 0x377   : > { %13885 = vst [vmem:[#allocation141_spill] sm:$0xff] %v10975_v46  ;;  %v7717_v60 = vpop.eup %7716  ;;  %7730 = vrcp.f32 %v3966_v17  ;;  %v2698_v39 = vmul.f32 %v13781_v6, %v10689_v42  ;;  %v10986_v45 = vmul.f32 %v13840_v40, %v10784_v41  ;;  %v6660_v38 = vmul.f32 -1.442695, %v10916_v7  ;;  %v13889_v17 = vld [vmem:[#allocation121_spill] sm:$0xff] }
 0x378   : > { %v7719_v28 = vpop.eup %7718  ;;  %v6718_v54 = vmul.f32 -1.442695, %v10966_v32  ;;  %v3356_v55 = vmul.f32 %v13559_v29, %v10927_v8  ;;  %v3284_v50 = vadd.f32 %v3222_v16, %v3025_v63  ;;  %v10993_v18 = vmul.f32 %v7717_v60, %v13887_v20 }
 0x379   : > { %v10996_v51 = vmul.f32 %v7719_v28, %v13889_v17  ;;  %v6661_v42 = vmul.f32 -1.442695, %v10975_v46  ;;  %v11001_v41 = vmul.f32 %v13833_v5, %v13890_v47  ;;  %v11005_v10 = vmul.f32 %v13844_v9, %v13891_v59  ;;  %v13896_v47 = vld [vmem:[#allocation58_spill] sm:$0xff] }
 0x37a   : > { %13888 = vst [vmem:[#allocation128_spill] sm:$0xff] %v10993_v18  ;;  %v7721_v4 = vpop.eup %7720  ;;  %v3420_v33 = vadd.f32 %v3356_v55, %v3284_v50  ;;  %v3490_v15 = vmul.f32 %v13882_v19, %v10978_v0  ;;  %v2177_v24 = vrot.slane %v10993_v18, 7  ;;  %v11011_v57 = vadd.f32 %v13837_v3, %v1577_v26  ;;  %v13894_v50 = vld [vmem:[#allocation64_spill] sm:$0xff] }
 0x37b   : > { %v11013_v49 = vadd.f32 1.0, %v7715_v43  ;;  %v2699_v16 = vmul.f32 %v13866_v22, %v10844_v25  ;;  %v2700_v63 = vmul.f32 %v13781_v6, %v10852_v48  ;;  %v2832_v35 = vmul.f32 %v8843_v14, %v10852_v48 }
 0x37c   : > { %13892 = vst [vmem:[#allocation69_spill] sm:$0xff] %v11011_v57  ;;  %v7723_v60 = vpop.eup %7722  ;;  %7732 = vpow2.f32 %v6718_v54  ;;  %v11021_v28 = vadd.f32 %v3490_v15, %v3420_v33  ;;  %v11024_v55 = vmul.f32 %v8793_v2, %v2177_v24  ;;  %v2178_v26 = vrot.slane %v10996_v51, 7 }
 0x37d   : > { %13893 = vst [vmem:[#allocation121_spill] sm:$0xff] %v11013_v49  ;;  %v11027_v43 = vadd.f32 1.0, %v7721_v4  ;;  %v2310_v25 = vmul.f32 %v13646_v52, %v10879_v62  ;;  %v3357_v20 = vmul.f32 %v13894_v50, %v10946_v27  ;;  %v11035_v48 = vmul.f32 %v13866_v22, %v10907_v13  ;;  %v13897_v4 = vld [vmem:[#allocation68_spill] sm:$0xff] }
 0x37e   : > { %v11037_v54 = vpop.eup %7724  ;;  %v2833_v17 = vmul.f32 %v8818_v23, %v10907_v13  ;;  %v2438_v59 = vmul.f32 %v13896_v47, %v11024_v55  ;;  %v2570_v33 = vmul.f32 %v13897_v4, %v11024_v55  ;;  %v2243_v62 = vmul.f32 %v8793_v2, %v2178_v26 }
 0x37f   : > { %13895 = vst [vmem:[#allocation129_spill] sm:$0xff] %v11037_v54  ;;  %v11046_v15 = vpop.eup %7726  ;;  %v3358_v24 = vmul.f32 %v13559_v29, %v10978_v0  ;;  %v3224_v32 = vmul.f32 %v13663_v31, %v10927_v8  ;;  %v11053_v46 = vmul.f32 %v7723_v60, %v13899_v21  ;;  %v6662_v13 = vmul.f32 -1.442695, %v11011_v57  ;;  %v13902_v60 = vld [vmem:[#allocation44_spill] sm:$0xff] }
 0x380   : > { %13898 = vst [vmem:[#allocation75_spill] sm:$0xff] %v11046_v15  ;;  %v7729_v6 = vpop.eup %7728  ;;  %v2502_v54 = vadd.f32 %v2438_v59, %v2310_v25  ;;  %v2630_v7 = vadd.f32 %v2570_v33, %v10909_v53  ;;  %v2571_v49 = vmul.f32 %v13636_v11, %v2243_v62  ;;  %7734 = vpow2.f32 %v6660_v38  ;;  %v13901_v15 = vld [vmem:[#allocation79_spill] sm:$0xff] }
 0x381   : > { %v11058_v26 = vpop.eup %7730  ;;  %v11062_v1 = vmul.f32 %v13901_v15, %v10959_v12  ;;  %v2179_v8 = vrot.slane %v11053_v46, 7  ;;  %v3225_v21 = vmul.f32 %v13840_v40, %v10946_v27  ;;  %v2311_v57 = vmul.f32 %v13902_v60, %v10930_v36  ;;  %v13903_v12 = vld [vmem:[#allocation84_spill] sm:$0xff]  ;;  %v13904_v36 = vld [vmem:[#allocation59_spill] sm:$0xff] }
 0x382   : > { %13900 = vst [vmem:[#allocation58_spill] sm:$0xff] %v11058_v26  ;;  %v2760_v25 = vadd.f32 %v2698_v39, %v2630_v7  ;;  %v3092_v53 = vrot.slane %v10993_v18, 1  ;;  %v2631_v59 = vadd.f32 %v2571_v49, %v10948_v44  ;;  %7736 = vpow2.f32 %v6661_v42 }
 0x383   : > { %v3093_v38 = vrot.slane %v10996_v51, 1  ;;  %v11073_v33 = vmul.f32 %v8793_v2, %v2179_v8  ;;  %v2104_v26 = vmul.f32 %v7729_v6, %v13903_v12  ;;  %7738 = vpow2.f32 %v6662_v13  ;;  %v13905_v8 = vld [vmem:[#allocation48_spill] sm:$0xff] }
 0x384   : > { %v2834_v27 = vmul.f32 %v8843_v14, %v10993_v18  ;;  %v2896_v40 = vadd.f32 %v2832_v35, %v2760_v25  ;;  %v2966_v7 = vmul.f32 %v13904_v36, %v10993_v18  ;;  %v2761_v39 = vadd.f32 %v2699_v16, %v2631_v59 }
 0x385   : > { %v2703_v44 = vmul.f32 %v13866_v22, %v10996_v51  ;;  %v2572_v42 = vmul.f32 %v13897_v4, %v11073_v33  ;;  %v2180_v49 = vrot.slane %v2104_v26, 7  ;;  %v2439_v9 = vmul.f32 %v13905_v8, %v2243_v62 }
 0x386   : > { %v11085_v3 = vpop.eup %7732  ;;  %v3026_v6 = vadd.f32 %v2966_v7, %v2896_v40  ;;  %v11088_v13 = vmul.f32 %v13878_v56, %v3092_v53  ;;  %v2897_v35 = vadd.f32 %v2833_v17, %v2761_v39  ;;  %v2967_v25 = vmul.f32 %v13715_v34, %v10996_v51 }
 0x387   : > { %v3158_v16 = vmul.f32 %v13878_v56, %v3093_v38  ;;  %v2632_v59 = vadd.f32 %v2572_v42, %v2502_v54  ;;  %v2245_v12 = vmul.f32 %v8793_v2, %v2180_v49  ;;  %v2503_v22 = vadd.f32 %v2439_v9, %v2311_v57 }
 0x388   : > { %v3285_v14 = vadd.f32 %v10986_v45, %v3026_v6  ;;  %v2835_v18 = vmul.f32 %v8818_v23, %v10996_v51  ;;  %v3027_v4 = vadd.f32 %v2967_v25, %v2897_v35  ;;  %v3094_v40 = vrot.slane %v11053_v46, 1 }
 0x389   : > { %v2762_v53 = vadd.f32 %v2700_v63, %v2632_v59  ;;  %v2313_v17 = vmul.f32 %v13902_v60, %v2243_v62  ;;  %v2441_v7 = vmul.f32 %v13905_v8, %v2245_v12  ;;  %v2573_v39 = vmul.f32 %v13636_v11, %v2245_v12  ;;  %v13906_v12 = vld [vmem:[#allocation62_spill] sm:$0xff] }
 0x38a   : > { %v7735_v38 = vpop.eup %7734  ;;  %v3421_v54 = vadd.f32 %v3357_v20, %v3285_v14  ;;  %v3491_v9 = vmul.f32 %v10508_v30, %v11088_v13  ;;  %v3286_v57 = vadd.f32 %v3224_v32, %v3027_v4  ;;  %v2968_v45 = vmul.f32 %v13904_v36, %v11053_v46 }
 0x38b   : > { %v3492_v51 = vmul.f32 %v13882_v19, %v3158_v16  ;;  %v2898_v42 = vadd.f32 %v2834_v27, %v2762_v53  ;;  %v2505_v49 = vadd.f32 %v2441_v7, %v2313_v17  ;;  %v2633_v63 = vadd.f32 %v2573_v39, %v2503_v22 }
 0x38c   : > { %v7737_v6 = vpop.eup %7736  ;;  %v11106_v62 = vadd.f32 %v3491_v9, %v3421_v54  ;;  %v3422_v35 = vadd.f32 %v3358_v24, %v3286_v57  ;;  %v11109_v25 = vmul.f32 %v13878_v56, %v3094_v40  ;;  %v3095_v14 = vrot.slane %v2104_v26, 1  ;;  %v13907_v54 = vld [vmem:[#allocation80_spill] sm:$0xff] }
 0x38d   : > { %v7739_v20 = vpop.eup %7738  ;;  %v3028_v59 = vadd.f32 %v2968_v45, %v2898_v42  ;;  %v2635_v32 = vadd.f32 %v13906_v12, %v2505_v49  ;;  %v2763_v4 = vadd.f32 %v11035_v48, %v2633_v63  ;;  %v1913_v11 = vadd.f32 1.0, %v7735_v38  ;;  %v13911_v63 = vld [vmem:[#allocation99_spill] sm:$0xff] }
 0x38e   : > { %v3359_v27 = vmul.f32 %v13894_v50, %v11088_v13  ;;  %v3552_v53 = vadd.f32 %v3492_v51, %v3422_v35  ;;  %v2837_v22 = vmul.f32 %v8818_v23, %v2104_v26  ;;  %v3226_v24 = vmul.f32 %v13663_v31, %v10978_v0 }
 0x38f   : > { %v3287_v17 = vadd.f32 %v3225_v21, %v3028_v59  ;;  %v2765_v40 = vadd.f32 %v2703_v44, %v2635_v32  ;;  %v2899_v7 = vadd.f32 %v2835_v18, %v2763_v4  ;;  %v2969_v39 = vmul.f32 %v13715_v34, %v2104_v26 }
 0x390   : > { %v11121_v9 = vadd.f32 %v13907_v54, %v11062_v1  ;;  %v3493_v48 = vmul.f32 %v10508_v30, %v11109_v25  ;;  %7740 = vrcp.f32 %v1913_v11  ;;  %v11127_v38 = vadd.f32 %v13841_v61, %v11001_v41  ;;  %v13910_v41 = vld [vmem:[#allocation101_spill] sm:$0xff] }
 0x391   : > { %v3423_v57 = vadd.f32 %v3359_v27, %v3287_v17  ;;  %v2901_v45 = vadd.f32 %v2837_v22, %v2765_v40  ;;  %v3029_v0 = vadd.f32 %v2969_v39, %v2899_v7  ;;  %v3160_v21 = vmul.f32 %v13878_v56, %v3095_v14  ;;  %v13913_v22 = vld [vmem:[#allocation67_spill] sm:$0xff]  ;;  %v13915_v40 = vld [vmem:[#allocation66_spill] sm:$0xff] }
 0x392   : > { %13908 = vst [vmem:[#allocation102_spill] sm:$0xff] %v11121_v9  ;;  %v3633_v18 = vmul.f32 %v13631_v37, %v10970_v58  ;;  %v3228_v26 = vmul.f32 %v13663_v31, %v3158_v16  ;;  %v2312_v1 = vmul.f32 %v13646_v52, %v11024_v55  ;;  %v2440_v11 = vmul.f32 %v13896_v47, %v11073_v33 }
 0x393   : > { %v11137_v30 = vadd.f32 %v3493_v48, %v3423_v57  ;;  %v3031_v44 = vadd.f32 %v13910_v41, %v2901_v45  ;;  %v3288_v51 = vadd.f32 %v3226_v24, %v3029_v0  ;;  %v3360_v42 = vmul.f32 %v13559_v29, %v3158_v16  ;;  %v13914_v24 = vld [vmem:[#allocation40_spill] sm:$0xff] }
 0x394   : > { %7742 = vrcp.f32 %v11027_v43  ;;  %v6719_v49 = vmul.f32 -1.442695, %v11121_v9  ;;  %v11143_v58 = vadd.f32 %v2440_v11, %v2312_v1  ;;  %v1580_v35 = vmul.f32 %v13833_v5, %v13911_v63  ;;  %v13912_v43 = vld [vmem:[#allocation42_spill] sm:$0xff]  ;;  %v13918_v45 = vld [vmem:[#allocation116_spill] sm:$0xff]  ;;  %v13922_v11 = vld [vmem:[#allocation121_spill] sm:$0xff] }
 0x395   : > { %13909 = vst [vmem:[#allocation84_spill] sm:$0xff] %v11137_v30  ;;  %v3290_v55 = vadd.f32 %v3228_v26, %v3031_v44  ;;  %v3362_v14 = vmul.f32 %v13559_v29, %v3160_v21  ;;  %v3424_v59 = vadd.f32 %v3360_v42, %v3288_v51  ;;  %v3494_v32 = vmul.f32 %v13882_v19, %v3160_v21  ;;  %v13917_v19 = vld [vmem:[#allocation89_spill] sm:$0xff]  ;;  %v13920_v26 = vld [vmem:[#allocation112_spill] sm:$0xff]  ;;  %v13923_v51 = vld [vmem:[#allocation55_spill] sm:$0xff] }
 0x396   : > { %v3634_v4 = vmul.f32 %v13901_v15, %v11021_v28  ;;  %v6663_v16 = vmul.f32 -1.442695, %v11127_v38  ;;  %v11154_v27 = vadd.f32 %v13912_v43, %v11005_v10  ;;  %v1581_v17 = vmul.f32 %v13914_v24, %v13913_v22  ;;  %v13919_v10 = vld [vmem:[#allocation123_spill] sm:$0xff] }
 0x397   : > { %v11159_v7 = vadd.f32 %v13915_v40, %v3633_v18  ;;  %v3426_v39 = vadd.f32 %v3362_v14, %v3290_v55  ;;  %v11161_v48 = vadd.f32 %v3494_v32, %v3424_v59  ;;  %v1914_v57 = vadd.f32 1.0, %v7737_v6  ;;  %v13928_v59 = vld [vmem:[#allocation124_spill] sm:$0xff]  ;;  %v13929_v32 = vld [vmem:[#allocation130_spill] sm:$0xff] }
 0x398   : > { %v4217_v0 = vadd.f32 %v13918_v45, %v13917_v19  ;;  %v3969_v28 = vadd.f32 1.0, %v11085_v3  ;;  %7744 = vpow2.f32 %v6719_v49  ;;  %v11167_v21 = vadd.f32 %v13841_v61, %v1580_v35  ;;  %v13925_v49 = vld [vmem:[#allocation119_spill] sm:$0xff]  ;;  %v13926_v35 = vld [vmem:[#allocation78_spill] sm:$0xff]  ;;  %v13948_v19 = vld [vmem:[#allocation128_spill] sm:$0xff] }
 0x399   : > { %13916 = vst [vmem:[#allocation99_spill] sm:$0xff] %v11159_v7  ;;  %v11171_v1 = vmul.f32 %v13920_v26, %v13919_v10  ;;  %7746 = vrcp.f32 %v13922_v11  ;;  %v1915_v18 = vadd.f32 1.0, %v7739_v20  ;;  %v11175_v44 = vadd.f32 %v13912_v43, %v1581_v17  ;;  %v13932_v11 = vld [vmem:[#allocation50_spill] sm:$0xff] }
 0x39a   : > { %v7741_v6 = vpop.eup %7740  ;;  %v4218_v42 = vadd.f32 %v4217_v0, %v13923_v51  ;;  %v11179_v63 = vadd.f32 %v13907_v54, %v3634_v4  ;;  %7748 = vpow2.f32 %v6663_v16  ;;  %v6664_v3 = vmul.f32 -1.442695, %v11154_v27  ;;  %v13931_v0 = vld [vmem:[#allocation90_spill] sm:$0xff] }
 0x39b   : > { %13921 = vst [vmem:[#allocation67_spill] sm:$0xff] %v11171_v1  ;;  %v11184_v55 = vmul.f32 %v13926_v35, %v13925_v49  ;;  %v6720_v14 = vmul.f32 -1.442695, %v11159_v7  ;;  %v2105_v20 = vmul.f32 %v7741_v6, %v13928_v59  ;;  %7750 = vrcp.f32 %v1914_v57  ;;  %v13933_v6 = vld [vmem:[#allocation133_spill] sm:$0xff]  ;;  %v13935_v49 = vld [vmem:[#allocation120_spill] sm:$0xff]  ;;  %v13936_v35 = vld [vmem:[#allocation58_spill] sm:$0xff] }
 0x39c   : > { %13924 = vst [vmem:[#allocation66_spill] sm:$0xff] %v11179_v63  ;;  %v11190_v22 = vmul.f32 %v13631_v37, %v13929_v32  ;;  %7752 = vrcp.f32 %v3969_v28  ;;  %v3636_v4 = vmul.f32 %v13901_v15, %v3552_v53  ;;  %v6665_v16 = vmul.f32 -1.442695, %v11167_v21  ;;  %v13940_v32 = vld [vmem:[#allocation129_spill] sm:$0xff] }
 0x39d   : > { %13927 = vst [vmem:[#allocation116_spill] sm:$0xff] %v11184_v55  ;;  %v2181_v17 = vrot.slane %v2105_v20, 7  ;;  %7754 = vrcp.f32 %v1915_v18  ;;  %v6666_v45 = vmul.f32 -1.442695, %v11175_v44  ;;  %v1582_v10 = vmul.f32 %v13833_v5, %v13931_v0  ;;  %v13939_v18 = vld [vmem:[#allocation136_spill] sm:$0xff] }
 0x39e   : > { %13930 = vst [vmem:[#allocation123_spill] sm:$0xff] %v11190_v22  ;;  %v7743_v26 = vpop.eup %7742  ;;  %v11199_v57 = vmul.f32 %v13933_v6, %v13932_v11  ;;  %v11203_v59 = vmul.f32 %v13936_v35, %v13935_v49  ;;  %v6721_v53 = vmul.f32 -1.442695, %v11179_v63  ;;  %7756 = vpow2.f32 %v6664_v3  ;;  %v13943_v49 = vld [vmem:[#allocation117_spill] sm:$0xff]  ;;  %v13944_v35 = vld [vmem:[#allocation68_spill] sm:$0xff] }
 0x39f   : > { %v11207_v28 = vadd.f32 %v4218_v42, %v11184_v55  ;;  %v11211_v51 = vmul.f32 %v13940_v32, %v13939_v18  ;;  %7758 = vpow2.f32 %v6720_v14  ;;  %v2246_v0 = vmul.f32 %v8793_v2, %v2181_v17  ;;  %v13945_v17 = vld [vmem:[#allocation115_spill] sm:$0xff] }
 0x3a0   : > { %13934 = vst [vmem:[#allocation112_spill] sm:$0xff] %v11199_v57  ;;  %13937 = vst [vmem:[#allocation121_spill] sm:$0xff] %v11203_v59  ;;  %v11215_v11 = vadd.f32 %v13907_v54, %v3636_v4  ;;  %v2314_v6 = vmul.f32 %v13646_v52, %v11073_v33  ;;  %7760 = vpow2.f32 %v6665_v16  ;;  %v1583_v3 = vmul.f32 %v13914_v24, %v13943_v49  ;;  %v13947_v33 = vld [vmem:[#allocation83_spill] sm:$0xff] }
 0x3a1   : > { %13938 = vst [vmem:[#allocation119_spill] sm:$0xff] %v11207_v28  ;;  %13941 = vst [vmem:[#allocation78_spill] sm:$0xff] %v11211_v51  ;;  %v2442_v42 = vmul.f32 %v13896_v47, %v2246_v0  ;;  %v2574_v55 = vmul.f32 %v13944_v35, %v2246_v0  ;;  %7762 = vpow2.f32 %v6666_v45  ;;  %v11224_v18 = vadd.f32 %v13841_v61, %v1582_v10  ;;  %v13949_v28 = vld [vmem:[#allocation49_spill] sm:$0xff] }
 0x3a2   : > { %13942 = vst [vmem:[#allocation124_spill] sm:$0xff] %v11215_v11  ;;  %v7745_v14 = vpop.eup %7744  ;;  %v11228_v4 = vadd.f32 %v11203_v59, %v11211_v51  ;;  %v11231_v32 = vmul.f32 %v7743_v26, %v13945_v17  ;;  %7764 = vpow2.f32 %v6721_v53  ;;  %v3556_v16 = vadd.f32 %v13947_v33, %v3426_v39  ;;  %v13950_v26 = vld [vmem:[#allocation53_spill] sm:$0xff]  ;;  %v13952_v33 = vld [vmem:[#allocation43_spill] sm:$0xff] }
 0x3a3   : > { %v11234_v49 = vpop.eup %7746  ;;  %v2702_v0 = vmul.f32 %v13949_v28, %v13948_v19  ;;  %v2704_v45 = vmul.f32 %v13949_v28, %v11053_v46  ;;  %v2506_v10 = vadd.f32 %v2442_v42, %v2314_v6  ;;  %v2634_v57 = vadd.f32 %v2574_v55, %v11143_v58  ;;  %v13954_v42 = vld [vmem:[#allocation60_spill] sm:$0xff] }
 0x3a4   : > { %13946 = vst [vmem:[#allocation130_spill] sm:$0xff] %v11231_v32  ;;  %v7749_v1 = vpop.eup %7748  ;;  %v6723_v59 = vmul.f32 -1.442695, %v11215_v11  ;;  %v2836_v17 = vmul.f32 %v13950_v26, %v11053_v46  ;;  %v3096_v53 = vrot.slane %v2105_v20, 1  ;;  %v11245_v39 = vadd.f32 %v13912_v43, %v1583_v3 }
 0x3a5   : > { %v7751_v51 = vpop.eup %7750  ;;  %v3970_v7 = vadd.f32 1.0, %v7745_v14  ;;  %v2636_v19 = vadd.f32 %v13952_v33, %v2506_v10  ;;  %v2764_v41 = vadd.f32 %v2702_v0, %v2634_v57  ;;  %v6667_v12 = vmul.f32 -1.442695, %v11224_v18  ;;  %v13955_v33 = vld [vmem:[#allocation141_spill] sm:$0xff] }
 0x3a6   : > { %13951 = vst [vmem:[#allocation90_spill] sm:$0xff] %v11245_v39  ;;  %v11249_v6 = vpop.eup %7752  ;;  %v3638_v58 = vmul.f32 %v13901_v15, %v11161_v48  ;;  %v3640_v55 = vmul.f32 %v13901_v15, %v3556_v16  ;;  %v2838_v46 = vmul.f32 %v13950_v26, %v2105_v20  ;;  %v3227_v3 = vmul.f32 %v13954_v42, %v11088_v13 }
 0x3a7   : > { %13953 = vst [vmem:[#allocation50_spill] sm:$0xff] %v11249_v6  ;;  %v7755_v22 = vpop.eup %7754  ;;  %v2766_v11 = vadd.f32 %v2704_v45, %v2636_v19  ;;  %v2900_v14 = vadd.f32 %v2836_v17, %v2764_v41  ;;  %v2970_v10 = vmul.f32 %v13904_v36, %v2105_v20  ;;  %v1916_v57 = vadd.f32 1.0, %v7749_v1 }
 0x3a8   : > { %v7757_v0 = vpop.eup %7756  ;;  %7766 = vpow2.f32 %v6723_v59  ;;  %v3161_v6 = vmul.f32 %v13878_v56, %v3096_v53  ;;  %v11260_v63 = vmul.f32 %v7751_v51, %v13955_v33  ;;  %v6668_v48 = vmul.f32 -1.442695, %v11245_v39  ;;  %v13957_v59 = vld [vmem:[#allocation69_spill] sm:$0xff]  ;;  %v13963_v39 = vld [vmem:[#allocation126_spill] sm:$0xff] }
 0x3a9   : > { %v7759_v16 = vpop.eup %7758  ;;  %v2902_v30 = vadd.f32 %v2838_v46, %v2766_v11  ;;  %v3030_v9 = vadd.f32 %v2970_v10, %v2900_v14  ;;  %v3229_v13 = vmul.f32 %v13954_v42, %v11109_v25  ;;  %7768 = vpow2.f32 %v6667_v12  ;;  %v13959_v11 = vld [vmem:[#allocation94_spill] sm:$0xff] }
 0x3aa   : > { %v7761_v41 = vpop.eup %7760  ;;  %v11266_v20 = vadd.f32 %v13907_v54, %v3638_v58  ;;  %v3361_v1 = vmul.f32 %v13894_v50, %v11109_v25  ;;  %v11271_v45 = vmul.f32 %v7755_v22, %v13957_v59  ;;  %7770 = vrcp.f32 %v1916_v57  ;;  %v11281_v58 = vld [vmem:[%s13086_s5 + $0x18] ss:$0 sm:$0xff]  ;;  %v13960_v57 = vld [vmem:[#allocation134_spill] sm:$0xff] }
 0x3ab   : > { %v7763_v51 = vpop.eup %7762  ;;  %v11274_v33 = vadd.f32 %v13907_v54, %v3640_v55  ;;  %v3032_v17 = vadd.f32 %v13959_v11, %v2902_v30  ;;  %v3289_v53 = vadd.f32 %v3227_v3, %v3030_v9  ;;  %v1917_v19 = vadd.f32 1.0, %v7757_v0 }
 0x3ac   : > { %13956 = vst [vmem:[#allocation133_spill] sm:$0xff] %v11266_v20  ;;  %v7765_v12 = vpop.eup %7764  ;;  %v3363_v46 = vmul.f32 %v13894_v50, %v3161_v6  ;;  %v3495_v25 = vmul.f32 %v11281_v58, %v3161_v6  ;;  %v2182_v22 = vrot.slane %v11260_v63, 7  ;;  %7772 = vpow2.f32 %v6668_v48  ;;  %v13962_v6 = vld [vmem:[#allocation135_spill] sm:$0xff] }
 0x3ad   : > { %13958 = vst [vmem:[#allocation120_spill] sm:$0xff] %v11274_v33  ;;  %v3291_v14 = vadd.f32 %v3229_v13, %v3032_v17  ;;  %v3425_v55 = vadd.f32 %v3361_v1, %v3289_v53  ;;  %7774 = vrcp.f32 %v1917_v19  ;;  %v1918_v10 = vadd.f32 1.0, %v7761_v41  ;;  %v13966_v41 = vld [vmem:[#allocation75_spill] sm:$0xff] }
 0x3ae   : > { %v3971_v30 = vadd.f32 1.0, %v7759_v16  ;;  %v2183_v9 = vrot.slane %v11271_v45, 7  ;;  %v1919_v3 = vadd.f32 1.0, %v7763_v51  ;;  %v1584_v0 = vmul.f32 %v13833_v5, %v13960_v57  ;;  %v13965_v16 = vld [vmem:[#allocation110_spill] sm:$0xff] }
 0x3af   : > { %7776 = vrcp.f32 %v3970_v7  ;;  %v3972_v59 = vadd.f32 1.0, %v7765_v12  ;;  %v11288_v11 = vadd.f32 %v3363_v46, %v3291_v14  ;;  %v3555_v54 = vadd.f32 %v3495_v25, %v3425_v55  ;;  %v13969_v46 = vld [vmem:[#allocation122_spill] sm:$0xff] }
 0x3b0   : > { %v11292_v15 = vmul.f32 %v13963_v39, %v13962_v6  ;;  %v6725_v48 = vmul.f32 -1.442695, %v11266_v20  ;;  %v3097_v13 = vrot.slane %v11260_v63, 1  ;;  %7778 = vrcp.f32 %v1918_v10 }
 0x3b1   : > { %13961 = vst [vmem:[#allocation58_spill] sm:$0xff] %v11288_v11  ;;  %v11298_v1 = vmul.f32 %v13966_v41, %v13965_v16  ;;  %v6727_v51 = vmul.f32 -1.442695, %v11274_v33  ;;  %v2247_v7 = vmul.f32 %v8793_v2, %v2182_v22  ;;  %7780 = vrcp.f32 %v1919_v3  ;;  %v13974_v3 = vld [vmem:[#allocation137_spill] sm:$0xff] }
 0x3b2   : > { %13964 = vst [vmem:[#allocation136_spill] sm:$0xff] %v11292_v15  ;;  %v7767_v17 = vpop.eup %7766  ;;  %7782 = vrcp.f32 %v3971_v30  ;;  %v2248_v53 = vmul.f32 %v8793_v2, %v2183_v9  ;;  %v3098_v39 = vrot.slane %v11271_v45, 1  ;;  %v11305_v19 = vadd.f32 %v13841_v61, %v1584_v0  ;;  %v13973_v30 = vld [vmem:[#allocation125_spill] sm:$0xff] }
 0x3b3   : > { %13967 = vst [vmem:[#allocation129_spill] sm:$0xff] %v11298_v1  ;;  %v7769_v12 = vpop.eup %7768  ;;  %v11309_v25 = vmul.f32 %v11234_v49, %v13969_v46  ;;  %v11313_v14 = vadd.f32 %v11228_v4, %v11231_v32  ;;  %7784 = vrcp.f32 %v3972_v59  ;;  %v11317_v22 = vmul.f32 %v13631_v37, %v11106_v62  ;;  %v13975_v59 = vld [vmem:[#allocation46_spill] sm:$0xff]  ;;  %v13977_v1 = vld [vmem:[#allocation63_spill] sm:$0xff] }
 0x3b4   : > { %13968 = vst [vmem:[#allocation117_spill] sm:$0xff] %v11305_v19  ;;  %v7771_v55 = vpop.eup %7770  ;;  %7786 = vpow2.f32 %v6725_v48  ;;  %v3162_v10 = vmul.f32 %v13878_v56, %v3097_v13  ;;  %v1585_v9 = vmul.f32 %v13914_v24, %v13973_v30  ;;  %v1586_v49 = vmul.f32 %v13833_v5, %v13974_v3 }
 0x3b5   : > { %13970 = vst [vmem:[#allocation68_spill] sm:$0xff] %v11309_v25  ;;  %13971 = vst [vmem:[#allocation115_spill] sm:$0xff] %v11313_v14  ;;  %v11324_v57 = vadd.f32 1.0, %v7767_v17  ;;  %7788 = vpow2.f32 %v6727_v51  ;;  %v2443_v4 = vmul.f32 %v13905_v8, %v2247_v7  ;;  %v11328_v0 = vmul.f32 %v7771_v55, %v11127_v38 }
 0x3b6   : > { %13972 = vst [vmem:[#allocation128_spill] sm:$0xff] %v11317_v22  ;;  %v7773_v62 = vpop.eup %7772  ;;  %v11332_v6 = vmul.f32 %v13975_v59, %v11260_v63  ;;  %v2444_v48 = vmul.f32 %v13896_v47, %v2248_v53  ;;  %v3163_v13 = vmul.f32 %v13878_v56, %v3098_v39  ;;  %v6669_v16 = vmul.f32 -1.442695, %v11305_v19 }
 0x3b7   : > { %v7775_v41 = vpop.eup %7774  ;;  %v2839_v51 = vmul.f32 %v8818_v23, %v11260_v63  ;;  %v11341_v17 = vmul.f32 %v13949_v28, %v11271_v45  ;;  %v2184_v38 = vrot.slane %v11328_v0, 7  ;;  %v1920_v46 = vadd.f32 1.0, %v7769_v12  ;;  %v13976_v63 = vld [vmem:[#allocation47_spill] sm:$0xff] }
 0x3b8   : > { %v2315_v55 = vmul.f32 %v13902_v60, %v2247_v7  ;;  %v11346_v30 = vmul.f32 %v13663_v31, %v3162_v10  ;;  %v2840_v39 = vmul.f32 %v13950_v26, %v11271_v45  ;;  %v11351_v3 = vmul.f32 %v7775_v41, %v11154_v27 }
 0x3b9   : > { %v11353_v32 = vpop.eup %7776  ;;  %v2507_v15 = vadd.f32 %v2443_v4, %v13976_v63  ;;  %v11357_v33 = vmul.f32 %v13559_v29, %v3162_v10  ;;  %v2316_v12 = vmul.f32 %v13646_v52, %v2248_v53  ;;  %v2249_v7 = vmul.f32 %v8793_v2, %v2184_v38  ;;  %v13978_v4 = vld [vmem:[#allocation65_spill] sm:$0xff] }
 0x3ba   : > { %v7779_v25 = vpop.eup %7778  ;;  %v2508_v20 = vadd.f32 %v2444_v48, %v13977_v1  ;;  %v11363_v22 = vmul.f32 %v13954_v42, %v3163_v13  ;;  %v2185_v27 = vrot.slane %v11351_v3, 7  ;;  %v1921_v45 = vadd.f32 1.0, %v7773_v62 }
 0x3bb   : > { %v7781_v41 = vpop.eup %7780  ;;  %v2445_v19 = vmul.f32 %v13905_v8, %v2249_v7  ;;  %v2575_v63 = vmul.f32 %v13978_v4, %v2249_v7  ;;  %7790 = vrcp.f32 %v1920_v46  ;;  %v11369_v10 = vadd.f32 %v13912_v43, %v1585_v9 }
 0x3bc   : > { %v11371_v53 = vpop.eup %7782  ;;  %v11374_v38 = vmul.f32 %v13631_v37, %v3555_v54  ;;  %v11377_v1 = vmul.f32 %v13894_v50, %v3163_v13  ;;  %v2250_v48 = vmul.f32 %v8793_v2, %v2185_v27  ;;  %v11381_v62 = vadd.f32 %v13841_v61, %v1586_v49  ;;  %v13984_v49 = vld [vmem:[#allocation138_spill] sm:$0xff] }
 0x3bd   : > { %13979 = vst [vmem:[#allocation53_spill] sm:$0xff] %v11369_v10  ;;  %13980 = vst [vmem:[#allocation141_spill] sm:$0xff] %v11371_v53  ;;  %v11383_v42 = vpop.eup %7784  ;;  %v2509_v11 = vadd.f32 %v2445_v19, %v2315_v55  ;;  %v2637_v46 = vadd.f32 %v2575_v63, %v2507_v15  ;;  %v3099_v9 = vrot.slane %v11328_v0, 1  ;;  %v11387_v5 = vmul.f32 %v7779_v25, %v11167_v21  ;;  %v13986_v15 = vld [vmem:[#allocation70_spill] sm:$0xff] }
 0x3be   : > { %13981 = vst [vmem:[#allocation69_spill] sm:$0xff] %v11381_v62  ;;  %13982 = vst [vmem:[#allocation134_spill] sm:$0xff] %v11383_v42  ;;  %v11389_v53 = vpop.eup %7786  ;;  %v2446_v54 = vmul.f32 %v13896_v47, %v2250_v48  ;;  %v2576_v13 = vmul.f32 %v13944_v35, %v2250_v48  ;;  %v11394_v27 = vmul.f32 %v7781_v41, %v11175_v44  ;;  %7792 = vrcp.f32 %v1921_v45 }
 0x3bf   : > { %13983 = vst [vmem:[#allocation135_spill] sm:$0xff] %v11389_v53  ;;  %v1587_v61 = vmul.f32 %v13914_v24, %v13984_v49  ;;  %v11398_v14 = vpop.eup %7788  ;;  %v2767_v19 = vadd.f32 %v13986_v15, %v2637_v46  ;;  %v2186_v55 = vrot.slane %v11387_v5, 7  ;;  %v6670_v21 = vmul.f32 -1.442695, %v11369_v10  ;;  %v13987_v15 = vld [vmem:[#allocation71_spill] sm:$0xff] }
 0x3c0   : > { %13985 = vst [vmem:[#allocation126_spill] sm:$0xff] %v11398_v14  ;;  %v2510_v25 = vadd.f32 %v2446_v54, %v2316_v12  ;;  %v2638_v63 = vadd.f32 %v2576_v13, %v2508_v20  ;;  %7794 = vpow2.f32 %v6669_v16  ;;  %v11404_v42 = vmul.f32 -1.442695, %v11381_v62  ;;  %v7184_v13 = vld [vmem:[%s13088_s7 + $0x40] sm:$0xff]  }
 0x3c1   : > { %v2903_v44 = vadd.f32 %v2839_v51, %v2767_v19  ;;  %v2971_v41 = vmul.f32 %v13715_v34, %v11328_v0  ;;  %v11409_v49 = vmul.f32 %v13878_v56, %v3099_v9  ;;  %v11412_v46 = vmul.f32 %v8793_v2, %v2186_v55  ;;  %v7185_v19 = vld [vmem:[%s13088_s7] sm:$0xff]   ;;  %6921 = vmatprep.subr.bf16.mxu0 %v7184_v13 }
 0x3c2   : > { %v2768_v45 = vadd.f32 %v13987_v15, %v2638_v63  ;;  %v3100_v10 = vrot.slane %v11351_v3, 1  ;;  %v2187_v20 = vrot.slane %v11394_v27, 7  ;;  %v11418_v16 = vadd.f32 %v13912_v43, %v1587_v61  ;;  %v7186_v61 = vld [vmem:[%s13088_s7 + $0x48] sm:$0xff]   ;;  %v13989_v15 = vld [vmem:[#allocation73_spill] sm:$0xff]  ;;  %v11445_v43 = vld [vmem:[%s13086_s5 + $0x10] ss:$0 sm:$0xff]  ;;  %6922 = vmatpush3.bf16.msra.mxu0 %v7185_v19 }
 0x3c3   : > { %v2317_v51 = vmul.f32 %v13902_v60, %v2249_v7  ;;  %v3033_v12 = vadd.f32 %v2971_v41, %v2903_v44  ;;  %v2447_v54 = vmul.f32 %v13905_v8, %v11412_v46  ;;  %v2577_v9 = vmul.f32 %v13978_v4, %v11412_v46  ;;  %13990 = vst [vmem:[#allocation75_spill] sm:$0xff] %v11445_v43 }
 0x3c4   : > { %13988 = vst [vmem:[#allocation110_spill] sm:$0xff] %v11418_v16  ;;  %v2841_v7 = vmul.f32 %v8818_v23, %v11328_v0  ;;  %v2904_v55 = vadd.f32 %v2840_v39, %v2768_v45  ;;  %v2972_v63 = vmul.f32 %v13904_v36, %v11351_v3  ;;  %v11439_v44 = vmul.f32 %v8793_v2, %v2187_v20 }
 0x3c5   : > { %v7791_v41 = vpop.eup %7790  ;;  %v3292_v62 = vadd.f32 %v13989_v15, %v3033_v12  ;;  %v3496_v24 = vmul.f32 %v11445_v43, %v11409_v49  ;;  %v2511_v14 = vadd.f32 %v2447_v54, %v2317_v51  ;;  %v2639_v28 = vadd.f32 %v2577_v9, %v2509_v11  ;;  %v7187_v12 = vld [vmem:[%s13088_s7 + $0x8] sm:$0xff]   ;;  %6923 = vmatprep.subr.bf16.mxu0 %v7186_v61  ;;  %v13991_v51 = vld [vmem:[#allocation76_spill] sm:$0xff] }
 0x3c6   : > { %v2318_v39 = vmul.f32 %v13646_v52, %v2250_v48  ;;  %v3034_v45 = vadd.f32 %v2972_v63, %v2904_v55  ;;  %v11451_v20 = vmul.f32 %v13878_v56, %v3100_v10  ;;  %v3101_v53 = vrot.slane %v11387_v5, 1  ;;  %v7188_v10 = vld [vmem:[%s13088_s7 + $0x50] sm:$0xff]   ;;  %6924 = vmatpush3.bf16.msra.mxu0 %v7187_v12 }
 0x3c7   : > { %v3428_v15 = vadd.f32 %v11357_v33, %v3292_v62  ;;  %v2769_v31 = vadd.f32 %v11332_v6, %v2639_v28  ;;  %v2448_v11 = vmul.f32 %v13896_v47, %v11439_v44  ;;  %v2578_v48 = vmul.f32 %v13944_v35, %v11439_v44  ;;  %6925 = vmatprep.subr.bf16.mxu0 %v7188_v10 }
 0x3c8   : > { %v3293_v54 = vadd.f32 %v13991_v51, %v3034_v45  ;;  %v2973_v9 = vmul.f32 %v13715_v34, %v11387_v5  ;;  %v11470_v33 = vmul.f32 %v7791_v41, %v11224_v18  ;;  %7796 = vpow2.f32 %v6670_v21  ;;  %v7793_v28 = vpop.eup %7792 }
 0x3c9   : > { %v3558_v6 = vadd.f32 %v3496_v24, %v3428_v15  ;;  %v2905_v62 = vadd.f32 %v2841_v7, %v2769_v31  ;;  %v11472_v13 = vadd.f32 %v2448_v11, %v2318_v39  ;;  %v2640_v19 = vadd.f32 %v2578_v48, %v2510_v25  ;;  %v7189_v31 = vld [vmem:[%s13088_s7 + $0x10] sm:$0xff]  }
 0x3ca   : > { %v11474_v61 = vpop.eup %7794  ;;  %v2842_v55 = vmul.f32 %v13950_v26, %v11351_v3  ;;  %v3429_v63 = vadd.f32 %v11377_v1, %v3293_v54  ;;  %v3497_v45 = vmul.f32 %v11281_v58, %v11451_v20  ;;  %v2188_v18 = vrot.slane %v11470_v33, 7  ;;  %v7190_v1 = vld [vmem:[%s13088_s7 + $0x58] sm:$0xff]   ;;  %6926 = vmatpush3.bf16.msra.mxu0 %v7189_v31 }
 0x3cb   : > { %v3035_v24 = vadd.f32 %v2973_v9, %v2905_v62  ;;  %v11486_v21 = vmul.f32 %v13878_v56, %v3101_v53  ;;  %v2770_v25 = vadd.f32 %v11341_v17, %v2640_v19  ;;  %v3102_v7 = vrot.slane %v11394_v27, 1  ;;  %6927 = vmatprep.subr.bf16.mxu0 %v7190_v1  ;;  %v7192_v62 = vld [vmem:[%s13088_s7 + $0x60] sm:$0xff]  }
 0x3cc   : > { %v11495_v41 = vadd.f32 %v13915_v40, %v11374_v38  ;;  %v11497_v39 = vadd.f32 %v3497_v45, %v3429_v63  ;;  %v11500_v12 = vmul.f32 %v8793_v2, %v2188_v18  ;;  %7798 = vpow2.f32 %v11404_v42  ;;  %v13993_v18 = vld [vmem:[#allocation79_spill] sm:$0xff] }
 0x3cd   : > { %v3366_v17 = vmul.f32 %v13559_v29, %v11409_v49  ;;  %v3294_v53 = vadd.f32 %v11346_v30, %v3035_v24  ;;  %v2906_v15 = vadd.f32 %v2842_v55, %v2770_v25  ;;  %v2974_v11 = vmul.f32 %v13904_v36, %v11394_v27  ;;  %v7191_v30 = vld [vmem:[%s13088_s7 + $0x18] sm:$0xff]  }
 0x3ce   : > { %13992 = vst [vmem:[#allocation122_spill] sm:$0xff] %v11495_v41  ;;  %v2319_v38 = vmul.f32 %v13902_v60, %v11412_v46  ;;  %v2449_v48 = vmul.f32 %v13905_v8, %v11500_v12  ;;  %v2579_v10 = vmul.f32 %v13978_v4, %v11500_v12  ;;  %v6672_v42 = vmul.f32 -1.442695, %v11418_v16  ;;  %6928 = vmatpush3.bf16.msra.mxu0 %v7191_v30 }
 0x3cf   : > { %v3430_v51 = vadd.f32 %v3366_v17, %v3294_v53  ;;  %v3498_v54 = vmul.f32 %v11445_v43, %v11486_v21  ;;  %v3036_v9 = vadd.f32 %v2974_v11, %v2906_v15  ;;  %v11521_v46 = vmul.f32 %v13878_v56, %v3102_v7  ;;  %v13994_v15 = vld [vmem:[#allocation90_spill] sm:$0xff]  ;;  %6929 = vmatprep.subr.bf16.mxu0 %v7192_v62 }
 0x3d0   : > { %v2707_v19 = vmul.f32 %v13975_v59, %v11328_v0  ;;  %v3367_v55 = vmul.f32 %v13894_v50, %v11451_v20  ;;  %v11530_v63 = vadd.f32 %v2449_v48, %v2319_v38  ;;  %v2641_v45 = vadd.f32 %v2579_v10, %v2511_v14  ;;  %v7193_v14 = vld [vmem:[%s13088_s7 + $0x20] sm:$0xff]   ;;  %v13997_v10 = vld [vmem:[#allocation84_spill] sm:$0xff] }
 0x3d1   : > { %v3642_v31 = vmul.f32 %v13993_v18, %v3558_v6  ;;  %v3560_v24 = vadd.f32 %v3498_v54, %v3430_v51  ;;  %v3295_v25 = vadd.f32 %v11363_v22, %v3036_v9  ;;  %v3103_v7 = vrot.slane %v11470_v33, 1  ;;  %v13995_v6 = vld [vmem:[#allocation102_spill] sm:$0xff]  ;;  %v13999_v54 = vld [vmem:[#allocation80_spill] sm:$0xff] }
 0x3d2   : > { %v7797_v1 = vpop.eup %7796  ;;  %v2843_v17 = vmul.f32 %v8818_v23, %v11387_v5  ;;  %v2771_v53 = vadd.f32 %v2707_v19, %v2641_v45  ;;  %v11538_v0 = vmul.f32 %v7793_v28, %v13994_v15  ;;  %7800 = vpow2.f32 %v6672_v42  ;;  %v7194_v28 = vld [vmem:[%s13088_s7 + $0x68] sm:$0xff]   ;;  %6930 = vmatpush3.bf16.msra.mxu0 %v7193_v14 }
 0x3d3   : > { %v11545_v11 = vmul.f32 %v11353_v32, %v13995_v6  ;;  %v6726_v22 = vmul.f32 -1.442695, %v11495_v41  ;;  %v3431_v38 = vadd.f32 %v3367_v55, %v3295_v25  ;;  %v3499_v48 = vmul.f32 %v11281_v58, %v11521_v46  ;;  %v14001_v25 = vld [vmem:[#allocation56_spill] sm:$0xff]  ;;  %6931 = vmatprep.subr.bf16.mxu0 %v7194_v28  ;;  %v14005_v41 = vld [vmem:[#allocation134_spill] sm:$0xff] }
 0x3d4   : > { %v11555_v42 = vmul.f32 %v13631_v37, %v13997_v10  ;;  %v2907_v30 = vadd.f32 %v2843_v17, %v2771_v53  ;;  %v2975_v32 = vmul.f32 %v13715_v34, %v11470_v33  ;;  %v2189_v51 = vrot.slane %v11538_v0, 7 }
 0x3d5   : > { %13996 = vst [vmem:[#allocation125_spill] sm:$0xff] %v11545_v11  ;;  %7802 = vrcp.f32 %v11324_v57  ;;  %v11562_v9 = vadd.f32 %v13999_v54, %v3642_v31  ;;  %v3561_v62 = vadd.f32 %v3499_v48, %v3431_v38  ;;  %v11565_v19 = vmul.f32 %v13878_v56, %v3103_v7  ;;  %v7195_v57 = vld [vmem:[%s13088_s7 + $0x28] sm:$0xff]  }
 0x3d6   : > { %13998 = vst [vmem:[#allocation137_spill] sm:$0xff] %v11555_v42  ;;  %v7799_v55 = vpop.eup %7798  ;;  %v3037_v45 = vadd.f32 %v2975_v32, %v2907_v30  ;;  %v3232_v15 = vmul.f32 %v14001_v25, %v11409_v49  ;;  %v11570_v17 = vmul.f32 %v8793_v2, %v2189_v51  ;;  %v1922_v53 = vadd.f32 1.0, %v11474_v61  ;;  %v14002_v31 = vld [vmem:[#allocation135_spill] sm:$0xff]  ;;  %v7196_v49 = vld [vmem:[%s13088_s7 + $0x70] sm:$0xff]   ;;  %v14003_v30 = vld [vmem:[#allocation49_spill] sm:$0xff]  ;;  %6932 = vmatpush3.bf16.msra.mxu0 %v7195_v57 }
 0x3d7   : > { %14000 = vst [vmem:[#allocation47_spill] sm:$0xff] %v11562_v9  ;;  %v3976_v6 = vadd.f32 1.0, %v14002_v31  ;;  %7804 = vpow2.f32 %v6726_v22  ;;  %v3368_v7 = vmul.f32 %v13559_v29, %v11486_v21  ;;  %v1923_v38 = vadd.f32 1.0, %v7797_v1  ;;  %v14008_v42 = vld [vmem:[#allocation87_spill] sm:$0xff]  ;;  %6933 = vmatprep.subr.bf16.mxu0 %v7196_v49  ;;  %v14011_v49 = vld [vmem:[#allocation126_spill] sm:$0xff] }
 0x3d8   : > { %v2320_v61 = vmul.f32 %v13646_v52, %v11439_v44  ;;  %v3296_v14 = vadd.f32 %v3232_v15, %v3037_v45  ;;  %v2450_v48 = vmul.f32 %v13896_v47, %v11570_v17  ;;  %v2580_v10 = vmul.f32 %v13944_v35, %v11570_v17  ;;  %v7197_v45 = vld [vmem:[%s13088_s7 + $0x30] sm:$0xff]   ;;  %v14004_v15 = vld [vmem:[#allocation66_spill] sm:$0xff] }
 0x3d9   : > { %v6729_v22 = vmul.f32 -1.442695, %v11562_v9  ;;  %v2708_v1 = vmul.f32 %v14003_v30, %v11351_v3  ;;  %v3644_v28 = vmul.f32 %v13993_v18, %v3560_v24  ;;  %v3500_v32 = vmul.f32 %v11445_v43, %v11565_v19  ;;  %v14007_v3 = vld [vmem:[#allocation115_spill] sm:$0xff] }
 0x3da   : > { %v3432_v51 = vadd.f32 %v3368_v7, %v3296_v14  ;;  %v11594_v31 = vadd.f32 %v2450_v48, %v2320_v61  ;;  %v2642_v44 = vadd.f32 %v2580_v10, %v11472_v13  ;;  %7806 = vrcp.f32 %v1922_v53  ;;  %v14009_v7 = vld [vmem:[#allocation39_spill] sm:$0xff]  ;;  %v7198_v13 = vld [vmem:[%s13088_s7 + $0x78] sm:$0xff]   ;;  %6934 = vmatpush3.bf16.msra.mxu0 %v7197_v45  ;;  %v14016_v45 = vld [vmem:[#allocation60_spill] sm:$0xff] }
 0x3db   : > { %v11602_v9 = vmul.f32 %v14005_v41, %v14004_v15  ;;  %v4242_v24 = vadd.f32 %v14007_v3, %v11545_v11  ;;  %7808 = vrcp.f32 %v1923_v38  ;;  %v1588_v61 = vmul.f32 %v14009_v7, %v14008_v42  ;;  %6935 = vmatprep.subr.bf16.mxu0 %v7198_v13 }
 0x3dc   : > { %v7801_v53 = vpop.eup %7800  ;;  %v2844_v57 = vmul.f32 %v13950_v26, %v11394_v27  ;;  %v3562_v14 = vadd.f32 %v3500_v32, %v3432_v51  ;;  %v2772_v48 = vadd.f32 %v2708_v1, %v2642_v44  ;;  %v3104_v41 = vrot.slane %v11538_v0, 1  ;;  %v7199_v1 = vld [vmem:[%s13088_s7 + $0x38] sm:$0xff]   ;;  %v14012_v32 = vld [vmem:[#allocation58_spill] sm:$0xff]  ;;  %v14013_v51 = vld [vmem:[#allocation104_spill] sm:$0xff] }
 0x3dd   : > { %14006 = vst [vmem:[#allocation63_spill] sm:$0xff] %v11602_v9  ;;  %7810 = vpow2.f32 %v6729_v22  ;;  %v3643_v38 = vmul.f32 %v13631_v37, %v11497_v39  ;;  %v11617_v10 = vadd.f32 %v13999_v54, %v3644_v28  ;;  %v1924_v42 = vadd.f32 1.0, %v7799_v55  ;;  %v14014_v55 = vld [vmem:[#allocation41_spill] sm:$0xff] }
 0x3de   : > { %v3978_v15 = vadd.f32 1.0, %v14011_v49  ;;  %7812 = vrcp.f32 %v3976_v6  ;;  %v2908_v3 = vadd.f32 %v2844_v57, %v2772_v48  ;;  %v2976_v11 = vmul.f32 %v13904_v36, %v11538_v0  ;;  %v14017_v49 = vld [vmem:[#allocation140_spill] sm:$0xff]  ;;  %6936 = vmatpush3.bf16.msra.mxu0 %v7199_v1 }
 0x3df   : > { %14010 = vst [vmem:[#allocation65_spill] sm:$0xff] %v11617_v10  ;;  %v7803_v22 = vpop.eup %7802  ;;  %v3557_v39 = vadd.f32 %v14013_v51, %v14012_v32  ;;  %v3645_v28 = vmul.f32 %v13631_v37, %v3561_v62  ;;  %v1925_v44 = vadd.f32 1.0, %v7801_v53  ;;  %v11629_v43 = vadd.f32 %v14014_v55, %v1588_v61  ;;  %v14018_v36 = vld [vmem:[#allocation40_spill] sm:$0xff]  ;;  %v14020_v61 = vld [vmem:[#allocation45_spill] sm:$0xff] }
 0x3e0   : > { %v3038_v6 = vadd.f32 %v2976_v11, %v2908_v3  ;;  %v11632_v57 = vmul.f32 %v13878_v56, %v3104_v41  ;;  %v3233_v48 = vmul.f32 %v14016_v45, %v11451_v20  ;;  %v1589_v34 = vmul.f32 %v14018_v36, %v14017_v49  ;;  %v14021_v41 = vld [vmem:[#allocation124_spill] sm:$0xff] }
 0x3e1   : > { %14015 = vst [vmem:[#allocation138_spill] sm:$0xff] %v11629_v43  ;;  %v7805_v16 = vpop.eup %7804  ;;  %v11639_v32 = vadd.f32 %v13915_v40, %v3643_v38  ;;  %v6731_v62 = vmul.f32 -1.442695, %v11617_v10  ;;  %7814 = vrcp.f32 %v1924_v42  ;;  %v1590_v13 = vmul.f32 %v14009_v7, %v14020_v61  ;;  %v14024_v61 = vld [vmem:[#allocation42_spill] sm:$0xff] }
 0x3e2   : > { %7816 = vrcp.f32 %v3978_v15  ;;  %v11645_v11 = vadd.f32 %v4242_v24, %v11602_v9  ;;  %v3369_v20 = vmul.f32 %v13894_v50, %v11521_v46  ;;  %v3297_v53 = vadd.f32 %v3233_v48, %v3038_v6 }
 0x3e3   : > { %14019 = vst [vmem:[#allocation70_spill] sm:$0xff] %v11639_v32  ;;  %v11650_v3 = vmul.f32 %v7803_v22, %v14021_v41  ;;  %v11653_v38 = vmul.f32 %v13631_v37, %v3557_v39  ;;  %v11656_v42 = vadd.f32 %v13915_v40, %v3645_v28  ;;  %7818 = vrcp.f32 %v1925_v44  ;;  %v14026_v39 = vld [vmem:[#allocation117_spill] sm:$0xff] }
 0x3e4   : > { %v7807_v7 = vpop.eup %7806  ;;  %v3433_v15 = vadd.f32 %v3369_v20, %v3297_v53  ;;  %v3501_v24 = vmul.f32 %v11281_v58, %v11632_v57  ;;  %v6673_v49 = vmul.f32 -1.442695, %v11629_v43  ;;  %v11662_v6 = vadd.f32 %v14024_v61, %v1589_v34  ;;  %v14028_v53 = vld [vmem:[#allocation53_spill] sm:$0xff]  ;;  %v14029_v34 = vld [vmem:[#allocation127_spill] sm:$0xff] }
 0x3e5   : > { %14022 = vst [vmem:[#allocation71_spill] sm:$0xff] %v11650_v3  ;;  %14023 = vst [vmem:[#allocation73_spill] sm:$0xff] %v11656_v42  ;;  %v7809_v1 = vpop.eup %7808  ;;  %v6730_v22 = vmul.f32 -1.442695, %v11639_v32  ;;  %7820 = vpow2.f32 %v6731_v62  ;;  %v11666_v48 = vmul.f32 %v7807_v7, %v14026_v39  ;;  %v11669_v28 = vadd.f32 %v14014_v55, %v1590_v13 }
 0x3e6   : > { %14025 = vst [vmem:[#allocation76_spill] sm:$0xff] %v11662_v6  ;;  %v2709_v44 = vmul.f32 %v13975_v59, %v11387_v5  ;;  %v11673_v20 = vadd.f32 %v3501_v24, %v3433_v15  ;;  %v11676_v41 = vmul.f32 %v7809_v1, %v14028_v53  ;;  %v11680_v9 = vmul.f32 %v14018_v36, %v14029_v34 }
 0x3e7   : > { %14027 = vst [vmem:[#allocation79_spill] sm:$0xff] %v11669_v28  ;;  %v7811_v32 = vpop.eup %7810  ;;  %v11682_v62 = vadd.f32 1.0, %v7805_v16  ;;  %v2710_v7 = vmul.f32 %v14003_v30, %v11394_v27  ;;  %v6732_v55 = vmul.f32 -1.442695, %v11656_v42  ;;  %v2190_v13 = vrot.slane %v11666_v48, 7 }
 0x3e8   : > { %v11688_v5 = vpop.eup %7812  ;;  %v11692_v15 = vmul.f32 %v13975_v59, %v11470_v33  ;;  %v2845_v36 = vmul.f32 %v8818_v23, %v11470_v33  ;;  %v3646_v24 = vmul.f32 %v13993_v18, %v3562_v14  ;;  %v2191_v16 = vrot.slane %v11676_v41, 7 }
 0x3e9   : > { %14030 = vst [vmem:[#allocation90_spill] sm:$0xff] %v11688_v5  ;;  %7822 = vpow2.f32 %v6730_v22  ;;  %v2321_v27 = vmul.f32 %v13902_v60, %v11500_v12  ;;  %v3370_v1 = vmul.f32 %v13559_v29, %v11565_v19  ;;  %v2255_v39 = vmul.f32 %v8793_v2, %v2190_v13 }
 0x3ea   : > { %v3980_v53 = vadd.f32 1.0, %v7811_v32  ;;  %v11705_v34 = vmul.f32 %v14003_v30, %v11538_v0  ;;  %v2846_v33 = vmul.f32 %v13950_v26, %v11538_v0  ;;  %v2256_v14 = vmul.f32 %v8793_v2, %v2191_v16 }
 0x3eb   : > { %v7815_v42 = vpop.eup %7814  ;;  %7824 = vpow2.f32 %v6732_v55  ;;  %v2451_v22 = vmul.f32 %v13905_v8, %v2255_v39  ;;  %v2581_v12 = vmul.f32 %v13978_v4, %v2255_v39  ;;  %v3234_v51 = vmul.f32 %v14001_v25, %v11486_v21 }
 0x3ec   : > { %v11714_v13 = vpop.eup %7816  ;;  %v11717_v32 = vadd.f32 %v13999_v54, %v3646_v24  ;;  %v2322_v10 = vmul.f32 %v13646_v52, %v11570_v17  ;;  %7826 = vpow2.f32 %v6673_v49  ;;  %v6674_v0 = vmul.f32 -1.442695, %v11662_v6  ;;  %v14033_v24 = vld [vmem:[#allocation69_spill] sm:$0xff] }
 0x3ed   : > { %14031 = vst [vmem:[#allocation102_spill] sm:$0xff] %v11714_v13  ;;  %v7819_v16 = vpop.eup %7818  ;;  %v2515_v55 = vadd.f32 %v2451_v22, %v2321_v27  ;;  %v2643_v30 = vadd.f32 %v2581_v12, %v11530_v63  ;;  %v2452_v59 = vmul.f32 %v13896_v47, %v2256_v14  ;;  %v2582_v43 = vmul.f32 %v13944_v35, %v2256_v14 }
 0x3ee   : > { %14032 = vst [vmem:[#allocation84_spill] sm:$0xff] %v11717_v32  ;;  %7828 = vrcp.f32 %v3980_v53  ;;  %v3235_v21 = vmul.f32 %v14016_v45, %v11521_v46  ;;  %v11728_v13 = vmul.f32 %v7815_v42, %v14033_v24  ;;  %v6675_v17 = vmul.f32 -1.442695, %v11669_v28  ;;  %v14034_v53 = vld [vmem:[#allocation110_spill] sm:$0xff] }
 0x3ef   : > { %v7821_v49 = vpop.eup %7820  ;;  %v2773_v54 = vadd.f32 %v2709_v44, %v2643_v30  ;;  %v3105_v6 = vrot.slane %v11666_v48, 1  ;;  %v2516_v27 = vadd.f32 %v2452_v59, %v2322_v10  ;;  %v2644_v63 = vadd.f32 %v2582_v43, %v11594_v31  ;;  %v14035_v42 = vld [vmem:[#allocation54_spill] sm:$0xff] }
 0x3f0   : > { %v6733_v22 = vmul.f32 -1.442695, %v11717_v32  ;;  %v2192_v12 = vrot.slane %v11728_v13, 7  ;;  %v11736_v5 = vmul.f32 %v7819_v16, %v14034_v53  ;;  %7830 = vpow2.f32 %v6674_v0 }
 0x3f1   : > { %v2909_v46 = vadd.f32 %v2845_v36, %v2773_v54  ;;  %v2977_v24 = vmul.f32 %v14035_v42, %v11666_v48  ;;  %v2774_v28 = vadd.f32 %v2710_v7, %v2644_v63  ;;  %v3106_v30 = vrot.slane %v11676_v41, 1  ;;  %v14037_v36 = vld [vmem:[#allocation59_spill] sm:$0xff] }
 0x3f2   : > { %v3982_v44 = vadd.f32 1.0, %v7821_v49  ;;  %v3371_v59 = vmul.f32 %v13894_v50, %v11632_v57  ;;  %v11744_v43 = vmul.f32 %v8793_v2, %v2192_v12  ;;  %7832 = vpow2.f32 %v6675_v17 }
 0x3f3   : > { %v7823_v31 = vpop.eup %7822  ;;  %v3039_v10 = vadd.f32 %v2977_v24, %v2909_v46  ;;  %v11747_v16 = vmul.f32 %v13878_v56, %v3105_v6  ;;  %v2910_v54 = vadd.f32 %v2846_v33, %v2774_v28  ;;  %v2978_v0 = vmul.f32 %v14037_v36, %v11676_v41 }
 0x3f4   : > { %14036 = vst [vmem:[#allocation56_spill] sm:$0xff] %v11744_v43  ;;  %v2323_v7 = vmul.f32 %v13902_v60, %v2255_v39  ;;  %v2453_v49 = vmul.f32 %v13905_v8, %v11744_v43  ;;  %v2583_v63 = vmul.f32 %v13978_v4, %v11744_v43  ;;  %v2193_v12 = vrot.slane %v11736_v5, 7  ;;  %v14038_v60 = vld [vmem:[#allocation75_spill] sm:$0xff] }
 0x3f5   : > { %v11757_v17 = vpop.eup %7824  ;;  %7834 = vpow2.f32 %v6733_v22  ;;  %v3298_v53 = vadd.f32 %v3234_v51, %v3039_v10  ;;  %v3040_v6 = vadd.f32 %v2978_v0, %v2910_v54  ;;  %v11760_v28 = vmul.f32 %v13878_v56, %v3106_v30 }
 0x3f6   : > { %v7827_v33 = vpop.eup %7826  ;;  %v2847_v39 = vmul.f32 %v8818_v23, %v11666_v48  ;;  %v11764_v46 = vadd.f32 %v2453_v49, %v2323_v7  ;;  %v2645_v24 = vadd.f32 %v2583_v63, %v2515_v55  ;;  %v11767_v32 = vmul.f32 %v8793_v2, %v2193_v12 }
 0x3f7   : > { %v3434_v8 = vadd.f32 %v3370_v1, %v3298_v53  ;;  %v3502_v43 = vmul.f32 %v14038_v60, %v11747_v16  ;;  %v3299_v22 = vadd.f32 %v3235_v21, %v3040_v6  ;;  %v3107_v51 = vrot.slane %v11728_v13, 1 }
 0x3f8   : > { %v11772_v10 = vpop.eup %7828  ;;  %v2324_v30 = vmul.f32 %v13646_v52, %v2256_v14  ;;  %v2775_v54 = vadd.f32 %v11692_v15, %v2645_v24  ;;  %v2454_v0 = vmul.f32 %v13896_v47, %v11767_v32  ;;  %v2584_v55 = vmul.f32 %v13944_v35, %v11767_v32 }
 0x3f9   : > { %v3564_v7 = vadd.f32 %v3502_v43, %v3434_v8  ;;  %v3435_v1 = vadd.f32 %v3371_v59, %v3299_v22  ;;  %v3503_v49 = vmul.f32 %v11281_v58, %v11760_v28  ;;  %v1926_v21 = vadd.f32 1.0, %v7827_v33 }
 0x3fa   : > { %v7831_v63 = vpop.eup %7830  ;;  %v2911_v12 = vadd.f32 %v2847_v39, %v2775_v54  ;;  %v2979_v53 = vmul.f32 %v14035_v42, %v11728_v13  ;;  %v11784_v14 = vadd.f32 %v2454_v0, %v2324_v30  ;;  %v2646_v15 = vadd.f32 %v2584_v55, %v2516_v27 }
 0x3fb   : > { %7836 = vrcp.f32 %v3982_v44  ;;  %v11786_v6 = vadd.f32 %v3503_v49, %v3435_v1  ;;  %v11789_v24 = vmul.f32 %v13878_v56, %v3107_v51  ;;  %v3236_v8 = vmul.f32 %v14001_v25, %v11565_v19 }
 0x3fc   : > { %v7833_v59 = vpop.eup %7832  ;;  %v2848_v43 = vmul.f32 %v13950_v26, %v11676_v41  ;;  %v3041_v33 = vadd.f32 %v2979_v53, %v2911_v12  ;;  %v2776_v39 = vadd.f32 %v11705_v34, %v2646_v15  ;;  %v3108_v22 = vrot.slane %v11736_v5, 1  ;;  %v14040_v53 = vld [vmem:[#allocation103_spill] sm:$0xff] }
 0x3fd   : > { %v3647_v27 = vmul.f32 %v13631_v37, %v11673_v20  ;;  %v3372_v44 = vmul.f32 %v13559_v29, %v11747_v16  ;;  %7838 = vrcp.f32 %v1926_v21  ;;  %v11803_v51 = vadd.f32 %v14024_v61, %v11680_v9  ;;  %v14042_v15 = vld [vmem:[#allocation123_spill] sm:$0xff] }
 0x3fe   : > { %v3300_v19 = vadd.f32 %v3236_v8, %v3041_v33  ;;  %v2912_v30 = vadd.f32 %v2848_v43, %v2776_v39  ;;  %v2980_v54 = vmul.f32 %v14037_v36, %v11736_v5  ;;  %v1927_v0 = vadd.f32 1.0, %v7831_v63 }
 0x3ff   : > { %v7835_v34 = vpop.eup %7834  ;;  %v3981_v55 = vadd.f32 1.0, %v7823_v31  ;;  %v3504_v1 = vmul.f32 %v14038_v60, %v11789_v24  ;;  %v3237_v20 = vmul.f32 %v14016_v45, %v11632_v57  ;;  %v1928_v49 = vadd.f32 1.0, %v7833_v59 }
 0x400   : > { %v3436_v21 = vadd.f32 %v3372_v44, %v3300_v19  ;;  %v3042_v12 = vadd.f32 %v2980_v54, %v2912_v30  ;;  %v11812_v9 = vmul.f32 %v13878_v56, %v3108_v22  ;;  %7840 = vrcp.f32 %v1927_v0  ;;  %v14045_v22 = vld [vmem:[#allocation128_spill] sm:$0xff]  ;;  %v14047_v44 = vld [vmem:[#allocation137_spill] sm:$0xff] }
 0x401   : > { %v11815_v61 = vadd.f32 %v13915_v40, %v3647_v27  ;;  %v6676_v63 = vmul.f32 -1.442695, %v11803_v51  ;;  %v11820_v31 = vadd.f32 %v13915_v40, %v14040_v53  ;;  %v11824_v8 = vadd.f32 %v13915_v40, %v14042_v15  ;;  %v14053_v53 = vld [vmem:[#allocation80_spill] sm:$0xff] }
 0x402   : > { %v3373_v57 = vmul.f32 %v13894_v50, %v11760_v28  ;;  %v3566_v59 = vadd.f32 %v3504_v1, %v3436_v21  ;;  %v3301_v43 = vadd.f32 %v3237_v20, %v3042_v12  ;;  %7842 = vrcp.f32 %v1928_v49  ;;  %v14051_v1 = vld [vmem:[#allocation90_spill] sm:$0xff] }
 0x403   : > { %14039 = vst [vmem:[#allocation135_spill] sm:$0xff] %v11815_v61  ;;  %14041 = vst [vmem:[#allocation66_spill] sm:$0xff] %v11820_v31  ;;  %v11830_v33 = vadd.f32 %v11645_v11, %v11650_v3  ;;  %v3648_v39 = vmul.f32 %v13993_v18, %v3564_v7  ;;  %v11835_v27 = vadd.f32 %v13915_v40, %v14045_v22  ;;  %7844 = vrcp.f32 %v11682_v62  ;;  %v14050_v7 = vld [vmem:[#allocation133_spill] sm:$0xff]  ;;  %v14055_v22 = vld [vmem:[#allocation138_spill] sm:$0xff] }
 0x404   : > { %14043 = vst [vmem:[#allocation134_spill] sm:$0xff] %v11824_v8  ;;  %v11839_v19 = vadd.f32 %v13915_v40, %v14047_v44  ;;  %v3437_v30 = vadd.f32 %v3373_v57, %v3301_v43  ;;  %v3505_v54 = vmul.f32 %v11281_v58, %v11812_v9  ;;  %v11846_v11 = vadd.f32 %v13915_v40, %v11653_v38 }
 0x405   : > { %14044 = vst [vmem:[#allocation115_spill] sm:$0xff] %v11830_v33  ;;  %14046 = vst [vmem:[#allocation87_spill] sm:$0xff] %v11835_v27  ;;  %v7837_v0 = vpop.eup %7836  ;;  %v11850_v20 = vmul.f32 %v14051_v1, %v14050_v7  ;;  %7846 = vrcp.f32 %v3981_v55  ;;  %v3983_v49 = vadd.f32 1.0, %v11757_v17  ;;  %v11854_v21 = vmul.f32 -1.442695, %v11820_v31  ;;  %v14059_v1 = vld [vmem:[#allocation47_spill] sm:$0xff] }
 0x406   : > { %14048 = vst [vmem:[#allocation39_spill] sm:$0xff] %v11839_v19  ;;  %14049 = vst [vmem:[#allocation126_spill] sm:$0xff] %v11846_v11  ;;  %v6734_v62 = vmul.f32 -1.442695, %v11815_v61  ;;  %v11857_v12 = vadd.f32 %v3505_v54, %v3437_v30  ;;  %7848 = vpow2.f32 %v6676_v63  ;;  %v6708_v58 = vmul.f32 -1.442695, %v11824_v8 }
 0x407   : > { %14052 = vst [vmem:[#allocation58_spill] sm:$0xff] %v11850_v20  ;;  %v7839_v38 = vpop.eup %7838  ;;  %v11861_v15 = vadd.f32 %v14053_v53, %v3648_v39  ;;  %v3650_v57 = vmul.f32 %v13993_v18, %v3566_v59  ;;  %v6722_v55 = vmul.f32 -1.442695, %v11835_v27  ;;  %v6724_v17 = vmul.f32 -1.442695, %v11839_v19  ;;  %v14056_v63 = vld [vmem:[#allocation100_spill] sm:$0xff] }
 0x408   : > { %v3984_v43 = vadd.f32 1.0, %v7835_v34  ;;  %v11867_v44 = vmul.f32 %v7839_v38, %v14055_v22  ;;  %v11870_v30 = vmul.f32 -1.442695, %v11846_v11  ;;  %v14057_v54 = vld [vmem:[#allocation95_spill] sm:$0xff]  ;;  %v11878_v39 = vmul.f32 %v11772_v10, %v14059_v1  ;;  %v14061_v59 = vld [vmem:[#allocation46_spill] sm:$0xff]  ;;  %v14062_v34 = vld [vmem:[#allocation49_spill] sm:$0xff] }
 0x409   : > { %14054 = vst [vmem:[#allocation41_spill] sm:$0xff] %v11861_v15  ;;  %v11874_v7 = vmul.f32 %v14057_v54, %v14056_v63  ;;  %7850 = vrcp.f32 %v3983_v49  ;;  %v2713_v3 = vmul.f32 %v14061_v59, %v11666_v48  ;;  %v2714_v61 = vmul.f32 %v14062_v34, %v11676_v41  ;;  %v14063_v10 = vld [vmem:[#allocation65_spill] sm:$0xff]  ;;  %v14066_v41 = vld [vmem:[#allocation76_spill] sm:$0xff] }
 0x40a   : > { %14060 = vst [vmem:[#allocation140_spill] sm:$0xff] %v11878_v39  ;;  %v7841_v38 = vpop.eup %7840  ;;  %7852 = vpow2.f32 %v6734_v62  ;;  %v11886_v22 = vmul.f32 %v14061_v59, %v11728_v13  ;;  %v2849_v63 = vmul.f32 %v8818_v23, %v11728_v13  ;;  %v2194_v54 = vrot.slane %v11867_v44, 7  ;;  %v14073_v39 = vld [vmem:[#allocation48_spill] sm:$0xff] }
 0x40b   : > { %14058 = vst [vmem:[#allocation60_spill] sm:$0xff] %v11874_v7  ;;  %v11892_v1 = vmul.f32 %v7837_v0, %v14063_v10  ;;  %v6735_v49 = vmul.f32 -1.442695, %v11861_v15  ;;  %v11896_v48 = vadd.f32 %v14053_v53, %v3650_v57  ;;  %v11899_v11 = vmul.f32 %v7841_v38, %v14066_v41  ;;  %v14070_v15 = vld [vmem:[#allocation44_spill] sm:$0xff] }
 0x40c   : > { %v7843_v62 = vpop.eup %7842  ;;  %7854 = vrcp.f32 %v3984_v43  ;;  %v11903_v33 = vmul.f32 %v14062_v34, %v11736_v5  ;;  %v2850_v13 = vmul.f32 %v13950_v26, %v11736_v5  ;;  %v2259_v0 = vmul.f32 %v8793_v2, %v2194_v54 }
 0x40d   : > { %14064 = vst [vmem:[#allocation40_spill] sm:$0xff] %v11892_v1  ;;  %14065 = vst [vmem:[#allocation45_spill] sm:$0xff] %v11896_v48  ;;  %v3649_v10 = vmul.f32 %v13631_v37, %v11786_v6  ;;  %v3374_v57 = vmul.f32 %v13559_v29, %v11789_v24  ;;  %v3238_v38 = vmul.f32 %v14001_v25, %v11747_v16  ;;  %v2195_v43 = vrot.slane %v11899_v11, 7  ;;  %v11915_v41 = vpop.eup %7844  ;;  %v14069_v6 = vld [vmem:[#allocation56_spill] sm:$0xff] }
 0x40e   : > { %14067 = vst [vmem:[#allocation124_spill] sm:$0xff] %v11903_v33  ;;  %14068 = vst [vmem:[#allocation42_spill] sm:$0xff] %v11915_v41  ;;  %v11919_v20 = vmul.f32 %v13894_v50, %v11812_v9  ;;  %v2585_v5 = vmul.f32 %v13978_v4, %v2259_v0  ;;  %v3239_v54 = vmul.f32 %v14016_v45, %v11760_v28  ;;  %7856 = vpow2.f32 %v6735_v49  ;;  %v14072_v41 = vld [vmem:[#allocation79_spill] sm:$0xff] }
 0x40f   : > { %v2325_v31 = vmul.f32 %v14070_v15, %v14069_v6  ;;  %v11926_v19 = vpop.eup %7846  ;;  %v6737_v16 = vmul.f32 -1.442695, %v11896_v48  ;;  %v11930_v7 = vmul.f32 %v8793_v2, %v2195_v43  ;;  %v2120_v8 = vmul.f32 %v7843_v62, %v14072_v41 }
 0x410   : > { %14071 = vst [vmem:[#allocation117_spill] sm:$0xff] %v11926_v19  ;;  %v7849_v27 = vpop.eup %7848  ;;  %v2647_v1 = vadd.f32 %v2585_v5, %v11764_v46  ;;  %v2455_v50 = vmul.f32 %v14073_v39, %v2259_v0  ;;  %v2326_v28 = vmul.f32 %v13646_v52, %v11767_v32  ;;  %7858 = vpow2.f32 %v6708_v58 }
 0x411   : > { %v2586_v6 = vmul.f32 %v13944_v35, %v11930_v7  ;;  %v2196_v49 = vrot.slane %v2120_v8, 7  ;;  %v11940_v19 = vadd.f32 %v13915_v40, %v3649_v10  ;;  %7860 = vpow2.f32 %v6722_v55 }
 0x412   : > { %v2777_v43 = vadd.f32 %v2713_v3, %v2647_v1  ;;  %v3109_v62 = vrot.slane %v11867_v44, 1  ;;  %v2519_v41 = vadd.f32 %v2455_v50, %v2325_v31  ;;  %7862 = vpow2.f32 %v6724_v17 }
 0x413   : > { %v11943_v46 = vpop.eup %7850  ;;  %7864 = vpow2.f32 %v6737_v16  ;;  %v2648_v5 = vadd.f32 %v2586_v6, %v11784_v14  ;;  %v2261_v32 = vmul.f32 %v8793_v2, %v2196_v49  ;;  %v1929_v58 = vadd.f32 1.0, %v7849_v27 }
 0x414   : > { %v7853_v48 = vpop.eup %7852  ;;  %v2913_v33 = vadd.f32 %v2849_v63, %v2777_v43  ;;  %v2981_v10 = vmul.f32 %v14035_v42, %v11867_v44  ;;  %v3110_v55 = vrot.slane %v11899_v11, 1  ;;  %v2456_v3 = vmul.f32 %v13896_v47, %v11930_v7 }
 0x415   : > { %v2778_v50 = vadd.f32 %v2714_v61, %v2648_v5  ;;  %v2327_v31 = vmul.f32 %v14070_v15, %v2259_v0  ;;  %v2457_v17 = vmul.f32 %v14073_v39, %v2261_v32  ;;  %v2587_v14 = vmul.f32 %v13978_v4, %v2261_v32 }
 0x416   : > { %v11955_v1 = vpop.eup %7854  ;;  %v2717_v27 = vmul.f32 %v14061_v59, %v11867_v44  ;;  %v3043_v63 = vadd.f32 %v2981_v10, %v2913_v33  ;;  %v3174_v16 = vmul.f32 %v13878_v56, %v3109_v62  ;;  %7866 = vrcp.f32 %v1929_v58  ;;  %v14074_v59 = vld [vmem:[#allocation62_spill] sm:$0xff] }
 0x417   : > { %v2914_v6 = vadd.f32 %v2850_v13, %v2778_v50  ;;  %v2982_v49 = vmul.f32 %v14037_v36, %v11899_v11  ;;  %v2521_v61 = vadd.f32 %v2457_v17, %v2327_v31  ;;  %v2649_v43 = vadd.f32 %v2587_v14, %v2519_v41 }
 0x418   : > { %v2851_v15 = vmul.f32 %v8818_v23, %v11867_v44  ;;  %v3302_v39 = vadd.f32 %v3238_v38, %v3043_v63  ;;  %v3111_v4 = vrot.slane %v2120_v8, 1  ;;  %v11964_v0 = vadd.f32 %v2456_v3, %v2326_v28  ;;  %v7857_v5 = vpop.eup %7856 }
 0x419   : > { %v3044_v32 = vadd.f32 %v2982_v49, %v2914_v6  ;;  %v11967_v33 = vmul.f32 %v13878_v56, %v3110_v55  ;;  %v2651_v62 = vadd.f32 %v14074_v59, %v2521_v61  ;;  %v2779_v13 = vadd.f32 %v11886_v22, %v2649_v43  ;;  %v14075_v61 = vld [vmem:[#allocation101_spill] sm:$0xff] }
 0x41a   : > { %v7859_v58 = vpop.eup %7858  ;;  %v3438_v10 = vadd.f32 %v3374_v57, %v3302_v39  ;;  %v3506_v41 = vmul.f32 %v14038_v60, %v3174_v16  ;;  %v2853_v50 = vmul.f32 %v8818_v23, %v2120_v8  ;;  %7868 = vpow2.f32 %v11854_v21  ;;  %v11983_v21 = vld [vmem:[%s13086_s5 + $0x18] ss:$0 sm:$0xff] }
 0x41b   : > { %v7861_v44 = vpop.eup %7860  ;;  %v3303_v38 = vadd.f32 %v3239_v54, %v3044_v32  ;;  %v2781_v28 = vadd.f32 %v2717_v27, %v2651_v62  ;;  %v2915_v3 = vadd.f32 %v2851_v15, %v2779_v13  ;;  %v2983_v31 = vmul.f32 %v14035_v42, %v2120_v8 }
 0x41c   : > { %v7863_v55 = vpop.eup %7862  ;;  %v3568_v17 = vadd.f32 %v3506_v41, %v3438_v10  ;;  %v3176_v14 = vmul.f32 %v13878_v56, %v3111_v4  ;;  %v3240_v22 = vmul.f32 %v14001_v25, %v11789_v24  ;;  %v6736_v57 = vmul.f32 -1.442695, %v11940_v19 }
 0x41d   : > { %v7865_v63 = vpop.eup %7864  ;;  %v3439_v23 = vadd.f32 %v11919_v20, %v3303_v38  ;;  %v3507_v42 = vmul.f32 %v11983_v21, %v11967_v33  ;;  %v2917_v8 = vadd.f32 %v2853_v50, %v2781_v28  ;;  %v3045_v54 = vadd.f32 %v2983_v31, %v2915_v3  ;;  %v14076_v3 = vld [vmem:[#allocation83_spill] sm:$0xff] }
 0x41e   : > { %v3986_v27 = vadd.f32 1.0, %v7857_v5  ;;  %v3652_v6 = vmul.f32 %v13993_v18, %v3568_v17  ;;  %v3242_v24 = vmul.f32 %v14001_v25, %v3174_v16  ;;  %7870 = vpow2.f32 %v11870_v30 }
 0x41f   : > { %v3569_v49 = vadd.f32 %v3507_v42, %v3439_v23  ;;  %v3047_v20 = vadd.f32 %v14075_v61, %v2917_v8  ;;  %v3304_v43 = vadd.f32 %v3240_v22, %v3045_v54  ;;  %v3376_v15 = vmul.f32 %v13559_v29, %v3174_v16 }
 0x420   : > { %v7867_v39 = vpop.eup %7866  ;;  %v11992_v4 = vadd.f32 1.0, %v7853_v48  ;;  %v3988_v32 = vadd.f32 1.0, %v7865_v63  ;;  %v11995_v59 = vadd.f32 %v14053_v53, %v3652_v6  ;;  %v3378_v5 = vmul.f32 %v13559_v29, %v3176_v14 }
 0x421   : > { %v3306_v62 = vadd.f32 %v3242_v24, %v3047_v20  ;;  %v3440_v13 = vadd.f32 %v3376_v15, %v3304_v43  ;;  %v3508_v25 = vmul.f32 %v14038_v60, %v3176_v14  ;;  %v12000_v30 = vmul.f32 %v7867_v39, %v11803_v51 }
 0x422   : > { %v3651_v10 = vmul.f32 %v13631_v37, %v11857_v12  ;;  %v6739_v16 = vmul.f32 -1.442695, %v11995_v59  ;;  %7872 = vpow2.f32 %v6736_v57  ;;  %v3959_v48 = vadd.f32 1.0, %v7859_v58 }
 0x423   : > { %7874 = vrcp.f32 %v3986_v27  ;;  %v3442_v41 = vadd.f32 %v3378_v5, %v3306_v62  ;;  %v3570_v50 = vadd.f32 %v3508_v25, %v3440_v13  ;;  %v2197_v38 = vrot.slane %v12000_v30, 7  ;;  %v14077_v27 = vld [vmem:[#allocation43_spill] sm:$0xff]  ;;  %v14079_v5 = vld [vmem:[#allocation113_spill] sm:$0xff]  ;;  %v14080_v62 = vld [vmem:[#allocation96_spill] sm:$0xff] }
 0x424   : > { %v7869_v29 = vpop.eup %7868  ;;  %7876 = vpow2.f32 %v6739_v16  ;;  %v3241_v60 = vmul.f32 %v14016_v45, %v11812_v9  ;;  %v3653_v51 = vmul.f32 %v13631_v37, %v3569_v49  ;;  %v3973_v28 = vadd.f32 1.0, %v7861_v44  ;;  %v14081_v25 = vld [vmem:[#allocation132_spill] sm:$0xff] }
 0x425   : > { %7878 = vrcp.f32 %v3988_v32  ;;  %v3572_v12 = vadd.f32 %v14076_v3, %v3442_v41  ;;  %v3654_v31 = vmul.f32 %v13993_v18, %v3570_v50  ;;  %v2262_v58 = vmul.f32 %v8793_v2, %v2197_v38  ;;  %v14085_v3 = vld [vmem:[#allocation106_spill] sm:$0xff] }
 0x426   : > { %v2328_v17 = vmul.f32 %v13646_v52, %v11930_v7  ;;  %v12015_v14 = vadd.f32 %v13915_v40, %v3651_v10  ;;  %v3975_v22 = vadd.f32 1.0, %v7863_v55  ;;  %7880 = vrcp.f32 %v3959_v48 }
 0x427   : > { %v3656_v9 = vmul.f32 %v13993_v18, %v3572_v12  ;;  %v12019_v57 = vadd.f32 %v14053_v53, %v3654_v31  ;;  %v2458_v44 = vmul.f32 %v13896_v47, %v2262_v58  ;;  %v2588_v63 = vmul.f32 %v13944_v35, %v2262_v58  ;;  %v14086_v12 = vld [vmem:[#allocation88_spill] sm:$0xff]  ;;  %v14087_v58 = vld [vmem:[#allocation129_spill] sm:$0xff] }
 0x428   : > { %v7871_v23 = vpop.eup %7870  ;;  %v2718_v2 = vmul.f32 %v14062_v34, %v11899_v11  ;;  %v12026_v52 = vadd.f32 %v13915_v40, %v3653_v51  ;;  %v3943_v7 = vadd.f32 1.0, %v7869_v29  ;;  %7882 = vrcp.f32 %v3973_v28 }
 0x429   : > { %v12029_v55 = vadd.f32 %v14053_v53, %v3656_v9  ;;  %v6741_v18 = vmul.f32 -1.442695, %v12019_v57  ;;  %v2522_v42 = vadd.f32 %v2458_v44, %v2328_v17  ;;  %v2650_v8 = vadd.f32 %v2588_v63, %v11964_v0  ;;  %v14078_v53 = vld [vmem:[#allocation124_spill] sm:$0xff]  ;;  %v14089_v9 = vld [vmem:[#allocation94_spill] sm:$0xff] }
 0x42a   : > { %v2852_v47 = vmul.f32 %v13950_v26, %v11899_v11  ;;  %v3112_v35 = vrot.slane %v12000_v30, 1  ;;  %v6738_v34 = vmul.f32 -1.442695, %v12015_v14  ;;  %7884 = vrcp.f32 %v3975_v22  ;;  %v14088_v17 = vld [vmem:[#allocation68_spill] sm:$0xff] }
 0x42b   : > { %7886 = vpow2.f32 %v6741_v18  ;;  %v6743_v54 = vmul.f32 -1.442695, %v12029_v55  ;;  %v2652_v6 = vadd.f32 %v14077_v27, %v2522_v42  ;;  %v2780_v24 = vadd.f32 %v14078_v53, %v2650_v8  ;;  %v14092_v18 = vld [vmem:[#allocation40_spill] sm:$0xff]  ;;  %v14094_v8 = vld [vmem:[#allocation141_spill] sm:$0xff] }
 0x42c   : > { %v7873_v49 = vpop.eup %7872  ;;  %v2854_v61 = vmul.f32 %v13950_v26, %v12000_v30  ;;  %v2984_v0 = vmul.f32 %v14037_v36, %v12000_v30  ;;  %v3979_v11 = vadd.f32 1.0, %v7871_v23  ;;  %7888 = vrcp.f32 %v3943_v7  ;;  %v14082_v26 = vld [vmem:[#allocation50_spill] sm:$0xff]  ;;  %v14083_v36 = vld [vmem:[#allocation77_spill] sm:$0xff]  ;;  %v14084_v30 = vld [vmem:[#allocation131_spill] sm:$0xff] }
 0x42d   : > { %v12044_v20 = vpop.eup %7874  ;;  %7890 = vpow2.f32 %v6743_v54  ;;  %v2782_v43 = vadd.f32 %v2718_v2, %v2652_v6  ;;  %v2916_v15 = vadd.f32 %v2852_v47, %v2780_v24  ;;  %v6740_v39 = vmul.f32 -1.442695, %v12026_v52  ;;  %v14090_v23 = vld [vmem:[#allocation64_spill] sm:$0xff] }
 0x42e   : > { %v7877_v32 = vpop.eup %7876  ;;  %7892 = vpow2.f32 %v6738_v34  ;;  %v12049_v13 = vmul.f32 %v14080_v62, %v14079_v5  ;;  %v12053_v10 = vmul.f32 %v14082_v26, %v14081_v25  ;;  %v4227_v16 = vadd.f32 %v14084_v30, %v14083_v36  ;;  %v14100_v5 = vld [vmem:[#allocation74_spill] sm:$0xff] }
 0x42f   : > { %v12057_v48 = vpop.eup %7878  ;;  %v3990_v41 = vadd.f32 1.0, %v7877_v32  ;;  %v2918_v50 = vadd.f32 %v2854_v61, %v2782_v43  ;;  %v3046_v38 = vadd.f32 %v2984_v0, %v2916_v15  ;;  %v3177_v29 = vmul.f32 %v13878_v56, %v3112_v35  ;;  %v14091_v56 = vld [vmem:[#allocation140_spill] sm:$0xff]  ;;  %v14095_v35 = vld [vmem:[#allocation67_spill] sm:$0xff]  ;;  %v14099_v0 = vld [vmem:[#allocation118_spill] sm:$0xff] }
 0x430   : > { %v7881_v51 = vpop.eup %7880  ;;  %v3243_v28 = vmul.f32 %v14016_v45, %v11967_v33  ;;  %7894 = vrcp.f32 %v3979_v11  ;;  %v4201_v31 = vadd.f32 %v14086_v12, %v14085_v3  ;;  %v4253_v22 = vadd.f32 %v14088_v17, %v14087_v58  ;;  %v14093_v45 = vld [vmem:[#allocation99_spill] sm:$0xff]  ;;  %v14098_v61 = vld [vmem:[#allocation52_spill] sm:$0xff] }
 0x431   : > { %v3048_v44 = vadd.f32 %v14089_v9, %v2918_v50  ;;  %v3305_v63 = vadd.f32 %v3241_v60, %v3046_v38  ;;  %v3377_v2 = vmul.f32 %v14090_v23, %v11967_v33  ;;  %7896 = vpow2.f32 %v6740_v39  ;;  %v14096_v33 = vld [vmem:[#allocation84_spill] sm:$0xff] }
 0x432   : > { %v7883_v7 = vpop.eup %7882  ;;  %v4266_v42 = vadd.f32 %v14092_v18, %v14091_v56  ;;  %7898 = vrcp.f32 %v3990_v41  ;;  %v12073_v47 = vmul.f32 %v14094_v8, %v14093_v45  ;;  %v4228_v34 = vadd.f32 %v4227_v16, %v14095_v35  ;;  %v14101_v16 = vld [vmem:[#allocation91_spill] sm:$0xff] }
 0x433   : > { %v3307_v54 = vadd.f32 %v3243_v28, %v3048_v44  ;;  %v3379_v27 = vmul.f32 %v14090_v23, %v3177_v29  ;;  %v3441_v6 = vadd.f32 %v3377_v2, %v3305_v63  ;;  %v3509_v60 = vmul.f32 %v11983_v21, %v3177_v29  ;;  %v14104_v28 = vld [vmem:[#allocation104_spill] sm:$0xff]  ;;  %v14105_v44 = vld [vmem:[#allocation134_spill] sm:$0xff] }
 0x434   : > { %v7885_v53 = vpop.eup %7884  ;;  %v12080_v24 = vmul.f32 %v11955_v1, %v14096_v33  ;;  %7900 = vrcp.f32 %v11992_v4  ;;  %v12085_v11 = vmul.f32 %v14099_v0, %v14098_v61  ;;  %v4254_v43 = vadd.f32 %v4253_v22, %v12053_v10  ;;  %v14102_v1 = vld [vmem:[#allocation109_spill] sm:$0xff]  ;;  %v14103_v4 = vld [vmem:[#allocation87_spill] sm:$0xff]  ;;  %v14106_v63 = vld [vmem:[#allocation60_spill] sm:$0xff] }
 0x435   : > { %v7887_v15 = vpop.eup %7886  ;;  %v3443_v39 = vadd.f32 %v3379_v27, %v3307_v54  ;;  %v3571_v32 = vadd.f32 %v3509_v60, %v3441_v6  ;;  %v4202_v62 = vadd.f32 %v4201_v31, %v14100_v5  ;;  %v4229_v21 = vadd.f32 %v4228_v34, %v12049_v13  ;;  %v14107_v34 = vld [vmem:[#allocation39_spill] sm:$0xff]  ;;  %v14108_v6 = vld [vmem:[#allocation66_spill] sm:$0xff]  ;;  %v14109_v0 = vld [vmem:[#allocation41_spill] sm:$0xff] }
 0x436   : > { %14097 = vst [vmem:[#allocation53_spill] sm:$0xff] %v12080_v24  ;;  %v7889_v25 = vpop.eup %7888  ;;  %v3992_v26 = vadd.f32 1.0, %v7887_v15  ;;  %v12092_v41 = vmul.f32 %v14102_v1, %v14101_v16  ;;  %v12095_v50 = vmul.f32 %v7883_v7, %v14103_v4  ;;  %v4255_v38 = vadd.f32 %v4254_v43, %v12073_v47  ;;  %v14113_v16 = vld [vmem:[#allocation45_spill] sm:$0xff] }
 0x437   : > { %v7891_v29 = vpop.eup %7890  ;;  %v3573_v22 = vadd.f32 %v14104_v28, %v3443_v39  ;;  %v3655_v9 = vmul.f32 %v13631_v37, %v3571_v32  ;;  %v12101_v31 = vmul.f32 %v7881_v51, %v14105_v44  ;;  %v4203_v23 = vadd.f32 %v4202_v62, %v14106_v63  ;;  %v14116_v28 = vld [vmem:[#allocation102_spill] sm:$0xff]  ;;  %v14119_v44 = vld [vmem:[#allocation115_spill] sm:$0xff] }
 0x438   : > { %v7893_v2 = vpop.eup %7892  ;;  %v3994_v45 = vadd.f32 1.0, %v7891_v29  ;;  %7902 = vrcp.f32 %v3992_v26  ;;  %v3987_v8 = vadd.f32 1.0, %v7873_v49  ;;  %v12105_v54 = vmul.f32 %v7885_v53, %v14107_v34  ;;  %v14115_v29 = vld [vmem:[#allocation120_spill] sm:$0xff] }
 0x439   : > { %v3657_v7 = vmul.f32 %v13631_v37, %v3573_v22  ;;  %v12109_v27 = vadd.f32 %v13915_v40, %v3655_v9  ;;  %v12112_v60 = vmul.f32 %v7889_v25, %v14108_v6  ;;  %v4230_v51 = vadd.f32 %v4229_v21, %v12085_v11  ;;  %v14112_v25 = vld [vmem:[#allocation42_spill] sm:$0xff] }
 0x43a   : > { %v7895_v33 = vpop.eup %7894  ;;  %v4267_v61 = vadd.f32 %v4266_v42, %v12080_v24  ;;  %v12118_v43 = vmul.f32 %v12044_v20, %v14109_v0  ;;  %7904 = vrcp.f32 %v3994_v45  ;;  %v4256_v49 = vadd.f32 %v4255_v38, %v12095_v50  ;;  %v14111_v42 = vld [vmem:[#allocation122_spill] sm:$0xff]  ;;  %v14124_v0 = vld [vmem:[#allocation105_spill] sm:$0xff] }
 0x43b   : > { %v7897_v53 = vpop.eup %7896  ;;  %v12122_v37 = vadd.f32 %v13915_v40, %v3657_v7  ;;  %v6742_v15 = vmul.f32 -1.442695, %v12109_v27  ;;  %v4204_v39 = vadd.f32 %v4203_v23, %v12092_v41  ;;  %v4231_v32 = vadd.f32 %v4230_v51, %v12101_v31  ;;  %v14118_v9 = vld [vmem:[#allocation58_spill] sm:$0xff] }
 0x43c   : > { %14110 = vst [vmem:[#allocation127_spill] sm:$0xff] %v12118_v43  ;;  %v7899_v62 = vpop.eup %7898  ;;  %v3989_v21 = vadd.f32 1.0, %v7893_v2  ;;  %7906 = vrcp.f32 %v3987_v8  ;;  %v12129_v20 = vmul.f32 %v14112_v25, %v14111_v42  ;;  %v4257_v26 = vadd.f32 %v4256_v49, %v12105_v54  ;;  %v14120_v45 = vld [vmem:[#allocation86_spill] sm:$0xff]  ;;  %v14121_v8 = vld [vmem:[#allocation139_spill] sm:$0xff]  ;;  %v14127_v25 = vld [vmem:[#allocation81_spill] sm:$0xff] }
 0x43d   : > { %v12134_v1 = vmul.f32 %v12057_v48, %v14113_v16  ;;  %7908 = vpow2.f32 %v6742_v15  ;;  %v6744_v40 = vmul.f32 -1.442695, %v12122_v37  ;;  %v4205_v4 = vadd.f32 %v4204_v39, %v12112_v60  ;;  %v14122_v48 = vld [vmem:[#allocation136_spill] sm:$0xff]  ;;  %v14125_v49 = vld [vmem:[#allocation51_spill] sm:$0xff]  ;;  %v14126_v39 = vld [vmem:[#allocation126_spill] sm:$0xff] }
 0x43e   : > { %v7901_v38 = vpop.eup %7900  ;;  %v12140_v22 = vmul.f32 %v14116_v28, %v14115_v29  ;;  %v4245_v23 = vadd.f32 %v14119_v44, %v14118_v9  ;;  %v3991_v2 = vadd.f32 1.0, %v7897_v53  ;;  %v12146_v34 = vmul.f32 %v14121_v8, %v14120_v45  ;;  %v14128_v16 = vld [vmem:[#allocation85_spill] sm:$0xff]  ;;  %v14130_v28 = vld [vmem:[#allocation112_spill] sm:$0xff] }
 0x43f   : > { %14114 = vst [vmem:[#allocation69_spill] sm:$0xff] %v12134_v1  ;;  %7910 = vpow2.f32 %v6744_v40  ;;  %v4232_v7 = vadd.f32 %v4231_v32, %v14122_v48  ;;  %v12150_v6 = vmul.f32 %v7899_v62, %v11995_v59  ;;  %v4268_v51 = vadd.f32 %v4267_v61, %v12118_v43  ;;  %v14129_v40 = vld [vmem:[#allocation93_spill] sm:$0xff]  ;;  %v14131_v61 = vld [vmem:[#allocation119_spill] sm:$0xff] }
 0x440   : > { %14117 = vst [vmem:[#allocation110_spill] sm:$0xff] %v12140_v22  ;;  %v4193_v15 = vadd.f32 %v14125_v49, %v14124_v0  ;;  %7912 = vrcp.f32 %v3989_v21  ;;  %v12156_v42 = vmul.f32 %v7895_v33, %v14126_v39  ;;  %v4258_v53 = vadd.f32 %v4257_v26, %v12129_v20  ;;  %v14132_v45 = vld [vmem:[#allocation73_spill] sm:$0xff] }
 0x441   : > { %14123 = vst [vmem:[#allocation54_spill] sm:$0xff] %v12150_v6  ;;  %v12161_v29 = vmul.f32 %v14128_v16, %v14127_v25  ;;  %v4206_v32 = vadd.f32 %v4205_v4, %v14129_v40  ;;  %v4269_v59 = vadd.f32 %v4268_v51, %v12134_v1  ;;  %v4220_v44 = vadd.f32 %v14131_v61, %v14130_v28  ;;  %v14135_v51 = vld [vmem:[#allocation57_spill] sm:$0xff]  ;;  %v14136_v16 = vld [vmem:[#allocation70_spill] sm:$0xff] }
 0x442   : > { %v7903_v62 = vpop.eup %7902  ;;  %7914 = vrcp.f32 %v3991_v2  ;;  %v12169_v21 = vmul.f32 %v11943_v46, %v14132_v45  ;;  %v4233_v26 = vadd.f32 %v4232_v7, %v12146_v34  ;;  %v4246_v8 = vadd.f32 %v4245_v23, %v12140_v22  ;;  %v14137_v2 = vld [vmem:[#allocation117_spill] sm:$0xff]  ;;  %v14140_v23 = vld [vmem:[#allocation135_spill] sm:$0xff] }
 0x443   : > { %v12172_v33 = vmul.f32 %v7903_v62, %v12019_v57  ;;  %v4270_v4 = vadd.f32 %v4269_v59, %v12150_v6  ;;  %v4194_v39 = vadd.f32 %v4193_v15, %v14135_v51  ;;  %v4259_v25 = vadd.f32 %v4258_v53, %v12156_v42 }
 0x444   : > { %14133 = vst [vmem:[#allocation59_spill] sm:$0xff] %v12169_v21  ;;  %v7905_v49 = vpop.eup %7904  ;;  %v12181_v61 = vmul.f32 %v14137_v2, %v14136_v16  ;;  %v4207_v46 = vadd.f32 %v4206_v32, %v12161_v29  ;;  %v12189_v45 = vmul.f32 %v7901_v38, %v14140_v23  ;;  %v4221_v59 = vrot.slane %v4220_v44, 4 }
 0x445   : > { %14134 = vst [vmem:[#allocation75_spill] sm:$0xff] %v12172_v33  ;;  %v12185_v57 = vmul.f32 %v7905_v49, %v12029_v55  ;;  %v4271_v7 = vadd.f32 %v4270_v4, %v12172_v33  ;;  %v4234_v15 = vrot.slane %v4233_v26, 4  ;;  %v4247_v1 = vrot.slane %v4246_v8, 4 }
 0x446   : > { %14138 = vst [vmem:[#allocation103_spill] sm:$0xff] %v12181_v61  ;;  %v7907_v62 = vpop.eup %7906  ;;  %v4279_v53 = vadd.f32 %v12169_v21, %v12181_v61  ;;  %v4260_v32 = vrot.slane %v4259_v25, 4  ;;  %v4195_v43 = vrot.slane %v4194_v39, 4  ;;  %v4208_v4 = vrot.slane %v4207_v46, 4 }
 0x447   : > { %14139 = vst [vmem:[#allocation123_spill] sm:$0xff] %v12185_v57  ;;  %v7909_v6 = vpop.eup %7908  ;;  %v4272_v16 = vadd.f32 %v4271_v7, %v12185_v57  ;;  %v12195_v49 = vmul.f32 %v7907_v62, %v11940_v19  ;;  %v4222_v24 = vadd.f32 %v4221_v59, %v4220_v44  ;;  %v4235_v18 = vadd.f32 %v4234_v15, %v4233_v26 }
 0x448   : > { %v3993_v2 = vadd.f32 1.0, %v7909_v6  ;;  %v4280_v56 = vadd.f32 %v4279_v53, %v12189_v45  ;;  %v4248_v21 = vadd.f32 %v4247_v1, %v4246_v8  ;;  %v4261_v7 = vadd.f32 %v4260_v32, %v4259_v25 }
 0x449   : > { %v7911_v55 = vpop.eup %7910  ;;  %14141 = vst [vmem:[#allocation128_spill] sm:$0xff] %v12195_v49  ;;  %v4273_v33 = vrot.slane %v4272_v16, 4  ;;  %v4196_v6 = vadd.f32 %v4195_v43, %v4194_v39  ;;  %v4209_v19 = vadd.f32 %v4208_v4, %v4207_v46  ;;  %v4223_v9 = vrot.slane %v4222_v24, 2 }
 0x44a   : > { %v7913_v38 = vpop.eup %7912  ;;  %v3995_v23 = vadd.f32 1.0, %v7911_v55  ;;  %7916 = vrcp.f32 %v3993_v2  ;;  %v4281_v62 = vadd.f32 %v4280_v56, %v12195_v49  ;;  %v4236_v44 = vrot.slane %v4235_v18, 2 }
 0x44b   : > { %v4274_v57 = vadd.f32 %v4273_v33, %v4272_v16  ;;  %v12199_v22 = vmul.f32 %v7913_v38, %v12015_v14  ;;  %v4249_v26 = vrot.slane %v4248_v21, 2  ;;  %v4262_v59 = vrot.slane %v4261_v7, 2 }
 0x44c   : > { %v7915_v61 = vpop.eup %7914  ;;  %7918 = vrcp.f32 %v3995_v23  ;;  %v4197_v15 = vrot.slane %v4196_v6, 2  ;;  %v4210_v8 = vrot.slane %v4209_v19, 2  ;;  %v4224_v43 = vadd.f32 %v4223_v9, %v4222_v24 }
 0x44d   : > { %14142 = vst [vmem:[#allocation137_spill] sm:$0xff] %v12199_v22  ;;  %v12203_v55 = vmul.f32 %v7915_v61, %v12026_v52  ;;  %v4275_v1 = vrot.slane %v4274_v57, 2  ;;  %v4282_v25 = vadd.f32 %v4281_v62, %v12199_v22  ;;  %v4237_v33 = vadd.f32 %v4236_v44, %v4235_v18 }
 0x44e   : > { %v4250_v39 = vadd.f32 %v4249_v26, %v4248_v21  ;;  %v4263_v53 = vadd.f32 %v4262_v59, %v4261_v7  ;;  %v4198_v56 = vadd.f32 %v4197_v15, %v4196_v6  ;;  %v4211_v61 = vadd.f32 %v4210_v8, %v4209_v19 }
 0x44f   : > { %14143 = vst [vmem:[#allocation133_spill] sm:$0xff] %v12203_v55  ;;  %v4283_v14 = vadd.f32 %v4282_v25, %v12203_v55  ;;  %v4276_v16 = vadd.f32 %v4275_v1, %v4274_v57  ;;  %v4225_v32 = vrot.slane %v4224_v43, 1  ;;  %v4238_v38 = vrot.slane %v4237_v33, 1 }
 0x450   : > { %v4251_v18 = vrot.slane %v4250_v39, 1  ;;  %v4264_v9 = vrot.slane %v4263_v53, 1  ;;  %v4199_v23 = vrot.slane %v4198_v56, 1  ;;  %v4212_v62 = vrot.slane %v4211_v61, 1 }
 0x451   : > { %v4277_v21 = vrot.slane %v4276_v16, 1  ;;  %v4226_v57 = vadd.f32 %v4225_v32, %v4224_v43  ;;  %v4239_v6 = vadd.f32 %v4238_v38, %v4237_v33 }
 0x452   : > { %v4252_v44 = vadd.f32 %v4251_v18, %v4250_v39  ;;  %v4265_v19 = vadd.f32 %v4264_v9, %v4263_v53  ;;  %v4200_v26 = vadd.f32 %v4199_v23, %v4198_v56  ;;  %v4213_v15 = vadd.f32 %v4212_v62, %v4211_v61 }
 0x453   : > { %v4278_v59 = vadd.f32 %v4277_v21, %v4276_v16  ;;  %v4294_v1 = vmul.f32 0.015625, %v4226_v57  ;;  %v4295_v25 = vmul.f32 0.015625, %v4239_v6 }
 0x454   : > { %v7917_v46 = vpop.eup %7916  ;;  %v4293_v22 = vmul.f32 0.015625, %v4213_v15  ;;  %v7200_v15 = vld [vmem:[%s13090_s9] ss:$8 sps:$4 sm:$0xff]  }
 0x455   : > { %v12208_v52 = vmul.f32 %v7917_v46, %v12109_v27  ;;  %v4297_v46 = vmul.f32 0.015625, %v4265_v19  ;;  %v4302_v49 = vpack.c.bf16 %v4294_v1, %v4294_v1  ;;  %v4303_v43 = vpack.c.bf16 %v4295_v25, %v4295_v25  ;;  %v7205_v1 = vld [vmem:[%s13090_s9 + $0x14] ss:$8 sps:$4 sm:$0xff]   ;;  %v7208_v25 = vld [vmem:[%s13090_s9 + $0x24] ss:$8 sps:$4 sm:$0xff]  }
 0x456   : > { %v7919_v2 = vpop.eup %7918  ;;  %v4301_v16 = vpack.c.bf16 %v4293_v22, %v4293_v22 }
 0x457   : > { %14144 = vst [vmem:[#allocation90_spill] sm:$0xff] %v12208_v52  ;;  %v12211_v4 = vmul.f32 %v7919_v2, %v12122_v37  ;;  %v4284_v24 = vadd.f32 %v4283_v14, %v12208_v52  ;;  %v4296_v14 = vmul.f32 0.015625, %v4252_v44  ;;  %v4292_v2 = vmul.f32 0.015625, %v4200_v26 }
 0x458   : > { %v4298_v52 = vmul.f32 0.015625, %v4278_v59  ;;  %v4305_v32 = vpack.c.bf16 %v4297_v46, %v4297_v46  ;;  %v4357_v61 = vunpack.c.l.b16 %v4302_v49  ;;  %v4358_v18 = vunpack.c.l.b16 %v4303_v43  ;;  %v7211_v46 = vld [vmem:[%s13090_s9 + $0x34] ss:$8 sps:$4 sm:$0xff]   ;;  %v7212_v43 = vld [vmem:[%s13090_s9 + $0x40] ss:$8 sps:$4 sm:$0xff]  }
 0x459   : > { %v4285_v7 = vadd.f32 %v4284_v24, %v12211_v4  ;;  %v4304_v33 = vpack.c.bf16 %v4296_v14, %v4296_v14  ;;  %v4300_v39 = vpack.c.bf16 %v4292_v2, %v4292_v2  ;;  %v4356_v57 = vunpack.c.l.b16 %v4301_v16  ;;  %v7206_v14 = vld [vmem:[%s13090_s9 + $0x20] ss:$8 sps:$4 sm:$0xff]   ;;  %v7209_v2 = vld [vmem:[%s13090_s9 + $0x30] ss:$8 sps:$4 sm:$0xff]  }
 0x45a   : > { %v4306_v53 = vpack.c.bf16 %v4298_v52, %v4298_v52  ;;  %v4360_v23 = vunpack.c.l.b16 %v4305_v32  ;;  %v14145_v59 = vmov 0   ;;  %v7215_v32 = vld [vmem:[%s13090_s9 + $0x50] ss:$8 sps:$4 sm:$0xff]  }
 0x45b   : > { %v4286_v27 = vrot.slane %v4285_v7, 4  ;;  %v4359_v9 = vunpack.c.l.b16 %v4304_v33  ;;  %v4355_v21 = vunpack.c.l.b16 %v4300_v39  ;;  %v4369_v44 = vsel %vm4363_vm2, %v4358_v18, %v4356_v57  ;;  %v7217_v33 = vld [vmem:[%s13090_s9 + $0x54] ss:$8 sps:$4 sm:$0xff]   ;;  %v7220_v39 = vld [vmem:[%s13090_s9 + $0x64] ss:$8 sps:$4 sm:$0xff]  }
 0x45c   : > { %v4361_v62 = vunpack.c.l.b16 %v4306_v53  ;;  %v4370_v22 = vsel %vm4365_vm3, %v4360_v23, %v4369_v44  ;;  %v7218_v53 = vld [vmem:[%s13090_s9 + $0x60] ss:$8 sps:$4 sm:$0xff]   ;;  %v7221_v16 = vld [vmem:[%s13090_s9 + $0x70] ss:$8 sps:$4 sm:$0xff]  }
 0x45d   : > { %v4287_v37 = vadd.f32 %v4286_v27, %v4285_v7  ;;  %v4364_v6 = vsel %vm4363_vm2, %v4357_v61, %v4355_v21 }
 0x45f   : > { %v4288_v8 = vrot.slane %v4287_v37, 2 }
 0x461   : > { %v4289_v55 = vadd.f32 %v4288_v8, %v4287_v37  ;;  %v7202_v37 = vld [vmem:[%s13090_s9 + $0x4] ss:$8 sps:$4 sm:$0xff]   ;;  %v7203_v8 = vld [vmem:[%s13090_s9 + $0x10] ss:$8 sps:$4 sm:$0xff]  }
 0x462   : > { %4628 = vmatprep.subr.bf16.mxu0 %v7202_v37  ;;  %v7230_v37 = vld [vmem:[%s13092_s11 + $0x58] sm:$0xff]  }
 0x463   : > { %v4290_v24 = vrot.slane %v4289_v55, 1 }
 0x465   : > { %v4291_v56 = vadd.f32 %v4290_v24, %v4289_v55  ;;  %v4366_v55 = vsel %vm4365_vm3, %v4359_v9, %v4364_v6  ;;  %v7214_v24 = vld [vmem:[%s13090_s9 + $0x44] ss:$8 sps:$4 sm:$0xff]  }
 0x466   : > { %v4368_v49 = vsel %vm4367_vm4, %v4361_v62, %v4366_v55 }
 0x467   : > { %v4299_v38 = vmul.f32 0.015625, %v4291_v56  ;;  %v4372_v26 = vpack.c.b16 %v4368_v49, %v4368_v49  ;;  %v7223_v56 = vld [vmem:[%s13090_s9 + $0x74] ss:$8 sps:$4 sm:$0xff]   ;;  %v7225_v49 = vld [vmem:[%s13092_s11] sm:$0xff]  }
 0x469   : > { %v4307_v7 = vpack.c.bf16 %v4299_v38, %v4299_v38  ;;  %v6745_v38 = vld [vmem:[%s13089_s8] ss:$0 sm:$0xff] }
 0x46b   : > { %v4362_v27 = vunpack.c.l.b16 %v4307_v7 }
 0x46d   : > { %v4371_v52 = vsel %vm4367_vm4, %v4362_v27, %v4370_v22  ;;  %v7224_v22 = vld [vmem:[%s13092_s11 + $0x40] sm:$0xff]  }
 0x46e   : > { %v4373_v19 = vpack.c.b16 %v4371_v52, %v4371_v52  ;;  %v7226_v52 = vld [vmem:[%s13092_s11 + $0x48] sm:$0xff]  }
 0x470   : > { %4504 = vmatprep.mubr.bf16.mxu0 %v4373_v19  ;;  %v7227_v19 = vld [vmem:[%s13092_s11 + $0x8] sm:$0xff]  }
 0x471   : > { %4505 = vmatmul.mubr.bf16.vlgmr.msra.gmra.mrb[32].mxu0 %v4372_v26  ;;  %v7228_v26 = vld [vmem:[%s13092_s11 + $0x50] sm:$0xff]  }
 0x472   : > { %4660 = vmatprep.mubr.bf16.mxu0 %v14145_v59  ;;  %4629 = vmatpush1.bf16.msra.mxu0 %v7200_v15  ;;  %v7229_v15 = vld [vmem:[%s13092_s11 + $0x10] sm:$0xff]  }
 0x473   : > { %4630 = vmatprep.subr.bf16.mxu0 %v7205_v1  ;;  %v7231_v1 = vld [vmem:[%s13092_s11 + $0x18] sm:$0xff]  }
 0x476   : > { %4631 = vmatpush1.bf16.msra.mxu0 %v7203_v8  ;;  %v7232_v8 = vld [vmem:[%s13092_s11 + $0x60] sm:$0xff]  }
 0x477   : > { %4632 = vmatprep.subr.bf16.mxu0 %v7208_v25  ;;  %v7233_v25 = vld [vmem:[%s13092_s11 + $0x20] sm:$0xff]  }
 0x47a   : > { %4633 = vmatpush1.bf16.msra.mxu0 %v7206_v14  ;;  %v7234_v14 = vld [vmem:[%s13092_s11 + $0x68] sm:$0xff]  }
 0x47b   : > { %4634 = vmatprep.subr.bf16.mxu0 %v7211_v46  ;;  %v7235_v46 = vld [vmem:[%s13092_s11 + $0x28] sm:$0xff]  }
 0x47e   : > { %4635 = vmatpush1.bf16.msra.mxu0 %v7209_v2  ;;  %v7236_v2 = vld [vmem:[%s13092_s11 + $0x70] sm:$0xff]  }
 0x47f   : > { %4636 = vmatprep.subr.bf16.mxu0 %v7214_v24  ;;  %v7237_v24 = vld [vmem:[%s13092_s11 + $0x30] sm:$0xff]  }
 0x482   : > { %4637 = vmatpush1.bf16.msra.mxu0 %v7212_v43  ;;  %v7238_v43 = vld [vmem:[%s13092_s11 + $0x78] sm:$0xff]  }
 0x483   : > { %4638 = vmatprep.subr.bf16.mxu0 %v7217_v33  ;;  %v7239_v33 = vld [vmem:[%s13092_s11 + $0x38] sm:$0xff]  }
 0x486   : > { %4639 = vmatpush1.bf16.msra.mxu0 %v7215_v32  ;;  %v4536_v32 = vld [vmem:[%s13091_s10] sm:$0x3] }
 0x487   : > { %4640 = vmatprep.subr.bf16.mxu0 %v7220_v39  ;;  %v14146_v39 = vld [vmem:[#allocation3_spill] sm:$0xff] }
 0x48a   : > { %4641 = vmatpush1.bf16.msra.mxu0 %v7218_v53  ;;  %v4541_v53 = vrot.slane %v4536_v32, %v14146_v39 }
 0x48b   : > { %4642 = vmatprep.subr.bf16.mxu0 %v7223_v56  ;;  %v14147_v56 = vld [vmem:[#allocation4_spill] sm:$0xff] }
 0x48e   : > { %4643 = vmatpush1.bf16.msra.mxu0 %v7221_v16  ;;  %v4545_v16 = vrot.slane %v4536_v32, %v14147_v56  ;;  %v7248_v32 = vld [vmem:[%s13094_s13 + $0x24] ss:$8 sps:$4 sm:$0xff]  }
 0x48f   : > { %6943 = vmatprep.subr.bf16.mxu0 %v7224_v22 }
 0x544   : > { %v6937_v61 = vpop.f32.mrb[32].mxu0 }
 0x545   : > { %v6938_v18 = vpop.f32.mrb[33].mxu0 }
 0x546   : > { %v6939_v9 = vadd.f32 %v6938_v18, %v6937_v61  ;;  %v6940_v23 = vpop.f32.mrb[34].mxu0 }
 0x547   : > { %v6941_v21 = vpop.f32.mrb[35].mxu0 }
 0x548   : > { %v4507_v62 = vadd.f32 %v6939_v9, %v6745_v38 }
 0x54a   : > { %v6762_v7 = vmul.f32 -1.442695, %v4507_v62 }
 0x54c   : > { %7920 = vpow2.f32 %v6762_v7 }
 0x556   : > { %v7921_v57 = vpop.eup %7920 }
 0x557   : > { %v4515_v6 = vadd.f32 1.0, %v7921_v57  ;;  %v7240_v57 = vld [vmem:[%s13094_s13] ss:$8 sps:$4 sm:$0xff]  }
 0x559   : > { %7922 = vrcp.f32 %v4515_v6  ;;  %v7242_v6 = vld [vmem:[%s13094_s13 + $0x4] ss:$8 sps:$4 sm:$0xff]  }
 0x55a   : > { %5350 = vmatprep.subr.bf16.mxu1 %v7242_v6  ;;  %v7249_v6 = vld [vmem:[%s13094_s13 + $0x30] ss:$8 sps:$4 sm:$0xff]  }
 0x55b   : > { %5351 = vmatpush1.bf16.msra.mxu1 %v7240_v57 }
 0x563   : > { %v7923_v27 = vpop.eup %7922 }
 0x564   : > { %v4518_v44 = vmul.f32 %v7923_v27, %v4507_v62 }
 0x566   : > { %v4519_v55 = vpack.c.bf16 %v4518_v44, %v4518_v44 }
 0x568   : > { %4661 = vmatmul.mubr.bf16.vlgmr.msra.gmra.mrb[36].mxu0 %v4519_v55 }
 0x569   : > { %6944 = vmatpush3.bf16.msra.mxu0 %v7225_v49  ;;  %v8205_v49 = vmov 1966171168  }
 0x56a   : > { %6945 = vmatprep.subr.bf16.mxu0 %v7226_v52  ;;  %v4685_v52 = vunpack.c.l.s4 %v8205_v49 }
 0x56d   : > { %6946 = vmatpush3.bf16.msra.mxu0 %v7227_v19  ;;  %v4686_v19 = vunpack.c.0.s8 %v4685_v52  ;;  %v7257_v52 = vld [vmem:[%s13094_s13 + $0x54] ss:$8 sps:$4 sm:$0xff]  }
 0x56e   : > { %6947 = vmatprep.subr.bf16.mxu0 %v7228_v26 }
 0x571   : > { %6948 = vmatpush3.bf16.msra.mxu0 %v7229_v15  ;;  %v14148_v15 = vld [vmem:[#allocation2_spill] sm:$0xff] }
 0x572   : > { %6949 = vmatprep.subr.bf16.mxu0 %v7230_v37  ;;  %v4689_v37 = vsub.s32 %v4686_v19, %v14148_v15 }
 0x575   : > { %6950 = vmatpush3.bf16.msra.mxu0 %v7231_v1  ;;  %v7243_v1 = vld [vmem:[%s13094_s13 + $0x10] ss:$8 sps:$4 sm:$0xff]  }
 0x576   : > { %6951 = vmatprep.subr.bf16.mxu0 %v7232_v8  ;;  %v7245_v8 = vld [vmem:[%s13094_s13 + $0x14] ss:$8 sps:$4 sm:$0xff]  }
 0x577   : > { %5352 = vmatprep.subr.bf16.mxu1 %v7245_v8 }
 0x578   : > { %5353 = vmatpush1.bf16.msra.mxu1 %v7243_v1 }
 0x579   : > { %6952 = vmatpush3.bf16.msra.mxu0 %v7233_v25  ;;  %5354 = vmatprep.subr.bf16.mxu1 %v7248_v32 }
 0x57a   : > { %6953 = vmatprep.subr.bf16.mxu0 %v7234_v14 }
 0x57d   : > { %6954 = vmatpush3.bf16.msra.mxu0 %v7235_v46 }
 0x57e   : > { %6955 = vmatprep.subr.bf16.mxu0 %v7236_v2 }
 0x581   : > { %6956 = vmatpush3.bf16.msra.mxu0 %v7237_v24 }
 0x582   : > { %6957 = vmatprep.subr.bf16.mxu0 %v7238_v43 }
 0x585   : > { %6958 = vmatpush3.bf16.msra.mxu0 %v7239_v33  ;;  %v7246_v33 = vld [vmem:[%s13094_s13 + $0x20] ss:$8 sps:$4 sm:$0xff]  }
 0x586   : > { %5355 = vmatpush1.bf16.msra.mxu1 %v7246_v33  ;;  %v7258_v33 = vld [vmem:[%s13094_s13 + $0x60] ss:$8 sps:$4 sm:$0xff]  }
 0x63b   : > { %v4662_v61 = vpop.f32.mrb[36].mxu0 }
 0x63c   : > { %v4663_v38 = vadd.f32 %v4662_v61, %v4541_v53  ;;  %v4664_v18 = vpop.f32.mrb[37].mxu0  ;;  %v7251_v53 = vld [vmem:[%s13094_s13 + $0x34] ss:$8 sps:$4 sm:$0xff]  }
 0x63d   : > { %v4665_v9 = vadd.f32 %v4664_v18, %v4545_v16  ;;  %v4666_v23 = vpop.f32.mrb[38].mxu0  ;;  %5356 = vmatprep.subr.bf16.mxu1 %v7251_v53 }
 0x63e   : > { %v6779_v21 = vmul.f32 -1.442695, %v4663_v38  ;;  %v4667_v62 = vpop.f32.mrb[39].mxu0  ;;  %v14149_v38 = vld [vmem:[#allocation98_spill] sm:$0xff]  ;;  %5357 = vmatpush1.bf16.msra.mxu1 %v7249_v6  ;;  %v14156_v6 = vld [vmem:[#allocation108_spill] sm:$0xff] }
 0x63f   : > { %v6780_v7 = vmul.f32 -1.442695, %v4665_v9  ;;  %v14150_v9 = vld [vmem:[#allocation72_spill] sm:$0xff] }
 0x640   : > { %7924 = vpow2.f32 %v6779_v21 }
 0x641   : > { %7926 = vpow2.f32 %v6780_v7 }
 0x64a   : > { %v7925_v27 = vpop.eup %7924 }
 0x64b   : > { %v7927_v44 = vpop.eup %7926  ;;  %v4675_v55 = vadd.f32 1.0, %v7925_v27  ;;  %v14151_v27 = vld [vmem:[#allocation61_spill] sm:$0xff] }
 0x64c   : > { %v4676_v22 = vadd.f32 1.0, %v7927_v44 }
 0x64d   : > { %7928 = vrcp.f32 %v4675_v55 }
 0x64e   : > { %7930 = vrcp.f32 %v4676_v22 }
 0x657   : > { %v7929_v26 = vpop.eup %7928 }
 0x658   : > { %v7931_v25 = vpop.eup %7930 }
 0x659   : > { %v4683_v14 = vcombine.low %v7929_v26, %v7931_v25  ;;  %v7255_v26 = vld [vmem:[%s13094_s13 + $0x50] ss:$8 sps:$4 sm:$0xff]   ;;  %v14154_v25 = vld [vmem:[#allocation82_spill] sm:$0xff] }
 0x65b   : > { %v4690_v46 = vrot.slane %v4683_v14, %v4689_v37 }
 0x65d   : > { %v12339_v2 = vrot.slane %v4690_v46, %v4689_v37  ;;  %v4691_v15 = vcombine.high %v4690_v46, %v4690_v46 }
 0x65f   : > { %v4711_v24 = vrot.slane %v12339_v2, %v14146_v39  ;;  %v4715_v43 = vrot.slane %v12339_v2, %v14147_v56  ;;  %v12387_v32 = vrot.slane %v4691_v15, %v4689_v37 }
 0x661   : > { %v4749_v16 = vmul.f32 %v4715_v43, %v14085_v3  ;;  %v4751_v61 = vmul.f32 %v4715_v43, %v14086_v12  ;;  %v4748_v18 = vmul.f32 %v4711_v24, %v14149_v38  ;;  %v4750_v23 = vmul.f32 %v4711_v24, %v14150_v9  ;;  %v7254_v12 = vld [vmem:[%s13094_s13 + $0x44] ss:$8 sps:$4 sm:$0xff]   ;;  %v7261_v38 = vld [vmem:[%s13094_s13 + $0x70] ss:$8 sps:$4 sm:$0xff]  }
 0x662   : > { %v4753_v21 = vmul.f32 %v4715_v43, %v14100_v5  ;;  %v4755_v7 = vmul.f32 %v4715_v43, %v14106_v63  ;;  %v4752_v44 = vmul.f32 %v4711_v24, %v14151_v27  ;;  %v14152_v5 = vld [vmem:[#allocation92_spill] sm:$0xff]  ;;  %v7252_v63 = vld [vmem:[%s13094_s13 + $0x40] ss:$8 sps:$4 sm:$0xff]   ;;  %v4757_v22 = vmul.f32 %v4715_v43, %v12092_v41  ;;  %5358 = vmatprep.subr.bf16.mxu1 %v7254_v12  ;;  %v7260_v41 = vld [vmem:[%s13094_s13 + $0x64] ss:$8 sps:$4 sm:$0xff]  }
 0x663   : > { %v4813_v62 = vpack.c.bf16 %v4751_v61, %v4749_v16  ;;  %v4812_v57 = vpack.c.bf16 %v4750_v23, %v4748_v18  ;;  %v4754_v55 = vmul.f32 %v4711_v24, %v14152_v5  ;;  %v4759_v49 = vmul.f32 %v4715_v43, %v12112_v60  ;;  %5359 = vmatpush1.bf16.msra.mxu1 %v7252_v63  ;;  %v14153_v60 = vld [vmem:[#allocation111_spill] sm:$0xff]  ;;  %v7263_v16 = vld [vmem:[%s13094_s13 + $0x74] ss:$8 sps:$4 sm:$0xff]   ;;  %v14158_v27 = vld [vmem:[#allocation114_spill] sm:$0xff] }
 0x664   : > { %v4815_v3 = vpack.c.bf16 %v4755_v7, %v4753_v21  ;;  %5360 = vmatprep.subr.bf16.mxu1 %v7257_v52  ;;  %v4756_v8 = vmul.f32 %v4711_v24, %v14153_v60  ;;  %v4758_v14 = vmul.f32 %v4711_v24, %v14154_v25  ;;  %v4761_v46 = vmul.f32 %v4715_v43, %v14129_v40  ;;  %v14155_v7 = vld [vmem:[#allocation97_spill] sm:$0xff]  ;;  %v14160_v52 = vld [vmem:[#allocation55_spill] sm:$0xff] }
 0x665   : > { %5004 = vmatprep.mubr.bf16.mxu0 %v4813_v62  ;;  %v4814_v19 = vpack.c.bf16 %v4754_v55, %v4752_v44  ;;  %v4817_v1 = vpack.c.bf16 %v4759_v49, %v4757_v22  ;;  %v4763_v53 = vmul.f32 %v4715_v43, %v12161_v29  ;;  %v4723_v18 = vrot.slane %v12387_v32, %v14147_v56  ;;  %v14159_v49 = vld [vmem:[#allocation89_spill] sm:$0xff] }
 0x666   : > { %5005 = vmatmul.mubr.bf16.vlgmr.msra.gmra.mrb[40].mxu0 %v4812_v57  ;;  %v4816_v61 = vpack.c.bf16 %v4758_v14, %v4756_v8  ;;  %v4760_v29 = vmul.f32 %v4711_v24, %v14124_v0  ;;  %v4762_v40 = vmul.f32 %v4711_v24, %v14135_v51  ;;  %v4719_v23 = vrot.slane %v12387_v32, %v14146_v39 }
 0x667   : > { %5012 = vmatprep.mubr.bf16.mxu0 %v4815_v3  ;;  %5361 = vmatpush1.bf16.msra.mxu1 %v7255_v26  ;;  %v4819_v37 = vpack.c.bf16 %v4763_v53, %v4761_v46  ;;  %v4765_v43 = vmul.f32 %v4723_v18, %v14083_v36  ;;  %v4767_v9 = vmul.f32 %v4723_v18, %v14084_v30  ;;  %v14157_v36 = vld [vmem:[#allocation107_spill] sm:$0xff]  ;;  %v14163_v53 = vld [vmem:[#allocation121_spill] sm:$0xff] }
 0x668   : > { %5362 = vmatprep.subr.bf16.mxu1 %v7260_v41  ;;  %v4818_v21 = vpack.c.bf16 %v4762_v40, %v4760_v29  ;;  %v4764_v57 = vmul.f32 %v4719_v23, %v14155_v7  ;;  %v4766_v3 = vmul.f32 %v4719_v23, %v14156_v6  ;;  %v4769_v0 = vmul.f32 %v4723_v18, %v14095_v35 }
 0x669   : > { %v4821_v62 = vpack.c.bf16 %v4767_v9, %v4765_v43  ;;  %v4771_v51 = vmul.f32 %v4723_v18, %v12049_v13  ;;  %v4768_v30 = vmul.f32 %v4719_v23, %v14157_v36  ;;  %v4770_v44 = vmul.f32 %v4719_v23, %v14158_v27  ;;  %v14170_v36 = vld [vmem:[#allocation103_spill] sm:$0xff] }
 0x66a   : > { %v4820_v24 = vpack.c.bf16 %v4766_v3, %v4764_v57  ;;  %v4773_v5 = vmul.f32 %v4723_v18, %v12085_v11  ;;  %v4775_v55 = vmul.f32 %v4723_v18, %v12101_v31  ;;  %v4772_v35 = vmul.f32 %v4719_v23, %v14159_v49  ;;  %v14161_v31 = vld [vmem:[#allocation116_spill] sm:$0xff]  ;;  %v14171_v27 = vld [vmem:[#allocation59_spill] sm:$0xff] }
 0x66b   : > { %5363 = vmatpush1.bf16.msra.mxu1 %v7258_v33  ;;  %v4823_v12 = vpack.c.bf16 %v4771_v51, %v4769_v0  ;;  %v4822_v63 = vpack.c.bf16 %v4770_v44, %v4768_v30  ;;  %v4774_v13 = vmul.f32 %v4719_v23, %v14160_v52  ;;  %v4777_v26 = vmul.f32 %v4723_v18, %v14122_v48 }
 0x66c   : > { %5364 = vmatprep.subr.bf16.mxu1 %v7263_v16  ;;  %v4825_v22 = vpack.c.bf16 %v4775_v55, %v4773_v5  ;;  %v4779_v15 = vmul.f32 %v4723_v18, %v12146_v34  ;;  %v4776_v60 = vmul.f32 %v4719_v23, %v14161_v31  ;;  %v4778_v8 = vmul.f32 %v4719_v23, %v14130_v28  ;;  %v14162_v34 = vld [vmem:[#allocation78_spill] sm:$0xff] }
 0x66d   : > { %v4707_v7 = vcombine.high %v12387_v32, %v12387_v32 }
 0x66e   : > { %5013 = vmatmul.mubr.bf16.gmra.mrb[44].mxu0 %v4814_v19  ;;  %v4706_v19 = vcombine.high %v12339_v2, %v12339_v2  ;;  %v4827_v41 = vpack.c.bf16 %v4779_v15, %v4777_v26  ;;  %v4826_v33 = vpack.c.bf16 %v4778_v8, %v4776_v60  ;;  %v14175_v26 = vld [vmem:[#allocation53_spill] sm:$0xff] }
 0x66f   : > { %5020 = vmatprep.mubr.bf16.mxu0 %v4817_v1  ;;  %5365 = vmatpush1.bf16.msra.mxu1 %v7261_v38  ;;  %v4824_v1 = vpack.c.bf16 %v4774_v13, %v4772_v35  ;;  %v4735_v32 = vrot.slane %v4707_v7, %v14146_v39  ;;  %v14174_v35 = vld [vmem:[#allocation128_spill] sm:$0xff]  ;;  %v14178_v60 = vld [vmem:[#allocation133_spill] sm:$0xff] }
 0x670   : > { %v4731_v11 = vrot.slane %v4706_v19, %v14147_v56  ;;  %v4727_v2 = vrot.slane %v4706_v19, %v14146_v39 }
 0x671   : > { %v4800_v15 = vmul.f32 %v4735_v32, %v14175_v26 }
 0x672   : > { %v4781_v25 = vmul.f32 %v4731_v11, %v14087_v58  ;;  %v4783_v14 = vmul.f32 %v4731_v11, %v14088_v17  ;;  %v4780_v46 = vmul.f32 %v4727_v2, %v14162_v34  ;;  %v4782_v16 = vmul.f32 %v4727_v2, %v14163_v53  ;;  %v14164_v58 = vld [vmem:[#allocation130_spill] sm:$0xff] }
 0x673   : > { %v4787_v38 = vmul.f32 %v4731_v11, %v12073_v47  ;;  %v4784_v17 = vmul.f32 %v4727_v2, %v14164_v58  ;;  %v4789_v40 = vmul.f32 %v4731_v11, %v12095_v50  ;;  %v4791_v43 = vmul.f32 %v4731_v11, %v12105_v54  ;;  %v14168_v54 = vld [vmem:[#allocation58_spill] sm:$0xff] }
 0x674   : > { %v4829_v48 = vpack.c.bf16 %v4783_v14, %v4781_v25  ;;  %v4828_v18 = vpack.c.bf16 %v4782_v16, %v4780_v46  ;;  %v4793_v57 = vmul.f32 %v4731_v11, %v12129_v20  ;;  %v4795_v6 = vmul.f32 %v4731_v11, %v12156_v42  ;;  %v14172_v42 = vld [vmem:[#allocation140_spill] sm:$0xff]  ;;  %v14181_v34 = vld [vmem:[#allocation90_spill] sm:$0xff] }
 0x675   : > { %v4833_v23 = vpack.c.bf16 %v4791_v43, %v4789_v40  ;;  %v4739_v50 = vrot.slane %v4707_v7, %v14147_v56  ;;  %v4792_v51 = vmul.f32 %v4727_v2, %v14168_v54  ;;  %v4796_v55 = vmul.f32 %v4735_v32, %v14172_v42  ;;  %v14185_v54 = vld [vmem:[#allocation6_spill] sm:$0xff] }
 0x676   : > { %5021 = vmatmul.mubr.bf16.gmra.mrb[48].mxu0 %v4816_v61  ;;  %v4785_v61 = vmul.f32 %v4731_v11, %v12053_v10  ;;  %v4835_v0 = vpack.c.bf16 %v4795_v6, %v4793_v57 }
 0x677   : > { %5028 = vmatprep.mubr.bf16.mxu0 %v4819_v37  ;;  %v14165_v37 = vld [vmem:[#allocation125_spill] sm:$0xff]  ;;  %v4797_v30 = vmul.f32 %v4739_v50, %v14170_v36  ;;  %v4799_v44 = vmul.f32 %v4739_v50, %v14171_v27  ;;  %v4801_v49 = vmul.f32 %v4739_v50, %v12189_v45  ;;  %v4803_v52 = vmul.f32 %v4739_v50, %v14174_v35 }
 0x678   : > { %v4831_v28 = vpack.c.bf16 %v4787_v38, %v4785_v61  ;;  %v4786_v29 = vmul.f32 %v4727_v2, %v14165_v37  ;;  %v4807_v8 = vmul.f32 %v4739_v50, %v14178_v60  ;;  %v4809_v46 = vmul.f32 %v4739_v50, %v14181_v34  ;;  %v14182_v38 = vld [vmem:[#allocation75_spill] sm:$0xff]  ;;  %v5133_v37 = vld [vmem:[%s13093_s12] sm:$0x3] }
 0x679   : > { %v4837_v20 = vpack.c.bf16 %v4799_v44, %v4797_v30  ;;  %v4839_v19 = vpack.c.bf16 %v4803_v52, %v4801_v49  ;;  %v4811_v53 = vmul.f32 %v4739_v50, %v12211_v4  ;;  %v12463_v40 = vrot.slane %v5133_v37, %v14146_v39  ;;  %v14186_v49 = vld [vmem:[#allocation8_spill] sm:$0xff]  ;;  %v14187_v52 = vld [vmem:[#allocation7_spill] sm:$0xff] }
 0x67a   : > { %v4830_v9 = vpack.c.bf16 %v4786_v29, %v4784_v17 }
 0x67b   : > { %v4843_v61 = vpack.c.bf16 %v4811_v53, %v4809_v46 }
 0x67e   : > { %5029 = vmatmul.mubr.bf16.gmra.mrb[52].mxu0 %v4818_v21  ;;  %v14166_v21 = vld [vmem:[#allocation63_spill] sm:$0xff] }
 0x67f   : > { %5036 = vmatprep.mubr.bf16.mxu0 %v4821_v62  ;;  %v4788_v10 = vmul.f32 %v4727_v2, %v14166_v21  ;;  %v14167_v62 = vld [vmem:[#allocation71_spill] sm:$0xff] }
 0x680   : > { %v4790_v47 = vmul.f32 %v4727_v2, %v14167_v62 }
 0x682   : > { %v4832_v3 = vpack.c.bf16 %v4790_v47, %v4788_v10 }
 0x686   : > { %5037 = vmatmul.mubr.bf16.gmra.mrb[56].mxu0 %v4820_v24  ;;  %v14169_v24 = vld [vmem:[#allocation110_spill] sm:$0xff] }
 0x687   : > { %5044 = vmatprep.mubr.bf16.mxu0 %v4823_v12  ;;  %v4794_v12 = vmul.f32 %v4727_v2, %v14169_v24  ;;  %v14179_v2 = vld [vmem:[#allocation69_spill] sm:$0xff] }
 0x688   : > { %v4804_v45 = vmul.f32 %v4735_v32, %v14179_v2  ;;  %v14188_v2 = vld [vmem:[#allocation10_spill] sm:$0xff] }
 0x689   : > { %v4834_v5 = vpack.c.bf16 %v4794_v12, %v4792_v51 }
 0x68e   : > { %5045 = vmatmul.mubr.bf16.gmra.mrb[60].mxu0 %v4822_v63  ;;  %v14173_v63 = vld [vmem:[#allocation40_spill] sm:$0xff] }
 0x68f   : > { %5052 = vmatprep.mubr.bf16.mxu0 %v4825_v22  ;;  %v4798_v22 = vmul.f32 %v4735_v32, %v14173_v63 }
 0x691   : > { %v4836_v13 = vpack.c.bf16 %v4798_v22, %v4796_v55 }
 0x696   : > { %5053 = vmatmul.mubr.bf16.gmra.mrb[64].mxu0 %v4824_v1  ;;  %v14176_v1 = vld [vmem:[#allocation127_spill] sm:$0xff] }
 0x697   : > { %5060 = vmatprep.mubr.bf16.mxu0 %v4827_v41  ;;  %v4802_v11 = vmul.f32 %v4735_v32, %v14176_v1  ;;  %v14177_v41 = vld [vmem:[#allocation137_spill] sm:$0xff] }
 0x698   : > { %v4805_v31 = vmul.f32 %v4739_v50, %v14177_v41  ;;  %v14184_v50 = vld [vmem:[#allocation5_spill] sm:$0xff] }
 0x699   : > { %v4838_v25 = vpack.c.bf16 %v4802_v11, %v4800_v15 }
 0x69a   : > { %v4841_v14 = vpack.c.bf16 %v4807_v8, %v4805_v31 }
 0x69e   : > { %5061 = vmatmul.mubr.bf16.gmra.mrb[68].mxu0 %v4826_v33  ;;  %v14180_v33 = vld [vmem:[#allocation54_spill] sm:$0xff] }
 0x69f   : > { %5068 = vmatprep.mubr.bf16.mxu0 %v4829_v48  ;;  %v4806_v48 = vmul.f32 %v4735_v32, %v14180_v33  ;;  %v14189_v33 = vld [vmem:[#allocation9_spill] sm:$0xff] }
 0x6a1   : > { %v4840_v16 = vpack.c.bf16 %v4806_v48, %v4804_v45 }
 0x6a6   : > { %5069 = vmatmul.mubr.bf16.gmra.mrb[72].mxu0 %v4828_v18  ;;  %v4808_v18 = vmul.f32 %v4735_v32, %v14182_v38 }
 0x6a7   : > { %5076 = vmatprep.mubr.bf16.mxu0 %v4831_v28  ;;  %v14183_v28 = vld [vmem:[#allocation123_spill] sm:$0xff] }
 0x6a8   : > { %v4810_v58 = vmul.f32 %v4735_v32, %v14183_v28 }
 0x6aa   : > { %v4842_v17 = vpack.c.bf16 %v4810_v58, %v4808_v18 }
 0x6ae   : > { %5077 = vmatmul.mubr.bf16.gmra.mrb[76].mxu0 %v4830_v9  ;;  %v12466_v9 = vrot.slane %v5133_v37, %v14147_v56 }
 0x6af   : > { %5084 = vmatprep.mubr.bf16.mxu0 %v4833_v23 }
 0x6b6   : > { %5085 = vmatmul.mubr.bf16.gmra.mrb[80].mxu0 %v4832_v3 }
 0x6b7   : > { %5092 = vmatprep.mubr.bf16.mxu0 %v4835_v0 }
 0x6be   : > { %5093 = vmatmul.mubr.bf16.gmra.mrb[84].mxu0 %v4834_v5 }
 0x6bf   : > { %5100 = vmatprep.mubr.bf16.mxu0 %v4837_v20 }
 0x6c6   : > { %5101 = vmatmul.mubr.bf16.gmra.mrb[88].mxu0 %v4836_v13 }
 0x6c7   : > { %5108 = vmatprep.mubr.bf16.mxu0 %v4839_v19 }
 0x6ce   : > { %5109 = vmatmul.mubr.bf16.gmra.mrb[92].mxu0 %v4838_v25 }
 0x6cf   : > { %5116 = vmatprep.mubr.bf16.mxu0 %v4841_v14 }
 0x6d6   : > { %5117 = vmatmul.mubr.bf16.gmra.mrb[96].mxu0 %v4840_v16 }
 0x6d7   : > { %5124 = vmatprep.mubr.bf16.mxu0 %v4843_v61 }
 0x6de   : > { %5125 = vmatmul.mubr.bf16.gmra.mrb[100].mxu0 %v4842_v17 }
 0x739   : > { %v6959_v29 = vpop.f32.mrb[40].mxu0 }
 0x73a   : > { %v6960_v43 = vpop.f32.mrb[41].mxu0 }
 0x73b   : > { %v6961_v4 = vadd.f32 %v6960_v43, %v6959_v29  ;;  %v6962_v23 = vpop.f32.mrb[42].mxu0  ;;  %v14190_v29 = vld [vmem:[#allocation12_spill] sm:$0xff] }
 0x73c   : > { %v6963_v21 = vpop.f32.mrb[43].mxu0 }
 0x73d   : > { %v5138_v10 = vmul.f32 %v6961_v4, %v12463_v40  ;;  %v6964_v62 = vadd.f32 %v6963_v21, %v6962_v23  ;;  %v14191_v4 = vld [vmem:[#allocation11_spill] sm:$0xff] }
 0x73f   : > { %v5174_v47 = vadd.f32 %v12466_v9, %v5138_v10  ;;  %v5139_v7 = vmul.f32 %v6964_v62, %v12463_v40 }
 0x741   : > { %v5175_v57 = vadd.f32 %v12466_v9, %v5139_v7  ;;  %v6965_v6 = vpop.f32.mrb[44].mxu0  ;;  %v5206_v0 = vadd.f32 %v5174_v47, %v14184_v50 }
 0x742   : > { %v6966_v3 = vpop.f32.mrb[45].mxu0 }
 0x743   : > { %v5207_v51 = vadd.f32 %v5175_v57, %v14185_v54  ;;  %v6967_v24 = vadd.f32 %v6966_v3, %v6965_v6  ;;  %v6968_v12 = vpop.f32.mrb[46].mxu0 }
 0x744   : > { %v6969_v36 = vpop.f32.mrb[47].mxu0 }
 0x745   : > { %v5238_v30 = vpack.c.bf16 %v5207_v51, %v5206_v0  ;;  %v5140_v27 = vmul.f32 %v6967_v24, %v12463_v40  ;;  %v6970_v44 = vadd.f32 %v6969_v36, %v6968_v12  ;;  %v14192_v51 = vld [vmem:[#allocation14_spill] sm:$0xff]  ;;  %v14193_v12 = vld [vmem:[#allocation13_spill] sm:$0xff] }
 0x747   : > { %v5176_v32 = vadd.f32 %v12466_v9, %v5140_v27  ;;  %v5141_v5 = vmul.f32 %v6970_v44, %v12463_v40  ;;  %5383 = vmatmul.mubr.bf16.vlgmr.msra.gmra.mrb[64].mxu1 %v5238_v30 }
 0x748   : > { %5392 = vmatprep.mubr.bf16.mxu1 %v14145_v59 }
 0x749   : > { %v5177_v20 = vadd.f32 %v12466_v9, %v5141_v5  ;;  %v6971_v42 = vpop.f32.mrb[48].mxu0  ;;  %v5208_v35 = vadd.f32 %v5176_v32, %v14186_v49 }
 0x74a   : > { %v6972_v55 = vpop.f32.mrb[49].mxu0 }
 0x74b   : > { %v6973_v63 = vadd.f32 %v6972_v55, %v6971_v42  ;;  %v6974_v22 = vpop.f32.mrb[50].mxu0  ;;  %v5209_v13 = vadd.f32 %v5177_v20, %v14187_v52 }
 0x74c   : > { %v6975_v19 = vpop.f32.mrb[51].mxu0 }
 0x74d   : > { %v5142_v26 = vmul.f32 %v6973_v63, %v12463_v40  ;;  %v6976_v15 = vadd.f32 %v6975_v19, %v6974_v22  ;;  %v5239_v1 = vpack.c.bf16 %v5209_v13, %v5208_v35  ;;  %v14194_v35 = vld [vmem:[#allocation16_spill] sm:$0xff]  ;;  %v14195_v13 = vld [vmem:[#allocation15_spill] sm:$0xff] }
 0x74f   : > { %v5178_v11 = vadd.f32 %v12466_v9, %v5142_v26  ;;  %v5143_v41 = vmul.f32 %v6976_v15, %v12463_v40  ;;  %5393 = vmatmul.mubr.bf16.gmra.mrb[68].mxu1 %v5239_v1 }
 0x750   : > { %5402 = vmatprep.mubr.bf16.mxu1 %v14145_v59 }
 0x751   : > { %v5179_v31 = vadd.f32 %v12466_v9, %v5143_v41  ;;  %v6977_v60 = vpop.f32.mrb[52].mxu0  ;;  %v5210_v45 = vadd.f32 %v5178_v11, %v14188_v2 }
 0x752   : > { %v6978_v8 = vpop.f32.mrb[53].mxu0 }
 0x753   : > { %v6979_v25 = vadd.f32 %v6978_v8, %v6977_v60  ;;  %v6980_v14 = vpop.f32.mrb[54].mxu0  ;;  %v5211_v48 = vadd.f32 %v5179_v31, %v14189_v33 }
 0x754   : > { %v6981_v34 = vpop.f32.mrb[55].mxu0 }
 0x755   : > { %v5144_v46 = vmul.f32 %v6979_v25, %v12463_v40  ;;  %v6982_v53 = vadd.f32 %v6981_v34, %v6980_v14  ;;  %v5240_v16 = vpack.c.bf16 %v5211_v48, %v5210_v45  ;;  %v14196_v45 = vld [vmem:[#allocation18_spill] sm:$0xff]  ;;  %v14197_v48 = vld [vmem:[#allocation17_spill] sm:$0xff] }
 0x757   : > { %v5180_v61 = vadd.f32 %v12466_v9, %v5144_v46  ;;  %v5145_v38 = vmul.f32 %v6982_v53, %v12463_v40  ;;  %5403 = vmatmul.mubr.bf16.gmra.mrb[72].mxu1 %v5240_v16 }
 0x758   : > { %5412 = vmatprep.mubr.bf16.mxu1 %v14145_v59 }
 0x759   : > { %v5181_v18 = vadd.f32 %v12466_v9, %v5145_v38  ;;  %v6983_v28 = vpop.f32.mrb[56].mxu0  ;;  %v5212_v43 = vadd.f32 %v5180_v61, %v14190_v29 }
 0x75a   : > { %v6984_v58 = vpop.f32.mrb[57].mxu0 }
 0x75b   : > { %v6985_v17 = vadd.f32 %v6984_v58, %v6983_v28  ;;  %v6986_v37 = vpop.f32.mrb[58].mxu0  ;;  %v5213_v23 = vadd.f32 %v5181_v18, %v14191_v4 }
 0x75c   : > { %v6987_v21 = vpop.f32.mrb[59].mxu0 }
 0x75d   : > { %v5146_v10 = vmul.f32 %v6985_v17, %v12463_v40  ;;  %v6988_v62 = vadd.f32 %v6987_v21, %v6986_v37  ;;  %v5241_v47 = vpack.c.bf16 %v5213_v23, %v5212_v43  ;;  %v14198_v43 = vld [vmem:[#allocation20_spill] sm:$0xff]  ;;  %v14199_v23 = vld [vmem:[#allocation19_spill] sm:$0xff] }
 0x75f   : > { %v5182_v7 = vadd.f32 %v12466_v9, %v5146_v10  ;;  %v5147_v57 = vmul.f32 %v6988_v62, %v12463_v40  ;;  %5413 = vmatmul.mubr.bf16.gmra.mrb[76].mxu1 %v5241_v47 }
 0x760   : > { %5422 = vmatprep.mubr.bf16.mxu1 %v14145_v59 }
 0x761   : > { %v5183_v6 = vadd.f32 %v12466_v9, %v5147_v57  ;;  %v6989_v3 = vpop.f32.mrb[60].mxu0  ;;  %v5214_v24 = vadd.f32 %v5182_v7, %v14192_v51 }
 0x762   : > { %v6990_v50 = vpop.f32.mrb[61].mxu0 }
 0x763   : > { %v6991_v0 = vadd.f32 %v6990_v50, %v6989_v3  ;;  %v6992_v54 = vpop.f32.mrb[62].mxu0  ;;  %v5215_v36 = vadd.f32 %v5183_v6, %v14193_v12 }
 0x764   : > { %v6993_v30 = vpop.f32.mrb[63].mxu0 }
 0x765   : > { %v5148_v27 = vmul.f32 %v6991_v0, %v12463_v40  ;;  %v6994_v44 = vadd.f32 %v6993_v30, %v6992_v54  ;;  %v5242_v32 = vpack.c.bf16 %v5215_v36, %v5214_v24  ;;  %v14200_v24 = vld [vmem:[#allocation21_spill] sm:$0xff]  ;;  %v14201_v36 = vld [vmem:[#allocation22_spill] sm:$0xff] }
 0x767   : > { %v5184_v5 = vadd.f32 %v12466_v9, %v5148_v27  ;;  %v5149_v20 = vmul.f32 %v6994_v44, %v12463_v40  ;;  %5423 = vmatmul.mubr.bf16.gmra.mrb[80].mxu1 %v5242_v32 }
 0x768   : > { %5432 = vmatprep.mubr.bf16.mxu1 %v14145_v59 }
 0x769   : > { %v5185_v42 = vadd.f32 %v12466_v9, %v5149_v20  ;;  %v6995_v55 = vpop.f32.mrb[64].mxu0  ;;  %v5216_v52 = vadd.f32 %v5184_v5, %v14194_v35 }
 0x76a   : > { %v6996_v63 = vpop.f32.mrb[65].mxu0 }
 0x76b   : > { %v6997_v22 = vadd.f32 %v6996_v63, %v6995_v55  ;;  %v6998_v49 = vpop.f32.mrb[66].mxu0  ;;  %v5217_v19 = vadd.f32 %v5185_v42, %v14195_v13 }
 0x76c   : > { %v6999_v26 = vpop.f32.mrb[67].mxu0 }
 0x76d   : > { %v5150_v15 = vmul.f32 %v6997_v22, %v12463_v40  ;;  %v7000_v1 = vadd.f32 %v6999_v26, %v6998_v49  ;;  %v5243_v11 = vpack.c.bf16 %v5217_v19, %v5216_v52  ;;  %v14202_v52 = vld [vmem:[#allocation23_spill] sm:$0xff]  ;;  %v14203_v19 = vld [vmem:[#allocation24_spill] sm:$0xff] }
 0x76f   : > { %v5186_v41 = vadd.f32 %v12466_v9, %v5150_v15  ;;  %v5151_v31 = vmul.f32 %v7000_v1, %v12463_v40  ;;  %5433 = vmatmul.mubr.bf16.gmra.mrb[84].mxu1 %v5243_v11 }
 0x770   : > { %5442 = vmatprep.mubr.bf16.mxu1 %v14145_v59 }
 0x771   : > { %v5187_v60 = vadd.f32 %v12466_v9, %v5151_v31  ;;  %v7001_v8 = vpop.f32.mrb[68].mxu0  ;;  %v5218_v33 = vadd.f32 %v5186_v41, %v14196_v45 }
 0x772   : > { %v7002_v25 = vpop.f32.mrb[69].mxu0 }
 0x773   : > { %v7003_v14 = vadd.f32 %v7002_v25, %v7001_v8  ;;  %v7004_v2 = vpop.f32.mrb[70].mxu0  ;;  %v5219_v34 = vadd.f32 %v5187_v60, %v14197_v48 }
 0x774   : > { %v7005_v46 = vpop.f32.mrb[71].mxu0 }
 0x775   : > { %v5152_v53 = vmul.f32 %v7003_v14, %v12463_v40  ;;  %v7006_v16 = vadd.f32 %v7005_v46, %v7004_v2  ;;  %v5244_v61 = vpack.c.bf16 %v5219_v34, %v5218_v33  ;;  %v14204_v33 = vld [vmem:[#allocation25_spill] sm:$0xff]  ;;  %v14205_v34 = vld [vmem:[#allocation26_spill] sm:$0xff] }
 0x777   : > { %v5188_v38 = vadd.f32 %v12466_v9, %v5152_v53  ;;  %v5153_v18 = vmul.f32 %v7006_v16, %v12463_v40  ;;  %5443 = vmatmul.mubr.bf16.gmra.mrb[88].mxu1 %v5244_v61 }
 0x778   : > { %5452 = vmatprep.mubr.bf16.mxu1 %v14145_v59 }
 0x779   : > { %v5189_v28 = vadd.f32 %v12466_v9, %v5153_v18  ;;  %v7007_v58 = vpop.f32.mrb[72].mxu0  ;;  %v5220_v4 = vadd.f32 %v5188_v38, %v14198_v43 }
 0x77a   : > { %v7008_v17 = vpop.f32.mrb[73].mxu0 }
 0x77b   : > { %v7009_v37 = vadd.f32 %v7008_v17, %v7007_v58  ;;  %v7010_v29 = vpop.f32.mrb[74].mxu0  ;;  %v5221_v21 = vadd.f32 %v5189_v28, %v14199_v23 }
 0x77c   : > { %v7011_v10 = vpop.f32.mrb[75].mxu0 }
 0x77d   : > { %v5154_v62 = vmul.f32 %v7009_v37, %v12463_v40  ;;  %v7012_v47 = vadd.f32 %v7011_v10, %v7010_v29  ;;  %v5245_v7 = vpack.c.bf16 %v5221_v21, %v5220_v4  ;;  %v14206_v4 = vld [vmem:[#allocation27_spill] sm:$0xff]  ;;  %v14207_v21 = vld [vmem:[#allocation28_spill] sm:$0xff] }
 0x77f   : > { %v5190_v57 = vadd.f32 %v12466_v9, %v5154_v62  ;;  %v5155_v6 = vmul.f32 %v7012_v47, %v12463_v40  ;;  %5453 = vmatmul.mubr.bf16.gmra.mrb[92].mxu1 %v5245_v7 }
 0x780   : > { %5462 = vmatprep.mubr.bf16.mxu1 %v14145_v59 }
 0x781   : > { %v5191_v3 = vadd.f32 %v12466_v9, %v5155_v6  ;;  %v7013_v50 = vpop.f32.mrb[76].mxu0  ;;  %v5222_v12 = vadd.f32 %v5190_v57, %v14200_v24 }
 0x782   : > { %v7014_v0 = vpop.f32.mrb[77].mxu0 }
 0x783   : > { %v7015_v54 = vadd.f32 %v7014_v0, %v7013_v50  ;;  %v7016_v51 = vpop.f32.mrb[78].mxu0  ;;  %v5223_v30 = vadd.f32 %v5191_v3, %v14201_v36 }
 0x784   : > { %v7017_v27 = vpop.f32.mrb[79].mxu0 }
 0x785   : > { %v5156_v44 = vmul.f32 %v7015_v54, %v12463_v40  ;;  %v7018_v32 = vadd.f32 %v7017_v27, %v7016_v51  ;;  %v5246_v5 = vpack.c.bf16 %v5223_v30, %v5222_v12  ;;  %v14208_v12 = vld [vmem:[#allocation29_spill] sm:$0xff]  ;;  %v14209_v30 = vld [vmem:[#allocation30_spill] sm:$0xff] }
 0x787   : > { %v5192_v20 = vadd.f32 %v12466_v9, %v5156_v44  ;;  %v5157_v42 = vmul.f32 %v7018_v32, %v12463_v40  ;;  %5463 = vmatmul.mubr.bf16.gmra.mrb[96].mxu1 %v5246_v5 }
 0x788   : > { %5472 = vmatprep.mubr.bf16.mxu1 %v14145_v59 }
 0x789   : > { %v5193_v55 = vadd.f32 %v12466_v9, %v5157_v42  ;;  %v7019_v63 = vpop.f32.mrb[80].mxu0  ;;  %v5224_v13 = vadd.f32 %v5192_v20, %v14202_v52 }
 0x78a   : > { %v7020_v22 = vpop.f32.mrb[81].mxu0 }
 0x78b   : > { %v7021_v49 = vadd.f32 %v7020_v22, %v7019_v63  ;;  %v7022_v35 = vpop.f32.mrb[82].mxu0  ;;  %v5225_v26 = vadd.f32 %v5193_v55, %v14203_v19 }
 0x78c   : > { %v7023_v15 = vpop.f32.mrb[83].mxu0 }
 0x78d   : > { %v5158_v1 = vmul.f32 %v7021_v49, %v12463_v40  ;;  %v7024_v11 = vadd.f32 %v7023_v15, %v7022_v35  ;;  %v5247_v41 = vpack.c.bf16 %v5225_v26, %v5224_v13  ;;  %v14210_v13 = vld [vmem:[#allocation31_spill] sm:$0xff]  ;;  %v14211_v26 = vld [vmem:[#allocation32_spill] sm:$0xff] }
 0x78f   : > { %v5194_v31 = vadd.f32 %v12466_v9, %v5158_v1  ;;  %v5159_v60 = vmul.f32 %v7024_v11, %v12463_v40  ;;  %5473 = vmatmul.mubr.bf16.gmra.mrb[100].mxu1 %v5247_v41 }
 0x790   : > { %5482 = vmatprep.mubr.bf16.mxu1 %v14145_v59 }
 0x791   : > { %v5195_v8 = vadd.f32 %v12466_v9, %v5159_v60  ;;  %v7025_v25 = vpop.f32.mrb[84].mxu0  ;;  %v5226_v48 = vadd.f32 %v5194_v31, %v14204_v33 }
 0x792   : > { %v7026_v14 = vpop.f32.mrb[85].mxu0 }
 0x793   : > { %v7027_v2 = vadd.f32 %v7026_v14, %v7025_v25  ;;  %v7028_v45 = vpop.f32.mrb[86].mxu0  ;;  %v5227_v46 = vadd.f32 %v5195_v8, %v14205_v34 }
 0x794   : > { %v7029_v53 = vpop.f32.mrb[87].mxu0 }
 0x795   : > { %v5160_v16 = vmul.f32 %v7027_v2, %v12463_v40  ;;  %v7030_v61 = vadd.f32 %v7029_v53, %v7028_v45  ;;  %v5248_v38 = vpack.c.bf16 %v5227_v46, %v5226_v48  ;;  %v14212_v48 = vld [vmem:[#allocation33_spill] sm:$0xff]  ;;  %v14213_v46 = vld [vmem:[#allocation34_spill] sm:$0xff] }
 0x797   : > { %v5196_v18 = vadd.f32 %v12466_v9, %v5160_v16  ;;  %v5161_v28 = vmul.f32 %v7030_v61, %v12463_v40  ;;  %5483 = vmatmul.mubr.bf16.gmra.mrb[104].mxu1 %v5248_v38 }
 0x798   : > { %5492 = vmatprep.mubr.bf16.mxu1 %v14145_v59 }
 0x799   : > { %v5197_v58 = vadd.f32 %v12466_v9, %v5161_v28  ;;  %v7031_v17 = vpop.f32.mrb[88].mxu0  ;;  %v5228_v23 = vadd.f32 %v5196_v18, %v14206_v4 }
 0x79a   : > { %v7032_v37 = vpop.f32.mrb[89].mxu0 }
 0x79b   : > { %v7033_v29 = vadd.f32 %v7032_v37, %v7031_v17  ;;  %v7034_v43 = vpop.f32.mrb[90].mxu0  ;;  %v5229_v10 = vadd.f32 %v5197_v58, %v14207_v21  ;;  %v14214_v37 = vld [vmem:[#allocation35_spill] sm:$0xff]  ;;  %v7264_v21 = vld [vmem:[%s13096_s15 + $0x40] sm:$0xff]  }
 0x79c   : > { %v7035_v62 = vpop.f32.mrb[91].mxu0  ;;  %7055 = vmatprep.subr.bf16.mxu0 %v7264_v21 }
 0x79d   : > { %v5162_v47 = vmul.f32 %v7033_v29, %v12463_v40  ;;  %v7036_v7 = vadd.f32 %v7035_v62, %v7034_v43  ;;  %v5249_v57 = vpack.c.bf16 %v5229_v10, %v5228_v23  ;;  %v14215_v43 = vld [vmem:[#allocation36_spill] sm:$0xff]  ;;  %v7265_v10 = vld [vmem:[%s13096_s15] sm:$0xff]  }
 0x79e   : > { %7056 = vmatpush3.bf16.msra.mxu0 %v7265_v10 }
 0x79f   : > { %v5198_v6 = vadd.f32 %v12466_v9, %v5162_v47  ;;  %v5163_v3 = vmul.f32 %v7036_v7, %v12463_v40  ;;  %5493 = vmatmul.mubr.bf16.gmra.mrb[108].mxu1 %v5249_v57  ;;  %v14216_v47 = vld [vmem:[#allocation37_spill] sm:$0xff]  ;;  %v7268_v57 = vld [vmem:[%s13096_s15 + $0x50] sm:$0xff]  }
 0x7a0   : > { %5502 = vmatprep.mubr.bf16.mxu1 %v14145_v59 }
 0x7a1   : > { %v5199_v50 = vadd.f32 %v12466_v9, %v5163_v3  ;;  %v7037_v0 = vpop.f32.mrb[92].mxu0  ;;  %v5230_v36 = vadd.f32 %v5198_v6, %v14208_v12  ;;  %v7269_v6 = vld [vmem:[%s13096_s15 + $0x10] sm:$0xff]  }
 0x7a2   : > { %v7038_v54 = vpop.f32.mrb[93].mxu0 }
 0x7a3   : > { %v7039_v51 = vadd.f32 %v7038_v54, %v7037_v0  ;;  %v7040_v24 = vpop.f32.mrb[94].mxu0  ;;  %v5231_v27 = vadd.f32 %v5199_v50, %v14209_v30  ;;  %v14217_v50 = vld [vmem:[#allocation38_spill] sm:$0xff] }
 0x7a4   : > { %v7041_v44 = vpop.f32.mrb[95].mxu0 }
 0x7a5   : > { %v5164_v32 = vmul.f32 %v7039_v51, %v12463_v40  ;;  %v7042_v5 = vadd.f32 %v7041_v44, %v7040_v24  ;;  %v5250_v20 = vpack.c.bf16 %v5231_v27, %v5230_v36 }
 0x7a7   : > { %v5200_v42 = vadd.f32 %v12466_v9, %v5164_v32  ;;  %v5165_v55 = vmul.f32 %v7042_v5, %v12463_v40  ;;  %5503 = vmatmul.mubr.bf16.gmra.mrb[112].mxu1 %v5250_v20 }
 0x7a8   : > { %5512 = vmatprep.mubr.bf16.mxu1 %v14145_v59 }
 0x7a9   : > { %v5201_v63 = vadd.f32 %v12466_v9, %v5165_v55  ;;  %v7043_v22 = vpop.f32.mrb[96].mxu0  ;;  %v5232_v19 = vadd.f32 %v5200_v42, %v14210_v13 }
 0x7aa   : > { %v7044_v49 = vpop.f32.mrb[97].mxu0 }
 0x7ab   : > { %v7045_v35 = vadd.f32 %v7044_v49, %v7043_v22  ;;  %v7046_v52 = vpop.f32.mrb[98].mxu0  ;;  %v5233_v15 = vadd.f32 %v5201_v63, %v14211_v26 }
 0x7ac   : > { %v7047_v1 = vpop.f32.mrb[99].mxu0 }
 0x7ad   : > { %v5166_v11 = vmul.f32 %v7045_v35, %v12463_v40  ;;  %v7048_v41 = vadd.f32 %v7047_v1, %v7046_v52  ;;  %v5251_v31 = vpack.c.bf16 %v5233_v15, %v5232_v19 }
 0x7af   : > { %v5202_v60 = vadd.f32 %v12466_v9, %v5166_v11  ;;  %v5167_v8 = vmul.f32 %v7048_v41, %v12463_v40  ;;  %5513 = vmatmul.mubr.bf16.gmra.mrb[116].mxu1 %v5251_v31 }
 0x7b0   : > { %5522 = vmatprep.mubr.bf16.mxu1 %v14145_v59 }
 0x7b1   : > { %v5203_v25 = vadd.f32 %v12466_v9, %v5167_v8  ;;  %v7049_v14 = vpop.f32.mrb[100].mxu0  ;;  %v5234_v34 = vadd.f32 %v5202_v60, %v14212_v48 }
 0x7b2   : > { %v7050_v2 = vpop.f32.mrb[101].mxu0 }
 0x7b3   : > { %v7051_v45 = vadd.f32 %v7050_v2, %v7049_v14  ;;  %v7052_v33 = vpop.f32.mrb[102].mxu0  ;;  %v5235_v53 = vadd.f32 %v5203_v25, %v14213_v46 }
 0x7b4   : > { %v7053_v16 = vpop.f32.mrb[103].mxu0 }
 0x7b5   : > { %v5168_v61 = vmul.f32 %v7051_v45, %v12463_v40  ;;  %v7054_v38 = vadd.f32 %v7053_v16, %v7052_v33  ;;  %v5252_v18 = vpack.c.bf16 %v5235_v53, %v5234_v34 }
 0x7b7   : > { %v5204_v28 = vadd.f32 %v12466_v9, %v5168_v61  ;;  %v5169_v58 = vmul.f32 %v7054_v38, %v12463_v40  ;;  %5523 = vmatmul.mubr.bf16.gmra.mrb[120].mxu1 %v5252_v18  ;;  %v7267_v40 = vld [vmem:[%s13096_s15 + $0x8] sm:$0xff]  }
 0x7b8   : > { %5532 = vmatprep.mubr.bf16.mxu1 %v14145_v59  ;;  %v7266_v59 = vld [vmem:[%s13096_s15 + $0x48] sm:$0xff]  }
 0x7b9   : > { %v5205_v17 = vadd.f32 %v12466_v9, %v5169_v58  ;;  %v5236_v29 = vadd.f32 %v5204_v28, %v14214_v37  ;;  %7057 = vmatprep.subr.bf16.mxu0 %v7266_v59  ;;  %v5543_v9 = vld [vmem:[%s13095_s14] sm:$0xf]  ;;  %v7270_v59 = vld [vmem:[%s13096_s15 + $0x58] sm:$0xff]  }
 0x7ba   : > { %7058 = vmatpush3.bf16.msra.mxu0 %v7267_v40  ;;  %v5548_v62 = vrot.slane %v5543_v9, %v14146_v39  ;;  %v5552_v7 = vrot.slane %v5543_v9, %v14216_v47  ;;  %v5630_v3 = vrot.slane %v5543_v9, %v14147_v56  ;;  %v5634_v0 = vrot.slane %v5543_v9, %v14217_v50  ;;  %v7271_v40 = vld [vmem:[%s13096_s15 + $0x18] sm:$0xff]  }
 0x7bb   : > { %v5237_v4 = vadd.f32 %v5205_v17, %v14215_v43  ;;  %7059 = vmatprep.subr.bf16.mxu0 %v7268_v57 }
 0x7bc   : > { %v12605_v54 = vrot.slane %v5548_v62, %v14146_v39  ;;  %v12608_v51 = vrot.slane %v5552_v7, %v14146_v39  ;;  %v12611_v24 = vrot.slane %v5630_v3, %v14147_v56  ;;  %v12614_v12 = vrot.slane %v5634_v0, %v14147_v56 }
 0x7bd   : > { %v5253_v23 = vpack.c.bf16 %v5237_v4, %v5236_v29 }
 0x7be   : > { %7060 = vmatpush3.bf16.msra.mxu0 %v7269_v6 }
 0x7bf   : > { %5533 = vmatmul.mubr.bf16.gmra.mrb[124].mxu1 %v5253_v23  ;;  %7061 = vmatprep.subr.bf16.mxu0 %v7270_v59 }
 0x7c2   : > { %7062 = vmatpush3.bf16.msra.mxu0 %v7271_v40 }
 0x81a   : > { %v5384_v36 = vpop.f32.mrb[64].mxu1 }
 0x81b   : > { %v5563_v30 = vmul.f32 %v12605_v54, %v5384_v36  ;;  %v5386_v27 = vpop.f32.mrb[65].mxu1 }
 0x81c   : > { %v5564_v44 = vmul.f32 %v12608_v51, %v5386_v27  ;;  %v5388_v32 = vpop.f32.mrb[66].mxu1 }
 0x81d   : > { %v12619_v5 = vadd.f32 %v12611_v24, %v5563_v30  ;;  %v5565_v20 = vmul.f32 %v12605_v54, %v5388_v32  ;;  %v5390_v39 = vpop.f32.mrb[67].mxu1 }
 0x81e   : > { %v12623_v42 = vadd.f32 %v12614_v12, %v5564_v44  ;;  %v5566_v55 = vmul.f32 %v12608_v51, %v5390_v39 }
 0x81f   : > { %v6813_v56 = vmul.f32 -1.442695, %v12619_v5  ;;  %v12628_v63 = vadd.f32 %v12611_v24, %v5565_v20 }
 0x820   : > { %v6814_v22 = vmul.f32 -1.442695, %v12623_v42  ;;  %v12632_v49 = vadd.f32 %v12614_v12, %v5566_v55 }
 0x821   : > { %7932 = vpow2.f32 %v6813_v56  ;;  %v6815_v35 = vmul.f32 -1.442695, %v12628_v63 }
 0x822   : > { %7934 = vpow2.f32 %v6814_v22  ;;  %v6816_v52 = vmul.f32 -1.442695, %v12632_v49  ;;  %v5394_v13 = vpop.f32.mrb[68].mxu1 }
 0x823   : > { %7936 = vpow2.f32 %v6815_v35  ;;  %v5567_v19 = vmul.f32 %v12605_v54, %v5394_v13  ;;  %v5396_v26 = vpop.f32.mrb[69].mxu1 }
 0x824   : > { %7938 = vpow2.f32 %v6816_v52  ;;  %v5568_v15 = vmul.f32 %v12608_v51, %v5396_v26  ;;  %v5398_v1 = vpop.f32.mrb[70].mxu1 }
 0x825   : > { %v12639_v11 = vadd.f32 %v12611_v24, %v5567_v19  ;;  %v5569_v41 = vmul.f32 %v12605_v54, %v5398_v1  ;;  %v5400_v31 = vpop.f32.mrb[71].mxu1 }
 0x826   : > { %v12643_v60 = vadd.f32 %v12614_v12, %v5568_v15  ;;  %v5570_v8 = vmul.f32 %v12608_v51, %v5400_v31 }
 0x827   : > { %v6817_v25 = vmul.f32 -1.442695, %v12639_v11  ;;  %v12648_v14 = vadd.f32 %v12611_v24, %v5569_v41 }
 0x828   : > { %v6818_v2 = vmul.f32 -1.442695, %v12643_v60  ;;  %v12652_v45 = vadd.f32 %v12614_v12, %v5570_v8 }
 0x829   : > { %7940 = vpow2.f32 %v6817_v25  ;;  %v6819_v33 = vmul.f32 -1.442695, %v12648_v14 }
 0x82a   : > { %7942 = vpow2.f32 %v6818_v2  ;;  %v6820_v48 = vmul.f32 -1.442695, %v12652_v45  ;;  %v5404_v34 = vpop.f32.mrb[72].mxu1 }
 0x82b   : > { %v7933_v46 = vpop.eup %7932  ;;  %7944 = vpow2.f32 %v6819_v33  ;;  %v5571_v53 = vmul.f32 %v12605_v54, %v5404_v34  ;;  %v5406_v16 = vpop.f32.mrb[73].mxu1 }
 0x82c   : > { %v7935_v61 = vpop.eup %7934  ;;  %v5901_v38 = vadd.f32 1.0, %v7933_v46  ;;  %7946 = vpow2.f32 %v6820_v48  ;;  %v5572_v18 = vmul.f32 %v12608_v51, %v5406_v16  ;;  %v5408_v28 = vpop.f32.mrb[74].mxu1 }
 0x82d   : > { %v7937_v58 = vpop.eup %7936  ;;  %v5902_v17 = vadd.f32 1.0, %v7935_v61  ;;  %v12659_v37 = vadd.f32 %v12611_v24, %v5571_v53  ;;  %v5573_v29 = vmul.f32 %v12605_v54, %v5408_v28  ;;  %v5410_v43 = vpop.f32.mrb[75].mxu1 }
 0x82e   : > { %v7939_v4 = vpop.eup %7938  ;;  %7948 = vrcp.f32 %v5901_v38  ;;  %v5903_v23 = vadd.f32 1.0, %v7937_v58  ;;  %v12663_v21 = vadd.f32 %v12614_v12, %v5572_v18  ;;  %v5574_v10 = vmul.f32 %v12608_v51, %v5410_v43 }
 0x82f   : > { %7950 = vrcp.f32 %v5902_v17  ;;  %v5904_v9 = vadd.f32 1.0, %v7939_v4  ;;  %v6821_v62 = vmul.f32 -1.442695, %v12659_v37  ;;  %v12674_v47 = vadd.f32 %v12611_v24, %v5573_v29  ;;  %v7272_v4 = vld [vmem:[%s13096_s15 + $0x60] sm:$0xff]  }
 0x830   : > { %7952 = vrcp.f32 %v5903_v23  ;;  %v6822_v7 = vmul.f32 -1.442695, %v12663_v21  ;;  %v12678_v57 = vadd.f32 %v12614_v12, %v5574_v10  ;;  %7063 = vmatprep.subr.bf16.mxu0 %v7272_v4 }
 0x831   : > { %7954 = vrcp.f32 %v5904_v9  ;;  %v6823_v6 = vmul.f32 -1.442695, %v12674_v47 }
 0x832   : > { %7956 = vpow2.f32 %v6821_v62  ;;  %v6824_v3 = vmul.f32 -1.442695, %v12678_v57  ;;  %v5414_v50 = vpop.f32.mrb[76].mxu1 }
 0x833   : > { %v7941_v0 = vpop.eup %7940  ;;  %7958 = vpow2.f32 %v6822_v7  ;;  %v5575_v36 = vmul.f32 %v12605_v54, %v5414_v50  ;;  %v5416_v30 = vpop.f32.mrb[77].mxu1 }
 0x834   : > { %v7943_v27 = vpop.eup %7942  ;;  %v5905_v44 = vadd.f32 1.0, %v7941_v0  ;;  %7960 = vpow2.f32 %v6823_v6  ;;  %v5576_v32 = vmul.f32 %v12608_v51, %v5416_v30  ;;  %v5418_v20 = vpop.f32.mrb[78].mxu1 }
 0x835   : > { %v7945_v39 = vpop.eup %7944  ;;  %v5906_v55 = vadd.f32 1.0, %v7943_v27  ;;  %7962 = vpow2.f32 %v6824_v3  ;;  %v12685_v56 = vadd.f32 %v12611_v24, %v5575_v36  ;;  %v5577_v22 = vmul.f32 %v12605_v54, %v5418_v20  ;;  %v5420_v35 = vpop.f32.mrb[79].mxu1 }
 0x836   : > { %v7947_v52 = vpop.eup %7946  ;;  %7964 = vrcp.f32 %v5905_v44  ;;  %v5907_v13 = vadd.f32 1.0, %v7945_v39  ;;  %v12689_v19 = vadd.f32 %v12614_v12, %v5576_v32  ;;  %v5578_v26 = vmul.f32 %v12608_v51, %v5420_v35 }
 0x837   : > { %7966 = vrcp.f32 %v5906_v55  ;;  %v5908_v15 = vadd.f32 1.0, %v7947_v52  ;;  %v6825_v1 = vmul.f32 -1.442695, %v12685_v56  ;;  %v12694_v41 = vadd.f32 %v12611_v24, %v5577_v22 }
 0x838   : > { %v7949_v31 = vpop.eup %7948  ;;  %7968 = vrcp.f32 %v5907_v13  ;;  %v6826_v8 = vmul.f32 -1.442695, %v12689_v19  ;;  %v12698_v25 = vadd.f32 %v12614_v12, %v5578_v26 }
 0x839   : > { %v7951_v2 = vpop.eup %7950  ;;  %7970 = vrcp.f32 %v5908_v15  ;;  %v6827_v33 = vmul.f32 -1.442695, %v12694_v41  ;;  %v6093_v16 = vmul.f32 %v7949_v31, %v12619_v5  ;;  %v7273_v5 = vld [vmem:[%s13096_s15 + $0x20] sm:$0xff]  }
 0x83a   : > { %v7953_v48 = vpop.eup %7952  ;;  %7972 = vpow2.f32 %v6825_v1  ;;  %v6828_v34 = vmul.f32 -1.442695, %v12698_v25  ;;  %v5424_v46 = vpop.f32.mrb[80].mxu1  ;;  %v6094_v58 = vmul.f32 %v7951_v2, %v12623_v42  ;;  %7064 = vmatpush3.bf16.msra.mxu0 %v7273_v5 }
 0x83b   : > { %v7955_v53 = vpop.eup %7954  ;;  %v6095_v61 = vmul.f32 %v7953_v48, %v12628_v63  ;;  %7974 = vpow2.f32 %v6826_v8  ;;  %v5579_v38 = vmul.f32 %v12605_v54, %v5424_v46  ;;  %v5426_v18 = vpop.f32.mrb[81].mxu1 }
 0x83c   : > { %v7957_v28 = vpop.eup %7956  ;;  %v6096_v17 = vmul.f32 %v7955_v53, %v12632_v49  ;;  %7976 = vpow2.f32 %v6827_v33  ;;  %v5580_v29 = vmul.f32 %v12608_v51, %v5426_v18  ;;  %v5428_v43 = vpop.f32.mrb[82].mxu1 }
 0x83d   : > { %v7959_v63 = vpop.eup %7958  ;;  %v6157_v23 = vadd.f32 %v6095_v61, %v6093_v16  ;;  %v5909_v10 = vadd.f32 1.0, %v7957_v28  ;;  %7978 = vpow2.f32 %v6828_v34  ;;  %v12715_v42 = vadd.f32 %v12611_v24, %v5579_v38  ;;  %v5430_v49 = vpop.f32.mrb[83].mxu1 }
 0x83e   : > { %v7961_v59 = vpop.eup %7960  ;;  %v6170_v40 = vadd.f32 %v6096_v17, %v6094_v58  ;;  %v5910_v9 = vadd.f32 1.0, %v7959_v63  ;;  %v12718_v62 = vadd.f32 %v12614_v12, %v5580_v29  ;;  %v5581_v7 = vmul.f32 %v12605_v54, %v5428_v43 }
 0x83f   : > { %v7963_v6 = vpop.eup %7962  ;;  %7980 = vrcp.f32 %v5909_v10  ;;  %v5911_v3 = vadd.f32 1.0, %v7961_v59  ;;  %v6829_v50 = vmul.f32 -1.442695, %v12715_v42  ;;  %v5582_v0 = vmul.f32 %v12608_v51, %v5430_v49 }
 0x840   : > { %v7965_v36 = vpop.eup %7964  ;;  %7982 = vrcp.f32 %v5910_v9  ;;  %v5912_v30 = vadd.f32 1.0, %v7963_v6  ;;  %v6830_v27 = vmul.f32 -1.442695, %v12718_v62  ;;  %v12725_v44 = vadd.f32 %v12611_v24, %v5581_v7 }
 0x841   : > { %v7967_v32 = vpop.eup %7966  ;;  %v6097_v20 = vmul.f32 %v7965_v36, %v12639_v11  ;;  %7984 = vrcp.f32 %v5911_v3  ;;  %v12729_v39 = vadd.f32 %v12614_v12, %v5582_v0 }
 0x842   : > { %v7969_v55 = vpop.eup %7968  ;;  %v6098_v22 = vmul.f32 %v7967_v32, %v12643_v60  ;;  %7986 = vrcp.f32 %v5912_v30  ;;  %v6831_v35 = vmul.f32 -1.442695, %v12725_v44  ;;  %v5434_v52 = vpop.f32.mrb[84].mxu1 }
 0x843   : > { %v7971_v13 = vpop.eup %7970  ;;  %v6158_v26 = vadd.f32 %v6157_v23, %v6097_v20  ;;  %v6099_v15 = vmul.f32 %v7969_v55, %v12648_v14  ;;  %7988 = vpow2.f32 %v6829_v50  ;;  %v6832_v1 = vmul.f32 -1.442695, %v12729_v39  ;;  %v5436_v31 = vpop.f32.mrb[85].mxu1 }
 0x844   : > { %v7973_v11 = vpop.eup %7972  ;;  %v6171_v8 = vadd.f32 %v6170_v40, %v6098_v22  ;;  %v6100_v2 = vmul.f32 %v7971_v13, %v12652_v45  ;;  %7990 = vpow2.f32 %v6830_v27  ;;  %v5583_v33 = vmul.f32 %v12605_v54, %v5434_v52  ;;  %v5438_v60 = vpop.f32.mrb[86].mxu1 }
 0x845   : > { %v7975_v48 = vpop.eup %7974  ;;  %v6159_v34 = vadd.f32 %v6158_v26, %v6099_v15  ;;  %v5913_v46 = vadd.f32 1.0, %v7973_v11  ;;  %7992 = vpow2.f32 %v6831_v35  ;;  %v5584_v53 = vmul.f32 %v12608_v51, %v5436_v31  ;;  %v5440_v16 = vpop.f32.mrb[87].mxu1 }
 0x846   : > { %v7977_v14 = vpop.eup %7976  ;;  %v6172_v61 = vadd.f32 %v6171_v8, %v6100_v2  ;;  %v5914_v38 = vadd.f32 1.0, %v7975_v48  ;;  %7994 = vpow2.f32 %v6832_v1  ;;  %v12739_v18 = vadd.f32 %v12611_v24, %v5583_v33 }
 0x847   : > { %v7979_v28 = vpop.eup %7978  ;;  %7996 = vrcp.f32 %v5913_v46  ;;  %v5915_v45 = vadd.f32 1.0, %v7977_v14  ;;  %v12742_v58 = vadd.f32 %v12614_v12, %v5584_v53  ;;  %v5585_v17 = vmul.f32 %v12605_v54, %v5438_v60 }
 0x848   : > { %7998 = vrcp.f32 %v5914_v38  ;;  %v5916_v29 = vadd.f32 1.0, %v7979_v28  ;;  %v6833_v43 = vmul.f32 -1.442695, %v12739_v18  ;;  %v5586_v4 = vmul.f32 %v12608_v51, %v5440_v16 }
 0x849   : > { %v7981_v5 = vpop.eup %7980  ;;  %8000 = vrcp.f32 %v5915_v45  ;;  %v6834_v63 = vmul.f32 -1.442695, %v12742_v58  ;;  %v12749_v23 = vadd.f32 %v12611_v24, %v5585_v17 }
 0x84a   : > { %v7983_v10 = vpop.eup %7982  ;;  %v6101_v49 = vmul.f32 %v7981_v5, %v12659_v37  ;;  %8002 = vrcp.f32 %v5916_v29  ;;  %v12753_v59 = vadd.f32 %v12614_v12, %v5586_v4  ;;  %v5444_v40 = vpop.f32.mrb[88].mxu1  ;;  %v7276_v4 = vld [vmem:[%s13096_s15 + $0x70] sm:$0xff]  }
 0x84b   : > { %v7985_v9 = vpop.eup %7984  ;;  %v6102_v7 = vmul.f32 %v7983_v10, %v12663_v21  ;;  %8004 = vpow2.f32 %v6833_v43  ;;  %v6835_v6 = vmul.f32 -1.442695, %v12749_v23  ;;  %v5587_v3 = vmul.f32 %v12605_v54, %v5444_v40  ;;  %v5446_v50 = vpop.f32.mrb[89].mxu1  ;;  %v7275_v43 = vld [vmem:[%s13096_s15 + $0x28] sm:$0xff]  }
 0x84c   : > { %v7987_v0 = vpop.eup %7986  ;;  %v6160_v36 = vadd.f32 %v6159_v34, %v6101_v49  ;;  %v6103_v30 = vmul.f32 %v7985_v9, %v12674_v47  ;;  %8006 = vpow2.f32 %v6834_v63  ;;  %v6836_v37 = vmul.f32 -1.442695, %v12753_v59  ;;  %v5448_v27 = vpop.f32.mrb[90].mxu1 }
 0x84d   : > { %v7989_v32 = vpop.eup %7988  ;;  %v6173_v20 = vadd.f32 %v6172_v61, %v6102_v7  ;;  %v6104_v55 = vmul.f32 %v7987_v0, %v12678_v57  ;;  %8008 = vpow2.f32 %v6835_v6  ;;  %v12762_v21 = vadd.f32 %v12611_v24, %v5587_v3  ;;  %v5450_v22 = vpop.f32.mrb[91].mxu1 }
 0x84e   : > { %v7991_v35 = vpop.eup %7990  ;;  %v6161_v52 = vadd.f32 %v6160_v36, %v6103_v30  ;;  %v5917_v13 = vadd.f32 1.0, %v7989_v32  ;;  %8010 = vpow2.f32 %v6836_v37  ;;  %v5588_v26 = vmul.f32 %v12608_v51, %v5446_v50  ;;  %v7277_v30 = vld [vmem:[%s13096_s15 + $0x30] sm:$0xff]  }
 0x84f   : > { %v7993_v47 = vpop.eup %7992  ;;  %v6174_v15 = vadd.f32 %v6173_v20, %v6104_v55  ;;  %v5918_v1 = vadd.f32 1.0, %v7991_v35  ;;  %v6837_v31 = vmul.f32 -1.442695, %v12762_v21  ;;  %v5589_v11 = vmul.f32 %v12605_v54, %v5448_v27  ;;  %v7278_v20 = vld [vmem:[%s13096_s15 + $0x78] sm:$0xff]  }
 0x850   : > { %v7995_v8 = vpop.eup %7994  ;;  %8012 = vrcp.f32 %v5917_v13  ;;  %v5919_v57 = vadd.f32 1.0, %v7993_v47  ;;  %v12768_v2 = vadd.f32 %v12614_v12, %v5588_v26  ;;  %v5590_v33 = vmul.f32 %v12608_v51, %v5450_v22 }
 0x851   : > { %v7997_v60 = vpop.eup %7996  ;;  %8014 = vrcp.f32 %v5918_v1  ;;  %v5920_v48 = vadd.f32 1.0, %v7995_v8  ;;  %v12772_v34 = vadd.f32 %v12611_v24, %v5589_v11 }
 0x852   : > { %v7999_v46 = vpop.eup %7998  ;;  %v6105_v53 = vmul.f32 %v7997_v60, %v12685_v56  ;;  %8016 = vrcp.f32 %v5919_v57  ;;  %v6838_v16 = vmul.f32 -1.442695, %v12768_v2  ;;  %v12777_v14 = vadd.f32 %v12614_v12, %v5590_v33  ;;  %v5454_v61 = vpop.f32.mrb[92].mxu1  ;;  %v7274_v56 = vld [vmem:[%s13096_s15 + $0x68] sm:$0xff]   ;;  %v7279_v57 = vld [vmem:[%s13096_s15 + $0x38] sm:$0xff]  }
 0x853   : > { %v8001_v38 = vpop.eup %8000  ;;  %v6106_v28 = vmul.f32 %v7999_v46, %v12689_v19  ;;  %8018 = vrcp.f32 %v5920_v48  ;;  %v6839_v45 = vmul.f32 -1.442695, %v12772_v34  ;;  %v5591_v17 = vmul.f32 %v12605_v54, %v5454_v61  ;;  %v5456_v29 = vpop.f32.mrb[93].mxu1  ;;  %7065 = vmatprep.subr.bf16.mxu0 %v7274_v56 }
 0x854   : > { %v8003_v5 = vpop.eup %8002  ;;  %v6162_v19 = vadd.f32 %v6161_v52, %v6105_v53  ;;  %v6107_v63 = vmul.f32 %v8001_v38, %v12694_v41  ;;  %8020 = vpow2.f32 %v6837_v31  ;;  %v6840_v10 = vmul.f32 -1.442695, %v12777_v14  ;;  %v5458_v49 = vpop.f32.mrb[94].mxu1  ;;  %7066 = vmatpush3.bf16.msra.mxu0 %v7275_v43 }
 0x855   : > { %v8005_v40 = vpop.eup %8004  ;;  %v6175_v9 = vadd.f32 %v6174_v15, %v6106_v28  ;;  %v6108_v7 = vmul.f32 %v8003_v5, %v12698_v25  ;;  %8022 = vpow2.f32 %v6838_v16  ;;  %v12795_v6 = vadd.f32 %v12611_v24, %v5591_v17  ;;  %v5460_v3 = vpop.f32.mrb[95].mxu1  ;;  %7067 = vmatprep.subr.bf16.mxu0 %v7276_v4 }
 0x856   : > { %v8007_v50 = vpop.eup %8006  ;;  %v6163_v0 = vadd.f32 %v6162_v19, %v6107_v63  ;;  %v5921_v36 = vadd.f32 1.0, %v8005_v40  ;;  %8024 = vpow2.f32 %v6839_v45  ;;  %v5592_v41 = vmul.f32 %v12608_v51, %v5456_v29 }
 0x857   : > { %v8009_v37 = vpop.eup %8008  ;;  %v6176_v27 = vadd.f32 %v6175_v9, %v6108_v7  ;;  %v5922_v25 = vadd.f32 1.0, %v8007_v50  ;;  %8026 = vpow2.f32 %v6840_v10  ;;  %v6841_v32 = vmul.f32 -1.442695, %v12795_v6 }
 0x858   : > { %v8011_v55 = vpop.eup %8010  ;;  %v6164_v22 = vrot.slane %v6163_v0, 4  ;;  %8028 = vrcp.f32 %v5921_v36  ;;  %v5923_v35 = vadd.f32 1.0, %v8009_v37  ;;  %v12806_v52 = vadd.f32 %v12614_v12, %v5592_v41  ;;  %7068 = vmatpush3.bf16.msra.mxu0 %v7277_v30 }
 0x859   : > { %v6177_v13 = vrot.slane %v6176_v27, 4  ;;  %8030 = vrcp.f32 %v5922_v25  ;;  %v5924_v26 = vadd.f32 1.0, %v8011_v55  ;;  %v5593_v47 = vmul.f32 %v12605_v54, %v5458_v49  ;;  %7069 = vmatprep.subr.bf16.mxu0 %v7278_v20 }
 0x85a   : > { %v8013_v15 = vpop.eup %8012  ;;  %v6165_v1 = vadd.f32 %v6164_v22, %v6163_v0  ;;  %8032 = vrcp.f32 %v5923_v35  ;;  %v6842_v31 = vmul.f32 -1.442695, %v12806_v52  ;;  %v5594_v11 = vmul.f32 %v12608_v51, %v5460_v3  ;;  %v5464_v8 = vpop.f32.mrb[96].mxu1 }
 0x85b   : > { %v8015_v33 = vpop.eup %8014  ;;  %v6178_v60 = vadd.f32 %v6177_v13, %v6176_v27  ;;  %v6109_v48 = vmul.f32 %v8013_v15, %v12715_v42  ;;  %8034 = vrcp.f32 %v5924_v26  ;;  %v12816_v46 = vadd.f32 %v12611_v24, %v5593_v47  ;;  %v5466_v53 = vpop.f32.mrb[97].mxu1 }
 0x85c   : > { %v8017_v16 = vpop.eup %8016  ;;  %v6166_v61 = vrot.slane %v6165_v1, 2  ;;  %v6110_v38 = vmul.f32 %v8015_v33, %v12718_v62  ;;  %8036 = vpow2.f32 %v6841_v32  ;;  %v12820_v28 = vadd.f32 %v12614_v12, %v5594_v11  ;;  %v5468_v45 = vpop.f32.mrb[98].mxu1  ;;  %7070 = vmatpush3.bf16.msra.mxu0 %v7279_v57 }
 0x85d   : > { %v8019_v17 = vpop.eup %8018  ;;  %v6179_v29 = vrot.slane %v6178_v60, 2  ;;  %v6111_v56 = vmul.f32 %v8017_v16, %v12725_v44  ;;  %8038 = vpow2.f32 %v6842_v31  ;;  %v6843_v42 = vmul.f32 -1.442695, %v12816_v46  ;;  %v5470_v43 = vpop.f32.mrb[99].mxu1 }
 0x85e   : > { %v8021_v4 = vpop.eup %8020  ;;  %v6167_v5 = vadd.f32 %v6166_v61, %v6165_v1  ;;  %v6112_v19 = vmul.f32 %v8019_v17, %v12729_v39  ;;  %v6844_v63 = vmul.f32 -1.442695, %v12820_v28  ;;  %v5595_v62 = vmul.f32 %v12605_v54, %v5464_v8 }
 0x85f   : > { %v8023_v10 = vpop.eup %8022  ;;  %v6180_v49 = vadd.f32 %v6179_v29, %v6178_v60  ;;  %v6183_v40 = vadd.f32 %v6111_v56, %v6109_v48  ;;  %v5925_v9 = vadd.f32 1.0, %v8021_v4  ;;  %8040 = vpow2.f32 %v6843_v42 }
 0x860   : > { %v8025_v7 = vpop.eup %8024  ;;  %v6168_v44 = vrot.slane %v6167_v5, 1  ;;  %v6196_v3 = vadd.f32 %v6112_v19, %v6110_v38  ;;  %v5926_v50 = vadd.f32 1.0, %v8023_v10  ;;  %8042 = vpow2.f32 %v6844_v63 }
 0x861   : > { %v8027_v0 = vpop.eup %8026  ;;  %v6181_v36 = vrot.slane %v6180_v49, 1  ;;  %8044 = vrcp.f32 %v5925_v9  ;;  %v5927_v41 = vadd.f32 1.0, %v8025_v7  ;;  %v12828_v39 = vadd.f32 %v12611_v24, %v5595_v62 }
 0x862   : > { %v8029_v30 = vpop.eup %8028  ;;  %8046 = vrcp.f32 %v5926_v50  ;;  %v5928_v37 = vadd.f32 1.0, %v8027_v0  ;;  %v5596_v27 = vmul.f32 %v12608_v51, %v5466_v53  ;;  %v5474_v25 = vpop.f32.mrb[100].mxu1  ;;  %v6169_v20 = vadd.f32 %v6168_v44, %v6167_v5 }
 0x863   : > { %v8031_v32 = vpop.eup %8030  ;;  %v6113_v55 = vmul.f32 %v8029_v30, %v12739_v18  ;;  %8048 = vrcp.f32 %v5927_v41  ;;  %v6845_v22 = vmul.f32 -1.442695, %v12828_v39  ;;  %v5476_v35 = vpop.f32.mrb[101].mxu1  ;;  %v6182_v26 = vadd.f32 %v6181_v36, %v6180_v49 }
 0x864   : > { %v8033_v13 = vpop.eup %8032  ;;  %v6114_v47 = vmul.f32 %v8031_v32, %v12742_v58  ;;  %8050 = vrcp.f32 %v5928_v37  ;;  %v12835_v15 = vadd.f32 %v12614_v12, %v5596_v27  ;;  %v5478_v1 = vpop.f32.mrb[102].mxu1  ;;  %v12840_v16 = vmul.f32 0.015625, %v6169_v20 }
 0x865   : > { %v8035_v31 = vpop.eup %8034  ;;  %v6184_v11 = vadd.f32 %v6183_v40, %v6113_v55  ;;  %v6115_v8 = vmul.f32 %v8033_v13, %v12749_v23  ;;  %8052 = vpow2.f32 %v6845_v22  ;;  %v5480_v57 = vpop.f32.mrb[103].mxu1  ;;  %v5597_v38 = vmul.f32 %v12605_v54, %v5468_v45 }
 0x866   : > { %v8037_v18 = vpop.eup %8036  ;;  %v6197_v33 = vadd.f32 %v6196_v3, %v6114_v47  ;;  %v6116_v60 = vmul.f32 %v8035_v31, %v12753_v59  ;;  %v6846_v48 = vmul.f32 -1.442695, %v12835_v15  ;;  %v12843_v17 = vmul.f32 0.015625, %v6182_v26 }
 0x867   : > { %v8039_v53 = vpop.eup %8038  ;;  %v6185_v58 = vadd.f32 %v6184_v11, %v6115_v8  ;;  %v5929_v61 = vadd.f32 1.0, %v8037_v18  ;;  %v12846_v42 = vadd.f32 %v12611_v24, %v5597_v38  ;;  %v5598_v59 = vmul.f32 %v12608_v51, %v5470_v43 }
 0x868   : > { %v6198_v29 = vadd.f32 %v6197_v33, %v6116_v60  ;;  %v5930_v56 = vadd.f32 1.0, %v8039_v53  ;;  %8054 = vpow2.f32 %v6846_v48  ;;  %v5599_v4 = vmul.f32 %v12605_v54, %v5474_v25 }
 0x869   : > { %v8041_v23 = vpop.eup %8040  ;;  %8056 = vrcp.f32 %v5929_v61  ;;  %v5600_v63 = vmul.f32 %v12608_v51, %v5476_v35  ;;  %v5601_v45 = vmul.f32 %v12605_v54, %v5478_v1  ;;  %v6847_v40 = vmul.f32 -1.442695, %v12846_v42 }
 0x86a   : > { %v8043_v5 = vpop.eup %8042  ;;  %8058 = vrcp.f32 %v5930_v56  ;;  %v5931_v19 = vadd.f32 1.0, %v8041_v23  ;;  %v5484_v62 = vpop.f32.mrb[104].mxu1  ;;  %v12854_v9 = vadd.f32 %v12614_v12, %v5598_v59  ;;  %v12857_v7 = vadd.f32 %v12611_v24, %v5599_v4 }
 0x86b   : > { %v8045_v10 = vpop.eup %8044  ;;  %v5932_v49 = vadd.f32 1.0, %v8043_v5  ;;  %v5486_v43 = vpop.f32.mrb[105].mxu1  ;;  %v12861_v50 = vadd.f32 %v12614_v12, %v5600_v63  ;;  %v12864_v0 = vadd.f32 %v12611_v24, %v5601_v45  ;;  %v5602_v1 = vmul.f32 %v12608_v51, %v5480_v57 }
 0x86c   : > { %v8047_v44 = vpop.eup %8046  ;;  %v6117_v3 = vmul.f32 %v8045_v10, %v12762_v21  ;;  %8060 = vrcp.f32 %v5931_v19  ;;  %v5488_v36 = vpop.f32.mrb[106].mxu1  ;;  %v6848_v37 = vmul.f32 -1.442695, %v12854_v9  ;;  %v6849_v27 = vmul.f32 -1.442695, %v12857_v7 }
 0x86d   : > { %v8049_v41 = vpop.eup %8048  ;;  %v6118_v30 = vmul.f32 %v8047_v44, %v12768_v2  ;;  %8062 = vrcp.f32 %v5932_v49  ;;  %v5490_v25 = vpop.f32.mrb[107].mxu1  ;;  %v6850_v55 = vmul.f32 -1.442695, %v12861_v50  ;;  %v6851_v2 = vmul.f32 -1.442695, %v12864_v0 }
 0x86e   : > { %v8051_v32 = vpop.eup %8050  ;;  %v6186_v20 = vadd.f32 %v6185_v58, %v6117_v3  ;;  %v6119_v21 = vmul.f32 %v8049_v41, %v12772_v34  ;;  %8064 = vpow2.f32 %v6847_v40  ;;  %v5603_v11 = vmul.f32 %v12605_v54, %v5484_v62 }
 0x86f   : > { %v8053_v22 = vpop.eup %8052  ;;  %v6199_v35 = vadd.f32 %v6198_v29, %v6118_v30  ;;  %v6120_v13 = vmul.f32 %v8051_v32, %v12777_v14  ;;  %8066 = vpow2.f32 %v6848_v37  ;;  %v5604_v34 = vmul.f32 %v12608_v51, %v5486_v43 }
 0x870   : > { %v6187_v26 = vadd.f32 %v6186_v20, %v6119_v21  ;;  %v5933_v47 = vadd.f32 1.0, %v8053_v22  ;;  %8068 = vpow2.f32 %v6849_v27  ;;  %v12877_v18 = vadd.f32 %v12614_v12, %v5602_v1 }
 0x871   : > { %v6200_v31 = vadd.f32 %v6199_v35, %v6120_v13  ;;  %8070 = vpow2.f32 %v6850_v55  ;;  %v5605_v14 = vmul.f32 %v12605_v54, %v5488_v36  ;;  %v5606_v33 = vmul.f32 %v12608_v51, %v5490_v25 }
 0x872   : > { %v8055_v8 = vpop.eup %8054  ;;  %8072 = vrcp.f32 %v5933_v47  ;;  %v5494_v60 = vpop.f32.mrb[108].mxu1  ;;  %v12882_v57 = vadd.f32 %v12611_v24, %v5603_v11  ;;  %v12885_v58 = vadd.f32 %v12614_v12, %v5604_v34  ;;  %v6852_v56 = vmul.f32 -1.442695, %v12877_v18 }
 0x873   : > { %v8057_v48 = vpop.eup %8056  ;;  %v5934_v53 = vadd.f32 1.0, %v8055_v8  ;;  %8074 = vpow2.f32 %v6851_v2  ;;  %v5496_v61 = vpop.f32.mrb[109].mxu1  ;;  %v12890_v23 = vadd.f32 %v12611_v24, %v5605_v14  ;;  %v12893_v59 = vadd.f32 %v12614_v12, %v5606_v33 }
 0x874   : > { %v8059_v38 = vpop.eup %8058  ;;  %v6121_v29 = vmul.f32 %v8057_v48, %v12795_v6  ;;  %v5498_v4 = vpop.f32.mrb[110].mxu1  ;;  %v6853_v19 = vmul.f32 -1.442695, %v12882_v57  ;;  %v6854_v63 = vmul.f32 -1.442695, %v12885_v58  ;;  %v5608_v41 = vmul.f32 %v12608_v51, %v5496_v61 }
 0x875   : > { %v6122_v5 = vmul.f32 %v8059_v38, %v12806_v52  ;;  %8076 = vrcp.f32 %v5934_v53  ;;  %v5500_v45 = vpop.f32.mrb[111].mxu1  ;;  %v6855_v6 = vmul.f32 -1.442695, %v12890_v23  ;;  %v6856_v49 = vmul.f32 -1.442695, %v12893_v59 }
 0x876   : > { %v8061_v62 = vpop.eup %8060  ;;  %v6188_v10 = vadd.f32 %v6187_v26, %v6121_v29  ;;  %8078 = vpow2.f32 %v6852_v56  ;;  %v5607_v52 = vmul.f32 %v12605_v54, %v5494_v60  ;;  %v5609_v30 = vmul.f32 %v12605_v54, %v5498_v4 }
 0x877   : > { %v8063_v40 = vpop.eup %8062  ;;  %v6201_v43 = vadd.f32 %v6200_v31, %v6122_v5  ;;  %v6123_v44 = vmul.f32 %v8061_v62, %v12816_v46  ;;  %8080 = vpow2.f32 %v6853_v19  ;;  %v12909_v55 = vadd.f32 %v12614_v12, %v5608_v41 }
 0x878   : > { %v8065_v3 = vpop.eup %8064  ;;  %v6124_v36 = vmul.f32 %v8063_v40, %v12820_v28  ;;  %8082 = vpow2.f32 %v6854_v63  ;;  %v12906_v32 = vadd.f32 %v12611_v24, %v5607_v52  ;;  %v12915_v60 = vadd.f32 %v12611_v24, %v5609_v30 }
 0x879   : > { %v8067_v37 = vpop.eup %8066  ;;  %v6189_v27 = vadd.f32 %v6188_v10, %v6123_v44  ;;  %v5935_v25 = vadd.f32 1.0, %v8065_v3  ;;  %8084 = vpow2.f32 %v6855_v6  ;;  %v6858_v11 = vmul.f32 -1.442695, %v12909_v55 }
 0x87a   : > { %v8069_v20 = vpop.eup %8068  ;;  %v6202_v46 = vadd.f32 %v6201_v43, %v6124_v36  ;;  %v5936_v21 = vadd.f32 1.0, %v8067_v37  ;;  %8086 = vpow2.f32 %v6856_v49  ;;  %v5504_v28 = vpop.f32.mrb[112].mxu1  ;;  %v6857_v2 = vmul.f32 -1.442695, %v12906_v32 }
 0x87b   : > { %v8071_v22 = vpop.eup %8070  ;;  %v6190_v35 = vrot.slane %v6189_v27, 4  ;;  %8088 = vrcp.f32 %v5935_v25  ;;  %v5937_v13 = vadd.f32 1.0, %v8069_v20  ;;  %v5506_v26 = vpop.f32.mrb[113].mxu1  ;;  %v5610_v38 = vmul.f32 %v12608_v51, %v5500_v45 }
 0x87c   : > { %v8073_v47 = vpop.eup %8072  ;;  %v6203_v1 = vrot.slane %v6202_v46, 4  ;;  %8090 = vrcp.f32 %v5936_v21  ;;  %v5938_v31 = vadd.f32 1.0, %v8071_v22  ;;  %v5508_v34 = vpop.f32.mrb[114].mxu1  ;;  %v6859_v4 = vmul.f32 -1.442695, %v12915_v60 }
 0x87d   : > { %v8075_v8 = vpop.eup %8074  ;;  %v6191_v14 = vadd.f32 %v6190_v35, %v6189_v27  ;;  %v6125_v33 = vmul.f32 %v8073_v47, %v12828_v39  ;;  %8092 = vrcp.f32 %v5937_v13  ;;  %v12917_v48 = vpop.f32.mrb[115].mxu1  ;;  %v5611_v5 = vmul.f32 %v12605_v54, %v5504_v28 }
 0x87e   : > { %v6204_v53 = vadd.f32 %v6203_v1, %v6202_v46  ;;  %8094 = vrcp.f32 %v5938_v31  ;;  %v5939_v61 = vadd.f32 1.0, %v8075_v8  ;;  %v12924_v62 = vadd.f32 %v12614_v12, %v5610_v38 }
 0x87f   : > { %v8077_v29 = vpop.eup %8076  ;;  %v6192_v56 = vrot.slane %v6191_v14, 2  ;;  %8096 = vpow2.f32 %v6857_v2  ;;  %v12927_v45 = vadd.f32 %v12611_v24, %v5611_v5  ;;  %v5612_v46 = vmul.f32 %v12608_v51, %v5506_v26 }
 0x880   : > { %v8079_v19 = vpop.eup %8078  ;;  %v6205_v39 = vrot.slane %v6204_v53, 2  ;;  %v6126_v63 = vmul.f32 %v8077_v29, %v12835_v15  ;;  %8098 = vrcp.f32 %v5939_v61  ;;  %v6860_v52 = vmul.f32 -1.442695, %v12924_v62 }
 0x881   : > { %v8081_v10 = vpop.eup %8080  ;;  %v6193_v6 = vadd.f32 %v6192_v56, %v6191_v14  ;;  %v5940_v49 = vadd.f32 1.0, %v8079_v19  ;;  %8100 = vpow2.f32 %v6858_v11  ;;  %v6861_v30 = vmul.f32 -1.442695, %v12927_v45 }
 0x882   : > { %v8083_v40 = vpop.eup %8082  ;;  %v6206_v43 = vadd.f32 %v6205_v39, %v6204_v53  ;;  %v5941_v44 = vadd.f32 1.0, %v8081_v10  ;;  %8102 = vpow2.f32 %v6859_v4  ;;  %v5514_v3 = vpop.f32.mrb[116].mxu1  ;;  %v5613_v13 = vmul.f32 %v12605_v54, %v5508_v34 }
 0x883   : > { %v8085_v36 = vpop.eup %8084  ;;  %v6194_v15 = vrot.slane %v6193_v6, 1  ;;  %8104 = vrcp.f32 %v5940_v49  ;;  %v5942_v41 = vadd.f32 1.0, %v8083_v40  ;;  %v5516_v37 = vpop.f32.mrb[117].mxu1  ;;  %v12937_v11 = vadd.f32 %v12614_v12, %v5612_v46 }
 0x884   : > { %v8087_v27 = vpop.eup %8086  ;;  %v6207_v25 = vrot.slane %v6206_v43, 1  ;;  %8106 = vrcp.f32 %v5941_v44  ;;  %v5943_v20 = vadd.f32 1.0, %v8085_v36  ;;  %v5518_v21 = vpop.f32.mrb[118].mxu1  ;;  %v12943_v53 = vadd.f32 %v12611_v24, %v5613_v13 }
 0x885   : > { %v8089_v28 = vpop.eup %8088  ;;  %v6195_v22 = vadd.f32 %v6194_v15, %v6193_v6  ;;  %8108 = vrcp.f32 %v5942_v41  ;;  %v5944_v35 = vadd.f32 1.0, %v8087_v27  ;;  %v12933_v2 = vpop.f32.mrb[119].mxu1  ;;  %v6269_v61 = vpack.c.bf16 %v12840_v16, %v12840_v16 }
 0x886   : > { %v8091_v47 = vpop.eup %8090  ;;  %v6208_v1 = vadd.f32 %v6207_v25, %v6206_v43  ;;  %v6127_v31 = vmul.f32 %v8089_v28, %v12846_v42  ;;  %8110 = vrcp.f32 %v5943_v20  ;;  %v6270_v56 = vpack.c.bf16 %v12843_v17, %v12843_v17 }
 0x887   : > { %v8093_v8 = vpop.eup %8092  ;;  %v12939_v14 = vmul.f32 0.015625, %v6195_v22  ;;  %v6128_v26 = vmul.f32 %v8091_v47, %v12854_v9  ;;  %8112 = vrcp.f32 %v5944_v35  ;;  %v6862_v6 = vmul.f32 -1.442695, %v12937_v11 }
 0x888   : > { %v8095_v34 = vpop.eup %8094  ;;  %v6209_v38 = vadd.f32 %v6127_v31, %v6125_v33  ;;  %v6129_v42 = vmul.f32 %v8093_v8, %v12857_v7  ;;  %8114 = vpow2.f32 %v6860_v52  ;;  %v12951_v19 = vmul.f32 0.015625, %v6208_v1 }
 0x889   : > { %v8097_v29 = vpop.eup %8096  ;;  %v6222_v4 = vadd.f32 %v6128_v26, %v6126_v63  ;;  %v6130_v5 = vmul.f32 %v8095_v34, %v12861_v50  ;;  %8116 = vpow2.f32 %v6861_v30  ;;  %v6271_v7 = vpack.c.bf16 %v12939_v14, %v12939_v14 }
 0x88a   : > { %v8099_v9 = vpop.eup %8098  ;;  %v6210_v39 = vadd.f32 %v6209_v38, %v6129_v42  ;;  %v5945_v10 = vadd.f32 1.0, %v8097_v29  ;;  %v5524_v49 = vpop.f32.mrb[120].mxu1  ;;  %v6863_v63 = vmul.f32 -1.442695, %v12943_v53  ;;  %v5614_v36 = vmul.f32 %v12608_v51, %v12917_v48 }
 0x88b   : > { %v8101_v33 = vpop.eup %8100  ;;  %v6223_v40 = vadd.f32 %v6222_v4, %v6130_v5  ;;  %v6131_v43 = vmul.f32 %v8099_v9, %v12864_v0  ;;  %v5526_v44 = vpop.f32.mrb[121].mxu1  ;;  %v5615_v15 = vmul.f32 %v12605_v54, %v5514_v3  ;;  %v5616_v20 = vmul.f32 %v12608_v51, %v5516_v37 }
 0x88c   : > { %v8103_v50 = vpop.eup %8102  ;;  %8118 = vrcp.f32 %v5945_v10  ;;  %v5946_v52 = vadd.f32 1.0, %v8101_v33  ;;  %v5528_v41 = vpop.f32.mrb[122].mxu1  ;;  %v12964_v22 = vadd.f32 %v12614_v12, %v5614_v36  ;;  %v5617_v37 = vmul.f32 %v12605_v54, %v5518_v21 }
 0x88d   : > { %v8105_v30 = vpop.eup %8104  ;;  %v6211_v27 = vadd.f32 %v6210_v39, %v6131_v43  ;;  %v5947_v25 = vadd.f32 1.0, %v8103_v50  ;;  %8120 = vpow2.f32 %v6862_v6  ;;  %v5530_v46 = vpop.f32.mrb[123].mxu1  ;;  %v12967_v35 = vadd.f32 %v12611_v24, %v5615_v15 }
 0x88e   : > { %v8107_v0 = vpop.eup %8106  ;;  %v6132_v28 = vmul.f32 %v8105_v30, %v12877_v18  ;;  %8122 = vrcp.f32 %v5946_v52  ;;  %v12971_v13 = vadd.f32 %v12614_v12, %v5616_v20  ;;  %v6864_v31 = vmul.f32 -1.442695, %v12964_v22 }
 0x88f   : > { %v8109_v48 = vpop.eup %8108  ;;  %v6133_v3 = vmul.f32 %v8107_v0, %v12882_v57  ;;  %8124 = vrcp.f32 %v5947_v25  ;;  %v6865_v38 = vmul.f32 -1.442695, %v12967_v35  ;;  %v12981_v21 = vadd.f32 %v12611_v24, %v5617_v37 }
 0x890   : > { %v8111_v47 = vpop.eup %8110  ;;  %v6224_v1 = vadd.f32 %v6223_v40, %v6132_v28  ;;  %v6134_v18 = vmul.f32 %v8109_v48, %v12885_v58  ;;  %8126 = vpow2.f32 %v6863_v63  ;;  %v6866_v57 = vmul.f32 -1.442695, %v12971_v13 }
 0x891   : > { %v8113_v8 = vpop.eup %8112  ;;  %v6212_v26 = vadd.f32 %v6211_v27, %v6133_v3  ;;  %v6135_v34 = vmul.f32 %v8111_v47, %v12890_v23  ;;  %8128 = vpow2.f32 %v6864_v31  ;;  %v5618_v23 = vmul.f32 %v12608_v51, %v12933_v2 }
 0x892   : > { %v8115_v42 = vpop.eup %8114  ;;  %v6225_v29 = vadd.f32 %v6224_v1, %v6134_v18  ;;  %v6136_v4 = vmul.f32 %v8113_v8, %v12893_v59  ;;  %v5534_v58 = vpop.f32.mrb[124].mxu1  ;;  %8130 = vpow2.f32 %v6865_v38  ;;  %v6867_v40 = vmul.f32 -1.442695, %v12981_v21 }
 0x893   : > { %v8117_v5 = vpop.eup %8116  ;;  %v6213_v9 = vadd.f32 %v6212_v26, %v6135_v34  ;;  %v5948_v39 = vadd.f32 1.0, %v8115_v42  ;;  %v5536_v10 = vpop.f32.mrb[125].mxu1  ;;  %8132 = vpow2.f32 %v6866_v57  ;;  %v12987_v59 = vadd.f32 %v12614_v12, %v5618_v23 }
 0x894   : > { %v6226_v6 = vadd.f32 %v6225_v29, %v6136_v4  ;;  %v5949_v33 = vadd.f32 1.0, %v8117_v5  ;;  %v5538_v43 = vpop.f32.mrb[126].mxu1  ;;  %v5619_v63 = vmul.f32 %v12605_v54, %v5524_v49  ;;  %v5620_v50 = vmul.f32 %v12608_v51, %v5526_v44 }
 0x895   : > { %8134 = vrcp.f32 %v5948_v39  ;;  %v5540_v52 = vpop.f32.mrb[127].mxu1  ;;  %v5621_v2 = vmul.f32 %v12605_v54, %v5528_v41  ;;  %v5622_v15 = vmul.f32 %v12608_v51, %v5530_v46  ;;  %v5623_v30 = vmul.f32 %v12605_v54, %v5534_v58 }
 0x896   : > { %v8119_v36 = vpop.eup %8118  ;;  %8136 = vrcp.f32 %v5949_v33  ;;  %v6868_v20 = vmul.f32 -1.442695, %v12987_v59  ;;  %v12997_v0 = vadd.f32 %v12611_v24, %v5619_v63  ;;  %v13000_v28 = vadd.f32 %v12614_v12, %v5620_v50 }
 0x897   : > { %v8121_v27 = vpop.eup %8120  ;;  %v6137_v25 = vmul.f32 %v8119_v36, %v12906_v32  ;;  %8138 = vpow2.f32 %v6867_v40  ;;  %v13003_v41 = vadd.f32 %v12611_v24, %v5621_v2  ;;  %v13006_v46 = vadd.f32 %v12614_v12, %v5622_v15 }
 0x898   : > { %v8123_v49 = vpop.eup %8122  ;;  %v5950_v44 = vadd.f32 1.0, %v8121_v27  ;;  %8140 = vpow2.f32 %v6868_v20  ;;  %v6869_v37 = vmul.f32 -1.442695, %v12997_v0  ;;  %v6870_v18 = vmul.f32 -1.442695, %v13000_v28 }
 0x899   : > { %v8125_v48 = vpop.eup %8124  ;;  %v6214_v3 = vadd.f32 %v6213_v9, %v6137_v25  ;;  %v6138_v32 = vmul.f32 %v8123_v49, %v12909_v55  ;;  %v6871_v31 = vmul.f32 -1.442695, %v13003_v41  ;;  %v6272_v8 = vpack.c.bf16 %v12951_v19, %v12951_v19 }
 0x89a   : > { %v8127_v47 = vpop.eup %8126  ;;  %v6139_v1 = vmul.f32 %v8125_v48, %v12915_v60  ;;  %8142 = vrcp.f32 %v5950_v44  ;;  %v13016_v55 = vadd.f32 %v12611_v24, %v5623_v30  ;;  %v5624_v42 = vmul.f32 %v12608_v51, %v5536_v10 }
 0x89b   : > { %v6227_v26 = vadd.f32 %v6226_v6, %v6138_v32  ;;  %v5951_v34 = vadd.f32 1.0, %v8127_v47  ;;  %8144 = vpow2.f32 %v6869_v37  ;;  %v8129_v38 = vpop.eup %8128  ;;  %v6872_v4 = vmul.f32 -1.442695, %v13006_v46 }
 0x89c   : > { %v6215_v57 = vadd.f32 %v6214_v3, %v6139_v1  ;;  %8146 = vpow2.f32 %v6870_v18  ;;  %v8131_v60 = vpop.eup %8130  ;;  %v5952_v29 = vadd.f32 1.0, %v8129_v38  ;;  %v5625_v58 = vmul.f32 %v12605_v54, %v5538_v43 }
 0x89d   : > { %8148 = vrcp.f32 %v5951_v34  ;;  %v8133_v5 = vpop.eup %8132  ;;  %v5953_v9 = vadd.f32 1.0, %v8131_v60  ;;  %v6873_v39 = vmul.f32 -1.442695, %v13016_v55  ;;  %v13023_v33 = vadd.f32 %v12614_v12, %v5624_v42 }
 0x89e   : > { %v6216_v19 = vrot.slane %v6215_v57, 4  ;;  %8150 = vpow2.f32 %v6871_v31  ;;  %v5954_v6 = vadd.f32 1.0, %v8133_v5  ;;  %v13026_v10 = vadd.f32 %v12611_v24, %v5625_v58 }
 0x89f   : > { %v8135_v23 = vpop.eup %8134  ;;  %8152 = vrcp.f32 %v5952_v29  ;;  %v6324_v54 = vunpack.c.l.b16 %v6269_v61  ;;  %v6326_v36 = vunpack.c.l.b16 %v6271_v7  ;;  %v6874_v2 = vmul.f32 -1.442695, %v13023_v33 }
 0x8a0   : > { %v8137_v40 = vpop.eup %8136  ;;  %v6217_v43 = vadd.f32 %v6216_v19, %v6215_v57  ;;  %v6140_v63 = vmul.f32 %v8135_v23, %v12924_v62  ;;  %8154 = vrcp.f32 %v5953_v9  ;;  %v5626_v24 = vmul.f32 %v12608_v51, %v5540_v52 }
 0x8a1   : > { %v8139_v50 = vpop.eup %8138  ;;  %8156 = vrcp.f32 %v5954_v6  ;;  %v6875_v61 = vmul.f32 -1.442695, %v13026_v10  ;;  %v6325_v62 = vunpack.c.l.b16 %v6270_v56  ;;  %v6327_v25 = vunpack.c.l.b16 %v6272_v8 }
 0x8a2   : > { %v6218_v15 = vrot.slane %v6217_v43, 2  ;;  %v6228_v30 = vadd.f32 %v6227_v26, %v6140_v63  ;;  %v5955_v27 = vadd.f32 1.0, %v8139_v50  ;;  %8158 = vpow2.f32 %v6872_v4  ;;  %v8141_v16 = vpop.eup %8140 }
 0x8a3   : > { %8160 = vpow2.f32 %v6873_v39  ;;  %v5956_v49 = vadd.f32 1.0, %v8141_v16  ;;  %v13042_v51 = vadd.f32 %v12614_v12, %v5626_v24  ;;  %v13045_v52 = vsel %vm4363_vm2, %v6327_v25, %v6325_v62 }
 0x8a4   : > { %v8143_v14 = vpop.eup %8142  ;;  %v6219_v7 = vadd.f32 %v6218_v15, %v6217_v43  ;;  %v6229_v20 = vrot.slane %v6228_v30, 4  ;;  %8162 = vrcp.f32 %v5955_v27  ;;  %v6332_v48 = vsel %vm4363_vm2, %v6326_v36, %v6324_v54 }
 0x8a5   : > { %v8145_v44 = vpop.eup %8144  ;;  %8164 = vpow2.f32 %v6874_v2  ;;  %v6141_v47 = vmul.f32 %v8137_v40, %v12927_v45  ;;  %v6142_v34 = vmul.f32 %v8143_v14, %v12937_v11  ;;  %v6876_v57 = vmul.f32 -1.442695, %v13042_v51 }
 0x8a6   : > { %v8147_v3 = vpop.eup %8146  ;;  %v6220_v32 = vrot.slane %v6219_v7, 1  ;;  %v6230_v17 = vadd.f32 %v6229_v20, %v6228_v30  ;;  %8166 = vrcp.f32 %v5956_v49  ;;  %v5957_v56 = vadd.f32 1.0, %v8145_v44 }
 0x8a7   : > { %v8149_v37 = vpop.eup %8148  ;;  %v5958_v1 = vadd.f32 1.0, %v8147_v3  ;;  %8168 = vpow2.f32 %v6875_v61 }
 0x8a8   : > { %v8151_v18 = vpop.eup %8150  ;;  %v6221_v31 = vadd.f32 %v6220_v32, %v6219_v7  ;;  %v6231_v8 = vrot.slane %v6230_v17, 2  ;;  %v6143_v12 = vmul.f32 %v8149_v37, %v12943_v53  ;;  %8170 = vrcp.f32 %v5957_v56 }
 0x8a9   : > { %v8153_v26 = vpop.eup %8152  ;;  %8172 = vrcp.f32 %v5958_v1  ;;  %v5959_v38 = vadd.f32 1.0, %v8151_v18 }
 0x8aa   : > { %v8155_v42 = vpop.eup %8154  ;;  %v6265_v60 = vmul.f32 0.015625, %v6221_v31  ;;  %v6232_v29 = vadd.f32 %v6231_v8, %v6230_v17  ;;  %v6235_v4 = vadd.f32 %v6143_v12, %v6141_v47  ;;  %v6144_v45 = vmul.f32 %v8153_v26, %v12964_v22 }
 0x8ab   : > { %v8157_v58 = vpop.eup %8156  ;;  %v6145_v5 = vmul.f32 %v8155_v42, %v12967_v35  ;;  %8174 = vrcp.f32 %v5959_v38 }
 0x8ac   : > { %v8159_v19 = vpop.eup %8158  ;;  %v6273_v53 = vpack.c.bf16 %v6265_v60, %v6265_v60  ;;  %v6233_v9 = vrot.slane %v6232_v29, 1  ;;  %v6248_v39 = vadd.f32 %v6144_v45, %v6142_v34  ;;  %v6146_v11 = vmul.f32 %v8157_v58, %v12971_v13 }
 0x8ad   : > { %v8161_v23 = vpop.eup %8160  ;;  %v6236_v6 = vadd.f32 %v6235_v4, %v6145_v5  ;;  %v5960_v40 = vadd.f32 1.0, %v8159_v19  ;;  %8176 = vpow2.f32 %v6876_v57 }
 0x8ae   : > { %v8163_v54 = vpop.eup %8162  ;;  %v6328_v43 = vunpack.c.l.b16 %v6273_v53  ;;  %v6249_v63 = vadd.f32 %v6248_v39, %v6146_v11  ;;  %v5961_v50 = vadd.f32 1.0, %v8161_v23  ;;  %v6234_v36 = vadd.f32 %v6233_v9, %v6232_v29 }
 0x8af   : > { %v8165_v22 = vpop.eup %8164  ;;  %v6147_v2 = vmul.f32 %v8163_v54, %v12981_v21  ;;  %8178 = vrcp.f32 %v5960_v40 }
 0x8b0   : > { %v8167_v35 = vpop.eup %8166  ;;  %8180 = vrcp.f32 %v5961_v50  ;;  %v5962_v24 = vadd.f32 1.0, %v8165_v22  ;;  %v6266_v15 = vmul.f32 0.015625, %v6234_v36  ;;  %v6333_v30 = vsel %vm4365_vm3, %v6328_v43, %v6332_v48  ;;  %v6877_v36 = vld [vmem:[%s13097_s16] ss:$0 sm:$0xff] }
 0x8b1   : > { %v8169_v13 = vpop.eup %8168  ;;  %v6237_v27 = vadd.f32 %v6236_v6, %v6147_v2  ;;  %v6148_v16 = vmul.f32 %v8167_v35, %v12987_v59 }
 0x8b2   : > { %v8171_v61 = vpop.eup %8170  ;;  %8182 = vrcp.f32 %v5962_v24  ;;  %v5963_v62 = vadd.f32 1.0, %v8169_v13  ;;  %v6274_v25 = vpack.c.bf16 %v6266_v15, %v6266_v15 }
 0x8b3   : > { %v8173_v14 = vpop.eup %8172  ;;  %v6250_v7 = vadd.f32 %v6249_v63, %v6148_v16  ;;  %v6149_v20 = vmul.f32 %v8171_v61, %v12997_v0 }
 0x8b4   : > { %v6150_v21 = vmul.f32 %v8173_v14, %v13000_v28  ;;  %8184 = vrcp.f32 %v5963_v62  ;;  %v6329_v49 = vunpack.c.l.b16 %v6274_v25 }
 0x8b5   : > { %v8175_v44 = vpop.eup %8174  ;;  %v6238_v3 = vadd.f32 %v6237_v27, %v6149_v20 }
 0x8b6   : > { %v6251_v32 = vadd.f32 %v6250_v7, %v6150_v21  ;;  %v6151_v48 = vmul.f32 %v8175_v44, %v13003_v41  ;;  %v6336_v59 = vsel %vm4365_vm3, %v6329_v49, %v13045_v52 }
 0x8b7   : > { %v8177_v17 = vpop.eup %8176 }
 0x8b8   : > { %v6239_v56 = vadd.f32 %v6238_v3, %v6151_v48  ;;  %v5964_v37 = vadd.f32 1.0, %v8177_v17 }
 0x8b9   : > { %v8179_v47 = vpop.eup %8178 }
 0x8ba   : > { %v8181_v1 = vpop.eup %8180  ;;  %v6152_v18 = vmul.f32 %v8179_v47, %v13006_v46  ;;  %8186 = vrcp.f32 %v5964_v37 }
 0x8bb   : > { %v6153_v0 = vmul.f32 %v8181_v1, %v13016_v55 }
 0x8bc   : > { %v8183_v28 = vpop.eup %8182  ;;  %v6252_v31 = vadd.f32 %v6251_v32, %v6152_v18 }
 0x8bd   : > { %v6240_v8 = vadd.f32 %v6239_v56, %v6153_v0  ;;  %v6154_v12 = vmul.f32 %v8183_v28, %v13023_v33 }
 0x8be   : > { %v8185_v26 = vpop.eup %8184 }
 0x8bf   : > { %v6253_v41 = vadd.f32 %v6252_v31, %v6154_v12  ;;  %v6155_v34 = vmul.f32 %v8185_v26, %v13026_v10 }
 0x8c1   : > { %v6241_v52 = vadd.f32 %v6240_v8, %v6155_v34 }
 0x8c3   : > { %v6242_v38 = vrot.slane %v6241_v52, 4 }
 0x8c4   : > { %v8187_v57 = vpop.eup %8186 }
 0x8c5   : > { %v6243_v42 = vadd.f32 %v6242_v38, %v6241_v52  ;;  %v6156_v60 = vmul.f32 %v8187_v57, %v13042_v51 }
 0x8c7   : > { %v6244_v29 = vrot.slane %v6243_v42, 2  ;;  %v6254_v46 = vadd.f32 %v6253_v41, %v6156_v60 }
 0x8c9   : > { %v6245_v4 = vadd.f32 %v6244_v29, %v6243_v42  ;;  %v6255_v45 = vrot.slane %v6254_v46, 4 }
 0x8cb   : > { %v6246_v55 = vrot.slane %v6245_v4, 1  ;;  %v6256_v58 = vadd.f32 %v6255_v45, %v6254_v46 }
 0x8cd   : > { %v6247_v5 = vadd.f32 %v6246_v55, %v6245_v4  ;;  %v6257_v19 = vrot.slane %v6256_v58, 2 }
 0x8cf   : > { %v6267_v33 = vmul.f32 0.015625, %v6247_v5  ;;  %v6258_v53 = vadd.f32 %v6257_v19, %v6256_v58 }
 0x8d1   : > { %v6275_v9 = vpack.c.bf16 %v6267_v33, %v6267_v33  ;;  %v6259_v10 = vrot.slane %v6258_v53, 1 }
 0x8d3   : > { %v6330_v39 = vunpack.c.l.b16 %v6275_v9  ;;  %v6260_v11 = vadd.f32 %v6259_v10, %v6258_v53 }
 0x8d5   : > { %v6268_v23 = vmul.f32 0.015625, %v6260_v11  ;;  %v6334_v6 = vsel %vm4367_vm4, %v6330_v39, %v6333_v30 }
 0x8d6   : > { %v6338_v63 = vpack.c.b16 %v6334_v6, %v6334_v6 }
 0x8d7   : > { %v6276_v51 = vpack.c.bf16 %v6268_v23, %v6268_v23 }
 0x8d9   : > { %v6331_v40 = vunpack.c.l.b16 %v6276_v51 }
 0x8db   : > { %v6337_v54 = vsel %vm4367_vm4, %v6331_v40, %v6336_v59 }
 0x8dc   : > { %v6339_v43 = vpack.c.b16 %v6337_v54, %v6337_v54 }
 0x8de   : > { %6470 = vmatprep.mubr.bf16.mxu0 %v6339_v43 }
 0x8df   : > { %6471 = vmatmul.mubr.bf16.vlgmr.msra.gmra.mrb[104].mxu0 %v6338_v63 }
 0x9b2   : > { %v7071_v50 = vpop.f32.mrb[104].mxu0 }
 0x9b3   : > { %v7072_v22 = vpop.f32.mrb[105].mxu0 }
 0x9b4   : > { %v7073_v2 = vadd.f32 %v7072_v22, %v7071_v50  ;;  %v7074_v35 = vpop.f32.mrb[106].mxu0 }
 0x9b5   : > { %v7075_v24 = vpop.f32.mrb[107].mxu0 }
 0x9b6   : > { %v6473_v15 = vadd.f32 %v7073_v2, %v6877_v36 }
 0x9b8   : > { %6478 = vst [vmem:[%s551_s30] sm:$0xf] %v6473_v15 }
 0x9b9 PF: > { %s27_s24 = sadd.s32 1, %s8201_s24  }
 0x9ba   : > { %p24_p5 = scmp.ge.s32.totalorder %s27_s24, 4  }
 0x9bc   :  { %26 = sbr.rel (!%p24_p5) target bundleno = 3 (0x3), region = 118 }

</bundles_post_ra>
